<compile_context>
chip_gen: v7x
topology: tpu7x:2x2x1
jax: 0.10.0
libtpu: 0.0.40
codegen_flags: <defaults>
</compile_context>

<pallas_src>
import numpy as np
import jax
import jax.numpy as jnp
from jax import lax
from jax.experimental import pallas as pl
from jax.experimental.pallas import tpu as pltpu

C_IN = 3
C_OUT = 8
K = 3

# Distinct shifted windows into the padded input needed by the two convs,
# keyed by (row, col) offset. conv1 (dil=2, pad=1) reads offsets (2ky, 2kx);
# conv2 (dil=1, pad=1, center-cropped by 1) reads (1+ky, 1+kx). Only (2, 2) is
# shared -> its two taps are pre-summed into one fused weight (51 MACs/chan).
_WIN_MAP = {}
for _ky in range(K):
    for _kx in range(K):
        _WIN_MAP.setdefault((2 * _ky, 2 * _kx), []).append((0, _ky, _kx))
        _WIN_MAP.setdefault((1 + _ky, 1 + _kx), []).append((1, _ky, _kx))
_WINDOWS = sorted(_WIN_MAP.items())          # 17 windows (9 + 9 - 1 shared)
N_WIN = len(_WINDOWS)

# Gather indices / 0-1 masks used to pre-fuse (w1, w2) into one 17-tap table.
# Exact f32 arithmetic (gather + multiply-by-{0,1} + add), no matmul, so no
# TPU default-precision surprises vs. the reference.
_IDX1 = np.zeros((N_WIN,), np.int32); _MSK1 = np.zeros((N_WIN,), np.float32)
_IDX2 = np.zeros((N_WIN,), np.int32); _MSK2 = np.zeros((N_WIN,), np.float32)
for _wi, (_, _taps) in enumerate(_WINDOWS):
    for _ci, _ky, _kx in _taps:
        if _ci == 0:
            _IDX1[_wi] = _ky * K + _kx; _MSK1[_wi] = 1.0
        else:
            _IDX2[_wi] = _ky * K + _kx; _MSK2[_wi] = 1.0


def _kernel(x_ref, wf_ref, b_ref, out_ref, xpad_ref):
    """One (image, output-row tile) grid step, all 8 output channels.

    x_ref    : (1, C_IN, H, W)        unpadded input image (VMEM)
    wf_ref   : (C_OUT*C_IN*N_WIN,)    fused tap weights (SMEM, scalar reads)
    b_ref    : (C_OUT,)               fused bias b1+b2 (SMEM)
    out_ref  : (1, C_OUT, TH, W-2)    output row-tile (VMEM)
    xpad_ref : (C_IN, HS, W+2)        zero-padded image scratch (VMEM)
    """
    h_img, w_img = x_ref.shape[2], x_ref.shape[3]
    th, wout = out_ref.shape[2], out_ref.shape[3]
    slab_rows = ((th + 4 + 7) // 8) * 8       # 8-aligned rows read per tile

    row0 = pl.program_id(1) * th
    if th % 8 == 0:
        row0 = pl.multiple_of(row0, 8)

    # Fused zero padding: build the padded image in VMEM (no wrapper jnp.pad).
    # Refilled every step so the kernel stays correct under any megacore split
    # of the two "parallel" grid axes; cost hides under the VALU-bound MACs.
    xpad_ref[...] = jnp.zeros_like(xpad_ref)
    for c in range(C_IN):
        xpad_ref[c, 1:1 + h_img, 1:1 + w_img] = x_ref[0, c]

    accs = [None] * C_OUT
    for c in range(C_IN):
        # One aligned dynamic-row slab load per input channel; the 17 shifted
        # windows are static value-slices of it (sublane/lane shifts -> XLU).
        slab = xpad_ref[c, pl.ds(row0, slab_rows), :]
        for wi, ((y0, x0), _) in enumerate(_WINDOWS):
            patch = slab[y0:y0 + th, x0:x0 + wout]
            for o in range(C_OUT):
                wv = wf_ref[(o * C_IN + c) * N_WIN + wi]   # scalar from SMEM
                term = wv * patch
                accs[o] = term if accs[o] is None else accs[o] + term

    for o in range(C_OUT):
        out_ref[0, o] = jnp.maximum(accs[o] + b_ref[o], 0.0).astype(out_ref.dtype)


@jax.jit
def conv_add_relu(x, w1, b1, w2, b2):
    """x: (N, 3, H, W) f32 -> relu(conv1(x) + crop(conv2(x))): (N, 8, H-2, W-2)."""
    n, c, h, w = x.shape
    assert c == C_IN
    h1, wout = h - 2, w - 2
    assert h1 >= 1 and wout >= 1

    # Output-row tile: 8 or 16 sublane-aligned rows, or the full (small) height.
    if h1 % 8 == 0 and h1 > 8:
        tile_h = 16 if (h1 % 16 == 0 and h1 > 16) else 8
    elif h1 > 32:
        tile_h = 16            # last block partial; Pallas clips OOB writes
    else:
        tile_h = h1            # single block covering the whole output height
    num_t = -(-h1 // tile_h)

    slab_rows = ((tile_h + 4 + 7) // 8) * 8   # must match _kernel
    hs = (num_t - 1) * tile_h + slab_rows     # scratch rows (>= h + 2)
    wp = w + 2                                # scratch cols (padded width)
    assert hs >= h + 2

    # Pre-fuse the two convolutions' weights into one 17-tap table per
    # (out_ch, in_ch) and the two biases into one vector (exact f32 ops).
    w1f = w1.reshape(C_OUT, C_IN, K * K).astype(jnp.float32)
    w2f = w2.reshape(C_OUT, C_IN, K * K).astype(jnp.float32)
    wf = (jnp.take(w1f, jnp.asarray(_IDX1), axis=-1) * jnp.asarray(_MSK1)
          + jnp.take(w2f, jnp.asarray(_IDX2), axis=-1) * jnp.asarray(_MSK2))
    wf_flat = wf.reshape(-1)                  # 1-D SMEM table, no [8,128] padding
    b = (b1 + b2).astype(jnp.float32)

    return pl.pallas_call(
        _kernel,
        out_shape=jax.ShapeDtypeStruct((n, C_OUT, h1, wout), x.dtype),
        grid=(n, num_t),
        in_specs=[
            pl.BlockSpec((1, C_IN, h, w), lambda i, t: (i, 0, 0, 0)),
            pl.BlockSpec(memory_space=pltpu.MemorySpace.SMEM),
            pl.BlockSpec(memory_space=pltpu.MemorySpace.SMEM),
        ],
        out_specs=pl.BlockSpec((1, C_OUT, tile_h, wout), lambda i, t: (i, 0, t, 0)),
        scratch_shapes=[pltpu.VMEM((C_IN, hs, wp), jnp.float32)],
        compiler_params=pltpu.CompilerParams(
            dimension_semantics=("parallel", "parallel")),
    )(x.astype(jnp.float32), wf_flat, b)


def reference(x, w1, b1, w2, b2):
    dn = ("NCHW", "OIHW", "NCHW")
    v1 = lax.conv_general_dilated(
        x, w1, window_strides=(1, 1), padding=((1, 1), (1, 1)),
        rhs_dilation=(2, 2), dimension_numbers=dn) + b1[None, :, None, None]
    v2 = lax.conv_general_dilated(
        x, w2, window_strides=(1, 1), padding=((1, 1), (1, 1)),
        rhs_dilation=(1, 1), dimension_numbers=dn) + b2[None, :, None, None]
    h1, w1dim = v1.shape[2], v1.shape[3]
    v2c = v2[:, :, 1:1 + h1, 1:1 + w1dim]
    return jnp.maximum(v1 + v2c, 0.0)


if __name__ == "__main__":
    key = jax.random.PRNGKey(0)
    k_x, k_w1, k_b1, k_w2, k_b2 = jax.random.split(key, 5)

    # Small shapes consistent with the module (original was 1x3x64x64).
    # H=W=18 -> 16x16 output = two 8-row tiles per image (exercises H-tiling).
    N, H, W = 2, 18, 18
    x = jax.random.normal(k_x, (N, C_IN, H, W), jnp.float32)

    # Deterministic "Kaiming-uniform-like" init (PyTorch default 1/sqrt(fan_in)).
    fan_in = C_IN * K * K
    bound = 1.0 / (fan_in ** 0.5)
    w1 = jax.random.uniform(k_w1, (C_OUT, C_IN, K, K), jnp.float32, -bound, bound)
    b1 = jax.random.uniform(k_b1, (C_OUT,), jnp.float32, -bound, bound)
    w2 = jax.random.uniform(k_w2, (C_OUT, C_IN, K, K), jnp.float32, -bound, bound)
    b2 = jax.random.uniform(k_b2, (C_OUT,), jnp.float32, -bound, bound)

    out = jax.block_until_ready(conv_add_relu(x, w1, b1, w2, b2))
    ref = reference(x, w1, b1, w2, b2)
    assert out.shape == (N, C_OUT, H - 2, W - 2), out.shape
    assert jnp.allclose(out, ref, atol=1e-5, rtol=1e-5), float(jnp.max(jnp.abs(out - ref)))

    print("KERNEL_OK")
</pallas_src>

<mosaic_0001>
module attributes {stable_mosaic.version = 11 : i64} {
  func.func @_kernel(%arg0: i32, %arg1: i32, %arg2: memref<1x3x18x18xf32, #tpu.memory_space<vmem>>, %arg3: memref<408xf32, #tpu.memory_space<smem>>, %arg4: memref<8xf32, #tpu.memory_space<smem>>, %arg5: memref<1x8x8x16xf32, #tpu.memory_space<vmem>>, %arg6: memref<3x24x20xf32, #tpu.memory_space<vmem>>) attributes {dimension_semantics = [#tpu.dimension_semantics<parallel>, #tpu.dimension_semantics<parallel>], iteration_bounds = array<i64: 2, 2>, scalar_prefetch = 0 : i64, scratch_operands = 1 : i64, tpu.core_type = #tpu.core_type<tc>, window_params = [{transform_indices = @transform_0, window_bounds = array<i64: 1, 3, 18, 18>}, {transform_indices = @transform_1, window_bounds = array<i64: 408>}, {transform_indices = @transform_2, window_bounds = array<i64: 8>}, {transform_indices = @transform_3, window_bounds = array<i64: 1, 8, 8, 16>}]} {
    %c8_i32 = arith.constant 8 : i32
    %0 = arith.muli %arg1, %c8_i32 : i32
    %1 = tpu.assume_multiple %0, 8 : i32
    %cst = arith.constant 0.000000e+00 : f32
    %2 = vector.broadcast %cst : f32 to vector<3x24x20xf32>
    %c0 = arith.constant 0 : index
    %c0_0 = arith.constant 0 : index
    %c0_1 = arith.constant 0 : index
    %3 = vector.load %arg6[%c0, %c0_0, %c0_1] : memref<3x24x20xf32, #tpu.memory_space<vmem>>, vector<3x24x20xf32>
    tpu.vector_store %arg6[%c0, %c0_0, %c0_1], %2 {strides = array<i32>} : memref<3x24x20xf32, #tpu.memory_space<vmem>>, vector<3x24x20xf32>,
    %c0_2 = arith.constant 0 : index
    %c0_3 = arith.constant 0 : index
    %c0_4 = arith.constant 0 : index
    %c0_5 = arith.constant 0 : index
    %4 = vector.load %arg2[%c0_2, %c0_3, %c0_4, %c0_5] : memref<1x3x18x18xf32, #tpu.memory_space<vmem>>, vector<1x1x18x18xf32>
    %5 = vector.shape_cast %4 : vector<1x1x18x18xf32> to vector<18x18xf32>
    %c0_6 = arith.constant 0 : index
    %c1 = arith.constant 1 : index
    %c1_7 = arith.constant 1 : index
    %6 = vector.load %arg6[%c0_6, %c1, %c1_7] : memref<3x24x20xf32, #tpu.memory_space<vmem>>, vector<1x18x18xf32>
    %7 = vector.shape_cast %6 : vector<1x18x18xf32> to vector<18x18xf32>
    %8 = vector.shape_cast %5 : vector<18x18xf32> to vector<1x18x18xf32>
    tpu.vector_store %arg6[%c0_6, %c1, %c1_7], %8 {strides = array<i32>} : memref<3x24x20xf32, #tpu.memory_space<vmem>>, vector<1x18x18xf32>,
    %c0_8 = arith.constant 0 : index
    %c1_9 = arith.constant 1 : index
    %c0_10 = arith.constant 0 : index
    %c0_11 = arith.constant 0 : index
    %9 = vector.load %arg2[%c0_8, %c1_9, %c0_10, %c0_11] : memref<1x3x18x18xf32, #tpu.memory_space<vmem>>, vector<1x1x18x18xf32>
    %10 = vector.shape_cast %9 : vector<1x1x18x18xf32> to vector<18x18xf32>
    %c1_12 = arith.constant 1 : index
    %c1_13 = arith.constant 1 : index
    %c1_14 = arith.constant 1 : index
    %11 = vector.load %arg6[%c1_12, %c1_13, %c1_14] : memref<3x24x20xf32, #tpu.memory_space<vmem>>, vector<1x18x18xf32>
    %12 = vector.shape_cast %11 : vector<1x18x18xf32> to vector<18x18xf32>
    %13 = vector.shape_cast %10 : vector<18x18xf32> to vector<1x18x18xf32>
    tpu.vector_store %arg6[%c1_12, %c1_13, %c1_14], %13 {strides = array<i32>} : memref<3x24x20xf32, #tpu.memory_space<vmem>>, vector<1x18x18xf32>,
    %c0_15 = arith.constant 0 : index
    %c2 = arith.constant 2 : index
    %c0_16 = arith.constant 0 : index
    %c0_17 = arith.constant 0 : index
    %14 = vector.load %arg2[%c0_15, %c2, %c0_16, %c0_17] : memref<1x3x18x18xf32, #tpu.memory_space<vmem>>, vector<1x1x18x18xf32>
    %15 = vector.shape_cast %14 : vector<1x1x18x18xf32> to vector<18x18xf32>
    %c2_18 = arith.constant 2 : index
    %c1_19 = arith.constant 1 : index
    %c1_20 = arith.constant 1 : index
    %16 = vector.load %arg6[%c2_18, %c1_19, %c1_20] : memref<3x24x20xf32, #tpu.memory_space<vmem>>, vector<1x18x18xf32>
    %17 = vector.shape_cast %16 : vector<1x18x18xf32> to vector<18x18xf32>
    %18 = vector.shape_cast %15 : vector<18x18xf32> to vector<1x18x18xf32>
    tpu.vector_store %arg6[%c2_18, %c1_19, %c1_20], %18 {strides = array<i32>} : memref<3x24x20xf32, #tpu.memory_space<vmem>>, vector<1x18x18xf32>,
    %c0_21 = arith.constant 0 : index
    %19 = arith.index_cast %1 : i32 to index
    %c0_22 = arith.constant 0 : index
    %20 = vector.load %arg6[%c0_21, %19, %c0_22] : memref<3x24x20xf32, #tpu.memory_space<vmem>>, vector<1x16x20xf32>
    %21 = vector.shape_cast %20 : vector<1x16x20xf32> to vector<16x20xf32>
    %22 = vector.extract_strided_slice %21 {offsets = [0, 0], sizes = [8, 16], strides = [1, 1]} : vector<16x20xf32> to vector<8x16xf32>
    %c0_23 = arith.constant 0 : index
    %23 = memref.load %arg3[%c0_23] : memref<408xf32, #tpu.memory_space<smem>>
    %24 = vector.broadcast %23 : f32 to vector<8x16xf32>
    %25 = arith.mulf %24, %22 : vector<8x16xf32>
    %c51 = arith.constant 51 : index
    %26 = memref.load %arg3[%c51] : memref<408xf32, #tpu.memory_space<smem>>
    %27 = vector.broadcast %26 : f32 to vector<8x16xf32>
    %28 = arith.mulf %27, %22 : vector<8x16xf32>
    %c102 = arith.constant 102 : index
    %29 = memref.load %arg3[%c102] : memref<408xf32, #tpu.memory_space<smem>>
    %30 = vector.broadcast %29 : f32 to vector<8x16xf32>
    %31 = arith.mulf %30, %22 : vector<8x16xf32>
    %c153 = arith.constant 153 : index
    %32 = memref.load %arg3[%c153] : memref<408xf32, #tpu.memory_space<smem>>
    %33 = vector.broadcast %32 : f32 to vector<8x16xf32>
    %34 = arith.mulf %33, %22 : vector<8x16xf32>
    %c204 = arith.constant 204 : index
    %35 = memref.load %arg3[%c204] : memref<408xf32, #tpu.memory_space<smem>>
    %36 = vector.broadcast %35 : f32 to vector<8x16xf32>
    %37 = arith.mulf %36, %22 : vector<8x16xf32>
    %c255 = arith.constant 255 : index
    %38 = memref.load %arg3[%c255] : memref<408xf32, #tpu.memory_space<smem>>
    %39 = vector.broadcast %38 : f32 to vector<8x16xf32>
    %40 = arith.mulf %39, %22 : vector<8x16xf32>
    %c306 = arith.constant 306 : index
    %41 = memref.load %arg3[%c306] : memref<408xf32, #tpu.memory_space<smem>>
    %42 = vector.broadcast %41 : f32 to vector<8x16xf32>
    %43 = arith.mulf %42, %22 : vector<8x16xf32>
    %c357 = arith.constant 357 : index
    %44 = memref.load %arg3[%c357] : memref<408xf32, #tpu.memory_space<smem>>
    %45 = vector.broadcast %44 : f32 to vector<8x16xf32>
    %46 = arith.mulf %45, %22 : vector<8x16xf32>
    %47 = vector.extract_strided_slice %21 {offsets = [0, 2], sizes = [8, 16], strides = [1, 1]} : vector<16x20xf32> to vector<8x16xf32>
    %c1_24 = arith.constant 1 : index
    %48 = memref.load %arg3[%c1_24] : memref<408xf32, #tpu.memory_space<smem>>
    %49 = vector.broadcast %48 : f32 to vector<8x16xf32>
    %50 = arith.mulf %49, %47 : vector<8x16xf32>
    %51 = arith.addf %25, %50 : vector<8x16xf32>
    %c52 = arith.constant 52 : index
    %52 = memref.load %arg3[%c52] : memref<408xf32, #tpu.memory_space<smem>>
    %53 = vector.broadcast %52 : f32 to vector<8x16xf32>
    %54 = arith.mulf %53, %47 : vector<8x16xf32>
    %55 = arith.addf %28, %54 : vector<8x16xf32>
    %c103 = arith.constant 103 : index
    %56 = memref.load %arg3[%c103] : memref<408xf32, #tpu.memory_space<smem>>
    %57 = vector.broadcast %56 : f32 to vector<8x16xf32>
    %58 = arith.mulf %57, %47 : vector<8x16xf32>
    %59 = arith.addf %31, %58 : vector<8x16xf32>
    %c154 = arith.constant 154 : index
    %60 = memref.load %arg3[%c154] : memref<408xf32, #tpu.memory_space<smem>>
    %61 = vector.broadcast %60 : f32 to vector<8x16xf32>
    %62 = arith.mulf %61, %47 : vector<8x16xf32>
    %63 = arith.addf %34, %62 : vector<8x16xf32>
    %c205 = arith.constant 205 : index
    %64 = memref.load %arg3[%c205] : memref<408xf32, #tpu.memory_space<smem>>
    %65 = vector.broadcast %64 : f32 to vector<8x16xf32>
    %66 = arith.mulf %65, %47 : vector<8x16xf32>
    %67 = arith.addf %37, %66 : vector<8x16xf32>
    %c256 = arith.constant 256 : index
    %68 = memref.load %arg3[%c256] : memref<408xf32, #tpu.memory_space<smem>>
    %69 = vector.broadcast %68 : f32 to vector<8x16xf32>
    %70 = arith.mulf %69, %47 : vector<8x16xf32>
    %71 = arith.addf %40, %70 : vector<8x16xf32>
    %c307 = arith.constant 307 : index
    %72 = memref.load %arg3[%c307] : memref<408xf32, #tpu.memory_space<smem>>
    %73 = vector.broadcast %72 : f32 to vector<8x16xf32>
    %74 = arith.mulf %73, %47 : vector<8x16xf32>
    %75 = arith.addf %43, %74 : vector<8x16xf32>
    %c358 = arith.constant 358 : index
    %76 = memref.load %arg3[%c358] : memref<408xf32, #tpu.memory_space<smem>>
    %77 = vector.broadcast %76 : f32 to vector<8x16xf32>
    %78 = arith.mulf %77, %47 : vector<8x16xf32>
    %79 = arith.addf %46, %78 : vector<8x16xf32>
    %80 = vector.extract_strided_slice %21 {offsets = [0, 4], sizes = [8, 16], strides = [1, 1]} : vector<16x20xf32> to vector<8x16xf32>
    %c2_25 = arith.constant 2 : index
    %81 = memref.load %arg3[%c2_25] : memref<408xf32, #tpu.memory_space<smem>>
    %82 = vector.broadcast %81 : f32 to vector<8x16xf32>
    %83 = arith.mulf %82, %80 : vector<8x16xf32>
    %84 = arith.addf %51, %83 : vector<8x16xf32>
    %c53 = arith.constant 53 : index
    %85 = memref.load %arg3[%c53] : memref<408xf32, #tpu.memory_space<smem>>
    %86 = vector.broadcast %85 : f32 to vector<8x16xf32>
    %87 = arith.mulf %86, %80 : vector<8x16xf32>
    %88 = arith.addf %55, %87 : vector<8x16xf32>
    %c104 = arith.constant 104 : index
    %89 = memref.load %arg3[%c104] : memref<408xf32, #tpu.memory_space<smem>>
    %90 = vector.broadcast %89 : f32 to vector<8x16xf32>
    %91 = arith.mulf %90, %80 : vector<8x16xf32>
    %92 = arith.addf %59, %91 : vector<8x16xf32>
    %c155 = arith.constant 155 : index
    %93 = memref.load %arg3[%c155] : memref<408xf32, #tpu.memory_space<smem>>
    %94 = vector.broadcast %93 : f32 to vector<8x16xf32>
    %95 = arith.mulf %94, %80 : vector<8x16xf32>
    %96 = arith.addf %63, %95 : vector<8x16xf32>
    %c206 = arith.constant 206 : index
    %97 = memref.load %arg3[%c206] : memref<408xf32, #tpu.memory_space<smem>>
    %98 = vector.broadcast %97 : f32 to vector<8x16xf32>
    %99 = arith.mulf %98, %80 : vector<8x16xf32>
    %100 = arith.addf %67, %99 : vector<8x16xf32>
    %c257 = arith.constant 257 : index
    %101 = memref.load %arg3[%c257] : memref<408xf32, #tpu.memory_space<smem>>
    %102 = vector.broadcast %101 : f32 to vector<8x16xf32>
    %103 = arith.mulf %102, %80 : vector<8x16xf32>
    %104 = arith.addf %71, %103 : vector<8x16xf32>
    %c308 = arith.constant 308 : index
    %105 = memref.load %arg3[%c308] : memref<408xf32, #tpu.memory_space<smem>>
    %106 = vector.broadcast %105 : f32 to vector<8x16xf32>
    %107 = arith.mulf %106, %80 : vector<8x16xf32>
    %108 = arith.addf %75, %107 : vector<8x16xf32>
    %c359 = arith.constant 359 : index
    %109 = memref.load %arg3[%c359] : memref<408xf32, #tpu.memory_space<smem>>
    %110 = vector.broadcast %109 : f32 to vector<8x16xf32>
    %111 = arith.mulf %110, %80 : vector<8x16xf32>
    %112 = arith.addf %79, %111 : vector<8x16xf32>
    %113 = vector.extract_strided_slice %21 {offsets = [1, 1], sizes = [8, 16], strides = [1, 1]} : vector<16x20xf32> to vector<8x16xf32>
    %c3 = arith.constant 3 : index
    %114 = memref.load %arg3[%c3] : memref<408xf32, #tpu.memory_space<smem>>
    %115 = vector.broadcast %114 : f32 to vector<8x16xf32>
    %116 = arith.mulf %115, %113 : vector<8x16xf32>
    %117 = arith.addf %84, %116 : vector<8x16xf32>
    %c54 = arith.constant 54 : index
    %118 = memref.load %arg3[%c54] : memref<408xf32, #tpu.memory_space<smem>>
    %119 = vector.broadcast %118 : f32 to vector<8x16xf32>
    %120 = arith.mulf %119, %113 : vector<8x16xf32>
    %121 = arith.addf %88, %120 : vector<8x16xf32>
    %c105 = arith.constant 105 : index
    %122 = memref.load %arg3[%c105] : memref<408xf32, #tpu.memory_space<smem>>
    %123 = vector.broadcast %122 : f32 to vector<8x16xf32>
    %124 = arith.mulf %123, %113 : vector<8x16xf32>
    %125 = arith.addf %92, %124 : vector<8x16xf32>
    %c156 = arith.constant 156 : index
    %126 = memref.load %arg3[%c156] : memref<408xf32, #tpu.memory_space<smem>>
    %127 = vector.broadcast %126 : f32 to vector<8x16xf32>
    %128 = arith.mulf %127, %113 : vector<8x16xf32>
    %129 = arith.addf %96, %128 : vector<8x16xf32>
    %c207 = arith.constant 207 : index
    %130 = memref.load %arg3[%c207] : memref<408xf32, #tpu.memory_space<smem>>
    %131 = vector.broadcast %130 : f32 to vector<8x16xf32>
    %132 = arith.mulf %131, %113 : vector<8x16xf32>
    %133 = arith.addf %100, %132 : vector<8x16xf32>
    %c258 = arith.constant 258 : index
    %134 = memref.load %arg3[%c258] : memref<408xf32, #tpu.memory_space<smem>>
    %135 = vector.broadcast %134 : f32 to vector<8x16xf32>
    %136 = arith.mulf %135, %113 : vector<8x16xf32>
    %137 = arith.addf %104, %136 : vector<8x16xf32>
    %c309 = arith.constant 309 : index
    %138 = memref.load %arg3[%c309] : memref<408xf32, #tpu.memory_space<smem>>
    %139 = vector.broadcast %138 : f32 to vector<8x16xf32>
    %140 = arith.mulf %139, %113 : vector<8x16xf32>
    %141 = arith.addf %108, %140 : vector<8x16xf32>
    %c360 = arith.constant 360 : index
    %142 = memref.load %arg3[%c360] : memref<408xf32, #tpu.memory_space<smem>>
    %143 = vector.broadcast %142 : f32 to vector<8x16xf32>
    %144 = arith.mulf %143, %113 : vector<8x16xf32>
    %145 = arith.addf %112, %144 : vector<8x16xf32>
    %146 = vector.extract_strided_slice %21 {offsets = [1, 2], sizes = [8, 16], strides = [1, 1]} : vector<16x20xf32> to vector<8x16xf32>
    %c4 = arith.constant 4 : index
    %147 = memref.load %arg3[%c4] : memref<408xf32, #tpu.memory_space<smem>>
    %148 = vector.broadcast %147 : f32 to vector<8x16xf32>
    %149 = arith.mulf %148, %146 : vector<8x16xf32>
    %150 = arith.addf %117, %149 : vector<8x16xf32>
    %c55 = arith.constant 55 : index
    %151 = memref.load %arg3[%c55] : memref<408xf32, #tpu.memory_space<smem>>
    %152 = vector.broadcast %151 : f32 to vector<8x16xf32>
    %153 = arith.mulf %152, %146 : vector<8x16xf32>
    %154 = arith.addf %121, %153 : vector<8x16xf32>
    %c106 = arith.constant 106 : index
    %155 = memref.load %arg3[%c106] : memref<408xf32, #tpu.memory_space<smem>>
    %156 = vector.broadcast %155 : f32 to vector<8x16xf32>
    %157 = arith.mulf %156, %146 : vector<8x16xf32>
    %158 = arith.addf %125, %157 : vector<8x16xf32>
    %c157 = arith.constant 157 : index
    %159 = memref.load %arg3[%c157] : memref<408xf32, #tpu.memory_space<smem>>
    %160 = vector.broadcast %159 : f32 to vector<8x16xf32>
    %161 = arith.mulf %160, %146 : vector<8x16xf32>
    %162 = arith.addf %129, %161 : vector<8x16xf32>
    %c208 = arith.constant 208 : index
    %163 = memref.load %arg3[%c208] : memref<408xf32, #tpu.memory_space<smem>>
    %164 = vector.broadcast %163 : f32 to vector<8x16xf32>
    %165 = arith.mulf %164, %146 : vector<8x16xf32>
    %166 = arith.addf %133, %165 : vector<8x16xf32>
    %c259 = arith.constant 259 : index
    %167 = memref.load %arg3[%c259] : memref<408xf32, #tpu.memory_space<smem>>
    %168 = vector.broadcast %167 : f32 to vector<8x16xf32>
    %169 = arith.mulf %168, %146 : vector<8x16xf32>
    %170 = arith.addf %137, %169 : vector<8x16xf32>
    %c310 = arith.constant 310 : index
    %171 = memref.load %arg3[%c310] : memref<408xf32, #tpu.memory_space<smem>>
    %172 = vector.broadcast %171 : f32 to vector<8x16xf32>
    %173 = arith.mulf %172, %146 : vector<8x16xf32>
    %174 = arith.addf %141, %173 : vector<8x16xf32>
    %c361 = arith.constant 361 : index
    %175 = memref.load %arg3[%c361] : memref<408xf32, #tpu.memory_space<smem>>
    %176 = vector.broadcast %175 : f32 to vector<8x16xf32>
    %177 = arith.mulf %176, %146 : vector<8x16xf32>
    %178 = arith.addf %145, %177 : vector<8x16xf32>
    %179 = vector.extract_strided_slice %21 {offsets = [1, 3], sizes = [8, 16], strides = [1, 1]} : vector<16x20xf32> to vector<8x16xf32>
    %c5 = arith.constant 5 : index
    %180 = memref.load %arg3[%c5] : memref<408xf32, #tpu.memory_space<smem>>
    %181 = vector.broadcast %180 : f32 to vector<8x16xf32>
    %182 = arith.mulf %181, %179 : vector<8x16xf32>
    %183 = arith.addf %150, %182 : vector<8x16xf32>
    %c56 = arith.constant 56 : index
    %184 = memref.load %arg3[%c56] : memref<408xf32, #tpu.memory_space<smem>>
    %185 = vector.broadcast %184 : f32 to vector<8x16xf32>
    %186 = arith.mulf %185, %179 : vector<8x16xf32>
    %187 = arith.addf %154, %186 : vector<8x16xf32>
    %c107 = arith.constant 107 : index
    %188 = memref.load %arg3[%c107] : memref<408xf32, #tpu.memory_space<smem>>
    %189 = vector.broadcast %188 : f32 to vector<8x16xf32>
    %190 = arith.mulf %189, %179 : vector<8x16xf32>
    %191 = arith.addf %158, %190 : vector<8x16xf32>
    %c158 = arith.constant 158 : index
    %192 = memref.load %arg3[%c158] : memref<408xf32, #tpu.memory_space<smem>>
    %193 = vector.broadcast %192 : f32 to vector<8x16xf32>
    %194 = arith.mulf %193, %179 : vector<8x16xf32>
    %195 = arith.addf %162, %194 : vector<8x16xf32>
    %c209 = arith.constant 209 : index
    %196 = memref.load %arg3[%c209] : memref<408xf32, #tpu.memory_space<smem>>
    %197 = vector.broadcast %196 : f32 to vector<8x16xf32>
    %198 = arith.mulf %197, %179 : vector<8x16xf32>
    %199 = arith.addf %166, %198 : vector<8x16xf32>
    %c260 = arith.constant 260 : index
    %200 = memref.load %arg3[%c260] : memref<408xf32, #tpu.memory_space<smem>>
    %201 = vector.broadcast %200 : f32 to vector<8x16xf32>
    %202 = arith.mulf %201, %179 : vector<8x16xf32>
    %203 = arith.addf %170, %202 : vector<8x16xf32>
    %c311 = arith.constant 311 : index
    %204 = memref.load %arg3[%c311] : memref<408xf32, #tpu.memory_space<smem>>
    %205 = vector.broadcast %204 : f32 to vector<8x16xf32>
    %206 = arith.mulf %205, %179 : vector<8x16xf32>
    %207 = arith.addf %174, %206 : vector<8x16xf32>
    %c362 = arith.constant 362 : index
    %208 = memref.load %arg3[%c362] : memref<408xf32, #tpu.memory_space<smem>>
    %209 = vector.broadcast %208 : f32 to vector<8x16xf32>
    %210 = arith.mulf %209, %179 : vector<8x16xf32>
    %211 = arith.addf %178, %210 : vector<8x16xf32>
    %212 = vector.extract_strided_slice %21 {offsets = [2, 0], sizes = [8, 16], strides = [1, 1]} : vector<16x20xf32> to vector<8x16xf32>
    %c6 = arith.constant 6 : index
    %213 = memref.load %arg3[%c6] : memref<408xf32, #tpu.memory_space<smem>>
    %214 = vector.broadcast %213 : f32 to vector<8x16xf32>
    %215 = arith.mulf %214, %212 : vector<8x16xf32>
    %216 = arith.addf %183, %215 : vector<8x16xf32>
    %c57 = arith.constant 57 : index
    %217 = memref.load %arg3[%c57] : memref<408xf32, #tpu.memory_space<smem>>
    %218 = vector.broadcast %217 : f32 to vector<8x16xf32>
    %219 = arith.mulf %218, %212 : vector<8x16xf32>
    %220 = arith.addf %187, %219 : vector<8x16xf32>
    %c108 = arith.constant 108 : index
    %221 = memref.load %arg3[%c108] : memref<408xf32, #tpu.memory_space<smem>>
    %222 = vector.broadcast %221 : f32 to vector<8x16xf32>
    %223 = arith.mulf %222, %212 : vector<8x16xf32>
    %224 = arith.addf %191, %223 : vector<8x16xf32>
    %c159 = arith.constant 159 : index
    %225 = memref.load %arg3[%c159] : memref<408xf32, #tpu.memory_space<smem>>
    %226 = vector.broadcast %225 : f32 to vector<8x16xf32>
    %227 = arith.mulf %226, %212 : vector<8x16xf32>
    %228 = arith.addf %195, %227 : vector<8x16xf32>
    %c210 = arith.constant 210 : index
    %229 = memref.load %arg3[%c210] : memref<408xf32, #tpu.memory_space<smem>>
    %230 = vector.broadcast %229 : f32 to vector<8x16xf32>
    %231 = arith.mulf %230, %212 : vector<8x16xf32>
    %232 = arith.addf %199, %231 : vector<8x16xf32>
    %c261 = arith.constant 261 : index
    %233 = memref.load %arg3[%c261] : memref<408xf32, #tpu.memory_space<smem>>
    %234 = vector.broadcast %233 : f32 to vector<8x16xf32>
    %235 = arith.mulf %234, %212 : vector<8x16xf32>
    %236 = arith.addf %203, %235 : vector<8x16xf32>
    %c312 = arith.constant 312 : index
    %237 = memref.load %arg3[%c312] : memref<408xf32, #tpu.memory_space<smem>>
    %238 = vector.broadcast %237 : f32 to vector<8x16xf32>
    %239 = arith.mulf %238, %212 : vector<8x16xf32>
    %240 = arith.addf %207, %239 : vector<8x16xf32>
    %c363 = arith.constant 363 : index
    %241 = memref.load %arg3[%c363] : memref<408xf32, #tpu.memory_space<smem>>
    %242 = vector.broadcast %241 : f32 to vector<8x16xf32>
    %243 = arith.mulf %242, %212 : vector<8x16xf32>
    %244 = arith.addf %211, %243 : vector<8x16xf32>
    %245 = vector.extract_strided_slice %21 {offsets = [2, 1], sizes = [8, 16], strides = [1, 1]} : vector<16x20xf32> to vector<8x16xf32>
    %c7 = arith.constant 7 : index
    %246 = memref.load %arg3[%c7] : memref<408xf32, #tpu.memory_space<smem>>
    %247 = vector.broadcast %246 : f32 to vector<8x16xf32>
    %248 = arith.mulf %247, %245 : vector<8x16xf32>
    %249 = arith.addf %216, %248 : vector<8x16xf32>
    %c58 = arith.constant 58 : index
    %250 = memref.load %arg3[%c58] : memref<408xf32, #tpu.memory_space<smem>>
    %251 = vector.broadcast %250 : f32 to vector<8x16xf32>
    %252 = arith.mulf %251, %245 : vector<8x16xf32>
    %253 = arith.addf %220, %252 : vector<8x16xf32>
    %c109 = arith.constant 109 : index
    %254 = memref.load %arg3[%c109] : memref<408xf32, #tpu.memory_space<smem>>
    %255 = vector.broadcast %254 : f32 to vector<8x16xf32>
    %256 = arith.mulf %255, %245 : vector<8x16xf32>
    %257 = arith.addf %224, %256 : vector<8x16xf32>
    %c160 = arith.constant 160 : index
    %258 = memref.load %arg3[%c160] : memref<408xf32, #tpu.memory_space<smem>>
    %259 = vector.broadcast %258 : f32 to vector<8x16xf32>
    %260 = arith.mulf %259, %245 : vector<8x16xf32>
    %261 = arith.addf %228, %260 : vector<8x16xf32>
    %c211 = arith.constant 211 : index
    %262 = memref.load %arg3[%c211] : memref<408xf32, #tpu.memory_space<smem>>
    %263 = vector.broadcast %262 : f32 to vector<8x16xf32>
    %264 = arith.mulf %263, %245 : vector<8x16xf32>
    %265 = arith.addf %232, %264 : vector<8x16xf32>
    %c262 = arith.constant 262 : index
    %266 = memref.load %arg3[%c262] : memref<408xf32, #tpu.memory_space<smem>>
    %267 = vector.broadcast %266 : f32 to vector<8x16xf32>
    %268 = arith.mulf %267, %245 : vector<8x16xf32>
    %269 = arith.addf %236, %268 : vector<8x16xf32>
    %c313 = arith.constant 313 : index
    %270 = memref.load %arg3[%c313] : memref<408xf32, #tpu.memory_space<smem>>
    %271 = vector.broadcast %270 : f32 to vector<8x16xf32>
    %272 = arith.mulf %271, %245 : vector<8x16xf32>
    %273 = arith.addf %240, %272 : vector<8x16xf32>
    %c364 = arith.constant 364 : index
    %274 = memref.load %arg3[%c364] : memref<408xf32, #tpu.memory_space<smem>>
    %275 = vector.broadcast %274 : f32 to vector<8x16xf32>
    %276 = arith.mulf %275, %245 : vector<8x16xf32>
    %277 = arith.addf %244, %276 : vector<8x16xf32>
    %278 = vector.extract_strided_slice %21 {offsets = [2, 2], sizes = [8, 16], strides = [1, 1]} : vector<16x20xf32> to vector<8x16xf32>
    %c8 = arith.constant 8 : index
    %279 = memref.load %arg3[%c8] : memref<408xf32, #tpu.memory_space<smem>>
    %280 = vector.broadcast %279 : f32 to vector<8x16xf32>
    %281 = arith.mulf %280, %278 : vector<8x16xf32>
    %282 = arith.addf %249, %281 : vector<8x16xf32>
    %c59 = arith.constant 59 : index
    %283 = memref.load %arg3[%c59] : memref<408xf32, #tpu.memory_space<smem>>
    %284 = vector.broadcast %283 : f32 to vector<8x16xf32>
    %285 = arith.mulf %284, %278 : vector<8x16xf32>
    %286 = arith.addf %253, %285 : vector<8x16xf32>
    %c110 = arith.constant 110 : index
    %287 = memref.load %arg3[%c110] : memref<408xf32, #tpu.memory_space<smem>>
    %288 = vector.broadcast %287 : f32 to vector<8x16xf32>
    %289 = arith.mulf %288, %278 : vector<8x16xf32>
    %290 = arith.addf %257, %289 : vector<8x16xf32>
    %c161 = arith.constant 161 : index
    %291 = memref.load %arg3[%c161] : memref<408xf32, #tpu.memory_space<smem>>
    %292 = vector.broadcast %291 : f32 to vector<8x16xf32>
    %293 = arith.mulf %292, %278 : vector<8x16xf32>
    %294 = arith.addf %261, %293 : vector<8x16xf32>
    %c212 = arith.constant 212 : index
    %295 = memref.load %arg3[%c212] : memref<408xf32, #tpu.memory_space<smem>>
    %296 = vector.broadcast %295 : f32 to vector<8x16xf32>
    %297 = arith.mulf %296, %278 : vector<8x16xf32>
    %298 = arith.addf %265, %297 : vector<8x16xf32>
    %c263 = arith.constant 263 : index
    %299 = memref.load %arg3[%c263] : memref<408xf32, #tpu.memory_space<smem>>
    %300 = vector.broadcast %299 : f32 to vector<8x16xf32>
    %301 = arith.mulf %300, %278 : vector<8x16xf32>
    %302 = arith.addf %269, %301 : vector<8x16xf32>
    %c314 = arith.constant 314 : index
    %303 = memref.load %arg3[%c314] : memref<408xf32, #tpu.memory_space<smem>>
    %304 = vector.broadcast %303 : f32 to vector<8x16xf32>
    %305 = arith.mulf %304, %278 : vector<8x16xf32>
    %306 = arith.addf %273, %305 : vector<8x16xf32>
    %c365 = arith.constant 365 : index
    %307 = memref.load %arg3[%c365] : memref<408xf32, #tpu.memory_space<smem>>
    %308 = vector.broadcast %307 : f32 to vector<8x16xf32>
    %309 = arith.mulf %308, %278 : vector<8x16xf32>
    %310 = arith.addf %277, %309 : vector<8x16xf32>
    %311 = vector.extract_strided_slice %21 {offsets = [2, 3], sizes = [8, 16], strides = [1, 1]} : vector<16x20xf32> to vector<8x16xf32>
    %c9 = arith.constant 9 : index
    %312 = memref.load %arg3[%c9] : memref<408xf32, #tpu.memory_space<smem>>
    %313 = vector.broadcast %312 : f32 to vector<8x16xf32>
    %314 = arith.mulf %313, %311 : vector<8x16xf32>
    %315 = arith.addf %282, %314 : vector<8x16xf32>
    %c60 = arith.constant 60 : index
    %316 = memref.load %arg3[%c60] : memref<408xf32, #tpu.memory_space<smem>>
    %317 = vector.broadcast %316 : f32 to vector<8x16xf32>
    %318 = arith.mulf %317, %311 : vector<8x16xf32>
    %319 = arith.addf %286, %318 : vector<8x16xf32>
    %c111 = arith.constant 111 : index
    %320 = memref.load %arg3[%c111] : memref<408xf32, #tpu.memory_space<smem>>
    %321 = vector.broadcast %320 : f32 to vector<8x16xf32>
    %322 = arith.mulf %321, %311 : vector<8x16xf32>
    %323 = arith.addf %290, %322 : vector<8x16xf32>
    %c162 = arith.constant 162 : index
    %324 = memref.load %arg3[%c162] : memref<408xf32, #tpu.memory_space<smem>>
    %325 = vector.broadcast %324 : f32 to vector<8x16xf32>
    %326 = arith.mulf %325, %311 : vector<8x16xf32>
    %327 = arith.addf %294, %326 : vector<8x16xf32>
    %c213 = arith.constant 213 : index
    %328 = memref.load %arg3[%c213] : memref<408xf32, #tpu.memory_space<smem>>
    %329 = vector.broadcast %328 : f32 to vector<8x16xf32>
    %330 = arith.mulf %329, %311 : vector<8x16xf32>
    %331 = arith.addf %298, %330 : vector<8x16xf32>
    %c264 = arith.constant 264 : index
    %332 = memref.load %arg3[%c264] : memref<408xf32, #tpu.memory_space<smem>>
    %333 = vector.broadcast %332 : f32 to vector<8x16xf32>
    %334 = arith.mulf %333, %311 : vector<8x16xf32>
    %335 = arith.addf %302, %334 : vector<8x16xf32>
    %c315 = arith.constant 315 : index
    %336 = memref.load %arg3[%c315] : memref<408xf32, #tpu.memory_space<smem>>
    %337 = vector.broadcast %336 : f32 to vector<8x16xf32>
    %338 = arith.mulf %337, %311 : vector<8x16xf32>
    %339 = arith.addf %306, %338 : vector<8x16xf32>
    %c366 = arith.constant 366 : index
    %340 = memref.load %arg3[%c366] : memref<408xf32, #tpu.memory_space<smem>>
    %341 = vector.broadcast %340 : f32 to vector<8x16xf32>
    %342 = arith.mulf %341, %311 : vector<8x16xf32>
    %343 = arith.addf %310, %342 : vector<8x16xf32>
    %344 = vector.extract_strided_slice %21 {offsets = [2, 4], sizes = [8, 16], strides = [1, 1]} : vector<16x20xf32> to vector<8x16xf32>
    %c10 = arith.constant 10 : index
    %345 = memref.load %arg3[%c10] : memref<408xf32, #tpu.memory_space<smem>>
    %346 = vector.broadcast %345 : f32 to vector<8x16xf32>
    %347 = arith.mulf %346, %344 : vector<8x16xf32>
    %348 = arith.addf %315, %347 : vector<8x16xf32>
    %c61 = arith.constant 61 : index
    %349 = memref.load %arg3[%c61] : memref<408xf32, #tpu.memory_space<smem>>
    %350 = vector.broadcast %349 : f32 to vector<8x16xf32>
    %351 = arith.mulf %350, %344 : vector<8x16xf32>
    %352 = arith.addf %319, %351 : vector<8x16xf32>
    %c112 = arith.constant 112 : index
    %353 = memref.load %arg3[%c112] : memref<408xf32, #tpu.memory_space<smem>>
    %354 = vector.broadcast %353 : f32 to vector<8x16xf32>
    %355 = arith.mulf %354, %344 : vector<8x16xf32>
    %356 = arith.addf %323, %355 : vector<8x16xf32>
    %c163 = arith.constant 163 : index
    %357 = memref.load %arg3[%c163] : memref<408xf32, #tpu.memory_space<smem>>
    %358 = vector.broadcast %357 : f32 to vector<8x16xf32>
    %359 = arith.mulf %358, %344 : vector<8x16xf32>
    %360 = arith.addf %327, %359 : vector<8x16xf32>
    %c214 = arith.constant 214 : index
    %361 = memref.load %arg3[%c214] : memref<408xf32, #tpu.memory_space<smem>>
    %362 = vector.broadcast %361 : f32 to vector<8x16xf32>
    %363 = arith.mulf %362, %344 : vector<8x16xf32>
    %364 = arith.addf %331, %363 : vector<8x16xf32>
    %c265 = arith.constant 265 : index
    %365 = memref.load %arg3[%c265] : memref<408xf32, #tpu.memory_space<smem>>
    %366 = vector.broadcast %365 : f32 to vector<8x16xf32>
    %367 = arith.mulf %366, %344 : vector<8x16xf32>
    %368 = arith.addf %335, %367 : vector<8x16xf32>
    %c316 = arith.constant 316 : index
    %369 = memref.load %arg3[%c316] : memref<408xf32, #tpu.memory_space<smem>>
    %370 = vector.broadcast %369 : f32 to vector<8x16xf32>
    %371 = arith.mulf %370, %344 : vector<8x16xf32>
    %372 = arith.addf %339, %371 : vector<8x16xf32>
    %c367 = arith.constant 367 : index
    %373 = memref.load %arg3[%c367] : memref<408xf32, #tpu.memory_space<smem>>
    %374 = vector.broadcast %373 : f32 to vector<8x16xf32>
    %375 = arith.mulf %374, %344 : vector<8x16xf32>
    %376 = arith.addf %343, %375 : vector<8x16xf32>
    %377 = vector.extract_strided_slice %21 {offsets = [3, 1], sizes = [8, 16], strides = [1, 1]} : vector<16x20xf32> to vector<8x16xf32>
    %c11 = arith.constant 11 : index
    %378 = memref.load %arg3[%c11] : memref<408xf32, #tpu.memory_space<smem>>
    %379 = vector.broadcast %378 : f32 to vector<8x16xf32>
    %380 = arith.mulf %379, %377 : vector<8x16xf32>
    %381 = arith.addf %348, %380 : vector<8x16xf32>
    %c62 = arith.constant 62 : index
    %382 = memref.load %arg3[%c62] : memref<408xf32, #tpu.memory_space<smem>>
    %383 = vector.broadcast %382 : f32 to vector<8x16xf32>
    %384 = arith.mulf %383, %377 : vector<8x16xf32>
    %385 = arith.addf %352, %384 : vector<8x16xf32>
    %c113 = arith.constant 113 : index
    %386 = memref.load %arg3[%c113] : memref<408xf32, #tpu.memory_space<smem>>
    %387 = vector.broadcast %386 : f32 to vector<8x16xf32>
    %388 = arith.mulf %387, %377 : vector<8x16xf32>
    %389 = arith.addf %356, %388 : vector<8x16xf32>
    %c164 = arith.constant 164 : index
    %390 = memref.load %arg3[%c164] : memref<408xf32, #tpu.memory_space<smem>>
    %391 = vector.broadcast %390 : f32 to vector<8x16xf32>
    %392 = arith.mulf %391, %377 : vector<8x16xf32>
    %393 = arith.addf %360, %392 : vector<8x16xf32>
    %c215 = arith.constant 215 : index
    %394 = memref.load %arg3[%c215] : memref<408xf32, #tpu.memory_space<smem>>
    %395 = vector.broadcast %394 : f32 to vector<8x16xf32>
    %396 = arith.mulf %395, %377 : vector<8x16xf32>
    %397 = arith.addf %364, %396 : vector<8x16xf32>
    %c266 = arith.constant 266 : index
    %398 = memref.load %arg3[%c266] : memref<408xf32, #tpu.memory_space<smem>>
    %399 = vector.broadcast %398 : f32 to vector<8x16xf32>
    %400 = arith.mulf %399, %377 : vector<8x16xf32>
    %401 = arith.addf %368, %400 : vector<8x16xf32>
    %c317 = arith.constant 317 : index
    %402 = memref.load %arg3[%c317] : memref<408xf32, #tpu.memory_space<smem>>
    %403 = vector.broadcast %402 : f32 to vector<8x16xf32>
    %404 = arith.mulf %403, %377 : vector<8x16xf32>
    %405 = arith.addf %372, %404 : vector<8x16xf32>
    %c368 = arith.constant 368 : index
    %406 = memref.load %arg3[%c368] : memref<408xf32, #tpu.memory_space<smem>>
    %407 = vector.broadcast %406 : f32 to vector<8x16xf32>
    %408 = arith.mulf %407, %377 : vector<8x16xf32>
    %409 = arith.addf %376, %408 : vector<8x16xf32>
    %410 = vector.extract_strided_slice %21 {offsets = [3, 2], sizes = [8, 16], strides = [1, 1]} : vector<16x20xf32> to vector<8x16xf32>
    %c12 = arith.constant 12 : index
    %411 = memref.load %arg3[%c12] : memref<408xf32, #tpu.memory_space<smem>>
    %412 = vector.broadcast %411 : f32 to vector<8x16xf32>
    %413 = arith.mulf %412, %410 : vector<8x16xf32>
    %414 = arith.addf %381, %413 : vector<8x16xf32>
    %c63 = arith.constant 63 : index
    %415 = memref.load %arg3[%c63] : memref<408xf32, #tpu.memory_space<smem>>
    %416 = vector.broadcast %415 : f32 to vector<8x16xf32>
    %417 = arith.mulf %416, %410 : vector<8x16xf32>
    %418 = arith.addf %385, %417 : vector<8x16xf32>
    %c114 = arith.constant 114 : index
    %419 = memref.load %arg3[%c114] : memref<408xf32, #tpu.memory_space<smem>>
    %420 = vector.broadcast %419 : f32 to vector<8x16xf32>
    %421 = arith.mulf %420, %410 : vector<8x16xf32>
    %422 = arith.addf %389, %421 : vector<8x16xf32>
    %c165 = arith.constant 165 : index
    %423 = memref.load %arg3[%c165] : memref<408xf32, #tpu.memory_space<smem>>
    %424 = vector.broadcast %423 : f32 to vector<8x16xf32>
    %425 = arith.mulf %424, %410 : vector<8x16xf32>
    %426 = arith.addf %393, %425 : vector<8x16xf32>
    %c216 = arith.constant 216 : index
    %427 = memref.load %arg3[%c216] : memref<408xf32, #tpu.memory_space<smem>>
    %428 = vector.broadcast %427 : f32 to vector<8x16xf32>
    %429 = arith.mulf %428, %410 : vector<8x16xf32>
    %430 = arith.addf %397, %429 : vector<8x16xf32>
    %c267 = arith.constant 267 : index
    %431 = memref.load %arg3[%c267] : memref<408xf32, #tpu.memory_space<smem>>
    %432 = vector.broadcast %431 : f32 to vector<8x16xf32>
    %433 = arith.mulf %432, %410 : vector<8x16xf32>
    %434 = arith.addf %401, %433 : vector<8x16xf32>
    %c318 = arith.constant 318 : index
    %435 = memref.load %arg3[%c318] : memref<408xf32, #tpu.memory_space<smem>>
    %436 = vector.broadcast %435 : f32 to vector<8x16xf32>
    %437 = arith.mulf %436, %410 : vector<8x16xf32>
    %438 = arith.addf %405, %437 : vector<8x16xf32>
    %c369 = arith.constant 369 : index
    %439 = memref.load %arg3[%c369] : memref<408xf32, #tpu.memory_space<smem>>
    %440 = vector.broadcast %439 : f32 to vector<8x16xf32>
    %441 = arith.mulf %440, %410 : vector<8x16xf32>
    %442 = arith.addf %409, %441 : vector<8x16xf32>
    %443 = vector.extract_strided_slice %21 {offsets = [3, 3], sizes = [8, 16], strides = [1, 1]} : vector<16x20xf32> to vector<8x16xf32>
    %c13 = arith.constant 13 : index
    %444 = memref.load %arg3[%c13] : memref<408xf32, #tpu.memory_space<smem>>
    %445 = vector.broadcast %444 : f32 to vector<8x16xf32>
    %446 = arith.mulf %445, %443 : vector<8x16xf32>
    %447 = arith.addf %414, %446 : vector<8x16xf32>
    %c64 = arith.constant 64 : index
    %448 = memref.load %arg3[%c64] : memref<408xf32, #tpu.memory_space<smem>>
    %449 = vector.broadcast %448 : f32 to vector<8x16xf32>
    %450 = arith.mulf %449, %443 : vector<8x16xf32>
    %451 = arith.addf %418, %450 : vector<8x16xf32>
    %c115 = arith.constant 115 : index
    %452 = memref.load %arg3[%c115] : memref<408xf32, #tpu.memory_space<smem>>
    %453 = vector.broadcast %452 : f32 to vector<8x16xf32>
    %454 = arith.mulf %453, %443 : vector<8x16xf32>
    %455 = arith.addf %422, %454 : vector<8x16xf32>
    %c166 = arith.constant 166 : index
    %456 = memref.load %arg3[%c166] : memref<408xf32, #tpu.memory_space<smem>>
    %457 = vector.broadcast %456 : f32 to vector<8x16xf32>
    %458 = arith.mulf %457, %443 : vector<8x16xf32>
    %459 = arith.addf %426, %458 : vector<8x16xf32>
    %c217 = arith.constant 217 : index
    %460 = memref.load %arg3[%c217] : memref<408xf32, #tpu.memory_space<smem>>
    %461 = vector.broadcast %460 : f32 to vector<8x16xf32>
    %462 = arith.mulf %461, %443 : vector<8x16xf32>
    %463 = arith.addf %430, %462 : vector<8x16xf32>
    %c268 = arith.constant 268 : index
    %464 = memref.load %arg3[%c268] : memref<408xf32, #tpu.memory_space<smem>>
    %465 = vector.broadcast %464 : f32 to vector<8x16xf32>
    %466 = arith.mulf %465, %443 : vector<8x16xf32>
    %467 = arith.addf %434, %466 : vector<8x16xf32>
    %c319 = arith.constant 319 : index
    %468 = memref.load %arg3[%c319] : memref<408xf32, #tpu.memory_space<smem>>
    %469 = vector.broadcast %468 : f32 to vector<8x16xf32>
    %470 = arith.mulf %469, %443 : vector<8x16xf32>
    %471 = arith.addf %438, %470 : vector<8x16xf32>
    %c370 = arith.constant 370 : index
    %472 = memref.load %arg3[%c370] : memref<408xf32, #tpu.memory_space<smem>>
    %473 = vector.broadcast %472 : f32 to vector<8x16xf32>
    %474 = arith.mulf %473, %443 : vector<8x16xf32>
    %475 = arith.addf %442, %474 : vector<8x16xf32>
    %476 = vector.extract_strided_slice %21 {offsets = [4, 0], sizes = [8, 16], strides = [1, 1]} : vector<16x20xf32> to vector<8x16xf32>
    %c14 = arith.constant 14 : index
    %477 = memref.load %arg3[%c14] : memref<408xf32, #tpu.memory_space<smem>>
    %478 = vector.broadcast %477 : f32 to vector<8x16xf32>
    %479 = arith.mulf %478, %476 : vector<8x16xf32>
    %480 = arith.addf %447, %479 : vector<8x16xf32>
    %c65 = arith.constant 65 : index
    %481 = memref.load %arg3[%c65] : memref<408xf32, #tpu.memory_space<smem>>
    %482 = vector.broadcast %481 : f32 to vector<8x16xf32>
    %483 = arith.mulf %482, %476 : vector<8x16xf32>
    %484 = arith.addf %451, %483 : vector<8x16xf32>
    %c116 = arith.constant 116 : index
    %485 = memref.load %arg3[%c116] : memref<408xf32, #tpu.memory_space<smem>>
    %486 = vector.broadcast %485 : f32 to vector<8x16xf32>
    %487 = arith.mulf %486, %476 : vector<8x16xf32>
    %488 = arith.addf %455, %487 : vector<8x16xf32>
    %c167 = arith.constant 167 : index
    %489 = memref.load %arg3[%c167] : memref<408xf32, #tpu.memory_space<smem>>
    %490 = vector.broadcast %489 : f32 to vector<8x16xf32>
    %491 = arith.mulf %490, %476 : vector<8x16xf32>
    %492 = arith.addf %459, %491 : vector<8x16xf32>
    %c218 = arith.constant 218 : index
    %493 = memref.load %arg3[%c218] : memref<408xf32, #tpu.memory_space<smem>>
    %494 = vector.broadcast %493 : f32 to vector<8x16xf32>
    %495 = arith.mulf %494, %476 : vector<8x16xf32>
    %496 = arith.addf %463, %495 : vector<8x16xf32>
    %c269 = arith.constant 269 : index
    %497 = memref.load %arg3[%c269] : memref<408xf32, #tpu.memory_space<smem>>
    %498 = vector.broadcast %497 : f32 to vector<8x16xf32>
    %499 = arith.mulf %498, %476 : vector<8x16xf32>
    %500 = arith.addf %467, %499 : vector<8x16xf32>
    %c320 = arith.constant 320 : index
    %501 = memref.load %arg3[%c320] : memref<408xf32, #tpu.memory_space<smem>>
    %502 = vector.broadcast %501 : f32 to vector<8x16xf32>
    %503 = arith.mulf %502, %476 : vector<8x16xf32>
    %504 = arith.addf %471, %503 : vector<8x16xf32>
    %c371 = arith.constant 371 : index
    %505 = memref.load %arg3[%c371] : memref<408xf32, #tpu.memory_space<smem>>
    %506 = vector.broadcast %505 : f32 to vector<8x16xf32>
    %507 = arith.mulf %506, %476 : vector<8x16xf32>
    %508 = arith.addf %475, %507 : vector<8x16xf32>
    %509 = vector.extract_strided_slice %21 {offsets = [4, 2], sizes = [8, 16], strides = [1, 1]} : vector<16x20xf32> to vector<8x16xf32>
    %c15 = arith.constant 15 : index
    %510 = memref.load %arg3[%c15] : memref<408xf32, #tpu.memory_space<smem>>
    %511 = vector.broadcast %510 : f32 to vector<8x16xf32>
    %512 = arith.mulf %511, %509 : vector<8x16xf32>
    %513 = arith.addf %480, %512 : vector<8x16xf32>
    %c66 = arith.constant 66 : index
    %514 = memref.load %arg3[%c66] : memref<408xf32, #tpu.memory_space<smem>>
    %515 = vector.broadcast %514 : f32 to vector<8x16xf32>
    %516 = arith.mulf %515, %509 : vector<8x16xf32>
    %517 = arith.addf %484, %516 : vector<8x16xf32>
    %c117 = arith.constant 117 : index
    %518 = memref.load %arg3[%c117] : memref<408xf32, #tpu.memory_space<smem>>
    %519 = vector.broadcast %518 : f32 to vector<8x16xf32>
    %520 = arith.mulf %519, %509 : vector<8x16xf32>
    %521 = arith.addf %488, %520 : vector<8x16xf32>
    %c168 = arith.constant 168 : index
    %522 = memref.load %arg3[%c168] : memref<408xf32, #tpu.memory_space<smem>>
    %523 = vector.broadcast %522 : f32 to vector<8x16xf32>
    %524 = arith.mulf %523, %509 : vector<8x16xf32>
    %525 = arith.addf %492, %524 : vector<8x16xf32>
    %c219 = arith.constant 219 : index
    %526 = memref.load %arg3[%c219] : memref<408xf32, #tpu.memory_space<smem>>
    %527 = vector.broadcast %526 : f32 to vector<8x16xf32>
    %528 = arith.mulf %527, %509 : vector<8x16xf32>
    %529 = arith.addf %496, %528 : vector<8x16xf32>
    %c270 = arith.constant 270 : index
    %530 = memref.load %arg3[%c270] : memref<408xf32, #tpu.memory_space<smem>>
    %531 = vector.broadcast %530 : f32 to vector<8x16xf32>
    %532 = arith.mulf %531, %509 : vector<8x16xf32>
    %533 = arith.addf %500, %532 : vector<8x16xf32>
    %c321 = arith.constant 321 : index
    %534 = memref.load %arg3[%c321] : memref<408xf32, #tpu.memory_space<smem>>
    %535 = vector.broadcast %534 : f32 to vector<8x16xf32>
    %536 = arith.mulf %535, %509 : vector<8x16xf32>
    %537 = arith.addf %504, %536 : vector<8x16xf32>
    %c372 = arith.constant 372 : index
    %538 = memref.load %arg3[%c372] : memref<408xf32, #tpu.memory_space<smem>>
    %539 = vector.broadcast %538 : f32 to vector<8x16xf32>
    %540 = arith.mulf %539, %509 : vector<8x16xf32>
    %541 = arith.addf %508, %540 : vector<8x16xf32>
    %542 = vector.extract_strided_slice %21 {offsets = [4, 4], sizes = [8, 16], strides = [1, 1]} : vector<16x20xf32> to vector<8x16xf32>
    %c16 = arith.constant 16 : index
    %543 = memref.load %arg3[%c16] : memref<408xf32, #tpu.memory_space<smem>>
    %544 = vector.broadcast %543 : f32 to vector<8x16xf32>
    %545 = arith.mulf %544, %542 : vector<8x16xf32>
    %546 = arith.addf %513, %545 : vector<8x16xf32>
    %c67 = arith.constant 67 : index
    %547 = memref.load %arg3[%c67] : memref<408xf32, #tpu.memory_space<smem>>
    %548 = vector.broadcast %547 : f32 to vector<8x16xf32>
    %549 = arith.mulf %548, %542 : vector<8x16xf32>
    %550 = arith.addf %517, %549 : vector<8x16xf32>
    %c118 = arith.constant 118 : index
    %551 = memref.load %arg3[%c118] : memref<408xf32, #tpu.memory_space<smem>>
    %552 = vector.broadcast %551 : f32 to vector<8x16xf32>
    %553 = arith.mulf %552, %542 : vector<8x16xf32>
    %554 = arith.addf %521, %553 : vector<8x16xf32>
    %c169 = arith.constant 169 : index
    %555 = memref.load %arg3[%c169] : memref<408xf32, #tpu.memory_space<smem>>
    %556 = vector.broadcast %555 : f32 to vector<8x16xf32>
    %557 = arith.mulf %556, %542 : vector<8x16xf32>
    %558 = arith.addf %525, %557 : vector<8x16xf32>
    %c220 = arith.constant 220 : index
    %559 = memref.load %arg3[%c220] : memref<408xf32, #tpu.memory_space<smem>>
    %560 = vector.broadcast %559 : f32 to vector<8x16xf32>
    %561 = arith.mulf %560, %542 : vector<8x16xf32>
    %562 = arith.addf %529, %561 : vector<8x16xf32>
    %c271 = arith.constant 271 : index
    %563 = memref.load %arg3[%c271] : memref<408xf32, #tpu.memory_space<smem>>
    %564 = vector.broadcast %563 : f32 to vector<8x16xf32>
    %565 = arith.mulf %564, %542 : vector<8x16xf32>
    %566 = arith.addf %533, %565 : vector<8x16xf32>
    %c322 = arith.constant 322 : index
    %567 = memref.load %arg3[%c322] : memref<408xf32, #tpu.memory_space<smem>>
    %568 = vector.broadcast %567 : f32 to vector<8x16xf32>
    %569 = arith.mulf %568, %542 : vector<8x16xf32>
    %570 = arith.addf %537, %569 : vector<8x16xf32>
    %c373 = arith.constant 373 : index
    %571 = memref.load %arg3[%c373] : memref<408xf32, #tpu.memory_space<smem>>
    %572 = vector.broadcast %571 : f32 to vector<8x16xf32>
    %573 = arith.mulf %572, %542 : vector<8x16xf32>
    %574 = arith.addf %541, %573 : vector<8x16xf32>
    %c1_26 = arith.constant 1 : index
    %575 = arith.index_cast %1 : i32 to index
    %c0_27 = arith.constant 0 : index
    %576 = vector.load %arg6[%c1_26, %575, %c0_27] : memref<3x24x20xf32, #tpu.memory_space<vmem>>, vector<1x16x20xf32>
    %577 = vector.shape_cast %576 : vector<1x16x20xf32> to vector<16x20xf32>
    %578 = vector.extract_strided_slice %577 {offsets = [0, 0], sizes = [8, 16], strides = [1, 1]} : vector<16x20xf32> to vector<8x16xf32>
    %c17 = arith.constant 17 : index
    %579 = memref.load %arg3[%c17] : memref<408xf32, #tpu.memory_space<smem>>
    %580 = vector.broadcast %579 : f32 to vector<8x16xf32>
    %581 = arith.mulf %580, %578 : vector<8x16xf32>
    %582 = arith.addf %546, %581 : vector<8x16xf32>
    %c68 = arith.constant 68 : index
    %583 = memref.load %arg3[%c68] : memref<408xf32, #tpu.memory_space<smem>>
    %584 = vector.broadcast %583 : f32 to vector<8x16xf32>
    %585 = arith.mulf %584, %578 : vector<8x16xf32>
    %586 = arith.addf %550, %585 : vector<8x16xf32>
    %c119 = arith.constant 119 : index
    %587 = memref.load %arg3[%c119] : memref<408xf32, #tpu.memory_space<smem>>
    %588 = vector.broadcast %587 : f32 to vector<8x16xf32>
    %589 = arith.mulf %588, %578 : vector<8x16xf32>
    %590 = arith.addf %554, %589 : vector<8x16xf32>
    %c170 = arith.constant 170 : index
    %591 = memref.load %arg3[%c170] : memref<408xf32, #tpu.memory_space<smem>>
    %592 = vector.broadcast %591 : f32 to vector<8x16xf32>
    %593 = arith.mulf %592, %578 : vector<8x16xf32>
    %594 = arith.addf %558, %593 : vector<8x16xf32>
    %c221 = arith.constant 221 : index
    %595 = memref.load %arg3[%c221] : memref<408xf32, #tpu.memory_space<smem>>
    %596 = vector.broadcast %595 : f32 to vector<8x16xf32>
    %597 = arith.mulf %596, %578 : vector<8x16xf32>
    %598 = arith.addf %562, %597 : vector<8x16xf32>
    %c272 = arith.constant 272 : index
    %599 = memref.load %arg3[%c272] : memref<408xf32, #tpu.memory_space<smem>>
    %600 = vector.broadcast %599 : f32 to vector<8x16xf32>
    %601 = arith.mulf %600, %578 : vector<8x16xf32>
    %602 = arith.addf %566, %601 : vector<8x16xf32>
    %c323 = arith.constant 323 : index
    %603 = memref.load %arg3[%c323] : memref<408xf32, #tpu.memory_space<smem>>
    %604 = vector.broadcast %603 : f32 to vector<8x16xf32>
    %605 = arith.mulf %604, %578 : vector<8x16xf32>
    %606 = arith.addf %570, %605 : vector<8x16xf32>
    %c374 = arith.constant 374 : index
    %607 = memref.load %arg3[%c374] : memref<408xf32, #tpu.memory_space<smem>>
    %608 = vector.broadcast %607 : f32 to vector<8x16xf32>
    %609 = arith.mulf %608, %578 : vector<8x16xf32>
    %610 = arith.addf %574, %609 : vector<8x16xf32>
    %611 = vector.extract_strided_slice %577 {offsets = [0, 2], sizes = [8, 16], strides = [1, 1]} : vector<16x20xf32> to vector<8x16xf32>
    %c18 = arith.constant 18 : index
    %612 = memref.load %arg3[%c18] : memref<408xf32, #tpu.memory_space<smem>>
    %613 = vector.broadcast %612 : f32 to vector<8x16xf32>
    %614 = arith.mulf %613, %611 : vector<8x16xf32>
    %615 = arith.addf %582, %614 : vector<8x16xf32>
    %c69 = arith.constant 69 : index
    %616 = memref.load %arg3[%c69] : memref<408xf32, #tpu.memory_space<smem>>
    %617 = vector.broadcast %616 : f32 to vector<8x16xf32>
    %618 = arith.mulf %617, %611 : vector<8x16xf32>
    %619 = arith.addf %586, %618 : vector<8x16xf32>
    %c120 = arith.constant 120 : index
    %620 = memref.load %arg3[%c120] : memref<408xf32, #tpu.memory_space<smem>>
    %621 = vector.broadcast %620 : f32 to vector<8x16xf32>
    %622 = arith.mulf %621, %611 : vector<8x16xf32>
    %623 = arith.addf %590, %622 : vector<8x16xf32>
    %c171 = arith.constant 171 : index
    %624 = memref.load %arg3[%c171] : memref<408xf32, #tpu.memory_space<smem>>
    %625 = vector.broadcast %624 : f32 to vector<8x16xf32>
    %626 = arith.mulf %625, %611 : vector<8x16xf32>
    %627 = arith.addf %594, %626 : vector<8x16xf32>
    %c222 = arith.constant 222 : index
    %628 = memref.load %arg3[%c222] : memref<408xf32, #tpu.memory_space<smem>>
    %629 = vector.broadcast %628 : f32 to vector<8x16xf32>
    %630 = arith.mulf %629, %611 : vector<8x16xf32>
    %631 = arith.addf %598, %630 : vector<8x16xf32>
    %c273 = arith.constant 273 : index
    %632 = memref.load %arg3[%c273] : memref<408xf32, #tpu.memory_space<smem>>
    %633 = vector.broadcast %632 : f32 to vector<8x16xf32>
    %634 = arith.mulf %633, %611 : vector<8x16xf32>
    %635 = arith.addf %602, %634 : vector<8x16xf32>
    %c324 = arith.constant 324 : index
    %636 = memref.load %arg3[%c324] : memref<408xf32, #tpu.memory_space<smem>>
    %637 = vector.broadcast %636 : f32 to vector<8x16xf32>
    %638 = arith.mulf %637, %611 : vector<8x16xf32>
    %639 = arith.addf %606, %638 : vector<8x16xf32>
    %c375 = arith.constant 375 : index
    %640 = memref.load %arg3[%c375] : memref<408xf32, #tpu.memory_space<smem>>
    %641 = vector.broadcast %640 : f32 to vector<8x16xf32>
    %642 = arith.mulf %641, %611 : vector<8x16xf32>
    %643 = arith.addf %610, %642 : vector<8x16xf32>
    %644 = vector.extract_strided_slice %577 {offsets = [0, 4], sizes = [8, 16], strides = [1, 1]} : vector<16x20xf32> to vector<8x16xf32>
    %c19 = arith.constant 19 : index
    %645 = memref.load %arg3[%c19] : memref<408xf32, #tpu.memory_space<smem>>
    %646 = vector.broadcast %645 : f32 to vector<8x16xf32>
    %647 = arith.mulf %646, %644 : vector<8x16xf32>
    %648 = arith.addf %615, %647 : vector<8x16xf32>
    %c70 = arith.constant 70 : index
    %649 = memref.load %arg3[%c70] : memref<408xf32, #tpu.memory_space<smem>>
    %650 = vector.broadcast %649 : f32 to vector<8x16xf32>
    %651 = arith.mulf %650, %644 : vector<8x16xf32>
    %652 = arith.addf %619, %651 : vector<8x16xf32>
    %c121 = arith.constant 121 : index
    %653 = memref.load %arg3[%c121] : memref<408xf32, #tpu.memory_space<smem>>
    %654 = vector.broadcast %653 : f32 to vector<8x16xf32>
    %655 = arith.mulf %654, %644 : vector<8x16xf32>
    %656 = arith.addf %623, %655 : vector<8x16xf32>
    %c172 = arith.constant 172 : index
    %657 = memref.load %arg3[%c172] : memref<408xf32, #tpu.memory_space<smem>>
    %658 = vector.broadcast %657 : f32 to vector<8x16xf32>
    %659 = arith.mulf %658, %644 : vector<8x16xf32>
    %660 = arith.addf %627, %659 : vector<8x16xf32>
    %c223 = arith.constant 223 : index
    %661 = memref.load %arg3[%c223] : memref<408xf32, #tpu.memory_space<smem>>
    %662 = vector.broadcast %661 : f32 to vector<8x16xf32>
    %663 = arith.mulf %662, %644 : vector<8x16xf32>
    %664 = arith.addf %631, %663 : vector<8x16xf32>
    %c274 = arith.constant 274 : index
    %665 = memref.load %arg3[%c274] : memref<408xf32, #tpu.memory_space<smem>>
    %666 = vector.broadcast %665 : f32 to vector<8x16xf32>
    %667 = arith.mulf %666, %644 : vector<8x16xf32>
    %668 = arith.addf %635, %667 : vector<8x16xf32>
    %c325 = arith.constant 325 : index
    %669 = memref.load %arg3[%c325] : memref<408xf32, #tpu.memory_space<smem>>
    %670 = vector.broadcast %669 : f32 to vector<8x16xf32>
    %671 = arith.mulf %670, %644 : vector<8x16xf32>
    %672 = arith.addf %639, %671 : vector<8x16xf32>
    %c376 = arith.constant 376 : index
    %673 = memref.load %arg3[%c376] : memref<408xf32, #tpu.memory_space<smem>>
    %674 = vector.broadcast %673 : f32 to vector<8x16xf32>
    %675 = arith.mulf %674, %644 : vector<8x16xf32>
    %676 = arith.addf %643, %675 : vector<8x16xf32>
    %677 = vector.extract_strided_slice %577 {offsets = [1, 1], sizes = [8, 16], strides = [1, 1]} : vector<16x20xf32> to vector<8x16xf32>
    %c20 = arith.constant 20 : index
    %678 = memref.load %arg3[%c20] : memref<408xf32, #tpu.memory_space<smem>>
    %679 = vector.broadcast %678 : f32 to vector<8x16xf32>
    %680 = arith.mulf %679, %677 : vector<8x16xf32>
    %681 = arith.addf %648, %680 : vector<8x16xf32>
    %c71 = arith.constant 71 : index
    %682 = memref.load %arg3[%c71] : memref<408xf32, #tpu.memory_space<smem>>
    %683 = vector.broadcast %682 : f32 to vector<8x16xf32>
    %684 = arith.mulf %683, %677 : vector<8x16xf32>
    %685 = arith.addf %652, %684 : vector<8x16xf32>
    %c122 = arith.constant 122 : index
    %686 = memref.load %arg3[%c122] : memref<408xf32, #tpu.memory_space<smem>>
    %687 = vector.broadcast %686 : f32 to vector<8x16xf32>
    %688 = arith.mulf %687, %677 : vector<8x16xf32>
    %689 = arith.addf %656, %688 : vector<8x16xf32>
    %c173 = arith.constant 173 : index
    %690 = memref.load %arg3[%c173] : memref<408xf32, #tpu.memory_space<smem>>
    %691 = vector.broadcast %690 : f32 to vector<8x16xf32>
    %692 = arith.mulf %691, %677 : vector<8x16xf32>
    %693 = arith.addf %660, %692 : vector<8x16xf32>
    %c224 = arith.constant 224 : index
    %694 = memref.load %arg3[%c224] : memref<408xf32, #tpu.memory_space<smem>>
    %695 = vector.broadcast %694 : f32 to vector<8x16xf32>
    %696 = arith.mulf %695, %677 : vector<8x16xf32>
    %697 = arith.addf %664, %696 : vector<8x16xf32>
    %c275 = arith.constant 275 : index
    %698 = memref.load %arg3[%c275] : memref<408xf32, #tpu.memory_space<smem>>
    %699 = vector.broadcast %698 : f32 to vector<8x16xf32>
    %700 = arith.mulf %699, %677 : vector<8x16xf32>
    %701 = arith.addf %668, %700 : vector<8x16xf32>
    %c326 = arith.constant 326 : index
    %702 = memref.load %arg3[%c326] : memref<408xf32, #tpu.memory_space<smem>>
    %703 = vector.broadcast %702 : f32 to vector<8x16xf32>
    %704 = arith.mulf %703, %677 : vector<8x16xf32>
    %705 = arith.addf %672, %704 : vector<8x16xf32>
    %c377 = arith.constant 377 : index
    %706 = memref.load %arg3[%c377] : memref<408xf32, #tpu.memory_space<smem>>
    %707 = vector.broadcast %706 : f32 to vector<8x16xf32>
    %708 = arith.mulf %707, %677 : vector<8x16xf32>
    %709 = arith.addf %676, %708 : vector<8x16xf32>
    %710 = vector.extract_strided_slice %577 {offsets = [1, 2], sizes = [8, 16], strides = [1, 1]} : vector<16x20xf32> to vector<8x16xf32>
    %c21 = arith.constant 21 : index
    %711 = memref.load %arg3[%c21] : memref<408xf32, #tpu.memory_space<smem>>
    %712 = vector.broadcast %711 : f32 to vector<8x16xf32>
    %713 = arith.mulf %712, %710 : vector<8x16xf32>
    %714 = arith.addf %681, %713 : vector<8x16xf32>
    %c72 = arith.constant 72 : index
    %715 = memref.load %arg3[%c72] : memref<408xf32, #tpu.memory_space<smem>>
    %716 = vector.broadcast %715 : f32 to vector<8x16xf32>
    %717 = arith.mulf %716, %710 : vector<8x16xf32>
    %718 = arith.addf %685, %717 : vector<8x16xf32>
    %c123 = arith.constant 123 : index
    %719 = memref.load %arg3[%c123] : memref<408xf32, #tpu.memory_space<smem>>
    %720 = vector.broadcast %719 : f32 to vector<8x16xf32>
    %721 = arith.mulf %720, %710 : vector<8x16xf32>
    %722 = arith.addf %689, %721 : vector<8x16xf32>
    %c174 = arith.constant 174 : index
    %723 = memref.load %arg3[%c174] : memref<408xf32, #tpu.memory_space<smem>>
    %724 = vector.broadcast %723 : f32 to vector<8x16xf32>
    %725 = arith.mulf %724, %710 : vector<8x16xf32>
    %726 = arith.addf %693, %725 : vector<8x16xf32>
    %c225 = arith.constant 225 : index
    %727 = memref.load %arg3[%c225] : memref<408xf32, #tpu.memory_space<smem>>
    %728 = vector.broadcast %727 : f32 to vector<8x16xf32>
    %729 = arith.mulf %728, %710 : vector<8x16xf32>
    %730 = arith.addf %697, %729 : vector<8x16xf32>
    %c276 = arith.constant 276 : index
    %731 = memref.load %arg3[%c276] : memref<408xf32, #tpu.memory_space<smem>>
    %732 = vector.broadcast %731 : f32 to vector<8x16xf32>
    %733 = arith.mulf %732, %710 : vector<8x16xf32>
    %734 = arith.addf %701, %733 : vector<8x16xf32>
    %c327 = arith.constant 327 : index
    %735 = memref.load %arg3[%c327] : memref<408xf32, #tpu.memory_space<smem>>
    %736 = vector.broadcast %735 : f32 to vector<8x16xf32>
    %737 = arith.mulf %736, %710 : vector<8x16xf32>
    %738 = arith.addf %705, %737 : vector<8x16xf32>
    %c378 = arith.constant 378 : index
    %739 = memref.load %arg3[%c378] : memref<408xf32, #tpu.memory_space<smem>>
    %740 = vector.broadcast %739 : f32 to vector<8x16xf32>
    %741 = arith.mulf %740, %710 : vector<8x16xf32>
    %742 = arith.addf %709, %741 : vector<8x16xf32>
    %743 = vector.extract_strided_slice %577 {offsets = [1, 3], sizes = [8, 16], strides = [1, 1]} : vector<16x20xf32> to vector<8x16xf32>
    %c22 = arith.constant 22 : index
    %744 = memref.load %arg3[%c22] : memref<408xf32, #tpu.memory_space<smem>>
    %745 = vector.broadcast %744 : f32 to vector<8x16xf32>
    %746 = arith.mulf %745, %743 : vector<8x16xf32>
    %747 = arith.addf %714, %746 : vector<8x16xf32>
    %c73 = arith.constant 73 : index
    %748 = memref.load %arg3[%c73] : memref<408xf32, #tpu.memory_space<smem>>
    %749 = vector.broadcast %748 : f32 to vector<8x16xf32>
    %750 = arith.mulf %749, %743 : vector<8x16xf32>
    %751 = arith.addf %718, %750 : vector<8x16xf32>
    %c124 = arith.constant 124 : index
    %752 = memref.load %arg3[%c124] : memref<408xf32, #tpu.memory_space<smem>>
    %753 = vector.broadcast %752 : f32 to vector<8x16xf32>
    %754 = arith.mulf %753, %743 : vector<8x16xf32>
    %755 = arith.addf %722, %754 : vector<8x16xf32>
    %c175 = arith.constant 175 : index
    %756 = memref.load %arg3[%c175] : memref<408xf32, #tpu.memory_space<smem>>
    %757 = vector.broadcast %756 : f32 to vector<8x16xf32>
    %758 = arith.mulf %757, %743 : vector<8x16xf32>
    %759 = arith.addf %726, %758 : vector<8x16xf32>
    %c226 = arith.constant 226 : index
    %760 = memref.load %arg3[%c226] : memref<408xf32, #tpu.memory_space<smem>>
    %761 = vector.broadcast %760 : f32 to vector<8x16xf32>
    %762 = arith.mulf %761, %743 : vector<8x16xf32>
    %763 = arith.addf %730, %762 : vector<8x16xf32>
    %c277 = arith.constant 277 : index
    %764 = memref.load %arg3[%c277] : memref<408xf32, #tpu.memory_space<smem>>
    %765 = vector.broadcast %764 : f32 to vector<8x16xf32>
    %766 = arith.mulf %765, %743 : vector<8x16xf32>
    %767 = arith.addf %734, %766 : vector<8x16xf32>
    %c328 = arith.constant 328 : index
    %768 = memref.load %arg3[%c328] : memref<408xf32, #tpu.memory_space<smem>>
    %769 = vector.broadcast %768 : f32 to vector<8x16xf32>
    %770 = arith.mulf %769, %743 : vector<8x16xf32>
    %771 = arith.addf %738, %770 : vector<8x16xf32>
    %c379 = arith.constant 379 : index
    %772 = memref.load %arg3[%c379] : memref<408xf32, #tpu.memory_space<smem>>
    %773 = vector.broadcast %772 : f32 to vector<8x16xf32>
    %774 = arith.mulf %773, %743 : vector<8x16xf32>
    %775 = arith.addf %742, %774 : vector<8x16xf32>
    %776 = vector.extract_strided_slice %577 {offsets = [2, 0], sizes = [8, 16], strides = [1, 1]} : vector<16x20xf32> to vector<8x16xf32>
    %c23 = arith.constant 23 : index
    %777 = memref.load %arg3[%c23] : memref<408xf32, #tpu.memory_space<smem>>
    %778 = vector.broadcast %777 : f32 to vector<8x16xf32>
    %779 = arith.mulf %778, %776 : vector<8x16xf32>
    %780 = arith.addf %747, %779 : vector<8x16xf32>
    %c74 = arith.constant 74 : index
    %781 = memref.load %arg3[%c74] : memref<408xf32, #tpu.memory_space<smem>>
    %782 = vector.broadcast %781 : f32 to vector<8x16xf32>
    %783 = arith.mulf %782, %776 : vector<8x16xf32>
    %784 = arith.addf %751, %783 : vector<8x16xf32>
    %c125 = arith.constant 125 : index
    %785 = memref.load %arg3[%c125] : memref<408xf32, #tpu.memory_space<smem>>
    %786 = vector.broadcast %785 : f32 to vector<8x16xf32>
    %787 = arith.mulf %786, %776 : vector<8x16xf32>
    %788 = arith.addf %755, %787 : vector<8x16xf32>
    %c176 = arith.constant 176 : index
    %789 = memref.load %arg3[%c176] : memref<408xf32, #tpu.memory_space<smem>>
    %790 = vector.broadcast %789 : f32 to vector<8x16xf32>
    %791 = arith.mulf %790, %776 : vector<8x16xf32>
    %792 = arith.addf %759, %791 : vector<8x16xf32>
    %c227 = arith.constant 227 : index
    %793 = memref.load %arg3[%c227] : memref<408xf32, #tpu.memory_space<smem>>
    %794 = vector.broadcast %793 : f32 to vector<8x16xf32>
    %795 = arith.mulf %794, %776 : vector<8x16xf32>
    %796 = arith.addf %763, %795 : vector<8x16xf32>
    %c278 = arith.constant 278 : index
    %797 = memref.load %arg3[%c278] : memref<408xf32, #tpu.memory_space<smem>>
    %798 = vector.broadcast %797 : f32 to vector<8x16xf32>
    %799 = arith.mulf %798, %776 : vector<8x16xf32>
    %800 = arith.addf %767, %799 : vector<8x16xf32>
    %c329 = arith.constant 329 : index
    %801 = memref.load %arg3[%c329] : memref<408xf32, #tpu.memory_space<smem>>
    %802 = vector.broadcast %801 : f32 to vector<8x16xf32>
    %803 = arith.mulf %802, %776 : vector<8x16xf32>
    %804 = arith.addf %771, %803 : vector<8x16xf32>
    %c380 = arith.constant 380 : index
    %805 = memref.load %arg3[%c380] : memref<408xf32, #tpu.memory_space<smem>>
    %806 = vector.broadcast %805 : f32 to vector<8x16xf32>
    %807 = arith.mulf %806, %776 : vector<8x16xf32>
    %808 = arith.addf %775, %807 : vector<8x16xf32>
    %809 = vector.extract_strided_slice %577 {offsets = [2, 1], sizes = [8, 16], strides = [1, 1]} : vector<16x20xf32> to vector<8x16xf32>
    %c24 = arith.constant 24 : index
    %810 = memref.load %arg3[%c24] : memref<408xf32, #tpu.memory_space<smem>>
    %811 = vector.broadcast %810 : f32 to vector<8x16xf32>
    %812 = arith.mulf %811, %809 : vector<8x16xf32>
    %813 = arith.addf %780, %812 : vector<8x16xf32>
    %c75 = arith.constant 75 : index
    %814 = memref.load %arg3[%c75] : memref<408xf32, #tpu.memory_space<smem>>
    %815 = vector.broadcast %814 : f32 to vector<8x16xf32>
    %816 = arith.mulf %815, %809 : vector<8x16xf32>
    %817 = arith.addf %784, %816 : vector<8x16xf32>
    %c126 = arith.constant 126 : index
    %818 = memref.load %arg3[%c126] : memref<408xf32, #tpu.memory_space<smem>>
    %819 = vector.broadcast %818 : f32 to vector<8x16xf32>
    %820 = arith.mulf %819, %809 : vector<8x16xf32>
    %821 = arith.addf %788, %820 : vector<8x16xf32>
    %c177 = arith.constant 177 : index
    %822 = memref.load %arg3[%c177] : memref<408xf32, #tpu.memory_space<smem>>
    %823 = vector.broadcast %822 : f32 to vector<8x16xf32>
    %824 = arith.mulf %823, %809 : vector<8x16xf32>
    %825 = arith.addf %792, %824 : vector<8x16xf32>
    %c228 = arith.constant 228 : index
    %826 = memref.load %arg3[%c228] : memref<408xf32, #tpu.memory_space<smem>>
    %827 = vector.broadcast %826 : f32 to vector<8x16xf32>
    %828 = arith.mulf %827, %809 : vector<8x16xf32>
    %829 = arith.addf %796, %828 : vector<8x16xf32>
    %c279 = arith.constant 279 : index
    %830 = memref.load %arg3[%c279] : memref<408xf32, #tpu.memory_space<smem>>
    %831 = vector.broadcast %830 : f32 to vector<8x16xf32>
    %832 = arith.mulf %831, %809 : vector<8x16xf32>
    %833 = arith.addf %800, %832 : vector<8x16xf32>
    %c330 = arith.constant 330 : index
    %834 = memref.load %arg3[%c330] : memref<408xf32, #tpu.memory_space<smem>>
    %835 = vector.broadcast %834 : f32 to vector<8x16xf32>
    %836 = arith.mulf %835, %809 : vector<8x16xf32>
    %837 = arith.addf %804, %836 : vector<8x16xf32>
    %c381 = arith.constant 381 : index
    %838 = memref.load %arg3[%c381] : memref<408xf32, #tpu.memory_space<smem>>
    %839 = vector.broadcast %838 : f32 to vector<8x16xf32>
    %840 = arith.mulf %839, %809 : vector<8x16xf32>
    %841 = arith.addf %808, %840 : vector<8x16xf32>
    %842 = vector.extract_strided_slice %577 {offsets = [2, 2], sizes = [8, 16], strides = [1, 1]} : vector<16x20xf32> to vector<8x16xf32>
    %c25 = arith.constant 25 : index
    %843 = memref.load %arg3[%c25] : memref<408xf32, #tpu.memory_space<smem>>
    %844 = vector.broadcast %843 : f32 to vector<8x16xf32>
    %845 = arith.mulf %844, %842 : vector<8x16xf32>
    %846 = arith.addf %813, %845 : vector<8x16xf32>
    %c76 = arith.constant 76 : index
    %847 = memref.load %arg3[%c76] : memref<408xf32, #tpu.memory_space<smem>>
    %848 = vector.broadcast %847 : f32 to vector<8x16xf32>
    %849 = arith.mulf %848, %842 : vector<8x16xf32>
    %850 = arith.addf %817, %849 : vector<8x16xf32>
    %c127 = arith.constant 127 : index
    %851 = memref.load %arg3[%c127] : memref<408xf32, #tpu.memory_space<smem>>
    %852 = vector.broadcast %851 : f32 to vector<8x16xf32>
    %853 = arith.mulf %852, %842 : vector<8x16xf32>
    %854 = arith.addf %821, %853 : vector<8x16xf32>
    %c178 = arith.constant 178 : index
    %855 = memref.load %arg3[%c178] : memref<408xf32, #tpu.memory_space<smem>>
    %856 = vector.broadcast %855 : f32 to vector<8x16xf32>
    %857 = arith.mulf %856, %842 : vector<8x16xf32>
    %858 = arith.addf %825, %857 : vector<8x16xf32>
    %c229 = arith.constant 229 : index
    %859 = memref.load %arg3[%c229] : memref<408xf32, #tpu.memory_space<smem>>
    %860 = vector.broadcast %859 : f32 to vector<8x16xf32>
    %861 = arith.mulf %860, %842 : vector<8x16xf32>
    %862 = arith.addf %829, %861 : vector<8x16xf32>
    %c280 = arith.constant 280 : index
    %863 = memref.load %arg3[%c280] : memref<408xf32, #tpu.memory_space<smem>>
    %864 = vector.broadcast %863 : f32 to vector<8x16xf32>
    %865 = arith.mulf %864, %842 : vector<8x16xf32>
    %866 = arith.addf %833, %865 : vector<8x16xf32>
    %c331 = arith.constant 331 : index
    %867 = memref.load %arg3[%c331] : memref<408xf32, #tpu.memory_space<smem>>
    %868 = vector.broadcast %867 : f32 to vector<8x16xf32>
    %869 = arith.mulf %868, %842 : vector<8x16xf32>
    %870 = arith.addf %837, %869 : vector<8x16xf32>
    %c382 = arith.constant 382 : index
    %871 = memref.load %arg3[%c382] : memref<408xf32, #tpu.memory_space<smem>>
    %872 = vector.broadcast %871 : f32 to vector<8x16xf32>
    %873 = arith.mulf %872, %842 : vector<8x16xf32>
    %874 = arith.addf %841, %873 : vector<8x16xf32>
    %875 = vector.extract_strided_slice %577 {offsets = [2, 3], sizes = [8, 16], strides = [1, 1]} : vector<16x20xf32> to vector<8x16xf32>
    %c26 = arith.constant 26 : index
    %876 = memref.load %arg3[%c26] : memref<408xf32, #tpu.memory_space<smem>>
    %877 = vector.broadcast %876 : f32 to vector<8x16xf32>
    %878 = arith.mulf %877, %875 : vector<8x16xf32>
    %879 = arith.addf %846, %878 : vector<8x16xf32>
    %c77 = arith.constant 77 : index
    %880 = memref.load %arg3[%c77] : memref<408xf32, #tpu.memory_space<smem>>
    %881 = vector.broadcast %880 : f32 to vector<8x16xf32>
    %882 = arith.mulf %881, %875 : vector<8x16xf32>
    %883 = arith.addf %850, %882 : vector<8x16xf32>
    %c128 = arith.constant 128 : index
    %884 = memref.load %arg3[%c128] : memref<408xf32, #tpu.memory_space<smem>>
    %885 = vector.broadcast %884 : f32 to vector<8x16xf32>
    %886 = arith.mulf %885, %875 : vector<8x16xf32>
    %887 = arith.addf %854, %886 : vector<8x16xf32>
    %c179 = arith.constant 179 : index
    %888 = memref.load %arg3[%c179] : memref<408xf32, #tpu.memory_space<smem>>
    %889 = vector.broadcast %888 : f32 to vector<8x16xf32>
    %890 = arith.mulf %889, %875 : vector<8x16xf32>
    %891 = arith.addf %858, %890 : vector<8x16xf32>
    %c230 = arith.constant 230 : index
    %892 = memref.load %arg3[%c230] : memref<408xf32, #tpu.memory_space<smem>>
    %893 = vector.broadcast %892 : f32 to vector<8x16xf32>
    %894 = arith.mulf %893, %875 : vector<8x16xf32>
    %895 = arith.addf %862, %894 : vector<8x16xf32>
    %c281 = arith.constant 281 : index
    %896 = memref.load %arg3[%c281] : memref<408xf32, #tpu.memory_space<smem>>
    %897 = vector.broadcast %896 : f32 to vector<8x16xf32>
    %898 = arith.mulf %897, %875 : vector<8x16xf32>
    %899 = arith.addf %866, %898 : vector<8x16xf32>
    %c332 = arith.constant 332 : index
    %900 = memref.load %arg3[%c332] : memref<408xf32, #tpu.memory_space<smem>>
    %901 = vector.broadcast %900 : f32 to vector<8x16xf32>
    %902 = arith.mulf %901, %875 : vector<8x16xf32>
    %903 = arith.addf %870, %902 : vector<8x16xf32>
    %c383 = arith.constant 383 : index
    %904 = memref.load %arg3[%c383] : memref<408xf32, #tpu.memory_space<smem>>
    %905 = vector.broadcast %904 : f32 to vector<8x16xf32>
    %906 = arith.mulf %905, %875 : vector<8x16xf32>
    %907 = arith.addf %874, %906 : vector<8x16xf32>
    %908 = vector.extract_strided_slice %577 {offsets = [2, 4], sizes = [8, 16], strides = [1, 1]} : vector<16x20xf32> to vector<8x16xf32>
    %c27 = arith.constant 27 : index
    %909 = memref.load %arg3[%c27] : memref<408xf32, #tpu.memory_space<smem>>
    %910 = vector.broadcast %909 : f32 to vector<8x16xf32>
    %911 = arith.mulf %910, %908 : vector<8x16xf32>
    %912 = arith.addf %879, %911 : vector<8x16xf32>
    %c78 = arith.constant 78 : index
    %913 = memref.load %arg3[%c78] : memref<408xf32, #tpu.memory_space<smem>>
    %914 = vector.broadcast %913 : f32 to vector<8x16xf32>
    %915 = arith.mulf %914, %908 : vector<8x16xf32>
    %916 = arith.addf %883, %915 : vector<8x16xf32>
    %c129 = arith.constant 129 : index
    %917 = memref.load %arg3[%c129] : memref<408xf32, #tpu.memory_space<smem>>
    %918 = vector.broadcast %917 : f32 to vector<8x16xf32>
    %919 = arith.mulf %918, %908 : vector<8x16xf32>
    %920 = arith.addf %887, %919 : vector<8x16xf32>
    %c180 = arith.constant 180 : index
    %921 = memref.load %arg3[%c180] : memref<408xf32, #tpu.memory_space<smem>>
    %922 = vector.broadcast %921 : f32 to vector<8x16xf32>
    %923 = arith.mulf %922, %908 : vector<8x16xf32>
    %924 = arith.addf %891, %923 : vector<8x16xf32>
    %c231 = arith.constant 231 : index
    %925 = memref.load %arg3[%c231] : memref<408xf32, #tpu.memory_space<smem>>
    %926 = vector.broadcast %925 : f32 to vector<8x16xf32>
    %927 = arith.mulf %926, %908 : vector<8x16xf32>
    %928 = arith.addf %895, %927 : vector<8x16xf32>
    %c282 = arith.constant 282 : index
    %929 = memref.load %arg3[%c282] : memref<408xf32, #tpu.memory_space<smem>>
    %930 = vector.broadcast %929 : f32 to vector<8x16xf32>
    %931 = arith.mulf %930, %908 : vector<8x16xf32>
    %932 = arith.addf %899, %931 : vector<8x16xf32>
    %c333 = arith.constant 333 : index
    %933 = memref.load %arg3[%c333] : memref<408xf32, #tpu.memory_space<smem>>
    %934 = vector.broadcast %933 : f32 to vector<8x16xf32>
    %935 = arith.mulf %934, %908 : vector<8x16xf32>
    %936 = arith.addf %903, %935 : vector<8x16xf32>
    %c384 = arith.constant 384 : index
    %937 = memref.load %arg3[%c384] : memref<408xf32, #tpu.memory_space<smem>>
    %938 = vector.broadcast %937 : f32 to vector<8x16xf32>
    %939 = arith.mulf %938, %908 : vector<8x16xf32>
    %940 = arith.addf %907, %939 : vector<8x16xf32>
    %941 = vector.extract_strided_slice %577 {offsets = [3, 1], sizes = [8, 16], strides = [1, 1]} : vector<16x20xf32> to vector<8x16xf32>
    %c28 = arith.constant 28 : index
    %942 = memref.load %arg3[%c28] : memref<408xf32, #tpu.memory_space<smem>>
    %943 = vector.broadcast %942 : f32 to vector<8x16xf32>
    %944 = arith.mulf %943, %941 : vector<8x16xf32>
    %945 = arith.addf %912, %944 : vector<8x16xf32>
    %c79 = arith.constant 79 : index
    %946 = memref.load %arg3[%c79] : memref<408xf32, #tpu.memory_space<smem>>
    %947 = vector.broadcast %946 : f32 to vector<8x16xf32>
    %948 = arith.mulf %947, %941 : vector<8x16xf32>
    %949 = arith.addf %916, %948 : vector<8x16xf32>
    %c130 = arith.constant 130 : index
    %950 = memref.load %arg3[%c130] : memref<408xf32, #tpu.memory_space<smem>>
    %951 = vector.broadcast %950 : f32 to vector<8x16xf32>
    %952 = arith.mulf %951, %941 : vector<8x16xf32>
    %953 = arith.addf %920, %952 : vector<8x16xf32>
    %c181 = arith.constant 181 : index
    %954 = memref.load %arg3[%c181] : memref<408xf32, #tpu.memory_space<smem>>
    %955 = vector.broadcast %954 : f32 to vector<8x16xf32>
    %956 = arith.mulf %955, %941 : vector<8x16xf32>
    %957 = arith.addf %924, %956 : vector<8x16xf32>
    %c232 = arith.constant 232 : index
    %958 = memref.load %arg3[%c232] : memref<408xf32, #tpu.memory_space<smem>>
    %959 = vector.broadcast %958 : f32 to vector<8x16xf32>
    %960 = arith.mulf %959, %941 : vector<8x16xf32>
    %961 = arith.addf %928, %960 : vector<8x16xf32>
    %c283 = arith.constant 283 : index
    %962 = memref.load %arg3[%c283] : memref<408xf32, #tpu.memory_space<smem>>
    %963 = vector.broadcast %962 : f32 to vector<8x16xf32>
    %964 = arith.mulf %963, %941 : vector<8x16xf32>
    %965 = arith.addf %932, %964 : vector<8x16xf32>
    %c334 = arith.constant 334 : index
    %966 = memref.load %arg3[%c334] : memref<408xf32, #tpu.memory_space<smem>>
    %967 = vector.broadcast %966 : f32 to vector<8x16xf32>
    %968 = arith.mulf %967, %941 : vector<8x16xf32>
    %969 = arith.addf %936, %968 : vector<8x16xf32>
    %c385 = arith.constant 385 : index
    %970 = memref.load %arg3[%c385] : memref<408xf32, #tpu.memory_space<smem>>
    %971 = vector.broadcast %970 : f32 to vector<8x16xf32>
    %972 = arith.mulf %971, %941 : vector<8x16xf32>
    %973 = arith.addf %940, %972 : vector<8x16xf32>
    %974 = vector.extract_strided_slice %577 {offsets = [3, 2], sizes = [8, 16], strides = [1, 1]} : vector<16x20xf32> to vector<8x16xf32>
    %c29 = arith.constant 29 : index
    %975 = memref.load %arg3[%c29] : memref<408xf32, #tpu.memory_space<smem>>
    %976 = vector.broadcast %975 : f32 to vector<8x16xf32>
    %977 = arith.mulf %976, %974 : vector<8x16xf32>
    %978 = arith.addf %945, %977 : vector<8x16xf32>
    %c80 = arith.constant 80 : index
    %979 = memref.load %arg3[%c80] : memref<408xf32, #tpu.memory_space<smem>>
    %980 = vector.broadcast %979 : f32 to vector<8x16xf32>
    %981 = arith.mulf %980, %974 : vector<8x16xf32>
    %982 = arith.addf %949, %981 : vector<8x16xf32>
    %c131 = arith.constant 131 : index
    %983 = memref.load %arg3[%c131] : memref<408xf32, #tpu.memory_space<smem>>
    %984 = vector.broadcast %983 : f32 to vector<8x16xf32>
    %985 = arith.mulf %984, %974 : vector<8x16xf32>
    %986 = arith.addf %953, %985 : vector<8x16xf32>
    %c182 = arith.constant 182 : index
    %987 = memref.load %arg3[%c182] : memref<408xf32, #tpu.memory_space<smem>>
    %988 = vector.broadcast %987 : f32 to vector<8x16xf32>
    %989 = arith.mulf %988, %974 : vector<8x16xf32>
    %990 = arith.addf %957, %989 : vector<8x16xf32>
    %c233 = arith.constant 233 : index
    %991 = memref.load %arg3[%c233] : memref<408xf32, #tpu.memory_space<smem>>
    %992 = vector.broadcast %991 : f32 to vector<8x16xf32>
    %993 = arith.mulf %992, %974 : vector<8x16xf32>
    %994 = arith.addf %961, %993 : vector<8x16xf32>
    %c284 = arith.constant 284 : index
    %995 = memref.load %arg3[%c284] : memref<408xf32, #tpu.memory_space<smem>>
    %996 = vector.broadcast %995 : f32 to vector<8x16xf32>
    %997 = arith.mulf %996, %974 : vector<8x16xf32>
    %998 = arith.addf %965, %997 : vector<8x16xf32>
    %c335 = arith.constant 335 : index
    %999 = memref.load %arg3[%c335] : memref<408xf32, #tpu.memory_space<smem>>
    %1000 = vector.broadcast %999 : f32 to vector<8x16xf32>
    %1001 = arith.mulf %1000, %974 : vector<8x16xf32>
    %1002 = arith.addf %969, %1001 : vector<8x16xf32>
    %c386 = arith.constant 386 : index
    %1003 = memref.load %arg3[%c386] : memref<408xf32, #tpu.memory_space<smem>>
    %1004 = vector.broadcast %1003 : f32 to vector<8x16xf32>
    %1005 = arith.mulf %1004, %974 : vector<8x16xf32>
    %1006 = arith.addf %973, %1005 : vector<8x16xf32>
    %1007 = vector.extract_strided_slice %577 {offsets = [3, 3], sizes = [8, 16], strides = [1, 1]} : vector<16x20xf32> to vector<8x16xf32>
    %c30 = arith.constant 30 : index
    %1008 = memref.load %arg3[%c30] : memref<408xf32, #tpu.memory_space<smem>>
    %1009 = vector.broadcast %1008 : f32 to vector<8x16xf32>
    %1010 = arith.mulf %1009, %1007 : vector<8x16xf32>
    %1011 = arith.addf %978, %1010 : vector<8x16xf32>
    %c81 = arith.constant 81 : index
    %1012 = memref.load %arg3[%c81] : memref<408xf32, #tpu.memory_space<smem>>
    %1013 = vector.broadcast %1012 : f32 to vector<8x16xf32>
    %1014 = arith.mulf %1013, %1007 : vector<8x16xf32>
    %1015 = arith.addf %982, %1014 : vector<8x16xf32>
    %c132 = arith.constant 132 : index
    %1016 = memref.load %arg3[%c132] : memref<408xf32, #tpu.memory_space<smem>>
    %1017 = vector.broadcast %1016 : f32 to vector<8x16xf32>
    %1018 = arith.mulf %1017, %1007 : vector<8x16xf32>
    %1019 = arith.addf %986, %1018 : vector<8x16xf32>
    %c183 = arith.constant 183 : index
    %1020 = memref.load %arg3[%c183] : memref<408xf32, #tpu.memory_space<smem>>
    %1021 = vector.broadcast %1020 : f32 to vector<8x16xf32>
    %1022 = arith.mulf %1021, %1007 : vector<8x16xf32>
    %1023 = arith.addf %990, %1022 : vector<8x16xf32>
    %c234 = arith.constant 234 : index
    %1024 = memref.load %arg3[%c234] : memref<408xf32, #tpu.memory_space<smem>>
    %1025 = vector.broadcast %1024 : f32 to vector<8x16xf32>
    %1026 = arith.mulf %1025, %1007 : vector<8x16xf32>
    %1027 = arith.addf %994, %1026 : vector<8x16xf32>
    %c285 = arith.constant 285 : index
    %1028 = memref.load %arg3[%c285] : memref<408xf32, #tpu.memory_space<smem>>
    %1029 = vector.broadcast %1028 : f32 to vector<8x16xf32>
    %1030 = arith.mulf %1029, %1007 : vector<8x16xf32>
    %1031 = arith.addf %998, %1030 : vector<8x16xf32>
    %c336 = arith.constant 336 : index
    %1032 = memref.load %arg3[%c336] : memref<408xf32, #tpu.memory_space<smem>>
    %1033 = vector.broadcast %1032 : f32 to vector<8x16xf32>
    %1034 = arith.mulf %1033, %1007 : vector<8x16xf32>
    %1035 = arith.addf %1002, %1034 : vector<8x16xf32>
    %c387 = arith.constant 387 : index
    %1036 = memref.load %arg3[%c387] : memref<408xf32, #tpu.memory_space<smem>>
    %1037 = vector.broadcast %1036 : f32 to vector<8x16xf32>
    %1038 = arith.mulf %1037, %1007 : vector<8x16xf32>
    %1039 = arith.addf %1006, %1038 : vector<8x16xf32>
    %1040 = vector.extract_strided_slice %577 {offsets = [4, 0], sizes = [8, 16], strides = [1, 1]} : vector<16x20xf32> to vector<8x16xf32>
    %c31 = arith.constant 31 : index
    %1041 = memref.load %arg3[%c31] : memref<408xf32, #tpu.memory_space<smem>>
    %1042 = vector.broadcast %1041 : f32 to vector<8x16xf32>
    %1043 = arith.mulf %1042, %1040 : vector<8x16xf32>
    %1044 = arith.addf %1011, %1043 : vector<8x16xf32>
    %c82 = arith.constant 82 : index
    %1045 = memref.load %arg3[%c82] : memref<408xf32, #tpu.memory_space<smem>>
    %1046 = vector.broadcast %1045 : f32 to vector<8x16xf32>
    %1047 = arith.mulf %1046, %1040 : vector<8x16xf32>
    %1048 = arith.addf %1015, %1047 : vector<8x16xf32>
    %c133 = arith.constant 133 : index
    %1049 = memref.load %arg3[%c133] : memref<408xf32, #tpu.memory_space<smem>>
    %1050 = vector.broadcast %1049 : f32 to vector<8x16xf32>
    %1051 = arith.mulf %1050, %1040 : vector<8x16xf32>
    %1052 = arith.addf %1019, %1051 : vector<8x16xf32>
    %c184 = arith.constant 184 : index
    %1053 = memref.load %arg3[%c184] : memref<408xf32, #tpu.memory_space<smem>>
    %1054 = vector.broadcast %1053 : f32 to vector<8x16xf32>
    %1055 = arith.mulf %1054, %1040 : vector<8x16xf32>
    %1056 = arith.addf %1023, %1055 : vector<8x16xf32>
    %c235 = arith.constant 235 : index
    %1057 = memref.load %arg3[%c235] : memref<408xf32, #tpu.memory_space<smem>>
    %1058 = vector.broadcast %1057 : f32 to vector<8x16xf32>
    %1059 = arith.mulf %1058, %1040 : vector<8x16xf32>
    %1060 = arith.addf %1027, %1059 : vector<8x16xf32>
    %c286 = arith.constant 286 : index
    %1061 = memref.load %arg3[%c286] : memref<408xf32, #tpu.memory_space<smem>>
    %1062 = vector.broadcast %1061 : f32 to vector<8x16xf32>
    %1063 = arith.mulf %1062, %1040 : vector<8x16xf32>
    %1064 = arith.addf %1031, %1063 : vector<8x16xf32>
    %c337 = arith.constant 337 : index
    %1065 = memref.load %arg3[%c337] : memref<408xf32, #tpu.memory_space<smem>>
    %1066 = vector.broadcast %1065 : f32 to vector<8x16xf32>
    %1067 = arith.mulf %1066, %1040 : vector<8x16xf32>
    %1068 = arith.addf %1035, %1067 : vector<8x16xf32>
    %c388 = arith.constant 388 : index
    %1069 = memref.load %arg3[%c388] : memref<408xf32, #tpu.memory_space<smem>>
    %1070 = vector.broadcast %1069 : f32 to vector<8x16xf32>
    %1071 = arith.mulf %1070, %1040 : vector<8x16xf32>
    %1072 = arith.addf %1039, %1071 : vector<8x16xf32>
    %1073 = vector.extract_strided_slice %577 {offsets = [4, 2], sizes = [8, 16], strides = [1, 1]} : vector<16x20xf32> to vector<8x16xf32>
    %c32 = arith.constant 32 : index
    %1074 = memref.load %arg3[%c32] : memref<408xf32, #tpu.memory_space<smem>>
    %1075 = vector.broadcast %1074 : f32 to vector<8x16xf32>
    %1076 = arith.mulf %1075, %1073 : vector<8x16xf32>
    %1077 = arith.addf %1044, %1076 : vector<8x16xf32>
    %c83 = arith.constant 83 : index
    %1078 = memref.load %arg3[%c83] : memref<408xf32, #tpu.memory_space<smem>>
    %1079 = vector.broadcast %1078 : f32 to vector<8x16xf32>
    %1080 = arith.mulf %1079, %1073 : vector<8x16xf32>
    %1081 = arith.addf %1048, %1080 : vector<8x16xf32>
    %c134 = arith.constant 134 : index
    %1082 = memref.load %arg3[%c134] : memref<408xf32, #tpu.memory_space<smem>>
    %1083 = vector.broadcast %1082 : f32 to vector<8x16xf32>
    %1084 = arith.mulf %1083, %1073 : vector<8x16xf32>
    %1085 = arith.addf %1052, %1084 : vector<8x16xf32>
    %c185 = arith.constant 185 : index
    %1086 = memref.load %arg3[%c185] : memref<408xf32, #tpu.memory_space<smem>>
    %1087 = vector.broadcast %1086 : f32 to vector<8x16xf32>
    %1088 = arith.mulf %1087, %1073 : vector<8x16xf32>
    %1089 = arith.addf %1056, %1088 : vector<8x16xf32>
    %c236 = arith.constant 236 : index
    %1090 = memref.load %arg3[%c236] : memref<408xf32, #tpu.memory_space<smem>>
    %1091 = vector.broadcast %1090 : f32 to vector<8x16xf32>
    %1092 = arith.mulf %1091, %1073 : vector<8x16xf32>
    %1093 = arith.addf %1060, %1092 : vector<8x16xf32>
    %c287 = arith.constant 287 : index
    %1094 = memref.load %arg3[%c287] : memref<408xf32, #tpu.memory_space<smem>>
    %1095 = vector.broadcast %1094 : f32 to vector<8x16xf32>
    %1096 = arith.mulf %1095, %1073 : vector<8x16xf32>
    %1097 = arith.addf %1064, %1096 : vector<8x16xf32>
    %c338 = arith.constant 338 : index
    %1098 = memref.load %arg3[%c338] : memref<408xf32, #tpu.memory_space<smem>>
    %1099 = vector.broadcast %1098 : f32 to vector<8x16xf32>
    %1100 = arith.mulf %1099, %1073 : vector<8x16xf32>
    %1101 = arith.addf %1068, %1100 : vector<8x16xf32>
    %c389 = arith.constant 389 : index
    %1102 = memref.load %arg3[%c389] : memref<408xf32, #tpu.memory_space<smem>>
    %1103 = vector.broadcast %1102 : f32 to vector<8x16xf32>
    %1104 = arith.mulf %1103, %1073 : vector<8x16xf32>
    %1105 = arith.addf %1072, %1104 : vector<8x16xf32>
    %1106 = vector.extract_strided_slice %577 {offsets = [4, 4], sizes = [8, 16], strides = [1, 1]} : vector<16x20xf32> to vector<8x16xf32>
    %c33 = arith.constant 33 : index
    %1107 = memref.load %arg3[%c33] : memref<408xf32, #tpu.memory_space<smem>>
    %1108 = vector.broadcast %1107 : f32 to vector<8x16xf32>
    %1109 = arith.mulf %1108, %1106 : vector<8x16xf32>
    %1110 = arith.addf %1077, %1109 : vector<8x16xf32>
    %c84 = arith.constant 84 : index
    %1111 = memref.load %arg3[%c84] : memref<408xf32, #tpu.memory_space<smem>>
    %1112 = vector.broadcast %1111 : f32 to vector<8x16xf32>
    %1113 = arith.mulf %1112, %1106 : vector<8x16xf32>
    %1114 = arith.addf %1081, %1113 : vector<8x16xf32>
    %c135 = arith.constant 135 : index
    %1115 = memref.load %arg3[%c135] : memref<408xf32, #tpu.memory_space<smem>>
    %1116 = vector.broadcast %1115 : f32 to vector<8x16xf32>
    %1117 = arith.mulf %1116, %1106 : vector<8x16xf32>
    %1118 = arith.addf %1085, %1117 : vector<8x16xf32>
    %c186 = arith.constant 186 : index
    %1119 = memref.load %arg3[%c186] : memref<408xf32, #tpu.memory_space<smem>>
    %1120 = vector.broadcast %1119 : f32 to vector<8x16xf32>
    %1121 = arith.mulf %1120, %1106 : vector<8x16xf32>
    %1122 = arith.addf %1089, %1121 : vector<8x16xf32>
    %c237 = arith.constant 237 : index
    %1123 = memref.load %arg3[%c237] : memref<408xf32, #tpu.memory_space<smem>>
    %1124 = vector.broadcast %1123 : f32 to vector<8x16xf32>
    %1125 = arith.mulf %1124, %1106 : vector<8x16xf32>
    %1126 = arith.addf %1093, %1125 : vector<8x16xf32>
    %c288 = arith.constant 288 : index
    %1127 = memref.load %arg3[%c288] : memref<408xf32, #tpu.memory_space<smem>>
    %1128 = vector.broadcast %1127 : f32 to vector<8x16xf32>
    %1129 = arith.mulf %1128, %1106 : vector<8x16xf32>
    %1130 = arith.addf %1097, %1129 : vector<8x16xf32>
    %c339 = arith.constant 339 : index
    %1131 = memref.load %arg3[%c339] : memref<408xf32, #tpu.memory_space<smem>>
    %1132 = vector.broadcast %1131 : f32 to vector<8x16xf32>
    %1133 = arith.mulf %1132, %1106 : vector<8x16xf32>
    %1134 = arith.addf %1101, %1133 : vector<8x16xf32>
    %c390 = arith.constant 390 : index
    %1135 = memref.load %arg3[%c390] : memref<408xf32, #tpu.memory_space<smem>>
    %1136 = vector.broadcast %1135 : f32 to vector<8x16xf32>
    %1137 = arith.mulf %1136, %1106 : vector<8x16xf32>
    %1138 = arith.addf %1105, %1137 : vector<8x16xf32>
    %c2_28 = arith.constant 2 : index
    %1139 = arith.index_cast %1 : i32 to index
    %c0_29 = arith.constant 0 : index
    %1140 = vector.load %arg6[%c2_28, %1139, %c0_29] : memref<3x24x20xf32, #tpu.memory_space<vmem>>, vector<1x16x20xf32>
    %1141 = vector.shape_cast %1140 : vector<1x16x20xf32> to vector<16x20xf32>
    %1142 = vector.extract_strided_slice %1141 {offsets = [0, 0], sizes = [8, 16], strides = [1, 1]} : vector<16x20xf32> to vector<8x16xf32>
    %c34 = arith.constant 34 : index
    %1143 = memref.load %arg3[%c34] : memref<408xf32, #tpu.memory_space<smem>>
    %1144 = vector.broadcast %1143 : f32 to vector<8x16xf32>
    %1145 = arith.mulf %1144, %1142 : vector<8x16xf32>
    %1146 = arith.addf %1110, %1145 : vector<8x16xf32>
    %c85 = arith.constant 85 : index
    %1147 = memref.load %arg3[%c85] : memref<408xf32, #tpu.memory_space<smem>>
    %1148 = vector.broadcast %1147 : f32 to vector<8x16xf32>
    %1149 = arith.mulf %1148, %1142 : vector<8x16xf32>
    %1150 = arith.addf %1114, %1149 : vector<8x16xf32>
    %c136 = arith.constant 136 : index
    %1151 = memref.load %arg3[%c136] : memref<408xf32, #tpu.memory_space<smem>>
    %1152 = vector.broadcast %1151 : f32 to vector<8x16xf32>
    %1153 = arith.mulf %1152, %1142 : vector<8x16xf32>
    %1154 = arith.addf %1118, %1153 : vector<8x16xf32>
    %c187 = arith.constant 187 : index
    %1155 = memref.load %arg3[%c187] : memref<408xf32, #tpu.memory_space<smem>>
    %1156 = vector.broadcast %1155 : f32 to vector<8x16xf32>
    %1157 = arith.mulf %1156, %1142 : vector<8x16xf32>
    %1158 = arith.addf %1122, %1157 : vector<8x16xf32>
    %c238 = arith.constant 238 : index
    %1159 = memref.load %arg3[%c238] : memref<408xf32, #tpu.memory_space<smem>>
    %1160 = vector.broadcast %1159 : f32 to vector<8x16xf32>
    %1161 = arith.mulf %1160, %1142 : vector<8x16xf32>
    %1162 = arith.addf %1126, %1161 : vector<8x16xf32>
    %c289 = arith.constant 289 : index
    %1163 = memref.load %arg3[%c289] : memref<408xf32, #tpu.memory_space<smem>>
    %1164 = vector.broadcast %1163 : f32 to vector<8x16xf32>
    %1165 = arith.mulf %1164, %1142 : vector<8x16xf32>
    %1166 = arith.addf %1130, %1165 : vector<8x16xf32>
    %c340 = arith.constant 340 : index
    %1167 = memref.load %arg3[%c340] : memref<408xf32, #tpu.memory_space<smem>>
    %1168 = vector.broadcast %1167 : f32 to vector<8x16xf32>
    %1169 = arith.mulf %1168, %1142 : vector<8x16xf32>
    %1170 = arith.addf %1134, %1169 : vector<8x16xf32>
    %c391 = arith.constant 391 : index
    %1171 = memref.load %arg3[%c391] : memref<408xf32, #tpu.memory_space<smem>>
    %1172 = vector.broadcast %1171 : f32 to vector<8x16xf32>
    %1173 = arith.mulf %1172, %1142 : vector<8x16xf32>
    %1174 = arith.addf %1138, %1173 : vector<8x16xf32>
    %1175 = vector.extract_strided_slice %1141 {offsets = [0, 2], sizes = [8, 16], strides = [1, 1]} : vector<16x20xf32> to vector<8x16xf32>
    %c35 = arith.constant 35 : index
    %1176 = memref.load %arg3[%c35] : memref<408xf32, #tpu.memory_space<smem>>
    %1177 = vector.broadcast %1176 : f32 to vector<8x16xf32>
    %1178 = arith.mulf %1177, %1175 : vector<8x16xf32>
    %1179 = arith.addf %1146, %1178 : vector<8x16xf32>
    %c86 = arith.constant 86 : index
    %1180 = memref.load %arg3[%c86] : memref<408xf32, #tpu.memory_space<smem>>
    %1181 = vector.broadcast %1180 : f32 to vector<8x16xf32>
    %1182 = arith.mulf %1181, %1175 : vector<8x16xf32>
    %1183 = arith.addf %1150, %1182 : vector<8x16xf32>
    %c137 = arith.constant 137 : index
    %1184 = memref.load %arg3[%c137] : memref<408xf32, #tpu.memory_space<smem>>
    %1185 = vector.broadcast %1184 : f32 to vector<8x16xf32>
    %1186 = arith.mulf %1185, %1175 : vector<8x16xf32>
    %1187 = arith.addf %1154, %1186 : vector<8x16xf32>
    %c188 = arith.constant 188 : index
    %1188 = memref.load %arg3[%c188] : memref<408xf32, #tpu.memory_space<smem>>
    %1189 = vector.broadcast %1188 : f32 to vector<8x16xf32>
    %1190 = arith.mulf %1189, %1175 : vector<8x16xf32>
    %1191 = arith.addf %1158, %1190 : vector<8x16xf32>
    %c239 = arith.constant 239 : index
    %1192 = memref.load %arg3[%c239] : memref<408xf32, #tpu.memory_space<smem>>
    %1193 = vector.broadcast %1192 : f32 to vector<8x16xf32>
    %1194 = arith.mulf %1193, %1175 : vector<8x16xf32>
    %1195 = arith.addf %1162, %1194 : vector<8x16xf32>
    %c290 = arith.constant 290 : index
    %1196 = memref.load %arg3[%c290] : memref<408xf32, #tpu.memory_space<smem>>
    %1197 = vector.broadcast %1196 : f32 to vector<8x16xf32>
    %1198 = arith.mulf %1197, %1175 : vector<8x16xf32>
    %1199 = arith.addf %1166, %1198 : vector<8x16xf32>
    %c341 = arith.constant 341 : index
    %1200 = memref.load %arg3[%c341] : memref<408xf32, #tpu.memory_space<smem>>
    %1201 = vector.broadcast %1200 : f32 to vector<8x16xf32>
    %1202 = arith.mulf %1201, %1175 : vector<8x16xf32>
    %1203 = arith.addf %1170, %1202 : vector<8x16xf32>
    %c392 = arith.constant 392 : index
    %1204 = memref.load %arg3[%c392] : memref<408xf32, #tpu.memory_space<smem>>
    %1205 = vector.broadcast %1204 : f32 to vector<8x16xf32>
    %1206 = arith.mulf %1205, %1175 : vector<8x16xf32>
    %1207 = arith.addf %1174, %1206 : vector<8x16xf32>
    %1208 = vector.extract_strided_slice %1141 {offsets = [0, 4], sizes = [8, 16], strides = [1, 1]} : vector<16x20xf32> to vector<8x16xf32>
    %c36 = arith.constant 36 : index
    %1209 = memref.load %arg3[%c36] : memref<408xf32, #tpu.memory_space<smem>>
    %1210 = vector.broadcast %1209 : f32 to vector<8x16xf32>
    %1211 = arith.mulf %1210, %1208 : vector<8x16xf32>
    %1212 = arith.addf %1179, %1211 : vector<8x16xf32>
    %c87 = arith.constant 87 : index
    %1213 = memref.load %arg3[%c87] : memref<408xf32, #tpu.memory_space<smem>>
    %1214 = vector.broadcast %1213 : f32 to vector<8x16xf32>
    %1215 = arith.mulf %1214, %1208 : vector<8x16xf32>
    %1216 = arith.addf %1183, %1215 : vector<8x16xf32>
    %c138 = arith.constant 138 : index
    %1217 = memref.load %arg3[%c138] : memref<408xf32, #tpu.memory_space<smem>>
    %1218 = vector.broadcast %1217 : f32 to vector<8x16xf32>
    %1219 = arith.mulf %1218, %1208 : vector<8x16xf32>
    %1220 = arith.addf %1187, %1219 : vector<8x16xf32>
    %c189 = arith.constant 189 : index
    %1221 = memref.load %arg3[%c189] : memref<408xf32, #tpu.memory_space<smem>>
    %1222 = vector.broadcast %1221 : f32 to vector<8x16xf32>
    %1223 = arith.mulf %1222, %1208 : vector<8x16xf32>
    %1224 = arith.addf %1191, %1223 : vector<8x16xf32>
    %c240 = arith.constant 240 : index
    %1225 = memref.load %arg3[%c240] : memref<408xf32, #tpu.memory_space<smem>>
    %1226 = vector.broadcast %1225 : f32 to vector<8x16xf32>
    %1227 = arith.mulf %1226, %1208 : vector<8x16xf32>
    %1228 = arith.addf %1195, %1227 : vector<8x16xf32>
    %c291 = arith.constant 291 : index
    %1229 = memref.load %arg3[%c291] : memref<408xf32, #tpu.memory_space<smem>>
    %1230 = vector.broadcast %1229 : f32 to vector<8x16xf32>
    %1231 = arith.mulf %1230, %1208 : vector<8x16xf32>
    %1232 = arith.addf %1199, %1231 : vector<8x16xf32>
    %c342 = arith.constant 342 : index
    %1233 = memref.load %arg3[%c342] : memref<408xf32, #tpu.memory_space<smem>>
    %1234 = vector.broadcast %1233 : f32 to vector<8x16xf32>
    %1235 = arith.mulf %1234, %1208 : vector<8x16xf32>
    %1236 = arith.addf %1203, %1235 : vector<8x16xf32>
    %c393 = arith.constant 393 : index
    %1237 = memref.load %arg3[%c393] : memref<408xf32, #tpu.memory_space<smem>>
    %1238 = vector.broadcast %1237 : f32 to vector<8x16xf32>
    %1239 = arith.mulf %1238, %1208 : vector<8x16xf32>
    %1240 = arith.addf %1207, %1239 : vector<8x16xf32>
    %1241 = vector.extract_strided_slice %1141 {offsets = [1, 1], sizes = [8, 16], strides = [1, 1]} : vector<16x20xf32> to vector<8x16xf32>
    %c37 = arith.constant 37 : index
    %1242 = memref.load %arg3[%c37] : memref<408xf32, #tpu.memory_space<smem>>
    %1243 = vector.broadcast %1242 : f32 to vector<8x16xf32>
    %1244 = arith.mulf %1243, %1241 : vector<8x16xf32>
    %1245 = arith.addf %1212, %1244 : vector<8x16xf32>
    %c88 = arith.constant 88 : index
    %1246 = memref.load %arg3[%c88] : memref<408xf32, #tpu.memory_space<smem>>
    %1247 = vector.broadcast %1246 : f32 to vector<8x16xf32>
    %1248 = arith.mulf %1247, %1241 : vector<8x16xf32>
    %1249 = arith.addf %1216, %1248 : vector<8x16xf32>
    %c139 = arith.constant 139 : index
    %1250 = memref.load %arg3[%c139] : memref<408xf32, #tpu.memory_space<smem>>
    %1251 = vector.broadcast %1250 : f32 to vector<8x16xf32>
    %1252 = arith.mulf %1251, %1241 : vector<8x16xf32>
    %1253 = arith.addf %1220, %1252 : vector<8x16xf32>
    %c190 = arith.constant 190 : index
    %1254 = memref.load %arg3[%c190] : memref<408xf32, #tpu.memory_space<smem>>
    %1255 = vector.broadcast %1254 : f32 to vector<8x16xf32>
    %1256 = arith.mulf %1255, %1241 : vector<8x16xf32>
    %1257 = arith.addf %1224, %1256 : vector<8x16xf32>
    %c241 = arith.constant 241 : index
    %1258 = memref.load %arg3[%c241] : memref<408xf32, #tpu.memory_space<smem>>
    %1259 = vector.broadcast %1258 : f32 to vector<8x16xf32>
    %1260 = arith.mulf %1259, %1241 : vector<8x16xf32>
    %1261 = arith.addf %1228, %1260 : vector<8x16xf32>
    %c292 = arith.constant 292 : index
    %1262 = memref.load %arg3[%c292] : memref<408xf32, #tpu.memory_space<smem>>
    %1263 = vector.broadcast %1262 : f32 to vector<8x16xf32>
    %1264 = arith.mulf %1263, %1241 : vector<8x16xf32>
    %1265 = arith.addf %1232, %1264 : vector<8x16xf32>
    %c343 = arith.constant 343 : index
    %1266 = memref.load %arg3[%c343] : memref<408xf32, #tpu.memory_space<smem>>
    %1267 = vector.broadcast %1266 : f32 to vector<8x16xf32>
    %1268 = arith.mulf %1267, %1241 : vector<8x16xf32>
    %1269 = arith.addf %1236, %1268 : vector<8x16xf32>
    %c394 = arith.constant 394 : index
    %1270 = memref.load %arg3[%c394] : memref<408xf32, #tpu.memory_space<smem>>
    %1271 = vector.broadcast %1270 : f32 to vector<8x16xf32>
    %1272 = arith.mulf %1271, %1241 : vector<8x16xf32>
    %1273 = arith.addf %1240, %1272 : vector<8x16xf32>
    %1274 = vector.extract_strided_slice %1141 {offsets = [1, 2], sizes = [8, 16], strides = [1, 1]} : vector<16x20xf32> to vector<8x16xf32>
    %c38 = arith.constant 38 : index
    %1275 = memref.load %arg3[%c38] : memref<408xf32, #tpu.memory_space<smem>>
    %1276 = vector.broadcast %1275 : f32 to vector<8x16xf32>
    %1277 = arith.mulf %1276, %1274 : vector<8x16xf32>
    %1278 = arith.addf %1245, %1277 : vector<8x16xf32>
    %c89 = arith.constant 89 : index
    %1279 = memref.load %arg3[%c89] : memref<408xf32, #tpu.memory_space<smem>>
    %1280 = vector.broadcast %1279 : f32 to vector<8x16xf32>
    %1281 = arith.mulf %1280, %1274 : vector<8x16xf32>
    %1282 = arith.addf %1249, %1281 : vector<8x16xf32>
    %c140 = arith.constant 140 : index
    %1283 = memref.load %arg3[%c140] : memref<408xf32, #tpu.memory_space<smem>>
    %1284 = vector.broadcast %1283 : f32 to vector<8x16xf32>
    %1285 = arith.mulf %1284, %1274 : vector<8x16xf32>
    %1286 = arith.addf %1253, %1285 : vector<8x16xf32>
    %c191 = arith.constant 191 : index
    %1287 = memref.load %arg3[%c191] : memref<408xf32, #tpu.memory_space<smem>>
    %1288 = vector.broadcast %1287 : f32 to vector<8x16xf32>
    %1289 = arith.mulf %1288, %1274 : vector<8x16xf32>
    %1290 = arith.addf %1257, %1289 : vector<8x16xf32>
    %c242 = arith.constant 242 : index
    %1291 = memref.load %arg3[%c242] : memref<408xf32, #tpu.memory_space<smem>>
    %1292 = vector.broadcast %1291 : f32 to vector<8x16xf32>
    %1293 = arith.mulf %1292, %1274 : vector<8x16xf32>
    %1294 = arith.addf %1261, %1293 : vector<8x16xf32>
    %c293 = arith.constant 293 : index
    %1295 = memref.load %arg3[%c293] : memref<408xf32, #tpu.memory_space<smem>>
    %1296 = vector.broadcast %1295 : f32 to vector<8x16xf32>
    %1297 = arith.mulf %1296, %1274 : vector<8x16xf32>
    %1298 = arith.addf %1265, %1297 : vector<8x16xf32>
    %c344 = arith.constant 344 : index
    %1299 = memref.load %arg3[%c344] : memref<408xf32, #tpu.memory_space<smem>>
    %1300 = vector.broadcast %1299 : f32 to vector<8x16xf32>
    %1301 = arith.mulf %1300, %1274 : vector<8x16xf32>
    %1302 = arith.addf %1269, %1301 : vector<8x16xf32>
    %c395 = arith.constant 395 : index
    %1303 = memref.load %arg3[%c395] : memref<408xf32, #tpu.memory_space<smem>>
    %1304 = vector.broadcast %1303 : f32 to vector<8x16xf32>
    %1305 = arith.mulf %1304, %1274 : vector<8x16xf32>
    %1306 = arith.addf %1273, %1305 : vector<8x16xf32>
    %1307 = vector.extract_strided_slice %1141 {offsets = [1, 3], sizes = [8, 16], strides = [1, 1]} : vector<16x20xf32> to vector<8x16xf32>
    %c39 = arith.constant 39 : index
    %1308 = memref.load %arg3[%c39] : memref<408xf32, #tpu.memory_space<smem>>
    %1309 = vector.broadcast %1308 : f32 to vector<8x16xf32>
    %1310 = arith.mulf %1309, %1307 : vector<8x16xf32>
    %1311 = arith.addf %1278, %1310 : vector<8x16xf32>
    %c90 = arith.constant 90 : index
    %1312 = memref.load %arg3[%c90] : memref<408xf32, #tpu.memory_space<smem>>
    %1313 = vector.broadcast %1312 : f32 to vector<8x16xf32>
    %1314 = arith.mulf %1313, %1307 : vector<8x16xf32>
    %1315 = arith.addf %1282, %1314 : vector<8x16xf32>
    %c141 = arith.constant 141 : index
    %1316 = memref.load %arg3[%c141] : memref<408xf32, #tpu.memory_space<smem>>
    %1317 = vector.broadcast %1316 : f32 to vector<8x16xf32>
    %1318 = arith.mulf %1317, %1307 : vector<8x16xf32>
    %1319 = arith.addf %1286, %1318 : vector<8x16xf32>
    %c192 = arith.constant 192 : index
    %1320 = memref.load %arg3[%c192] : memref<408xf32, #tpu.memory_space<smem>>
    %1321 = vector.broadcast %1320 : f32 to vector<8x16xf32>
    %1322 = arith.mulf %1321, %1307 : vector<8x16xf32>
    %1323 = arith.addf %1290, %1322 : vector<8x16xf32>
    %c243 = arith.constant 243 : index
    %1324 = memref.load %arg3[%c243] : memref<408xf32, #tpu.memory_space<smem>>
    %1325 = vector.broadcast %1324 : f32 to vector<8x16xf32>
    %1326 = arith.mulf %1325, %1307 : vector<8x16xf32>
    %1327 = arith.addf %1294, %1326 : vector<8x16xf32>
    %c294 = arith.constant 294 : index
    %1328 = memref.load %arg3[%c294] : memref<408xf32, #tpu.memory_space<smem>>
    %1329 = vector.broadcast %1328 : f32 to vector<8x16xf32>
    %1330 = arith.mulf %1329, %1307 : vector<8x16xf32>
    %1331 = arith.addf %1298, %1330 : vector<8x16xf32>
    %c345 = arith.constant 345 : index
    %1332 = memref.load %arg3[%c345] : memref<408xf32, #tpu.memory_space<smem>>
    %1333 = vector.broadcast %1332 : f32 to vector<8x16xf32>
    %1334 = arith.mulf %1333, %1307 : vector<8x16xf32>
    %1335 = arith.addf %1302, %1334 : vector<8x16xf32>
    %c396 = arith.constant 396 : index
    %1336 = memref.load %arg3[%c396] : memref<408xf32, #tpu.memory_space<smem>>
    %1337 = vector.broadcast %1336 : f32 to vector<8x16xf32>
    %1338 = arith.mulf %1337, %1307 : vector<8x16xf32>
    %1339 = arith.addf %1306, %1338 : vector<8x16xf32>
    %1340 = vector.extract_strided_slice %1141 {offsets = [2, 0], sizes = [8, 16], strides = [1, 1]} : vector<16x20xf32> to vector<8x16xf32>
    %c40 = arith.constant 40 : index
    %1341 = memref.load %arg3[%c40] : memref<408xf32, #tpu.memory_space<smem>>
    %1342 = vector.broadcast %1341 : f32 to vector<8x16xf32>
    %1343 = arith.mulf %1342, %1340 : vector<8x16xf32>
    %1344 = arith.addf %1311, %1343 : vector<8x16xf32>
    %c91 = arith.constant 91 : index
    %1345 = memref.load %arg3[%c91] : memref<408xf32, #tpu.memory_space<smem>>
    %1346 = vector.broadcast %1345 : f32 to vector<8x16xf32>
    %1347 = arith.mulf %1346, %1340 : vector<8x16xf32>
    %1348 = arith.addf %1315, %1347 : vector<8x16xf32>
    %c142 = arith.constant 142 : index
    %1349 = memref.load %arg3[%c142] : memref<408xf32, #tpu.memory_space<smem>>
    %1350 = vector.broadcast %1349 : f32 to vector<8x16xf32>
    %1351 = arith.mulf %1350, %1340 : vector<8x16xf32>
    %1352 = arith.addf %1319, %1351 : vector<8x16xf32>
    %c193 = arith.constant 193 : index
    %1353 = memref.load %arg3[%c193] : memref<408xf32, #tpu.memory_space<smem>>
    %1354 = vector.broadcast %1353 : f32 to vector<8x16xf32>
    %1355 = arith.mulf %1354, %1340 : vector<8x16xf32>
    %1356 = arith.addf %1323, %1355 : vector<8x16xf32>
    %c244 = arith.constant 244 : index
    %1357 = memref.load %arg3[%c244] : memref<408xf32, #tpu.memory_space<smem>>
    %1358 = vector.broadcast %1357 : f32 to vector<8x16xf32>
    %1359 = arith.mulf %1358, %1340 : vector<8x16xf32>
    %1360 = arith.addf %1327, %1359 : vector<8x16xf32>
    %c295 = arith.constant 295 : index
    %1361 = memref.load %arg3[%c295] : memref<408xf32, #tpu.memory_space<smem>>
    %1362 = vector.broadcast %1361 : f32 to vector<8x16xf32>
    %1363 = arith.mulf %1362, %1340 : vector<8x16xf32>
    %1364 = arith.addf %1331, %1363 : vector<8x16xf32>
    %c346 = arith.constant 346 : index
    %1365 = memref.load %arg3[%c346] : memref<408xf32, #tpu.memory_space<smem>>
    %1366 = vector.broadcast %1365 : f32 to vector<8x16xf32>
    %1367 = arith.mulf %1366, %1340 : vector<8x16xf32>
    %1368 = arith.addf %1335, %1367 : vector<8x16xf32>
    %c397 = arith.constant 397 : index
    %1369 = memref.load %arg3[%c397] : memref<408xf32, #tpu.memory_space<smem>>
    %1370 = vector.broadcast %1369 : f32 to vector<8x16xf32>
    %1371 = arith.mulf %1370, %1340 : vector<8x16xf32>
    %1372 = arith.addf %1339, %1371 : vector<8x16xf32>
    %1373 = vector.extract_strided_slice %1141 {offsets = [2, 1], sizes = [8, 16], strides = [1, 1]} : vector<16x20xf32> to vector<8x16xf32>
    %c41 = arith.constant 41 : index
    %1374 = memref.load %arg3[%c41] : memref<408xf32, #tpu.memory_space<smem>>
    %1375 = vector.broadcast %1374 : f32 to vector<8x16xf32>
    %1376 = arith.mulf %1375, %1373 : vector<8x16xf32>
    %1377 = arith.addf %1344, %1376 : vector<8x16xf32>
    %c92 = arith.constant 92 : index
    %1378 = memref.load %arg3[%c92] : memref<408xf32, #tpu.memory_space<smem>>
    %1379 = vector.broadcast %1378 : f32 to vector<8x16xf32>
    %1380 = arith.mulf %1379, %1373 : vector<8x16xf32>
    %1381 = arith.addf %1348, %1380 : vector<8x16xf32>
    %c143 = arith.constant 143 : index
    %1382 = memref.load %arg3[%c143] : memref<408xf32, #tpu.memory_space<smem>>
    %1383 = vector.broadcast %1382 : f32 to vector<8x16xf32>
    %1384 = arith.mulf %1383, %1373 : vector<8x16xf32>
    %1385 = arith.addf %1352, %1384 : vector<8x16xf32>
    %c194 = arith.constant 194 : index
    %1386 = memref.load %arg3[%c194] : memref<408xf32, #tpu.memory_space<smem>>
    %1387 = vector.broadcast %1386 : f32 to vector<8x16xf32>
    %1388 = arith.mulf %1387, %1373 : vector<8x16xf32>
    %1389 = arith.addf %1356, %1388 : vector<8x16xf32>
    %c245 = arith.constant 245 : index
    %1390 = memref.load %arg3[%c245] : memref<408xf32, #tpu.memory_space<smem>>
    %1391 = vector.broadcast %1390 : f32 to vector<8x16xf32>
    %1392 = arith.mulf %1391, %1373 : vector<8x16xf32>
    %1393 = arith.addf %1360, %1392 : vector<8x16xf32>
    %c296 = arith.constant 296 : index
    %1394 = memref.load %arg3[%c296] : memref<408xf32, #tpu.memory_space<smem>>
    %1395 = vector.broadcast %1394 : f32 to vector<8x16xf32>
    %1396 = arith.mulf %1395, %1373 : vector<8x16xf32>
    %1397 = arith.addf %1364, %1396 : vector<8x16xf32>
    %c347 = arith.constant 347 : index
    %1398 = memref.load %arg3[%c347] : memref<408xf32, #tpu.memory_space<smem>>
    %1399 = vector.broadcast %1398 : f32 to vector<8x16xf32>
    %1400 = arith.mulf %1399, %1373 : vector<8x16xf32>
    %1401 = arith.addf %1368, %1400 : vector<8x16xf32>
    %c398 = arith.constant 398 : index
    %1402 = memref.load %arg3[%c398] : memref<408xf32, #tpu.memory_space<smem>>
    %1403 = vector.broadcast %1402 : f32 to vector<8x16xf32>
    %1404 = arith.mulf %1403, %1373 : vector<8x16xf32>
    %1405 = arith.addf %1372, %1404 : vector<8x16xf32>
    %1406 = vector.extract_strided_slice %1141 {offsets = [2, 2], sizes = [8, 16], strides = [1, 1]} : vector<16x20xf32> to vector<8x16xf32>
    %c42 = arith.constant 42 : index
    %1407 = memref.load %arg3[%c42] : memref<408xf32, #tpu.memory_space<smem>>
    %1408 = vector.broadcast %1407 : f32 to vector<8x16xf32>
    %1409 = arith.mulf %1408, %1406 : vector<8x16xf32>
    %1410 = arith.addf %1377, %1409 : vector<8x16xf32>
    %c93 = arith.constant 93 : index
    %1411 = memref.load %arg3[%c93] : memref<408xf32, #tpu.memory_space<smem>>
    %1412 = vector.broadcast %1411 : f32 to vector<8x16xf32>
    %1413 = arith.mulf %1412, %1406 : vector<8x16xf32>
    %1414 = arith.addf %1381, %1413 : vector<8x16xf32>
    %c144 = arith.constant 144 : index
    %1415 = memref.load %arg3[%c144] : memref<408xf32, #tpu.memory_space<smem>>
    %1416 = vector.broadcast %1415 : f32 to vector<8x16xf32>
    %1417 = arith.mulf %1416, %1406 : vector<8x16xf32>
    %1418 = arith.addf %1385, %1417 : vector<8x16xf32>
    %c195 = arith.constant 195 : index
    %1419 = memref.load %arg3[%c195] : memref<408xf32, #tpu.memory_space<smem>>
    %1420 = vector.broadcast %1419 : f32 to vector<8x16xf32>
    %1421 = arith.mulf %1420, %1406 : vector<8x16xf32>
    %1422 = arith.addf %1389, %1421 : vector<8x16xf32>
    %c246 = arith.constant 246 : index
    %1423 = memref.load %arg3[%c246] : memref<408xf32, #tpu.memory_space<smem>>
    %1424 = vector.broadcast %1423 : f32 to vector<8x16xf32>
    %1425 = arith.mulf %1424, %1406 : vector<8x16xf32>
    %1426 = arith.addf %1393, %1425 : vector<8x16xf32>
    %c297 = arith.constant 297 : index
    %1427 = memref.load %arg3[%c297] : memref<408xf32, #tpu.memory_space<smem>>
    %1428 = vector.broadcast %1427 : f32 to vector<8x16xf32>
    %1429 = arith.mulf %1428, %1406 : vector<8x16xf32>
    %1430 = arith.addf %1397, %1429 : vector<8x16xf32>
    %c348 = arith.constant 348 : index
    %1431 = memref.load %arg3[%c348] : memref<408xf32, #tpu.memory_space<smem>>
    %1432 = vector.broadcast %1431 : f32 to vector<8x16xf32>
    %1433 = arith.mulf %1432, %1406 : vector<8x16xf32>
    %1434 = arith.addf %1401, %1433 : vector<8x16xf32>
    %c399 = arith.constant 399 : index
    %1435 = memref.load %arg3[%c399] : memref<408xf32, #tpu.memory_space<smem>>
    %1436 = vector.broadcast %1435 : f32 to vector<8x16xf32>
    %1437 = arith.mulf %1436, %1406 : vector<8x16xf32>
    %1438 = arith.addf %1405, %1437 : vector<8x16xf32>
    %1439 = vector.extract_strided_slice %1141 {offsets = [2, 3], sizes = [8, 16], strides = [1, 1]} : vector<16x20xf32> to vector<8x16xf32>
    %c43 = arith.constant 43 : index
    %1440 = memref.load %arg3[%c43] : memref<408xf32, #tpu.memory_space<smem>>
    %1441 = vector.broadcast %1440 : f32 to vector<8x16xf32>
    %1442 = arith.mulf %1441, %1439 : vector<8x16xf32>
    %1443 = arith.addf %1410, %1442 : vector<8x16xf32>
    %c94 = arith.constant 94 : index
    %1444 = memref.load %arg3[%c94] : memref<408xf32, #tpu.memory_space<smem>>
    %1445 = vector.broadcast %1444 : f32 to vector<8x16xf32>
    %1446 = arith.mulf %1445, %1439 : vector<8x16xf32>
    %1447 = arith.addf %1414, %1446 : vector<8x16xf32>
    %c145 = arith.constant 145 : index
    %1448 = memref.load %arg3[%c145] : memref<408xf32, #tpu.memory_space<smem>>
    %1449 = vector.broadcast %1448 : f32 to vector<8x16xf32>
    %1450 = arith.mulf %1449, %1439 : vector<8x16xf32>
    %1451 = arith.addf %1418, %1450 : vector<8x16xf32>
    %c196 = arith.constant 196 : index
    %1452 = memref.load %arg3[%c196] : memref<408xf32, #tpu.memory_space<smem>>
    %1453 = vector.broadcast %1452 : f32 to vector<8x16xf32>
    %1454 = arith.mulf %1453, %1439 : vector<8x16xf32>
    %1455 = arith.addf %1422, %1454 : vector<8x16xf32>
    %c247 = arith.constant 247 : index
    %1456 = memref.load %arg3[%c247] : memref<408xf32, #tpu.memory_space<smem>>
    %1457 = vector.broadcast %1456 : f32 to vector<8x16xf32>
    %1458 = arith.mulf %1457, %1439 : vector<8x16xf32>
    %1459 = arith.addf %1426, %1458 : vector<8x16xf32>
    %c298 = arith.constant 298 : index
    %1460 = memref.load %arg3[%c298] : memref<408xf32, #tpu.memory_space<smem>>
    %1461 = vector.broadcast %1460 : f32 to vector<8x16xf32>
    %1462 = arith.mulf %1461, %1439 : vector<8x16xf32>
    %1463 = arith.addf %1430, %1462 : vector<8x16xf32>
    %c349 = arith.constant 349 : index
    %1464 = memref.load %arg3[%c349] : memref<408xf32, #tpu.memory_space<smem>>
    %1465 = vector.broadcast %1464 : f32 to vector<8x16xf32>
    %1466 = arith.mulf %1465, %1439 : vector<8x16xf32>
    %1467 = arith.addf %1434, %1466 : vector<8x16xf32>
    %c400 = arith.constant 400 : index
    %1468 = memref.load %arg3[%c400] : memref<408xf32, #tpu.memory_space<smem>>
    %1469 = vector.broadcast %1468 : f32 to vector<8x16xf32>
    %1470 = arith.mulf %1469, %1439 : vector<8x16xf32>
    %1471 = arith.addf %1438, %1470 : vector<8x16xf32>
    %1472 = vector.extract_strided_slice %1141 {offsets = [2, 4], sizes = [8, 16], strides = [1, 1]} : vector<16x20xf32> to vector<8x16xf32>
    %c44 = arith.constant 44 : index
    %1473 = memref.load %arg3[%c44] : memref<408xf32, #tpu.memory_space<smem>>
    %1474 = vector.broadcast %1473 : f32 to vector<8x16xf32>
    %1475 = arith.mulf %1474, %1472 : vector<8x16xf32>
    %1476 = arith.addf %1443, %1475 : vector<8x16xf32>
    %c95 = arith.constant 95 : index
    %1477 = memref.load %arg3[%c95] : memref<408xf32, #tpu.memory_space<smem>>
    %1478 = vector.broadcast %1477 : f32 to vector<8x16xf32>
    %1479 = arith.mulf %1478, %1472 : vector<8x16xf32>
    %1480 = arith.addf %1447, %1479 : vector<8x16xf32>
    %c146 = arith.constant 146 : index
    %1481 = memref.load %arg3[%c146] : memref<408xf32, #tpu.memory_space<smem>>
    %1482 = vector.broadcast %1481 : f32 to vector<8x16xf32>
    %1483 = arith.mulf %1482, %1472 : vector<8x16xf32>
    %1484 = arith.addf %1451, %1483 : vector<8x16xf32>
    %c197 = arith.constant 197 : index
    %1485 = memref.load %arg3[%c197] : memref<408xf32, #tpu.memory_space<smem>>
    %1486 = vector.broadcast %1485 : f32 to vector<8x16xf32>
    %1487 = arith.mulf %1486, %1472 : vector<8x16xf32>
    %1488 = arith.addf %1455, %1487 : vector<8x16xf32>
    %c248 = arith.constant 248 : index
    %1489 = memref.load %arg3[%c248] : memref<408xf32, #tpu.memory_space<smem>>
    %1490 = vector.broadcast %1489 : f32 to vector<8x16xf32>
    %1491 = arith.mulf %1490, %1472 : vector<8x16xf32>
    %1492 = arith.addf %1459, %1491 : vector<8x16xf32>
    %c299 = arith.constant 299 : index
    %1493 = memref.load %arg3[%c299] : memref<408xf32, #tpu.memory_space<smem>>
    %1494 = vector.broadcast %1493 : f32 to vector<8x16xf32>
    %1495 = arith.mulf %1494, %1472 : vector<8x16xf32>
    %1496 = arith.addf %1463, %1495 : vector<8x16xf32>
    %c350 = arith.constant 350 : index
    %1497 = memref.load %arg3[%c350] : memref<408xf32, #tpu.memory_space<smem>>
    %1498 = vector.broadcast %1497 : f32 to vector<8x16xf32>
    %1499 = arith.mulf %1498, %1472 : vector<8x16xf32>
    %1500 = arith.addf %1467, %1499 : vector<8x16xf32>
    %c401 = arith.constant 401 : index
    %1501 = memref.load %arg3[%c401] : memref<408xf32, #tpu.memory_space<smem>>
    %1502 = vector.broadcast %1501 : f32 to vector<8x16xf32>
    %1503 = arith.mulf %1502, %1472 : vector<8x16xf32>
    %1504 = arith.addf %1471, %1503 : vector<8x16xf32>
    %1505 = vector.extract_strided_slice %1141 {offsets = [3, 1], sizes = [8, 16], strides = [1, 1]} : vector<16x20xf32> to vector<8x16xf32>
    %c45 = arith.constant 45 : index
    %1506 = memref.load %arg3[%c45] : memref<408xf32, #tpu.memory_space<smem>>
    %1507 = vector.broadcast %1506 : f32 to vector<8x16xf32>
    %1508 = arith.mulf %1507, %1505 : vector<8x16xf32>
    %1509 = arith.addf %1476, %1508 : vector<8x16xf32>
    %c96 = arith.constant 96 : index
    %1510 = memref.load %arg3[%c96] : memref<408xf32, #tpu.memory_space<smem>>
    %1511 = vector.broadcast %1510 : f32 to vector<8x16xf32>
    %1512 = arith.mulf %1511, %1505 : vector<8x16xf32>
    %1513 = arith.addf %1480, %1512 : vector<8x16xf32>
    %c147 = arith.constant 147 : index
    %1514 = memref.load %arg3[%c147] : memref<408xf32, #tpu.memory_space<smem>>
    %1515 = vector.broadcast %1514 : f32 to vector<8x16xf32>
    %1516 = arith.mulf %1515, %1505 : vector<8x16xf32>
    %1517 = arith.addf %1484, %1516 : vector<8x16xf32>
    %c198 = arith.constant 198 : index
    %1518 = memref.load %arg3[%c198] : memref<408xf32, #tpu.memory_space<smem>>
    %1519 = vector.broadcast %1518 : f32 to vector<8x16xf32>
    %1520 = arith.mulf %1519, %1505 : vector<8x16xf32>
    %1521 = arith.addf %1488, %1520 : vector<8x16xf32>
    %c249 = arith.constant 249 : index
    %1522 = memref.load %arg3[%c249] : memref<408xf32, #tpu.memory_space<smem>>
    %1523 = vector.broadcast %1522 : f32 to vector<8x16xf32>
    %1524 = arith.mulf %1523, %1505 : vector<8x16xf32>
    %1525 = arith.addf %1492, %1524 : vector<8x16xf32>
    %c300 = arith.constant 300 : index
    %1526 = memref.load %arg3[%c300] : memref<408xf32, #tpu.memory_space<smem>>
    %1527 = vector.broadcast %1526 : f32 to vector<8x16xf32>
    %1528 = arith.mulf %1527, %1505 : vector<8x16xf32>
    %1529 = arith.addf %1496, %1528 : vector<8x16xf32>
    %c351 = arith.constant 351 : index
    %1530 = memref.load %arg3[%c351] : memref<408xf32, #tpu.memory_space<smem>>
    %1531 = vector.broadcast %1530 : f32 to vector<8x16xf32>
    %1532 = arith.mulf %1531, %1505 : vector<8x16xf32>
    %1533 = arith.addf %1500, %1532 : vector<8x16xf32>
    %c402 = arith.constant 402 : index
    %1534 = memref.load %arg3[%c402] : memref<408xf32, #tpu.memory_space<smem>>
    %1535 = vector.broadcast %1534 : f32 to vector<8x16xf32>
    %1536 = arith.mulf %1535, %1505 : vector<8x16xf32>
    %1537 = arith.addf %1504, %1536 : vector<8x16xf32>
    %1538 = vector.extract_strided_slice %1141 {offsets = [3, 2], sizes = [8, 16], strides = [1, 1]} : vector<16x20xf32> to vector<8x16xf32>
    %c46 = arith.constant 46 : index
    %1539 = memref.load %arg3[%c46] : memref<408xf32, #tpu.memory_space<smem>>
    %1540 = vector.broadcast %1539 : f32 to vector<8x16xf32>
    %1541 = arith.mulf %1540, %1538 : vector<8x16xf32>
    %1542 = arith.addf %1509, %1541 : vector<8x16xf32>
    %c97 = arith.constant 97 : index
    %1543 = memref.load %arg3[%c97] : memref<408xf32, #tpu.memory_space<smem>>
    %1544 = vector.broadcast %1543 : f32 to vector<8x16xf32>
    %1545 = arith.mulf %1544, %1538 : vector<8x16xf32>
    %1546 = arith.addf %1513, %1545 : vector<8x16xf32>
    %c148 = arith.constant 148 : index
    %1547 = memref.load %arg3[%c148] : memref<408xf32, #tpu.memory_space<smem>>
    %1548 = vector.broadcast %1547 : f32 to vector<8x16xf32>
    %1549 = arith.mulf %1548, %1538 : vector<8x16xf32>
    %1550 = arith.addf %1517, %1549 : vector<8x16xf32>
    %c199 = arith.constant 199 : index
    %1551 = memref.load %arg3[%c199] : memref<408xf32, #tpu.memory_space<smem>>
    %1552 = vector.broadcast %1551 : f32 to vector<8x16xf32>
    %1553 = arith.mulf %1552, %1538 : vector<8x16xf32>
    %1554 = arith.addf %1521, %1553 : vector<8x16xf32>
    %c250 = arith.constant 250 : index
    %1555 = memref.load %arg3[%c250] : memref<408xf32, #tpu.memory_space<smem>>
    %1556 = vector.broadcast %1555 : f32 to vector<8x16xf32>
    %1557 = arith.mulf %1556, %1538 : vector<8x16xf32>
    %1558 = arith.addf %1525, %1557 : vector<8x16xf32>
    %c301 = arith.constant 301 : index
    %1559 = memref.load %arg3[%c301] : memref<408xf32, #tpu.memory_space<smem>>
    %1560 = vector.broadcast %1559 : f32 to vector<8x16xf32>
    %1561 = arith.mulf %1560, %1538 : vector<8x16xf32>
    %1562 = arith.addf %1529, %1561 : vector<8x16xf32>
    %c352 = arith.constant 352 : index
    %1563 = memref.load %arg3[%c352] : memref<408xf32, #tpu.memory_space<smem>>
    %1564 = vector.broadcast %1563 : f32 to vector<8x16xf32>
    %1565 = arith.mulf %1564, %1538 : vector<8x16xf32>
    %1566 = arith.addf %1533, %1565 : vector<8x16xf32>
    %c403 = arith.constant 403 : index
    %1567 = memref.load %arg3[%c403] : memref<408xf32, #tpu.memory_space<smem>>
    %1568 = vector.broadcast %1567 : f32 to vector<8x16xf32>
    %1569 = arith.mulf %1568, %1538 : vector<8x16xf32>
    %1570 = arith.addf %1537, %1569 : vector<8x16xf32>
    %1571 = vector.extract_strided_slice %1141 {offsets = [3, 3], sizes = [8, 16], strides = [1, 1]} : vector<16x20xf32> to vector<8x16xf32>
    %c47 = arith.constant 47 : index
    %1572 = memref.load %arg3[%c47] : memref<408xf32, #tpu.memory_space<smem>>
    %1573 = vector.broadcast %1572 : f32 to vector<8x16xf32>
    %1574 = arith.mulf %1573, %1571 : vector<8x16xf32>
    %1575 = arith.addf %1542, %1574 : vector<8x16xf32>
    %c98 = arith.constant 98 : index
    %1576 = memref.load %arg3[%c98] : memref<408xf32, #tpu.memory_space<smem>>
    %1577 = vector.broadcast %1576 : f32 to vector<8x16xf32>
    %1578 = arith.mulf %1577, %1571 : vector<8x16xf32>
    %1579 = arith.addf %1546, %1578 : vector<8x16xf32>
    %c149 = arith.constant 149 : index
    %1580 = memref.load %arg3[%c149] : memref<408xf32, #tpu.memory_space<smem>>
    %1581 = vector.broadcast %1580 : f32 to vector<8x16xf32>
    %1582 = arith.mulf %1581, %1571 : vector<8x16xf32>
    %1583 = arith.addf %1550, %1582 : vector<8x16xf32>
    %c200 = arith.constant 200 : index
    %1584 = memref.load %arg3[%c200] : memref<408xf32, #tpu.memory_space<smem>>
    %1585 = vector.broadcast %1584 : f32 to vector<8x16xf32>
    %1586 = arith.mulf %1585, %1571 : vector<8x16xf32>
    %1587 = arith.addf %1554, %1586 : vector<8x16xf32>
    %c251 = arith.constant 251 : index
    %1588 = memref.load %arg3[%c251] : memref<408xf32, #tpu.memory_space<smem>>
    %1589 = vector.broadcast %1588 : f32 to vector<8x16xf32>
    %1590 = arith.mulf %1589, %1571 : vector<8x16xf32>
    %1591 = arith.addf %1558, %1590 : vector<8x16xf32>
    %c302 = arith.constant 302 : index
    %1592 = memref.load %arg3[%c302] : memref<408xf32, #tpu.memory_space<smem>>
    %1593 = vector.broadcast %1592 : f32 to vector<8x16xf32>
    %1594 = arith.mulf %1593, %1571 : vector<8x16xf32>
    %1595 = arith.addf %1562, %1594 : vector<8x16xf32>
    %c353 = arith.constant 353 : index
    %1596 = memref.load %arg3[%c353] : memref<408xf32, #tpu.memory_space<smem>>
    %1597 = vector.broadcast %1596 : f32 to vector<8x16xf32>
    %1598 = arith.mulf %1597, %1571 : vector<8x16xf32>
    %1599 = arith.addf %1566, %1598 : vector<8x16xf32>
    %c404 = arith.constant 404 : index
    %1600 = memref.load %arg3[%c404] : memref<408xf32, #tpu.memory_space<smem>>
    %1601 = vector.broadcast %1600 : f32 to vector<8x16xf32>
    %1602 = arith.mulf %1601, %1571 : vector<8x16xf32>
    %1603 = arith.addf %1570, %1602 : vector<8x16xf32>
    %1604 = vector.extract_strided_slice %1141 {offsets = [4, 0], sizes = [8, 16], strides = [1, 1]} : vector<16x20xf32> to vector<8x16xf32>
    %c48 = arith.constant 48 : index
    %1605 = memref.load %arg3[%c48] : memref<408xf32, #tpu.memory_space<smem>>
    %1606 = vector.broadcast %1605 : f32 to vector<8x16xf32>
    %1607 = arith.mulf %1606, %1604 : vector<8x16xf32>
    %1608 = arith.addf %1575, %1607 : vector<8x16xf32>
    %c99 = arith.constant 99 : index
    %1609 = memref.load %arg3[%c99] : memref<408xf32, #tpu.memory_space<smem>>
    %1610 = vector.broadcast %1609 : f32 to vector<8x16xf32>
    %1611 = arith.mulf %1610, %1604 : vector<8x16xf32>
    %1612 = arith.addf %1579, %1611 : vector<8x16xf32>
    %c150 = arith.constant 150 : index
    %1613 = memref.load %arg3[%c150] : memref<408xf32, #tpu.memory_space<smem>>
    %1614 = vector.broadcast %1613 : f32 to vector<8x16xf32>
    %1615 = arith.mulf %1614, %1604 : vector<8x16xf32>
    %1616 = arith.addf %1583, %1615 : vector<8x16xf32>
    %c201 = arith.constant 201 : index
    %1617 = memref.load %arg3[%c201] : memref<408xf32, #tpu.memory_space<smem>>
    %1618 = vector.broadcast %1617 : f32 to vector<8x16xf32>
    %1619 = arith.mulf %1618, %1604 : vector<8x16xf32>
    %1620 = arith.addf %1587, %1619 : vector<8x16xf32>
    %c252 = arith.constant 252 : index
    %1621 = memref.load %arg3[%c252] : memref<408xf32, #tpu.memory_space<smem>>
    %1622 = vector.broadcast %1621 : f32 to vector<8x16xf32>
    %1623 = arith.mulf %1622, %1604 : vector<8x16xf32>
    %1624 = arith.addf %1591, %1623 : vector<8x16xf32>
    %c303 = arith.constant 303 : index
    %1625 = memref.load %arg3[%c303] : memref<408xf32, #tpu.memory_space<smem>>
    %1626 = vector.broadcast %1625 : f32 to vector<8x16xf32>
    %1627 = arith.mulf %1626, %1604 : vector<8x16xf32>
    %1628 = arith.addf %1595, %1627 : vector<8x16xf32>
    %c354 = arith.constant 354 : index
    %1629 = memref.load %arg3[%c354] : memref<408xf32, #tpu.memory_space<smem>>
    %1630 = vector.broadcast %1629 : f32 to vector<8x16xf32>
    %1631 = arith.mulf %1630, %1604 : vector<8x16xf32>
    %1632 = arith.addf %1599, %1631 : vector<8x16xf32>
    %c405 = arith.constant 405 : index
    %1633 = memref.load %arg3[%c405] : memref<408xf32, #tpu.memory_space<smem>>
    %1634 = vector.broadcast %1633 : f32 to vector<8x16xf32>
    %1635 = arith.mulf %1634, %1604 : vector<8x16xf32>
    %1636 = arith.addf %1603, %1635 : vector<8x16xf32>
    %1637 = vector.extract_strided_slice %1141 {offsets = [4, 2], sizes = [8, 16], strides = [1, 1]} : vector<16x20xf32> to vector<8x16xf32>
    %c49 = arith.constant 49 : index
    %1638 = memref.load %arg3[%c49] : memref<408xf32, #tpu.memory_space<smem>>
    %1639 = vector.broadcast %1638 : f32 to vector<8x16xf32>
    %1640 = arith.mulf %1639, %1637 : vector<8x16xf32>
    %1641 = arith.addf %1608, %1640 : vector<8x16xf32>
    %c100 = arith.constant 100 : index
    %1642 = memref.load %arg3[%c100] : memref<408xf32, #tpu.memory_space<smem>>
    %1643 = vector.broadcast %1642 : f32 to vector<8x16xf32>
    %1644 = arith.mulf %1643, %1637 : vector<8x16xf32>
    %1645 = arith.addf %1612, %1644 : vector<8x16xf32>
    %c151 = arith.constant 151 : index
    %1646 = memref.load %arg3[%c151] : memref<408xf32, #tpu.memory_space<smem>>
    %1647 = vector.broadcast %1646 : f32 to vector<8x16xf32>
    %1648 = arith.mulf %1647, %1637 : vector<8x16xf32>
    %1649 = arith.addf %1616, %1648 : vector<8x16xf32>
    %c202 = arith.constant 202 : index
    %1650 = memref.load %arg3[%c202] : memref<408xf32, #tpu.memory_space<smem>>
    %1651 = vector.broadcast %1650 : f32 to vector<8x16xf32>
    %1652 = arith.mulf %1651, %1637 : vector<8x16xf32>
    %1653 = arith.addf %1620, %1652 : vector<8x16xf32>
    %c253 = arith.constant 253 : index
    %1654 = memref.load %arg3[%c253] : memref<408xf32, #tpu.memory_space<smem>>
    %1655 = vector.broadcast %1654 : f32 to vector<8x16xf32>
    %1656 = arith.mulf %1655, %1637 : vector<8x16xf32>
    %1657 = arith.addf %1624, %1656 : vector<8x16xf32>
    %c304 = arith.constant 304 : index
    %1658 = memref.load %arg3[%c304] : memref<408xf32, #tpu.memory_space<smem>>
    %1659 = vector.broadcast %1658 : f32 to vector<8x16xf32>
    %1660 = arith.mulf %1659, %1637 : vector<8x16xf32>
    %1661 = arith.addf %1628, %1660 : vector<8x16xf32>
    %c355 = arith.constant 355 : index
    %1662 = memref.load %arg3[%c355] : memref<408xf32, #tpu.memory_space<smem>>
    %1663 = vector.broadcast %1662 : f32 to vector<8x16xf32>
    %1664 = arith.mulf %1663, %1637 : vector<8x16xf32>
    %1665 = arith.addf %1632, %1664 : vector<8x16xf32>
    %c406 = arith.constant 406 : index
    %1666 = memref.load %arg3[%c406] : memref<408xf32, #tpu.memory_space<smem>>
    %1667 = vector.broadcast %1666 : f32 to vector<8x16xf32>
    %1668 = arith.mulf %1667, %1637 : vector<8x16xf32>
    %1669 = arith.addf %1636, %1668 : vector<8x16xf32>
    %1670 = vector.extract_strided_slice %1141 {offsets = [4, 4], sizes = [8, 16], strides = [1, 1]} : vector<16x20xf32> to vector<8x16xf32>
    %c50 = arith.constant 50 : index
    %1671 = memref.load %arg3[%c50] : memref<408xf32, #tpu.memory_space<smem>>
    %1672 = vector.broadcast %1671 : f32 to vector<8x16xf32>
    %1673 = arith.mulf %1672, %1670 : vector<8x16xf32>
    %1674 = arith.addf %1641, %1673 : vector<8x16xf32>
    %c101 = arith.constant 101 : index
    %1675 = memref.load %arg3[%c101] : memref<408xf32, #tpu.memory_space<smem>>
    %1676 = vector.broadcast %1675 : f32 to vector<8x16xf32>
    %1677 = arith.mulf %1676, %1670 : vector<8x16xf32>
    %1678 = arith.addf %1645, %1677 : vector<8x16xf32>
    %c152 = arith.constant 152 : index
    %1679 = memref.load %arg3[%c152] : memref<408xf32, #tpu.memory_space<smem>>
    %1680 = vector.broadcast %1679 : f32 to vector<8x16xf32>
    %1681 = arith.mulf %1680, %1670 : vector<8x16xf32>
    %1682 = arith.addf %1649, %1681 : vector<8x16xf32>
    %c203 = arith.constant 203 : index
    %1683 = memref.load %arg3[%c203] : memref<408xf32, #tpu.memory_space<smem>>
    %1684 = vector.broadcast %1683 : f32 to vector<8x16xf32>
    %1685 = arith.mulf %1684, %1670 : vector<8x16xf32>
    %1686 = arith.addf %1653, %1685 : vector<8x16xf32>
    %c254 = arith.constant 254 : index
    %1687 = memref.load %arg3[%c254] : memref<408xf32, #tpu.memory_space<smem>>
    %1688 = vector.broadcast %1687 : f32 to vector<8x16xf32>
    %1689 = arith.mulf %1688, %1670 : vector<8x16xf32>
    %1690 = arith.addf %1657, %1689 : vector<8x16xf32>
    %c305 = arith.constant 305 : index
    %1691 = memref.load %arg3[%c305] : memref<408xf32, #tpu.memory_space<smem>>
    %1692 = vector.broadcast %1691 : f32 to vector<8x16xf32>
    %1693 = arith.mulf %1692, %1670 : vector<8x16xf32>
    %1694 = arith.addf %1661, %1693 : vector<8x16xf32>
    %c356 = arith.constant 356 : index
    %1695 = memref.load %arg3[%c356] : memref<408xf32, #tpu.memory_space<smem>>
    %1696 = vector.broadcast %1695 : f32 to vector<8x16xf32>
    %1697 = arith.mulf %1696, %1670 : vector<8x16xf32>
    %1698 = arith.addf %1665, %1697 : vector<8x16xf32>
    %c407 = arith.constant 407 : index
    %1699 = memref.load %arg3[%c407] : memref<408xf32, #tpu.memory_space<smem>>
    %1700 = vector.broadcast %1699 : f32 to vector<8x16xf32>
    %1701 = arith.mulf %1700, %1670 : vector<8x16xf32>
    %1702 = arith.addf %1669, %1701 : vector<8x16xf32>
    %c0_30 = arith.constant 0 : index
    %1703 = memref.load %arg4[%c0_30] : memref<8xf32, #tpu.memory_space<smem>>
    %1704 = vector.broadcast %1703 : f32 to vector<8x16xf32>
    %1705 = arith.addf %1674, %1704 : vector<8x16xf32>
    %cst_31 = arith.constant 0.000000e+00 : f32
    %1706 = vector.broadcast %cst_31 : f32 to vector<8x16xf32>
    %1707 = arith.maximumf %1705, %1706 : vector<8x16xf32>
    %c0_32 = arith.constant 0 : index
    %c0_33 = arith.constant 0 : index
    %c0_34 = arith.constant 0 : index
    %c0_35 = arith.constant 0 : index
    %1708 = vector.load %arg5[%c0_32, %c0_33, %c0_34, %c0_35] : memref<1x8x8x16xf32, #tpu.memory_space<vmem>>, vector<1x1x8x16xf32>
    %1709 = vector.shape_cast %1708 : vector<1x1x8x16xf32> to vector<8x16xf32>
    %1710 = vector.shape_cast %1707 : vector<8x16xf32> to vector<1x1x8x16xf32>
    tpu.vector_store %arg5[%c0_32, %c0_33, %c0_34, %c0_35], %1710 {strides = array<i32>} : memref<1x8x8x16xf32, #tpu.memory_space<vmem>>, vector<1x1x8x16xf32>,
    %c1_36 = arith.constant 1 : index
    %1711 = memref.load %arg4[%c1_36] : memref<8xf32, #tpu.memory_space<smem>>
    %1712 = vector.broadcast %1711 : f32 to vector<8x16xf32>
    %1713 = arith.addf %1678, %1712 : vector<8x16xf32>
    %cst_37 = arith.constant 0.000000e+00 : f32
    %1714 = vector.broadcast %cst_37 : f32 to vector<8x16xf32>
    %1715 = arith.maximumf %1713, %1714 : vector<8x16xf32>
    %c0_38 = arith.constant 0 : index
    %c1_39 = arith.constant 1 : index
    %c0_40 = arith.constant 0 : index
    %c0_41 = arith.constant 0 : index
    %1716 = vector.load %arg5[%c0_38, %c1_39, %c0_40, %c0_41] : memref<1x8x8x16xf32, #tpu.memory_space<vmem>>, vector<1x1x8x16xf32>
    %1717 = vector.shape_cast %1716 : vector<1x1x8x16xf32> to vector<8x16xf32>
    %1718 = vector.shape_cast %1715 : vector<8x16xf32> to vector<1x1x8x16xf32>
    tpu.vector_store %arg5[%c0_38, %c1_39, %c0_40, %c0_41], %1718 {strides = array<i32>} : memref<1x8x8x16xf32, #tpu.memory_space<vmem>>, vector<1x1x8x16xf32>,
    %c2_42 = arith.constant 2 : index
    %1719 = memref.load %arg4[%c2_42] : memref<8xf32, #tpu.memory_space<smem>>
    %1720 = vector.broadcast %1719 : f32 to vector<8x16xf32>
    %1721 = arith.addf %1682, %1720 : vector<8x16xf32>
    %cst_43 = arith.constant 0.000000e+00 : f32
    %1722 = vector.broadcast %cst_43 : f32 to vector<8x16xf32>
    %1723 = arith.maximumf %1721, %1722 : vector<8x16xf32>
    %c0_44 = arith.constant 0 : index
    %c2_45 = arith.constant 2 : index
    %c0_46 = arith.constant 0 : index
    %c0_47 = arith.constant 0 : index
    %1724 = vector.load %arg5[%c0_44, %c2_45, %c0_46, %c0_47] : memref<1x8x8x16xf32, #tpu.memory_space<vmem>>, vector<1x1x8x16xf32>
    %1725 = vector.shape_cast %1724 : vector<1x1x8x16xf32> to vector<8x16xf32>
    %1726 = vector.shape_cast %1723 : vector<8x16xf32> to vector<1x1x8x16xf32>
    tpu.vector_store %arg5[%c0_44, %c2_45, %c0_46, %c0_47], %1726 {strides = array<i32>} : memref<1x8x8x16xf32, #tpu.memory_space<vmem>>, vector<1x1x8x16xf32>,
    %c3_48 = arith.constant 3 : index
    %1727 = memref.load %arg4[%c3_48] : memref<8xf32, #tpu.memory_space<smem>>
    %1728 = vector.broadcast %1727 : f32 to vector<8x16xf32>
    %1729 = arith.addf %1686, %1728 : vector<8x16xf32>
    %cst_49 = arith.constant 0.000000e+00 : f32
    %1730 = vector.broadcast %cst_49 : f32 to vector<8x16xf32>
    %1731 = arith.maximumf %1729, %1730 : vector<8x16xf32>
    %c0_50 = arith.constant 0 : index
    %c3_51 = arith.constant 3 : index
    %c0_52 = arith.constant 0 : index
    %c0_53 = arith.constant 0 : index
    %1732 = vector.load %arg5[%c0_50, %c3_51, %c0_52, %c0_53] : memref<1x8x8x16xf32, #tpu.memory_space<vmem>>, vector<1x1x8x16xf32>
    %1733 = vector.shape_cast %1732 : vector<1x1x8x16xf32> to vector<8x16xf32>
    %1734 = vector.shape_cast %1731 : vector<8x16xf32> to vector<1x1x8x16xf32>
    tpu.vector_store %arg5[%c0_50, %c3_51, %c0_52, %c0_53], %1734 {strides = array<i32>} : memref<1x8x8x16xf32, #tpu.memory_space<vmem>>, vector<1x1x8x16xf32>,
    %c4_54 = arith.constant 4 : index
    %1735 = memref.load %arg4[%c4_54] : memref<8xf32, #tpu.memory_space<smem>>
    %1736 = vector.broadcast %1735 : f32 to vector<8x16xf32>
    %1737 = arith.addf %1690, %1736 : vector<8x16xf32>
    %cst_55 = arith.constant 0.000000e+00 : f32
    %1738 = vector.broadcast %cst_55 : f32 to vector<8x16xf32>
    %1739 = arith.maximumf %1737, %1738 : vector<8x16xf32>
    %c0_56 = arith.constant 0 : index
    %c4_57 = arith.constant 4 : index
    %c0_58 = arith.constant 0 : index
    %c0_59 = arith.constant 0 : index
    %1740 = vector.load %arg5[%c0_56, %c4_57, %c0_58, %c0_59] : memref<1x8x8x16xf32, #tpu.memory_space<vmem>>, vector<1x1x8x16xf32>
    %1741 = vector.shape_cast %1740 : vector<1x1x8x16xf32> to vector<8x16xf32>
    %1742 = vector.shape_cast %1739 : vector<8x16xf32> to vector<1x1x8x16xf32>
    tpu.vector_store %arg5[%c0_56, %c4_57, %c0_58, %c0_59], %1742 {strides = array<i32>} : memref<1x8x8x16xf32, #tpu.memory_space<vmem>>, vector<1x1x8x16xf32>,
    %c5_60 = arith.constant 5 : index
    %1743 = memref.load %arg4[%c5_60] : memref<8xf32, #tpu.memory_space<smem>>
    %1744 = vector.broadcast %1743 : f32 to vector<8x16xf32>
    %1745 = arith.addf %1694, %1744 : vector<8x16xf32>
    %cst_61 = arith.constant 0.000000e+00 : f32
    %1746 = vector.broadcast %cst_61 : f32 to vector<8x16xf32>
    %1747 = arith.maximumf %1745, %1746 : vector<8x16xf32>
    %c0_62 = arith.constant 0 : index
    %c5_63 = arith.constant 5 : index
    %c0_64 = arith.constant 0 : index
    %c0_65 = arith.constant 0 : index
    %1748 = vector.load %arg5[%c0_62, %c5_63, %c0_64, %c0_65] : memref<1x8x8x16xf32, #tpu.memory_space<vmem>>, vector<1x1x8x16xf32>
    %1749 = vector.shape_cast %1748 : vector<1x1x8x16xf32> to vector<8x16xf32>
    %1750 = vector.shape_cast %1747 : vector<8x16xf32> to vector<1x1x8x16xf32>
    tpu.vector_store %arg5[%c0_62, %c5_63, %c0_64, %c0_65], %1750 {strides = array<i32>} : memref<1x8x8x16xf32, #tpu.memory_space<vmem>>, vector<1x1x8x16xf32>,
    %c6_66 = arith.constant 6 : index
    %1751 = memref.load %arg4[%c6_66] : memref<8xf32, #tpu.memory_space<smem>>
    %1752 = vector.broadcast %1751 : f32 to vector<8x16xf32>
    %1753 = arith.addf %1698, %1752 : vector<8x16xf32>
    %cst_67 = arith.constant 0.000000e+00 : f32
    %1754 = vector.broadcast %cst_67 : f32 to vector<8x16xf32>
    %1755 = arith.maximumf %1753, %1754 : vector<8x16xf32>
    %c0_68 = arith.constant 0 : index
    %c6_69 = arith.constant 6 : index
    %c0_70 = arith.constant 0 : index
    %c0_71 = arith.constant 0 : index
    %1756 = vector.load %arg5[%c0_68, %c6_69, %c0_70, %c0_71] : memref<1x8x8x16xf32, #tpu.memory_space<vmem>>, vector<1x1x8x16xf32>
    %1757 = vector.shape_cast %1756 : vector<1x1x8x16xf32> to vector<8x16xf32>
    %1758 = vector.shape_cast %1755 : vector<8x16xf32> to vector<1x1x8x16xf32>
    tpu.vector_store %arg5[%c0_68, %c6_69, %c0_70, %c0_71], %1758 {strides = array<i32>} : memref<1x8x8x16xf32, #tpu.memory_space<vmem>>, vector<1x1x8x16xf32>,
    %c7_72 = arith.constant 7 : index
    %1759 = memref.load %arg4[%c7_72] : memref<8xf32, #tpu.memory_space<smem>>
    %1760 = vector.broadcast %1759 : f32 to vector<8x16xf32>
    %1761 = arith.addf %1702, %1760 : vector<8x16xf32>
    %cst_73 = arith.constant 0.000000e+00 : f32
    %1762 = vector.broadcast %cst_73 : f32 to vector<8x16xf32>
    %1763 = arith.maximumf %1761, %1762 : vector<8x16xf32>
    %c0_74 = arith.constant 0 : index
    %c7_75 = arith.constant 7 : index
    %c0_76 = arith.constant 0 : index
    %c0_77 = arith.constant 0 : index
    %1764 = vector.load %arg5[%c0_74, %c7_75, %c0_76, %c0_77] : memref<1x8x8x16xf32, #tpu.memory_space<vmem>>, vector<1x1x8x16xf32>
    %1765 = vector.shape_cast %1764 : vector<1x1x8x16xf32> to vector<8x16xf32>
    %1766 = vector.shape_cast %1763 : vector<8x16xf32> to vector<1x1x8x16xf32>
    tpu.vector_store %arg5[%c0_74, %c7_75, %c0_76, %c0_77], %1766 {strides = array<i32>} : memref<1x8x8x16xf32, #tpu.memory_space<vmem>>, vector<1x1x8x16xf32>,
    return
  }
  func.func @transform_0(%arg0: i32, %arg1: i32) -> (i32, i32, i32, i32) {
    %c0_i32 = arith.constant 0 : i32
    %c0_i32_0 = arith.constant 0 : i32
    %c0_i32_1 = arith.constant 0 : i32
    %c0_i32_2 = arith.constant 0 : i32
    return %arg0, %c0_i32, %c0_i32_0, %c0_i32_1 : i32, i32, i32, i32
  }
  func.func @transform_1(%arg0: i32, %arg1: i32) -> i32 {
    %c0_i32 = arith.constant 0 : i32
    %c0_i32_0 = arith.constant 0 : i32
    return %c0_i32 : i32
  }
  func.func @transform_2(%arg0: i32, %arg1: i32) -> i32 {
    %c0_i32 = arith.constant 0 : i32
    %c0_i32_0 = arith.constant 0 : i32
    return %c0_i32 : i32
  }
  func.func @transform_3(%arg0: i32, %arg1: i32) -> (i32, i32, i32, i32) {
    %c0_i32 = arith.constant 0 : i32
    %c0_i32_0 = arith.constant 0 : i32
    %c0_i32_1 = arith.constant 0 : i32
    return %arg0, %c0_i32, %arg1, %c0_i32_0 : i32, i32, i32, i32
  }
}

</mosaic_0001>

<bundles_post_ra>
// kernel: conv_add_relu.1
= control target key start
LH: loop header
LB: loop body
LE: loop exit
PB: predicated region body
PF: predicated region fallthrough
CT: control target
= control target key end

     0   :  { %s11223_s0 = inlined_call_operand.vmem [shape: f32[2,3,18,18], index: 0, kind: input, shape index: {}]   ;;  %s11224_s1 = inlined_call_operand.vmem [shape: f32[408], index: 1, kind: input, shape index: {}]   ;;  %s11225_s2 = inlined_call_operand.vmem [shape: f32[8], index: 2, kind: input, shape index: {}]   ;;  %s11226_s3 = inlined_call_operand.hbm [shape: f32[2,8,16,16], index: 3, kind: output, shape index: {}]  }
   0x1   :  { %11270 = sst [smem:[#allocation73_spill]] %s11223_s0 }
   0x2   :  { %11271 = sst [smem:[#allocation74_spill]] %s11224_s1 }
   0x3   :  { %11272 = sst [smem:[#allocation75_spill]] %s11225_s2 }
   0x4   :  { %11273 = sst [smem:[#allocation76_spill]] %s11226_s3 }
   0x5   :  { %8 = vsyncpa [#allocation5], 0 }
   0x6   :  { %9 = vsyncpa [#allocation7], 0 }
   0x7   :  { %10 = vsyncpa [#allocation4], 0 }
   0x8   :  { %12 = vsyncpa [#allocation4 + $0x1], 0  ;;  %s5940_s12 = smov 0   ;;  %s5942_s13 = smov 0  }
   0x9   :  { %s5944_s14 = smov 0   ;;  %s5946_s15 = smov 0  }
   0xa   :  { %s5948_s16 = smov 0   ;;  %s5950_s17 = smov 0  }
   0xb   :  { %s5952_s18 = smov 0   ;;  %s5954_s19 = smov 0  }
   0xc LB: > { %11274 = sst [smem:[#allocation12_spill]] %s5878_s12  ;;  %s5208_s20 = sadd.s32 4294967295, %s5906_s19   ;;  %s5906_s19 = sphi %s5954_s19, %s18_s19   ;;  %s5902_s18 = sphi %s5952_s18, %s11710_s18   ;;  %s5898_s17 = sphi %s5950_s17, %s11709_s17   ;;  %s5894_s16 = sphi %s5948_s16, %s11708_s16   ;;  %s5890_s15 = sphi %s5946_s15, %s11707_s15   ;;  %s5886_s14 = sphi %s5944_s14, %s11706_s14   ;;  %s5882_s13 = sphi %s5942_s13, %s11705_s13   ;;  %s5878_s12 = sphi %s5940_s12, %s11704_s12  }
   0xd   : > { %11275 = sst [smem:[#allocation13_spill]] %s5882_s13  ;;  %s5209_s21 = sadd.s32 4294967294, %s5906_s19  }
   0xe   : > { %11276 = sst [smem:[#allocation14_spill]] %s5886_s14  ;;  %s27_s22 = sadd.s32 1, %s5898_s17 }
   0xf   : > { %11277 = sst [smem:[#allocation15_spill]] %s5890_s15  ;;  %s30_s23 = sadd.s32 1, %s5902_s18 }
  0x10   : > { %11278 = sst [smem:[#allocation16_spill]] %s5894_s16  ;;  %p28_p0 = scmp.ge.s32.totalorder %s27_s22, 2 }
  0x11   : > { %11279 = sst [smem:[#allocation17_spill]] %s5898_s17  ;;  %s107_s24 = sadd.s32 1, %s5886_s14 }
  0x12   : > { %11280 = sst [smem:[#allocation18_spill]] %s5902_s18  ;;  %p117_p1 = scmp.ne.s32.totalorder %s5886_s14, %s5882_s13 }
  0x13   : > { %11281 = sst [smem:[#allocation19_spill]] %s5906_s19  ;;  %p118_p2 = scmp.eq.s32.totalorder %s5208_s20, 3 }
  0x14   : > { %s11712_s22 = smov (%p28_p0, %s27_s22), 0  ;;  %s11714_s23 = smov (!%p28_p0, %s30_s23), %s5902_s18 }
  0x15   : > { %11282 = sst [smem:[#allocation20_spill]] %s11712_s22  ;;  %s103_s25 = ssub.s32 %s5898_s17, %s11712_s22 }
  0x16   : > { %p5992_p3 = por %p118_p2, %p117_p1  ;;  %p32_p4 = scmp.ge.s32.totalorder %s11714_s23, 2 }
  0x17   : > { %p123_p5 = scmp.ne.s32.totalorder %s5882_s13, %s5878_s12  ;;  %p124_p6 = scmp.eq.s32.totalorder %s5209_s21, 3 }
  0x18   : > { %s11283_s26 = scalar_select %p5992_p3, 1, 0 }
  0x19   : > { %p5210_p7 = scmp.ge.s32.totalorder %s5906_s19, 1  ;;  %s11716_s23 = smov (%p32_p4, %s11714_s23), 0 }
  0x1a   : > { %11284 = sst [smem:[#allocation21_spill]] %s11283_s26  ;;  %p6001_p8 = por %p124_p6, %p123_p5 }
  0x1b   : > { %11285 = sst [smem:[#allocation22_spill]] %s11716_s23  ;;  %p131_p9 = scmp.lt.s32.totalorder %s5906_s19, 5 }
  0x1c   : > { %s11286_s27 = scalar_select %p6001_p8, 1, 0 }
  0x1d   : > { %s102_s28 = ssub.s32 %s5902_s18, %s11716_s23  ;;  %p6008_p10 = pnand %p5210_p7, %p131_p9 }
  0x1e   : > { %11287 = sst [smem:[#allocation23_spill]] %s11286_s27  ;;  %s104_s29 = sor.u32 %s103_s25, %s102_s28 }
  0x1f   : > { %s11288_s30 = scalar_select %p6008_p10, 1, 0 }
  0x20   : > { %p105_p11 = scmp.eq.s32.totalorder %s104_s29, 0  ;;  %p6012_p12 = scmp.eq.s32.totalorder %s5208_s20, 0 }
  0x21   : > { %p5669_p13 = pneg %p6008_p10  ;;  %s11290_s1 = sld [smem:[#allocation74_spill]] }
  0x22   : > { %s11289_s4 = scalar_select %p6012_p12, 1, 0 }
  0x23   : > { %s6022_s8 = scalar_select %p105_p11, %s5886_s14, %s107_s24  }
  0x24   : > { %p6026_p0 = pnand %p6012_p12, %p5669_p13  ;;  %s11293_s2 = sld [smem:[#allocation75_spill]] }
  0x25   : > { %11291 = sst [smem:[#allocation24_spill]] %s6022_s8 }
  0x26   : > { %p5776_p2 = pneg %p6026_p0 }
  0x27   : > { %s144_s7 = sshll.u32 %s11290_s1, 4  ;;  %s145_s7 = int_to_ptr.vmem [resolvable:$true] %s144_s7 }
  0x28   : > { %s5774_s21 = scalar_lea.vmem %s145_s7, 64  ;;  %p5782_p6 = scmp.lt.s32.totalorder %s145_s7, %s145_s7 }
  0x29   : > { %p5775_p1 = scmp.ne.s32.totalorder %s145_s7, %s5774_s21  ;;  %p5783_p7 = scmp.lt.s32.totalorder %s5774_s21, %s5774_s21 }
  0x2a   : > { %s155_s20 = sshll.u32 %s11293_s2, 4  ;;  %s156_s20 = int_to_ptr.vmem [resolvable:$true] %s155_s20 }
  0x2b   : > { %p5777_p4 = pnand %p5776_p2, %p5775_p1  ;;  %p5784_p9 = por %p5783_p7, %p5782_p6 }
  0x2d   : > { %p5778_p5 = pneg %p5777_p4 }
  0x2f   : > { %p5785_p11 = pnand %p5784_p9, %p5778_p5 }
  0x31   : > { %5788 = shalt.err (!%p5785_p11)
}
  0x32   : > { %s5908_s24 = smov [#allocation3]   ;;  %s5789_s25 = scalar_lea.vmem %s156_s20, 16 }
  0x33   : > { %5672 = dma.vmem_to_smem (!%p6026_p0), %s145_s7, 64, %s5908_s24, [#allocation5]  }
  0x34   : > { %p5790_p13 = scmp.ne.s32.totalorder %s156_s20, %s5789_s25  ;;  %p5797_p12 = scmp.lt.s32.totalorder %s156_s20, %s156_s20 }
  0x35   : > { %p5798_p10 = scmp.lt.s32.totalorder %s5789_s25, %s5789_s25 }
  0x36   : > { %p5792_p8 = pnand %p5790_p13, %p5776_p2 }
  0x37   : > { %p5799_p1 = por %p5798_p10, %p5797_p12 }
  0x38   : > { %p5793_p3 = pneg %p5792_p8 }
  0x3a   : > { %p5800_p4 = pnand %p5799_p1, %p5793_p3 }
  0x3c   : > { %5803 = shalt.err (!%p5800_p4)
}
  0x3d   : > { %s5909_s28 = smov [#allocation6]   ;;  %p11294_p5 = scmp.ne.s32.totalorder %s11288_s30, 0 }
  0x3e   : > { %5675 = dma.vmem_to_smem (!%p6026_p0), %s156_s20, 16, %s5909_s28, [#allocation7]  }
  0x3f   : > { %176 = sbr.rel (%p11294_p5) target bundleno = 1035 (0x40b), region = 32 }
  0x46   : > { %p11295_p6 = scmp.ne.s32.totalorder %s11289_s4, 0 }
  0x48   : > { %5865 = dma.done.wait (%p11295_p6), [#allocation5], 64  }
  0x49   : > { %5867 = vsyncadd (%p11295_p6), [#allocation5], 4294967232 }
  0x4a   : > { %5869 = dma.done.wait (%p11295_p6), [#allocation7], 16  }
  0x4b   : > { %5871 = vsyncadd (%p11295_p6), [#allocation7], 4294967280 }
  0x4c   : > { %186 = sfence }
  0x4d   : > { %p205_p3 = scmp.lt.s32.totalorder %s5894_s16, 1  ;;  %vm211_vm0 = vcmask 162816   ;;  %v5910_v0 = vmov 0.0   ;;  %s11296_s0 = sld [smem:[#allocation73_spill]]  ;;  %vm236_vm1 = vcmask 154632   ;;  %vm239_vm2 = vcmask 148488  }
  0x4e   : > { %212 = vst.msk [vmem:[#allocation2] sm:$0xff] %vm211_vm0, %v5910_v0  ;;  %213 = vst.msk [vmem:[#allocation2 + $0x8] sm:$0xff] %vm211_vm0, %v5910_v0  ;;  %s5911_s7 = smov 1   ;;  %s5234_s9 = sld [smem:[#allocation3 + $0x34]]  ;;  %vm442_vm3 = vcmask 1046528   ;;  %vm755_vm4 = vcmask 1045504  }
  0x4f   : > { %214 = vst.msk [vmem:[#allocation2 + $0x10] sm:$0xff] %vm211_vm0, %v5910_v0  ;;  %215 = vst.msk [vmem:[#allocation2 + $0x18] sm:$0xff] %vm211_vm0, %v5910_v0  ;;  %s206_s29 = scalar_select %p205_p3, %s5894_s16, 1  ;;  %vm1260_vm5 = vcmask 1044480   ;;  %vm1573_vm6 = vcmask 1043456   ;;  %vm5044_vm7 = vcmask 130048  }
  0x50   : > { %216 = vst.msk [vmem:[#allocation2 + $0x20] sm:$0xff] %vm211_vm0, %v5910_v0  ;;  %217 = vst.msk [vmem:[#allocation2 + $0x28] sm:$0xff] %vm211_vm0, %v5910_v0  ;;  %s5233_s10 = sld [smem:[#allocation3 + $0x1]]  ;;  %s5219_s11 = sshll.u32 %s5890_s15, 3 }
  0x51   : > { %218 = vst.msk [vmem:[#allocation2 + $0x30] sm:$0xff] %vm211_vm0, %v5910_v0  ;;  %219 = vst.msk [vmem:[#allocation2 + $0x38] sm:$0xff] %vm211_vm0, %v5910_v0  ;;  %s5658_s30 = smul.u32 72, %s206_s29  ;;  %s5236_s20 = sld [smem:[#allocation3 + $0x9a]] }
  0x52   : > { %220 = vst.msk [vmem:[#allocation2 + $0x40] sm:$0xff] %vm211_vm0, %v5910_v0  ;;  %s5235_s21 = sld [smem:[#allocation3 + $0x67]]  ;;  %s5238_s24 = sld [smem:[#allocation3 + $0x100]] }
  0x53   : > { %s209_s6 = scalar_lea.vmem %s11296_s0, %s5658_s30  ;;  %s5237_s25 = sld [smem:[#allocation3 + $0xcd]] }
  0x54   : > { %v221_v1 = vld [vmem:[%s209_s6] sm:$0xff]  ;;  %v223_v2 = vld [vmem:[%s209_s6 + $0x10] sm:$0x3]  ;;  %v222_v3 = vld [vmem:[%s209_s6 + $0x8] sm:$0xff]  ;;  %v317_v19 = vstv %s5234_s9  ;;  %s6064_s28 = scalar_lea.vmem [#allocation2], %s5219_s11  ;;  %s5240_s29 = sld [smem:[#allocation3 + $0x166]] }
  0x55   : > { %227 = vrot.lane.b32.xlu0 %v221_v1, %s5911_s7  ;;  %231 = vrot.lane.b32.xlu1 %v223_v2, %s5911_s7  ;;  %v5220_v4 = vld [vmem:[%s209_s6 + $0x18] sm:$0xff]  ;;  %v5221_v5 = vld [vmem:[%s209_s6 + $0x20] sm:$0xff]  ;;  %11297 = sst [smem:[#allocation25_spill]] %s6064_s28  ;;  %s5239_s30 = sld [smem:[#allocation3 + $0x133]] }
  0x56   : > { %v5222_v6 = vld [vmem:[%s209_s6 + $0x28] sm:$0x3]  ;;  %v5223_v7 = vld [vmem:[%s209_s6 + $0x30] sm:$0xff]  ;;  %v5224_v8 = vld [vmem:[%s209_s6 + $0x38] sm:$0xff]  ;;  %v309_v20 = vstv %s5233_s10  ;;  %s11231_s5 = smov 126   ;;  %s5242_s4 = sld [smem:[#allocation3 + $0x35]] }
  0x57   : > { %v5225_v9 = vld [vmem:[%s209_s6 + $0x40] sm:$0x3]  ;;  %v333_v24 = vstv %s5236_s20  ;;  %s5241_s6 = sld [smem:[#allocation3 + $0x2]]  ;;  %s5243_s9 = sld [smem:[#allocation3 + $0x68]] }
  0x58   : > { %v325_v25 = vstv %s5235_s21  ;;  %v349_v28 = vstv %s5238_s24  ;;  %s6083_s10 = sld [smem:[#allocation3 + $0x101]]  ;;  %s5245_s11 = sld [smem:[#allocation3 + $0xce]] }
  0x59   : > { %229 = vrot.lane.b32.xlu0 %v222_v3, %s5911_s7  ;;  %248 = vrot.lane.b32.xlu1 %v5220_v4, %s5911_s7  ;;  %v341_v29 = vstv %s5237_s25  ;;  %s6085_s20 = sld [smem:[#allocation3 + $0x36]]  ;;  %s6089_s21 = sld [smem:[#allocation3 + $0x167]] }
  0x5a   : > { %v365_v32 = vstv %s5240_s29  ;;  %s6091_s24 = sld [smem:[#allocation3 + $0x3]]  ;;  %s6093_s25 = sld [smem:[#allocation3 + $0x134]] }
  0x5b   : > { %v357_v33 = vstv %s5239_s30  ;;  %s6097_s29 = sld [smem:[#allocation3 + $0x9c]]  ;;  %s6099_s30 = sld [smem:[#allocation3 + $0x69]] }
  0x5c   : > { %v381_v36 = vstv %s5242_s4  ;;  %s11235_s4 = smov 124   ;;  %s6513_s0 = sld [smem:[#allocation3 + $0x132]] }
  0x5d   : > { %250 = vrot.lane.b32.xlu0 %v5221_v5, %s5911_s7  ;;  %252 = vrot.lane.b32.xlu1 %v5222_v6, %s5911_s7  ;;  %v373_v37 = vstv %s5241_s6  ;;  %v389_v41 = vstv %s5243_s9  ;;  %s6105_s6 = sld [smem:[#allocation3 + $0x102]]  ;;  %s6131_s9 = sld [smem:[#allocation3 + $0x135]] }
  0x5e   : > { %v413_v44 = vstv %s6083_s10  ;;  %v405_v45 = vstv %s5245_s11  ;;  %s6137_s10 = sld [smem:[#allocation3 + $0x37]]  ;;  %s6139_s11 = sld [smem:[#allocation3 + $0x4]] }
  0x5f   : > { %v451_v46 = vstv %s6085_s20  ;;  %v429_v49 = vstv %s6089_s21  ;;  %s6147_s20 = sld [smem:[#allocation3 + $0x9d]]  ;;  %s6149_s21 = sld [smem:[#allocation3 + $0x6a]] }
  0x60   : > { %v437_v48 = vstv %s6091_s24  ;;  %v421_v50 = vstv %s6093_s25  ;;  %s6169_s24 = sld [smem:[#allocation3 + $0x103]]  ;;  %s6173_s25 = sld [smem:[#allocation3 + $0xd0]] }
  0x61   : > { %268 = vrot.lane.b32.xlu0 %v5223_v7, %s5911_s7  ;;  %270 = vrot.lane.b32.xlu1 %v5224_v8, %s5911_s7  ;;  %v477_v53 = vstv %s6097_s29  ;;  %v464_v54 = vstv %s6099_s30  ;;  %s6179_s29 = sld [smem:[#allocation3 + $0x169]]  ;;  %s6181_s30 = sld [smem:[#allocation3 + $0x136]] }
  0x62   : > { %11299 = sst [smem:[#allocation26_spill]] %s6513_s0  ;;  %s6516_s1 = sld [smem:[#allocation3 + $0xa4]] }
  0x63   : > { %v503_v1 = vstv %s6105_s6  ;;  %s6190_s6 = sld [smem:[#allocation3 + $0x38]]  ;;  %s6532_s2 = sld [smem:[#allocation3 + $0x71]] }
  0x64   : > { %s6534_s23 = sld [smem:[#allocation3 + $0x10a]]  ;;  %s6539_s22 = sld [smem:[#allocation3 + $0xd7]] }
  0x65   : > { %272 = vrot.lane.b32.xlu0 %v5225_v9, %s5911_s7  ;;  %s5244_s7 = sld [smem:[#allocation3 + $0x9b]]  ;;  %s6569_s18 = sld [smem:[#allocation3 + $0xa5]] }
  0x66   : > { %s6585_s17 = sld [smem:[#allocation3 + $0x10b]]  ;;  %s6589_s8 = sld [smem:[#allocation3 + $0xd8]] }
  0x67   : > { %s6591_s14 = sld [smem:[#allocation3 + $0x171]]  ;;  %s6642_s27 = sld [smem:[#allocation3 + $0x73]] }
  0x68   : > { %s6644_s12 = sld [smem:[#allocation3 + $0x9f]]  ;;  %s6658_s19 = sld [smem:[#allocation3 + $0x6c]] }
  0x69   : > { %s6660_s3 = sld [smem:[#allocation3 + $0x10c]]  ;;  %s6664_s26 = sld [smem:[#allocation3 + $0xd9]] }
  0x6a   : > { %s6666_s15 = sld [smem:[#allocation3 + $0x105]]  ;;  %s6682_s16 = sld [smem:[#allocation3 + $0xd2]] }
  0x6b   : > { %v397_v40 = vstv %s5244_s7  ;;  %s6127_s7 = sld [smem:[#allocation3 + $0x168]]  ;;  %s6684_s13 = sld [smem:[#allocation3 + $0x172]] }
  0x6c   : > { %s6716_s0 = sld [smem:[#allocation3 + $0x42]] }
  0x6e   : > { %11302 = sst [smem:[#allocation27_spill]] %s6644_s12  ;;  %s6714_s12 = sld [smem:[#allocation3 + $0x138]] }
  0x70   : > { %11303 = sst [smem:[#allocation28_spill]] %s6682_s16  ;;  %s6764_s16 = sld [smem:[#allocation3 + $0x174]] }
  0xc7   : > { %v228_v10 = vpop.permute.xlu0 %227  ;;  %v232_v11 = vpop.permute.xlu1 %231 }
  0xc8   : > { %237 = vst.msk [vmem:[#allocation2 + $0x1] sm:$0xff] %vm236_vm1, %v228_v10 }
  0xc9   : > { %240 = vst.msk [vmem:[#allocation2 + $0x11] sm:$0x3] %vm239_vm2, %v232_v11 }
  0xcb   : > { %v230_v12 = vpop.permute.xlu0 %229  ;;  %v249_v13 = vpop.permute.xlu1 %248 }
  0xcc   : > { %238 = vst.msk [vmem:[#allocation2 + $0x9] sm:$0xff] %vm236_vm1, %v230_v12  ;;  %258 = vst.msk [vmem:[#allocation2 + $0x19] sm:$0xff] %vm236_vm1, %v249_v13 }
  0xcf   : > { %v251_v14 = vpop.permute.xlu0 %250  ;;  %v253_v15 = vpop.permute.xlu1 %252 }
  0xd0   : > { %259 = vst.msk [vmem:[#allocation2 + $0x21] sm:$0xff] %vm236_vm1, %v251_v14 }
  0xd1   : > { %260 = vst.msk [vmem:[#allocation2 + $0x29] sm:$0x3] %vm239_vm2, %v253_v15 }
  0xd3   : > { %v269_v16 = vpop.permute.xlu0 %268  ;;  %v271_v17 = vpop.permute.xlu1 %270 }
  0xd4   : > { %278 = vst.msk [vmem:[#allocation2 + $0x31] sm:$0xff] %vm236_vm1, %v269_v16  ;;  %279 = vst.msk [vmem:[#allocation2 + $0x39] sm:$0xff] %vm236_vm1, %v271_v17  ;;  %v529_v17 = vstv %s6127_s7  ;;  %s6201_s7 = sld [smem:[#allocation3 + $0x5]] }
  0xd7   : > { %v273_v18 = vpop.permute.xlu0 %272 }
  0xd8   : > { %280 = vst.msk [vmem:[#allocation2 + $0x41] sm:$0x3] %vm239_vm2, %v273_v18  ;;  %v516_v18 = vstv %s6131_s9  ;;  %s6208_s9 = sld [smem:[#allocation3 + $0x9e]] }
  0xdf   : > { %v6067_v21 = vld [vmem:[%s6064_s28] sm:$0xff]  ;;  %v6112_v47 = vld [vmem:[%s6064_s28 + $0x8] sm:$0xff] }
  0xe0   : > { %v318_v22 = vmul.f32 %v317_v19, %v6067_v21  ;;  %v310_v23 = vmul.f32 %v309_v20, %v6067_v21  ;;  %v334_v26 = vmul.f32 %v333_v24, %v6067_v21  ;;  %v326_v27 = vmul.f32 %v325_v25, %v6067_v21 }
  0xe1   : > { %v350_v30 = vmul.f32 %v349_v28, %v6067_v21  ;;  %v342_v31 = vmul.f32 %v341_v29, %v6067_v21  ;;  %v366_v34 = vmul.f32 %v365_v32, %v6067_v21  ;;  %v358_v35 = vmul.f32 %v357_v33, %v6067_v21 }
  0xe2   : > { %320 = vrot.lane.b32.xlu0 %v318_v22, %s11231_s5  ;;  %312 = vrot.lane.b32.xlu1 %v310_v23, %s11231_s5  ;;  %v382_v38 = vmul.f32 %v381_v36, %v6067_v21  ;;  %v374_v39 = vmul.f32 %v373_v37, %v6067_v21  ;;  %v398_v42 = vmul.f32 %v397_v40, %v6067_v21  ;;  %v555_v22 = vstv %s6137_s10  ;;  %s11298_s10 = smov 126  }
  0xe3   : > { %v390_v43 = vmul.f32 %v389_v41, %v6067_v21  ;;  %v414_v51 = vmul.f32 %v413_v44, %v6067_v21  ;;  %v406_v52 = vmul.f32 %v405_v45, %v6067_v21  ;;  %v452_v55 = vmul.f32 %v451_v46, %v6067_v21 }
  0xe4   : > { %v453_v56 = vmul.f32 %v451_v46, %v6112_v47  ;;  %v438_v57 = vmul.f32 %v437_v48, %v6067_v21  ;;  %v439_v58 = vmul.f32 %v437_v48, %v6112_v47  ;;  %v478_v59 = vmul.f32 %v477_v53, %v6067_v21 }
  0xe5   : > { %v479_v60 = vmul.f32 %v477_v53, %v6112_v47  ;;  %v465_v61 = vmul.f32 %v464_v54, %v6067_v21  ;;  %v466_v62 = vmul.f32 %v464_v54, %v6112_v47  ;;  %v430_v63 = vmul.f32 %v429_v49, %v6067_v21 }
  0xe6   : > { %336 = vrot.lane.b32.xlu0 %v334_v26, %s11231_s5  ;;  %328 = vrot.lane.b32.xlu1 %v326_v27, %s11231_s5  ;;  %v422_v0 = vmul.f32 %v421_v50, %v6067_v21  ;;  %v456_v3 = vrot.slane %v452_v55, 1  ;;  %v457_v4 = vrot.slane %v453_v56, 1  ;;  %v443_v5 = vrot.slane %v438_v57, 1 }
  0xe7   : > { %v444_v6 = vrot.slane %v439_v58, 1  ;;  %v482_v7 = vrot.slane %v478_v59, 1  ;;  %v483_v8 = vrot.slane %v479_v60, 1  ;;  %v469_v9 = vrot.slane %v465_v61, 1 }
  0xe8   : > { %v470_v10 = vrot.slane %v466_v62, 1  ;;  %v504_v11 = vmul.f32 %v503_v1, %v6067_v21  ;;  %v505_v12 = vmul.f32 %v503_v1, %v6112_v47  ;;  %v458_v14 = vsel %vm442_vm3, %v456_v3, %v457_v4 }
  0xe9   : > { %v445_v15 = vsel %vm442_vm3, %v443_v5, %v444_v6  ;;  %v484_v19 = vsel %vm442_vm3, %v482_v7, %v483_v8  ;;  %v542_v23 = vstv %s6139_s11  ;;  %v530_v27 = vmul.f32 %v529_v17, %v6067_v21  ;;  %s6215_s11 = sld [smem:[#allocation3 + $0x6b]] }
  0xea   : > { %352 = vrot.lane.b32.xlu0 %v350_v30, %s11231_s5  ;;  %344 = vrot.lane.b32.xlu1 %v342_v31, %s11231_s5  ;;  %v471_v20 = vsel %vm442_vm3, %v469_v9, %v470_v10  ;;  %v508_v24 = vrot.slane %v504_v11, 1  ;;  %v509_v25 = vrot.slane %v505_v12, 1  ;;  %v531_v29 = vmul.f32 %v529_v17, %v6112_v47 }
  0xeb   : > { %v517_v30 = vmul.f32 %v516_v18, %v6067_v21  ;;  %v518_v31 = vmul.f32 %v516_v18, %v6112_v47  ;;  %v556_v32 = vmul.f32 %v555_v22, %v6067_v21  ;;  %v557_v33 = vmul.f32 %v555_v22, %v6112_v47 }
  0xec   : > { %v510_v36 = vsel %vm442_vm3, %v508_v24, %v509_v25  ;;  %v534_v37 = vrot.slane %v530_v27, 1  ;;  %v535_v41 = vrot.slane %v531_v29, 1  ;;  %v607_v55 = vstv %s6169_s24  ;;  %s6232_s24 = sld [smem:[#allocation3 + $0x16a]] }
  0xed   : > { %v560_v44 = vrot.slane %v556_v32, 1  ;;  %v561_v45 = vrot.slane %v557_v33, 1  ;;  %v594_v56 = vstv %s6173_s25  ;;  %v633_v59 = vstv %s6179_s29  ;;  %s6234_s25 = sld [smem:[#allocation3 + $0x137]]  ;;  %s6253_s29 = sld [smem:[#allocation3 + $0x3a]] }
  0xee   : > { %368 = vrot.lane.b32.xlu0 %v366_v34, %s11231_s5  ;;  %360 = vrot.lane.b32.xlu1 %v358_v35, %s11231_s5  ;;  %s6107_s5 = sld [smem:[#allocation3 + $0xcf]]  ;;  %v581_v34 = vstv %s6147_s20  ;;  %v568_v35 = vstv %s6149_s21  ;;  %v595_v3 = vmul.f32 %v594_v56, %v6067_v21  ;;  %v596_v4 = vmul.f32 %v594_v56, %v6112_v47  ;;  %s6220_s20 = sld [smem:[#allocation3 + $0x104]] }
  0xef   : > { %v582_v46 = vmul.f32 %v581_v34, %v6067_v21  ;;  %v583_v50 = vmul.f32 %v581_v34, %v6112_v47  ;;  %v570_v54 = vmul.f32 %v568_v35, %v6112_v47  ;;  %v562_v57 = vsel %vm442_vm3, %v560_v44, %v561_v45  ;;  %s6222_s21 = sld [smem:[#allocation3 + $0xd1]] }
  0xf0   : > { %v620_v60 = vstv %s6181_s30  ;;  %v634_v5 = vmul.f32 %v633_v59, %v6067_v21  ;;  %v635_v6 = vmul.f32 %v633_v59, %v6112_v47  ;;  %v659_v7 = vstv %s6190_s6  ;;  %s6257_s30 = sld [smem:[#allocation3 + $0x7]]  ;;  %s6259_s6 = sld [smem:[#allocation3 + $0xa0]] }
  0xf1   : > { %v586_v58 = vrot.slane %v582_v46, 1  ;;  %v587_v62 = vrot.slane %v583_v50, 1  ;;  %v574_v1 = vrot.slane %v570_v54, 1  ;;  %v621_v10 = vmul.f32 %v620_v60, %v6067_v21 }
  0xf2   : > { %384 = vrot.lane.b32.xlu0 %v382_v38, %s11235_s4  ;;  %376 = vrot.lane.b32.xlu1 %v374_v39, %s11235_s4  ;;  %v543_v38 = vmul.f32 %v542_v23, %v6067_v21  ;;  %v544_v39 = vmul.f32 %v542_v23, %v6112_v47  ;;  %v622_v11 = vmul.f32 %v620_v60, %v6112_v47  ;;  %v638_v17 = vrot.slane %v634_v5, 1 }
  0xf3   : > { %v588_v8 = vsel %vm442_vm3, %v586_v58, %v587_v62  ;;  %v639_v18 = vrot.slane %v635_v6, 1  ;;  %v661_v23 = vmul.f32 %v659_v7, %v6112_v47  ;;  %v685_v24 = vstv %s6208_s9  ;;  %s11237_s9 = smov 125  }
  0xf4   : > { %v490_v2 = vstv %s6107_s5  ;;  %s11233_s5 = smov 127   ;;  %v547_v48 = vrot.slane %v543_v38, 1  ;;  %v548_v49 = vrot.slane %v544_v39, 1  ;;  %v626_v22 = vrot.slane %v622_v11, 1 }
  0xf5   : > { %v491_v13 = vmul.f32 %v490_v2, %v6067_v21  ;;  %v492_v16 = vmul.f32 %v490_v2, %v6112_v47  ;;  %v609_v2 = vmul.f32 %v607_v55, %v6112_v47  ;;  %v672_v29 = vstv %s6215_s11  ;;  %s6274_s11 = sld [smem:[#allocation3 + $0x106]] }
  0xf6   : > { %400 = vrot.lane.b32.xlu0 %v398_v42, %s11235_s4  ;;  %392 = vrot.lane.b32.xlu1 %v390_v43, %s11235_s4  ;;  %v521_v42 = vrot.slane %v517_v30, 1  ;;  %v522_v43 = vrot.slane %v518_v31, 1  ;;  %v549_v61 = vsel %vm442_vm3, %v547_v48, %v548_v49  ;;  %v640_v30 = vsel %vm442_vm3, %v638_v17, %v639_v18 }
  0xf7   : > { %v495_v26 = vrot.slane %v491_v13, 1  ;;  %v496_v28 = vrot.slane %v492_v16, 1  ;;  %v613_v13 = vrot.slane %v609_v2, 1  ;;  %v646_v16 = vstv %s6201_s7  ;;  %s6265_s7 = sld [smem:[#allocation3 + $0x6d]] }
  0xf8   : > { %v523_v53 = vsel %vm442_vm3, %v521_v42, %v522_v43  ;;  %v647_v27 = vmul.f32 %v646_v16, %v6067_v21  ;;  %v711_v32 = vstv %s6220_s20  ;;  %v698_v33 = vstv %s6222_s21  ;;  %s6285_s20 = sld [smem:[#allocation3 + $0xd3]]  ;;  %s6292_s21 = sld [smem:[#allocation3 + $0x16c]] }
  0xf9   : > { %v497_v40 = vsel %vm442_vm3, %v495_v26, %v496_v28  ;;  %v648_v28 = vmul.f32 %v646_v16, %v6112_v47  ;;  %v712_v42 = vmul.f32 %v711_v32, %v6067_v21  ;;  %v713_v43 = vmul.f32 %v711_v32, %v6112_v47 }
  0xfa   : > { %416 = vrot.lane.b32.xlu0 %v414_v51, %s11235_s4  ;;  %408 = vrot.lane.b32.xlu1 %v406_v52, %s11235_s4  ;;  %v569_v51 = vmul.f32 %v568_v35, %v6067_v21  ;;  %v536_v52 = vsel %vm442_vm3, %v534_v37, %v535_v41  ;;  %v665_v35 = vrot.slane %v661_v23, 1  ;;  %v687_v37 = vmul.f32 %v685_v24, %v6112_v47 }
  0xfb   : > { %v651_v38 = vrot.slane %v647_v27, 1  ;;  %v652_v39 = vrot.slane %v648_v28, 1  ;;  %v674_v41 = vmul.f32 %v672_v29, %v6112_v47  ;;  %v737_v44 = vstv %s6232_s24  ;;  %s6299_s24 = sld [smem:[#allocation3 + $0x139]] }
  0xfc   : > { %v724_v45 = vstv %s6234_s25  ;;  %v699_v49 = vmul.f32 %v698_v33, %v6067_v21  ;;  %v700_v50 = vmul.f32 %v698_v33, %v6112_v47  ;;  %v717_v56 = vrot.slane %v713_v43, 1  ;;  %s6304_s25 = sld [smem:[#allocation3 + $0x3b]] }
  0xfd   : > { %v678_v54 = vrot.slane %v674_v41, 1  ;;  %v739_v60 = vmul.f32 %v737_v44, %v6112_v47  ;;  %v839_v2 = vstv %s6257_s30  ;;  %v878_v5 = vstv %s6259_s6  ;;  %s6316_s30 = sld [smem:[#allocation3 + $0xa1]]  ;;  %s6318_s6 = sld [smem:[#allocation3 + $0x6e]] }
  0xfe   : > { %432 = vrot.lane.b32.xlu0 %v430_v63, %s11235_s4  ;;  %424 = vrot.lane.b32.xlu1 %v422_v0, %s11235_s4  ;;  %v573_v63 = vrot.slane %v569_v51, 1  ;;  %v608_v0 = vmul.f32 %v607_v55, %v6067_v21  ;;  %v653_v51 = vsel %vm442_vm3, %v651_v38, %v652_v39  ;;  %v716_v55 = vrot.slane %v712_v42, 1  ;;  %s6494_s4 = sld [smem:[#allocation3 + $0xb]] }
  0xff   : > { %v703_v58 = vrot.slane %v699_v49, 1  ;;  %v704_v59 = vrot.slane %v700_v50, 1  ;;  %v865_v6 = vstv %s6265_s7  ;;  %v880_v16 = vmul.f32 %v878_v5, %v6112_v47  ;;  %s6337_s7 = sld [smem:[#allocation3 + $0x107]] }
 0x100   : > { %v612_v9 = vrot.slane %v608_v0, 1  ;;  %v575_v12 = vsel %vm442_vm3, %v573_v63, %v574_v1  ;;  %v726_v0 = vmul.f32 %v724_v45, %v6112_v47  ;;  %v852_v1 = vstv %s6253_s29  ;;  %s6306_s29 = sld [smem:[#allocation3 + $0x8]] }
 0x101   : > { %v904_v17 = vstv %s6274_s11  ;;  %v891_v27 = vstv %s6285_s20  ;;  %v917_v39 = vstv %s6299_s24  ;;  %s6341_s11 = sld [smem:[#allocation3 + $0xd4]]  ;;  %s6347_s20 = sld [smem:[#allocation3 + $0x16d]] }
 0x102   : > { %459 = vrot.lane.b32.xlu0 %v458_v14, %s11233_s5  ;;  %446 = vrot.lane.b32.xlu1 %v445_v15, %s11233_s5  ;;  %v599_v14 = vrot.slane %v595_v3, 1  ;;  %v600_v15 = vrot.slane %v596_v4, 1  ;;  %v614_v25 = vsel %vm442_vm3, %v612_v9, %v613_v13  ;;  %v718_v3 = vsel %vm442_vm3, %v716_v55, %v717_v56  ;;  %s6358_s24 = sld [smem:[#allocation3 + $0x3c]] }
 0x103   : > { %v730_v11 = vrot.slane %v726_v0, 1  ;;  %v840_v13 = vmul.f32 %v839_v2, %v6067_v21  ;;  %v906_v33 = vmul.f32 %v904_v17, %v6112_v47  ;;  %v893_v38 = vmul.f32 %v891_v27, %v6112_v47 }
 0x104   : > { %v601_v26 = vsel %vm442_vm3, %v599_v14, %v600_v15  ;;  %v841_v14 = vmul.f32 %v839_v2, %v6112_v47  ;;  %v879_v15 = vmul.f32 %v878_v5, %v6067_v21  ;;  %v956_v42 = vstv %s6304_s25  ;;  %s6362_s25 = sld [smem:[#allocation3 + $0x9]] }
 0x105   : > { %v897_v50 = vrot.slane %v893_v38, 2  ;;  %v982_v55 = vstv %s6316_s30  ;;  %v969_v56 = vstv %s6318_s6  ;;  %s6383_s30 = sld [smem:[#allocation3 + $0x6f]]  ;;  %s6389_s6 = sld [smem:[#allocation3 + $0x108]] }
 0x106   : > { %485 = vrot.lane.b32.xlu0 %v484_v19, %s11233_s5  ;;  %472 = vrot.lane.b32.xlu1 %v471_v20, %s11233_s5  ;;  %v660_v19 = vmul.f32 %v659_v7, %v6067_v21  ;;  %v625_v20 = vrot.slane %v621_v10, 1  ;;  %v705_v7 = vsel %vm442_vm3, %v703_v58, %v704_v59  ;;  %v853_v10 = vmul.f32 %v852_v1, %v6067_v21 }
 0x107   : > { %v883_v28 = vrot.slane %v879_v15, 2  ;;  %v943_v43 = vstv %s6306_s29  ;;  %v1034_v15 = vstv %s6347_s20  ;;  %s6381_s29 = sld [smem:[#allocation3 + $0xa2]]  ;;  %s6405_s20 = sld [smem:[#allocation3 + $0x13b]] }
 0x108   : > { %v664_v31 = vrot.slane %v660_v19, 1  ;;  %v627_v34 = vsel %vm442_vm3, %v625_v20, %v626_v22  ;;  %v857_v19 = vrot.slane %v853_v10, 2  ;;  %v866_v20 = vmul.f32 %v865_v6, %v6067_v21 }
 0x109   : > { %v867_v22 = vmul.f32 %v865_v6, %v6112_v47  ;;  %v944_v59 = vmul.f32 %v943_v43, %v6067_v21  ;;  %v984_v6 = vmul.f32 %v982_v55, %v6112_v47  ;;  %v971_v10 = vmul.f32 %v969_v56, %v6112_v47 }
 0x10a   : > { %511 = vrot.lane.b32.xlu0 %v510_v36, %s11233_s5  ;;  %498 = vrot.lane.b32.xlu1 %v497_v40, %s11233_s5  ;;  %v686_v36 = vmul.f32 %v685_v24, %v6067_v21  ;;  %v673_v40 = vmul.f32 %v672_v29, %v6067_v21  ;;  %v666_v46 = vsel %vm442_vm3, %v664_v31, %v665_v35  ;;  %v884_v29 = vrot.slane %v880_v16, 2 }
 0x10b   : > { %v870_v31 = vrot.slane %v866_v20, 2  ;;  %v871_v32 = vrot.slane %v867_v22, 2  ;;  %v975_v22 = vrot.slane %v971_v10, 2 }
 0x10c   : > { %v690_v48 = vrot.slane %v686_v36, 1 }
 0x10e   : > { %537 = vrot.lane.b32.xlu0 %v536_v52, %s11233_s5  ;;  %524 = vrot.lane.b32.xlu1 %v523_v53, %s11233_s5  ;;  %v691_v52 = vrot.slane %v687_v37, 1  ;;  %v677_v53 = vrot.slane %v673_v40, 1  ;;  %v892_v37 = vmul.f32 %v891_v27, %v6067_v21  ;;  %v885_v40 = vsel %vm755_vm4, %v883_v28, %v884_v29 }
 0x10f   : > { %v1036_v27 = vmul.f32 %v1034_v15, %v6112_v47  ;;  %v1060_v29 = vstv %s6358_s24  ;;  %s6425_s24 = sld [smem:[#allocation3 + $0xa]] }
 0x110   : > { %v692_v62 = vsel %vm442_vm3, %v690_v48, %v691_v52  ;;  %v679_v63 = vsel %vm442_vm3, %v677_v53, %v678_v54  ;;  %v896_v49 = vrot.slane %v892_v37, 2  ;;  %v919_v52 = vmul.f32 %v917_v39, %v6112_v47 }
 0x111   : > { %v957_v53 = vmul.f32 %v956_v42, %v6067_v21  ;;  %v958_v54 = vmul.f32 %v956_v42, %v6112_v47 }
 0x112   : > { %563 = vrot.lane.b32.xlu0 %v562_v57, %s11298_s10  ;;  %550 = vrot.lane.b32.xlu1 %v549_v61, %s11298_s10  ;;  %v738_v57 = vmul.f32 %v737_v44, %v6067_v21  ;;  %v725_v61 = vmul.f32 %v724_v45, %v6067_v21  ;;  %v872_v44 = vsel %vm755_vm4, %v870_v31, %v871_v32  ;;  %v910_v45 = vrot.slane %v906_v33, 2 }
 0x113   : > { %v923_v0 = vrot.slane %v919_v52, 2  ;;  %v962_v2 = vrot.slane %v958_v54, 2  ;;  %v1047_v33 = vstv %s6362_s25  ;;  %s6431_s25 = sld [smem:[#allocation3 + $0xa3]] }
 0x114   : > { %v742_v4 = vrot.slane %v738_v57, 1  ;;  %v729_v9 = vrot.slane %v725_v61, 1  ;;  %v898_v61 = vsel %vm755_vm4, %v896_v49, %v897_v50  ;;  %v1086_v49 = vstv %s6381_s29  ;;  %s6433_s29 = sld [smem:[#allocation3 + $0x70]] }
 0x115   : > { %v1073_v50 = vstv %s6383_s30  ;;  %s6441_s30 = sld [smem:[#allocation3 + $0x33]] }
 0x116   : > { %589 = vrot.lane.b32.xlu0 %v588_v8, %s11298_s10  ;;  %576 = vrot.lane.b32.xlu1 %v575_v12, %s11298_s10  ;;  %v743_v8 = vrot.slane %v739_v60, 1  ;;  %v854_v12 = vmul.f32 %v852_v1, %v6112_v47  ;;  %v731_v23 = vsel %vm442_vm3, %v729_v9, %v730_v11  ;;  %v945_v60 = vmul.f32 %v943_v43, %v6112_v47 }
 0x117   : > { %v961_v1 = vrot.slane %v957_v53, 2  ;;  %v1008_v11 = vstv %s6337_s7  ;;  %s6391_s7 = sld [smem:[#allocation3 + $0xd5]]  ;;  %v1062_v43 = vmul.f32 %v1060_v29, %v6112_v47  ;;  %v1112_v53 = vstv %s6389_s6  ;;  %s6443_s6 = sld [smem:[#allocation3 + $0x109]] }
 0x118   : > { %v744_v18 = vsel %vm442_vm3, %v742_v4, %v743_v8  ;;  %v858_v24 = vrot.slane %v854_v12, 2  ;;  %v948_v4 = vrot.slane %v944_v59, 2  ;;  %v949_v5 = vrot.slane %v945_v60, 2 }
 0x119   : > { %v995_v12 = vstv %s6341_s11  ;;  %v1009_v20 = vmul.f32 %v1008_v11, %v6067_v21  ;;  %s6403_s11 = sld [smem:[#allocation3 + $0x16e]]  ;;  %v1087_v59 = vmul.f32 %v1086_v49, %v6067_v21  ;;  %v1088_v60 = vmul.f32 %v1086_v49, %v6112_v47 }
 0x11a   : > { %615 = vrot.lane.b32.xlu0 %v614_v25, %s11298_s10  ;;  %602 = vrot.lane.b32.xlu1 %v601_v26, %s11298_s10  ;;  %v844_v25 = vrot.slane %v840_v13, 2  ;;  %v845_v26 = vrot.slane %v841_v14, 2  ;;  %v859_v35 = vsel %vm755_vm4, %v857_v19, %v858_v24  ;;  %v963_v13 = vsel %vm755_vm4, %v961_v1, %v962_v2 }
 0x11b   : > { %v996_v24 = vmul.f32 %v995_v12, %v6067_v21  ;;  %v1013_v31 = vrot.slane %v1009_v20, 2 }
 0x11c   : > { %v846_v36 = vsel %vm755_vm4, %v844_v25, %v845_v26  ;;  %v997_v25 = vmul.f32 %v995_v12, %v6112_v47  ;;  %v1035_v26 = vmul.f32 %v1034_v15, %v6067_v21 }
 0x11d   : > { %v1099_v54 = vstv %s6391_s7  ;;  %s6445_s7 = sld [smem:[#allocation3 + $0xd6]] }
 0x11e   : > { %641 = vrot.lane.b32.xlu0 %v640_v30, %s11298_s10  ;;  %628 = vrot.lane.b32.xlu1 %v627_v34, %s11298_s10  ;;  %v905_v30 = vmul.f32 %v904_v17, %v6067_v21  ;;  %v930_v34 = vstv %s6292_s21  ;;  %s6349_s21 = sld [smem:[#allocation3 + $0x13a]]  ;;  %v950_v17 = vsel %vm755_vm4, %v948_v4, %v949_v5  ;;  %v1001_v37 = vrot.slane %v997_v25, 2 }
 0x11f   : > { %v932_v48 = vmul.f32 %v930_v34, %v6112_v47  ;;  %v1039_v38 = vrot.slane %v1035_v26, 2  ;;  %v1100_v1 = vmul.f32 %v1099_v54, %v6067_v21  ;;  %v1101_v2 = vmul.f32 %v1099_v54, %v6112_v47 }
 0x120   : > { %v909_v41 = vrot.slane %v905_v30, 2  ;;  %v1138_v5 = vstv %s6403_s11  ;;  %s6457_s11 = sld [smem:[#allocation3]]  ;;  %v1151_v25 = vstv %s6425_s24  ;;  %s6484_s24 = sld [smem:[#allocation3 + $0xff]] }
 0x122   : > { %667 = vrot.lane.b32.xlu0 %v666_v46, %s11237_s9  ;;  %654 = vrot.lane.b32.xlu1 %v653_v51, %s11237_s9  ;;  %v931_v46 = vmul.f32 %v930_v34, %v6067_v21  ;;  %v918_v51 = vmul.f32 %v917_v39, %v6067_v21  ;;  %v911_v57 = vsel %vm755_vm4, %v909_v41, %v910_v45  ;;  %v1040_v39 = vrot.slane %v1036_v27, 2 }
 0x123   : > { %v1061_v41 = vmul.f32 %v1060_v29, %v6067_v21  ;;  %v1049_v45 = vmul.f32 %v1047_v33, %v6112_v47  ;;  %v1177_v29 = vstv %s6433_s29  ;;  %s6492_s29 = sld [smem:[#allocation3 + $0x3e]] }
 0x124   : > { %v935_v58 = vrot.slane %v931_v46, 2  ;;  %v1021_v16 = vstv %s6349_s21  ;;  %s6423_s21 = sld [smem:[#allocation3 + $0x3d]] }
 0x125   : > { %v1022_v28 = vmul.f32 %v1021_v16, %v6067_v21  ;;  %v1023_v32 = vmul.f32 %v1021_v16, %v6112_v47  ;;  %v1065_v52 = vrot.slane %v1061_v41, 2 }
 0x126   : > { %693 = vrot.lane.b32.xlu0 %v692_v62, %s11237_s9  ;;  %680 = vrot.lane.b32.xlu1 %v679_v63, %s11237_s9  ;;  %v936_v62 = vrot.slane %v932_v48, 2  ;;  %v922_v63 = vrot.slane %v918_v51, 2  ;;  %v1041_v51 = vsel %vm755_vm4, %v1039_v38, %v1040_v39  ;;  %v1152_v38 = vmul.f32 %v1151_v25, %v6067_v21 }
 0x127   : > { %v1027_v42 = vrot.slane %v1023_v32, 2  ;;  %v1153_v39 = vmul.f32 %v1151_v25, %v6112_v47 }
 0x128   : > { %v937_v8 = vsel %vm755_vm4, %v935_v58, %v936_v62  ;;  %v924_v9 = vsel %vm755_vm4, %v922_v63, %v923_v0  ;;  %v1053_v58 = vrot.slane %v1049_v45, 2  ;;  %v1075_v62 = vmul.f32 %v1073_v50, %v6112_v47 }
 0x129   : > { %v1113_v63 = vmul.f32 %v1112_v53, %v6067_v21  ;;  %v1114_v0 = vmul.f32 %v1112_v53, %v6112_v47  ;;  %v1156_v54 = vrot.slane %v1152_v38, 2 }
 0x12a   : > { %719 = vrot.lane.b32.xlu0 %v718_v3, %s11237_s9  ;;  %706 = vrot.lane.b32.xlu1 %v705_v7, %s11237_s9  ;;  %v983_v3 = vmul.f32 %v982_v55, %v6067_v21  ;;  %v970_v7 = vmul.f32 %v969_v56, %v6067_v21  ;;  %v1066_v56 = vrot.slane %v1062_v43, 2  ;;  %v1079_v10 = vrot.slane %v1075_v62, 2 }
 0x12b   : > { %v1118_v12 = vrot.slane %v1114_v0, 2  ;;  %v1216_v43 = vstv %s6443_s6  ;;  %s6506_s6 = sld [smem:[#allocation3 + $0xcc]] }
 0x12c   : > { %v987_v14 = vrot.slane %v983_v3, 2  ;;  %v974_v19 = vrot.slane %v970_v7, 2  ;;  %v1067_v3 = vsel %vm755_vm4, %v1065_v52, %v1066_v56  ;;  %v1091_v7 = vrot.slane %v1087_v59, 2 }
 0x12d   : > { %v285_v56 = vstv %s6457_s11  ;;  %s7130_s11 = sld [smem:[#allocation3 + $0xab]] }
 0x12e   : > { %745 = vrot.lane.b32.xlu0 %v744_v18, %s11237_s9  ;;  %732 = vrot.lane.b32.xlu1 %v731_v23, %s11237_s9  ;;  %v988_v18 = vrot.slane %v984_v6, 2  ;;  %v1010_v23 = vmul.f32 %v1008_v11, %v6112_v47  ;;  %v976_v34 = vsel %vm755_vm4, %v974_v19, %v975_v22  ;;  %v1125_v6 = vstv %s6405_s20  ;;  %s6461_s20 = sld [smem:[#allocation3 + $0x99]] }
 0x12f   : > { %v1117_v11 = vrot.slane %v1113_v63, 2  ;;  %v1126_v19 = vmul.f32 %v1125_v6, %v6067_v21  ;;  %v1127_v20 = vmul.f32 %v1125_v6, %v6112_v47 }
 0x130   : > { %v989_v30 = vsel %vm755_vm4, %v987_v14, %v988_v18  ;;  %v1105_v14 = vrot.slane %v1101_v2, 2  ;;  %v1140_v18 = vmul.f32 %v1138_v5, %v6112_v47  ;;  %v1218_v2 = vmul.f32 %v1216_v43, %v6112_v47 }
 0x131   : > { %v1119_v26 = vsel %vm755_vm4, %v1117_v11, %v1118_v12  ;;  %v1269_v11 = vstv %s6492_s29  ;;  %v1255_v12 = vstv %s6494_s4  ;;  %s6559_s4 = sld [smem:[#allocation3 + $0x13d]]  ;;  %s6567_s29 = sld [smem:[#allocation3 + $0xc]] }
 0x132   : > { %860 = vrot.lane.b32.xlu0 %v859_v35, %s11233_s5  ;;  %847 = vrot.lane.b32.xlu1 %v846_v36, %s11233_s5  ;;  %v1014_v35 = vrot.slane %v1010_v23, 2  ;;  %v1000_v36 = vrot.slane %v996_v24, 2  ;;  %v1164_v24 = vstv %s6423_s21  ;;  %s6479_s21 = sld [smem:[#allocation3 + $0x16f]] }
 0x134   : > { %v1015_v46 = vsel %vm755_vm4, %v1013_v31, %v1014_v35  ;;  %v1002_v48 = vsel %vm755_vm4, %v1000_v36, %v1001_v37  ;;  %v1131_v35 = vrot.slane %v1127_v20, 2  ;;  %v1165_v36 = vmul.f32 %v1164_v24, %v6067_v21  ;;  %v6547_v20 = vld [vmem:[%s6064_s28] sm:$0xff] }
 0x135   : > { %v1166_v37 = vmul.f32 %v1164_v24, %v6112_v47 }
 0x136   : > { %886 = vrot.lane.b32.xlu0 %v885_v40, %s11233_s5  ;;  %873 = vrot.lane.b32.xlu1 %v872_v44, %s11233_s5  ;;  %v1026_v40 = vrot.slane %v1022_v28, 2  ;;  %v1048_v44 = vmul.f32 %v1047_v33, %v6067_v21  ;;  %v1190_v28 = vstv %s6431_s25  ;;  %v1144_v33 = vrot.slane %v1140_v18, 2  ;;  %s6486_s25 = sld [smem:[#allocation3 + $0x13c]] }
 0x137   : > { %v1191_v41 = vmul.f32 %v1190_v28, %v6067_v21  ;;  %v1169_v52 = vrot.slane %v1165_v36, 2  ;;  %v1170_v53 = vrot.slane %v1166_v37, 2  ;;  %v1222_v18 = vrot.slane %v1218_v2, 2 }
 0x138   : > { %v1028_v55 = vsel %vm755_vm4, %v1026_v40, %v1027_v42  ;;  %v288_v40 = vstv %s6441_s30  ;;  %v1192_v42 = vmul.f32 %v1190_v28, %v6112_v47  ;;  %s7127_s30 = sld [smem:[#allocation3 + $0x12]] }
 0x139   : > { %v1195_v59 = vrot.slane %v1191_v41, 2  ;;  %v1257_v41 = vmul.f32 %v1255_v12, %v6112_v47 }
 0x13a   : > { %912 = vrot.lane.b32.xlu0 %v911_v57, %s11233_s5  ;;  %899 = vrot.lane.b32.xlu1 %v898_v61, %s11233_s5  ;;  %v1052_v57 = vrot.slane %v1048_v44, 2  ;;  %v1074_v61 = vmul.f32 %v1073_v50, %v6067_v21  ;;  %v1203_v44 = vstv %s6445_s7  ;;  %v1178_v50 = vmul.f32 %v1177_v29, %v6067_v21  ;;  %s6510_s7 = sld [smem:[#allocation3 + $0x165]] }
 0x13b   : > { %v1205_v6 = vmul.f32 %v1203_v44, %v6112_v47 }
 0x13c   : > { %v1054_v4 = vsel %vm755_vm4, %v1052_v57, %v1053_v58  ;;  %v294_v57 = vstv %s6461_s20  ;;  %v1182_v0 = vrot.slane %v1178_v50, 2  ;;  %v1321_v50 = vstv %s6534_s23  ;;  %s6617_s23 = sld [smem:[#allocation3 + $0xd]]  ;;  %s11375_s20 = smov 124  }
 0x13e   : > { %938 = vrot.lane.b32.xlu0 %v937_v8, %s11233_s5  ;;  %925 = vrot.lane.b32.xlu1 %v924_v9, %s11233_s5  ;;  %v1092_v8 = vrot.slane %v1088_v60, 2  ;;  %v1078_v9 = vrot.slane %v1074_v61, 2  ;;  %s6465_s5 = sld [smem:[#allocation3 + $0x66]]  ;;  %v1196_v60 = vrot.slane %v1192_v42, 2  ;;  %v1217_v61 = vmul.f32 %v1216_v43, %v6067_v21 }
 0x140   : > { %v1093_v22 = vsel %vm755_vm4, %v1091_v7, %v1092_v8  ;;  %v1080_v23 = vsel %vm755_vm4, %v1078_v9, %v1079_v10  ;;  %v1242_v7 = vstv %s6479_s21  ;;  %v300_v8 = vstv %s6484_s24  ;;  %s6550_s21 = sld [smem:[#allocation3 + $0x170]] }
 0x141   : > { %v1229_v9 = vstv %s6486_s25  ;;  %v1221_v10 = vrot.slane %v1217_v61, 2  ;;  %v1244_v24 = vmul.f32 %v1242_v7, %v6112_v47  ;;  %s6561_s25 = sld [smem:[#allocation3 + $0x3f]]  ;;  %v6598_v61 = vld [vmem:[%s6064_s28 + $0x8] sm:$0xff]  ;;  %s7139_s24 = sld [smem:[#allocation3 + $0x78]] }
 0x142   : > { %964 = vrot.lane.b32.xlu0 %v963_v13, %s11298_s10  ;;  %951 = vrot.lane.b32.xlu1 %v950_v17, %s11298_s10  ;;  %v1104_v13 = vrot.slane %v1100_v1, 2  ;;  %v1139_v17 = vmul.f32 %v1138_v5, %v6067_v21  ;;  %v1230_v25 = vmul.f32 %v6547_v20, %v1229_v9  ;;  %s6689_s28 = sld [smem:[#allocation3 + $0x13f]] }
 0x143   : > { %v1223_v37 = vsel %vm755_vm4, %v1221_v10, %v1222_v18  ;;  %v1248_v43 = vrot.slane %v1244_v24, 2  ;;  %v1360_v10 = vstv %s6567_s29  ;;  %s6636_s29 = sld [smem:[#allocation3 + $0xa6]] }
 0x144   : > { %v1106_v27 = vsel %vm755_vm4, %v1104_v13, %v1105_v14  ;;  %v1143_v32 = vrot.slane %v1139_v17, 2  ;;  %v291_v58 = vstv %s6465_s5  ;;  %s7058_s5 = sld [smem:[#allocation3 + $0x175]] }
 0x146   : > { %990 = vrot.lane.b32.xlu0 %v989_v30, %s11298_s10  ;;  %977 = vrot.lane.b32.xlu1 %v976_v34, %s11298_s10  ;;  %v1130_v34 = vrot.slane %v1126_v19, 2 }
 0x148   : > { %v1132_v49 = vsel %vm755_vm4, %v1130_v34, %v1131_v35  ;;  %v1295_v34 = vstv %s6516_s1  ;;  %s6583_s1 = sld [smem:[#allocation3 + $0x72]] }
 0x14a   : > { %1016 = vrot.lane.b32.xlu0 %v1015_v46, %s11298_s10  ;;  %1003 = vrot.lane.b32.xlu1 %v1002_v48, %s11298_s10  ;;  %v1145_v48 = vsel %vm755_vm4, %v1143_v32, %v1144_v33  ;;  %v1270_v32 = vmul.f32 %v6547_v20, %v1269_v11  ;;  %v1271_v33 = vmul.f32 %v1269_v11, %v6112_v47  ;;  %v1399_v11 = vstv %s6569_s18  ;;  %s6726_s18 = sld [smem:[#allocation3 + $0xf]] }
 0x14e   : > { %1042 = vrot.lane.b32.xlu0 %v1041_v51, %s11298_s10  ;;  %1029 = vrot.lane.b32.xlu1 %v1028_v55, %s11298_s10  ;;  %v1179_v51 = vmul.f32 %v1177_v29, %v6112_v47  ;;  %v1157_v55 = vrot.slane %v1153_v39, 2  ;;  %v1256_v39 = vmul.f32 %v6547_v20, %v1255_v12 }
 0x150   : > { %v1183_v1 = vrot.slane %v1179_v51, 2  ;;  %v1158_v5 = vsel %vm755_vm4, %v1156_v54, %v1157_v55  ;;  %v1274_v51 = vrot.slane %v1270_v32, 3 }
 0x152   : > { %1068 = vrot.lane.b32.xlu0 %v1067_v3, %s11237_s9  ;;  %1055 = vrot.lane.b32.xlu1 %v1054_v4, %s11237_s9  ;;  %v1204_v3 = vmul.f32 %v1203_v44, %v6067_v21  ;;  %v1171_v4 = vsel %vm755_vm4, %v1169_v52, %v1170_v53  ;;  %v1197_v21 = vsel %vm755_vm4, %v1195_v59, %v1196_v60  ;;  %v1234_v44 = vrot.slane %v1230_v25, 2 }
 0x153   : > { %v1184_v17 = vsel %vm755_vm4, %v1182_v0, %v1183_v1  ;;  %v1296_v52 = vmul.f32 %v6547_v20, %v1295_v34  ;;  %v1308_v53 = vstv %s6539_s22  ;;  %v1261_v59 = vrot.slane %v1256_v39, 3  ;;  %s6612_s22 = sld [smem:[#allocation3 + $0x40]] }
 0x154   : > { %v6447_v15 = vpop.permute.xlu0 %320  ;;  %v6449_v16 = vpop.permute.xlu1 %312  ;;  %v1208_v19 = vrot.slane %v1204_v3, 2  ;;  %v1262_v60 = vrot.slane %v1257_v41, 3  ;;  %v1297_v0 = vmul.f32 %v6598_v61, %v1295_v34  ;;  %v1347_v1 = vstv %s6550_s21  ;;  %s6628_s21 = sld [smem:[#allocation3 + $0x39]] }
 0x155   : > { %v1310_v32 = vmul.f32 %v6598_v61, %v1308_v53  ;;  %v1425_v34 = vstv %s6585_s17  ;;  %v1412_v39 = vstv %s6589_s8  ;;  %v1451_v41 = vstv %s6591_s14  ;;  %s6746_s17 = sld [smem:[#allocation3 + $0x75]]  ;;  %s6762_s8 = sld [smem:[#allocation3 + $0xdb]] }
 0x156   : > { %1094 = vrot.lane.b32.xlu0 %v1093_v22, %s11237_s9  ;;  %1081 = vrot.lane.b32.xlu1 %v1080_v23, %s11237_s9  ;;  %v1243_v22 = vmul.f32 %v6547_v20, %v1242_v7  ;;  %v1209_v23 = vrot.slane %v1205_v6, 2  ;;  %v1334_v6 = vstv %s6559_s4  ;;  %v1373_v7 = vstv %s6561_s25  ;;  %s11301_s4 = smov 127   ;;  %s6634_s25 = sld [smem:[#allocation3 + $0x6]] }
 0x157   : > { %v1263_v18 = vsel %vm1260_vm5, %v1261_v59, %v1262_v60  ;;  %s6778_s14 = sld [smem:[#allocation3 + $0x141]] }
 0x158   : > { %v6471_v30 = vpop.permute.xlu0 %336  ;;  %v6473_v31 = vpop.permute.xlu1 %328  ;;  %v1247_v38 = vrot.slane %v1243_v22, 2  ;;  %v1210_v42 = vsel %vm755_vm4, %v1208_v19, %v1209_v23  ;;  %v1301_v19 = vrot.slane %v1297_v0, 3  ;;  %v1322_v22 = vmul.f32 %v6547_v20, %v1321_v50 }
 0x159   : > { %v1323_v23 = vmul.f32 %v6598_v61, %v1321_v50  ;;  %v1336_v50 = vmul.f32 %v6598_v61, %v1334_v6  ;;  %v1477_v60 = vstv %s6612_s22  ;;  %s7159_s22 = sld [smem:[#allocation3 + $0x177]] }
 0x15a   : > { %1120 = vrot.lane.b32.xlu0 %v1119_v26, %s11237_s9  ;;  %1107 = vrot.lane.b32.xlu1 %v1106_v27, %s11237_s9  ;;  %v1231_v26 = vmul.f32 %v1229_v9, %v6112_v47  ;;  %v1275_v47 = vrot.slane %v1271_v33, 3  ;;  %v1249_v2 = vsel %vm755_vm4, %v1247_v38, %v1248_v43  ;;  %v1386_v33 = vstv %s6583_s1  ;;  %s6728_s1 = sld [smem:[#allocation3 + $0xa8]] }
 0x15b   : > { %v1349_v38 = vmul.f32 %v6598_v61, %v1347_v1 }
 0x15c   : > { %v6496_v45 = vpop.permute.xlu0 %352  ;;  %v6498_v46 = vpop.permute.xlu1 %344  ;;  %v1276_v9 = vsel %vm1260_vm5, %v1274_v51, %v1275_v47  ;;  %v1327_v47 = vrot.slane %v1323_v23, 3  ;;  %v1362_v23 = vmul.f32 %v6598_v61, %v1360_v10 }
 0x15e   : > { %1146 = vrot.lane.b32.xlu0 %v1145_v48, %s11237_s9  ;;  %1133 = vrot.lane.b32.xlu1 %v1132_v49, %s11237_s9  ;;  %s11300_s9 = smov 124   ;;  %v1235_v48 = vrot.slane %v1231_v26, 2  ;;  %v1282_v49 = vstv %s6532_s2  ;;  %s6610_s2 = sld [smem:[#allocation3 + $0x13e]]  ;;  %v1309_v26 = vmul.f32 %v6547_v20, %v1308_v53  ;;  %v1314_v53 = vrot.slane %v1310_v32, 3 }
 0x160   : > { %v6518_v62 = vpop.permute.xlu0 %368  ;;  %v6520_v63 = vpop.permute.xlu1 %360  ;;  %v1236_v3 = vsel %vm755_vm4, %v1234_v44, %v1235_v48  ;;  %v1326_v48 = vrot.slane %v1322_v22, 3 }
 0x162   : > { %1172 = vrot.lane.b32.xlu0 %v1171_v4, %s11300_s9  ;;  %1159 = vrot.lane.b32.xlu1 %v1158_v5, %s11300_s9  ;;  %v1283_v4 = vmul.f32 %v6547_v20, %v1282_v49  ;;  %v1284_v5 = vmul.f32 %v6598_v61, %v1282_v49  ;;  %v1335_v49 = vmul.f32 %v6547_v20, %v1334_v6 }
 0x164   : > { %v6541_v13 = vpop.permute.xlu0 %384  ;;  %v6543_v14 = vpop.permute.xlu1 %376  ;;  %v1287_v24 = vrot.slane %v1283_v4, 3  ;;  %v1288_v25 = vrot.slane %v1284_v5, 3  ;;  %v1438_v59 = vstv %s6610_s2  ;;  %v1339_v6 = vrot.slane %v1335_v49, 3  ;;  %s6806_s2 = sld [smem:[#allocation3 + $0x10]] }
 0x166   : > { %1198 = vrot.lane.b32.xlu0 %v1197_v21, %s11300_s9  ;;  %1185 = vrot.lane.b32.xlu1 %v1184_v17, %s11300_s9  ;;  %v1300_v21 = vrot.slane %v1296_v52, 3  ;;  %v1289_v51 = vsel %vm1260_vm5, %v1287_v24, %v1288_v25  ;;  %v1313_v52 = vrot.slane %v1309_v26, 3  ;;  %v762_v24 = vstv %s6628_s21  ;;  %s11376_s21 = sld [smem:[#allocation25_spill]] }
 0x167   : > { %v750_v25 = vstv %s6634_s25  ;;  %v1503_v26 = vstv %s6636_s29  ;;  %s7175_s25 = sld [smem:[#allocation3 + $0x13]]  ;;  %s7177_s29 = sld [smem:[#allocation3 + $0x47]] }
 0x168   : > { %v6571_v35 = vpop.permute.xlu0 %400  ;;  %v6573_v36 = vpop.permute.xlu1 %392  ;;  %v1302_v44 = vsel %vm1260_vm5, %v1300_v21, %v1301_v19  ;;  %v1375_v21 = vmul.f32 %v6598_v61, %v1373_v7  ;;  %v1328_v19 = vsel %vm1260_vm5, %v1326_v48, %v1327_v47  ;;  %v1315_v22 = vsel %vm1260_vm5, %v1313_v52, %v1314_v53 }
 0x169   : > { %v1366_v47 = vrot.slane %v1362_v23, 3  ;;  %v1401_v52 = vmul.f32 %v6598_v61, %v1399_v11  ;;  %v1387_v53 = vmul.f32 %v6547_v20, %v1386_v33  ;;  %v1414_v23 = vmul.f32 %v6598_v61, %v1412_v39 }
 0x16a   : > { %1224 = vrot.lane.b32.xlu0 %v1223_v37, %s11300_s9  ;;  %1211 = vrot.lane.b32.xlu1 %v1210_v42, %s11300_s9  ;;  %v1348_v37 = vmul.f32 %v6547_v20, %v1347_v1  ;;  %v1353_v1 = vrot.slane %v1349_v38, 3  ;;  %v1379_v49 = vrot.slane %v1375_v21, 3 }
 0x16c   : > { %v6593_v54 = vpop.permute.xlu0 %416  ;;  %v6595_v55 = vpop.permute.xlu1 %408  ;;  %v1352_v0 = vrot.slane %v1348_v37, 3  ;;  %v1490_v37 = vstv %s6642_s27  ;;  %s6922_s27 = sld [smem:[#allocation3 + $0x76]] }
 0x16e   : > { %1250 = vrot.lane.b32.xlu0 %v1249_v2, %s11300_s9  ;;  %1237 = vrot.lane.b32.xlu1 %v1236_v3, %s11300_s9  ;;  %v1374_v2 = vmul.f32 %v6547_v20, %v1373_v7  ;;  %v1464_v3 = vstv %s6617_s23  ;;  %v1354_v7 = vsel %vm1260_vm5, %v1352_v0, %v1353_v1  ;;  %s6699_s9 = sld [smem:[#allocation3 + $0x16b]]  ;;  %v1388_v0 = vmul.f32 %v6598_v61, %v1386_v33  ;;  %s7165_s23 = sld [smem:[#allocation3 + $0x144]] }
 0x16f   : > { %v1391_v33 = vrot.slane %v1387_v53, 3  ;;  %v1466_v29 = vmul.f32 %v6598_v61, %v1464_v3 }
 0x170   : > { %v6619_v12 = vpop.permute.xlu0 %432  ;;  %v6621_v17 = vpop.permute.xlu1 %424  ;;  %v1378_v32 = vrot.slane %v1374_v2, 3  ;;  %v1529_v2 = vstv %s6660_s3  ;;  %v1392_v1 = vrot.slane %v1388_v0, 3  ;;  %s11312_s3 = smov 125  }
 0x171   : > { %v1470_v27 = vrot.slane %v1466_v29, 3 }
 0x172   : > { %1277 = vrot.lane.b32.xlu0 %v1276_v9, %s11301_s4  ;;  %1264 = vrot.lane.b32.xlu1 %v1263_v18, %s11301_s4  ;;  %v1340_v9 = vrot.slane %v1336_v50, 3  ;;  %v1361_v18 = vmul.f32 %v6547_v20, %v1360_v10  ;;  %v1439_v10 = vmul.f32 %v6547_v20, %v1438_v59 }
 0x174   : > { %v6646_v42 = vpop.permute.xlu0 %459  ;;  %v6648_v43 = vpop.permute.xlu1 %446  ;;  %v1341_v48 = vsel %vm1260_vm5, %v1339_v6, %v1340_v9  ;;  %v1365_v50 = vrot.slane %v1361_v18, 3  ;;  %11304 = sst [smem:[#allocation29_spill]] %s6699_s9  ;;  %v1427_v6 = vmul.f32 %v6598_v61, %v1425_v34  ;;  %v1516_v9 = vstv %s6664_s26  ;;  %s6780_s9 = sld [smem:[#allocation3 + $0x43]] }
 0x175   : > { %s6884_s26 = sld [smem:[#allocation3 + $0xa9]] }
 0x176   : > { %1303 = vrot.lane.b32.xlu0 %v1302_v44, %s11301_s4  ;;  %1290 = vrot.lane.b32.xlu1 %v1289_v51, %s11301_s4  ;;  %v1400_v51 = vmul.f32 %v6547_v20, %v1399_v11  ;;  %v1426_v11 = vmul.f32 %v6547_v20, %v1425_v34  ;;  %v1413_v34 = vmul.f32 %v6547_v20, %v1412_v39 }
 0x178   : > { %v6668_v4 = vpop.permute.xlu0 %485  ;;  %v6670_v5 = vpop.permute.xlu1 %472  ;;  %v1430_v39 = vrot.slane %v1426_v11, 3  ;;  %v1417_v0 = vrot.slane %v1413_v34, 3  ;;  %v1440_v34 = vmul.f32 %v6598_v61, %v1438_v59  ;;  %v1465_v59 = vmul.f32 %v6547_v20, %v1464_v3 }
 0x179   : > { %v1492_v3 = vmul.f32 %v6598_v61, %v1490_v37 }
 0x17a   : > { %1329 = vrot.lane.b32.xlu0 %v1328_v19, %s11301_s4  ;;  %1316 = vrot.lane.b32.xlu1 %v1315_v22, %s11301_s4  ;;  %v1380_v19 = vsel %vm1260_vm5, %v1378_v32, %v1379_v49  ;;  %v1404_v22 = vrot.slane %v1400_v51, 3  ;;  %v1555_v49 = vstv %s6684_s13  ;;  %v1431_v51 = vrot.slane %v1427_v6, 3  ;;  %s11317_s13 = sld [smem:[#allocation26_spill]] }
 0x17b   : > { %v1393_v6 = vsel %vm1260_vm5, %v1391_v33, %v1392_v1  ;;  %v1478_v32 = vmul.f32 %v6547_v20, %v1477_v60  ;;  %v1469_v28 = vrot.slane %v1465_v59, 3 }
 0x17c   : > { %v6691_v38 = vpop.permute.xlu0 %511  ;;  %v6693_v44 = vpop.permute.xlu1 %498  ;;  %v1432_v1 = vsel %vm1260_vm5, %v1430_v39, %v1431_v51  ;;  %v1479_v39 = vmul.f32 %v6598_v61, %v1477_v60  ;;  %v1443_v51 = vrot.slane %v1439_v10, 3  ;;  %v1504_v60 = vmul.f32 %v6547_v20, %v1503_v26 }
 0x17d   : > { %v1505_v10 = vmul.f32 %v6598_v61, %v1503_v26 }
 0x17e   : > { %1355 = vrot.lane.b32.xlu0 %v1354_v7, %s11301_s4  ;;  %1342 = vrot.lane.b32.xlu1 %v1341_v48, %s11301_s4  ;;  %v1367_v7 = vsel %vm1260_vm5, %v1365_v50, %v1366_v47  ;;  %v1405_v48 = vrot.slane %v1401_v52, 3  ;;  %s6748_s4 = sld [smem:[#allocation3 + $0x10e]]  ;;  %v1452_v50 = vmul.f32 %v6547_v20, %v1451_v41  ;;  %v1542_v47 = vstv %s6689_s28  ;;  %s11320_s28 = sld [smem:[#allocation27_spill]] }
 0x17f   : > { %v1483_v26 = vrot.slane %v1479_v39, 3  ;;  %v1508_v59 = vrot.slane %v1504_v60, 3  ;;  %v1509_v29 = vrot.slane %v1505_v10, 3  ;;  %v1517_v60 = vmul.f32 %v6547_v20, %v1516_v9 }
 0x180   : > { %v6730_v21 = vpop.permute.xlu0 %537  ;;  %v6732_v18 = vpop.permute.xlu1 %524  ;;  %v1406_v11 = vsel %vm1260_vm5, %v1404_v22, %v1405_v48  ;;  %v1456_v33 = vrot.slane %v1452_v50, 3  ;;  %v1444_v50 = vrot.slane %v1440_v34, 3  ;;  %v1518_v10 = vmul.f32 %v6598_v61, %v1516_v9 }
 0x181   : > { %v1521_v9 = vrot.slane %v1517_v60, 3 }
 0x182   : > { %1381 = vrot.lane.b32.xlu0 %v1380_v19, %s11298_s10  ;;  %1368 = vrot.lane.b32.xlu1 %v1367_v7, %s11298_s10  ;;  %v1418_v19 = vrot.slane %v1414_v23, 3  ;;  %v1453_v7 = vmul.f32 %v6598_v61, %v1451_v41  ;;  %v1445_v23 = vsel %vm1260_vm5, %v1443_v51, %v1444_v50 }
 0x184   : > { %v6754_v52 = vpop.permute.xlu0 %563  ;;  %v6756_v53 = vpop.permute.xlu1 %550  ;;  %v1457_v41 = vrot.slane %v1453_v7, 3  ;;  %v1491_v7 = vmul.f32 %v6547_v20, %v1490_v37  ;;  %v6831_v37 = vmul.f32 %v6547_v20, %v288_v40  ;;  %v1496_v40 = vrot.slane %v1492_v3, 3 }
 0x185   : > { %11305 = vst [vmem:[#allocation30_spill] sm:$0xff] %v6756_v53  ;;  %v6866_v3 = vmul.f32 %v6547_v20, %v291_v58  ;;  %v764_v58 = vmul.f32 %v6598_v61, %v762_v24 }
 0x186   : > { %1407 = vrot.lane.b32.xlu0 %v1406_v11, %s11298_s10  ;;  %1394 = vrot.lane.b32.xlu1 %v1393_v6, %s11298_s10  ;;  %v1419_v6 = vsel %vm1260_vm5, %v1417_v0, %v1418_v19  ;;  %v1482_v19 = vrot.slane %v1478_v32, 3  ;;  %v1495_v39 = vrot.slane %v1491_v7, 3  ;;  %v6861_v7 = vmul.f32 %v6547_v20, %v294_v57 }
 0x187   : > { %v763_v57 = vmul.f32 %v6547_v20, %v762_v24  ;;  %v1522_v32 = vrot.slane %v1518_v10, 3  ;;  %v768_v22 = vrot.slane %v764_v58, 2 }
 0x188   : > { %v6785_v48 = vpop.permute.xlu0 %589  ;;  %v6787_v11 = vpop.permute.xlu1 %576 }
 0x189   : > { %11306 = vst [vmem:[#allocation31_spill] sm:$0xff] %v6785_v48  ;;  %11307 = vst [vmem:[#allocation32_spill] sm:$0xff] %v6787_v11  ;;  %v767_v10 = vrot.slane %v763_v57, 2  ;;  %v11325_v11 = vstv %s11317_s13  ;;  %s7243_s13 = sld [smem:[#allocation3 + $0x145]] }
 0x18a   : > { %1433 = vrot.lane.b32.xlu0 %v1432_v1, %s11298_s10  ;;  %1420 = vrot.lane.b32.xlu1 %v1419_v6, %s11298_s10  ;;  %v1458_v6 = vsel %vm1260_vm5, %v1456_v33, %v1457_v41  ;;  %v6836_v41 = vmul.f32 %v6547_v20, %v285_v56  ;;  %v1530_v56 = vmul.f32 %v6547_v20, %v1529_v2 }
 0x18b   : > { %v1471_v33 = vsel %vm1260_vm5, %v1469_v28, %v1470_v27  ;;  %v752_v27 = vmul.f32 %v6598_v61, %v750_v25  ;;  %v1510_v28 = vsel %vm1260_vm5, %v1508_v59, %v1509_v29  ;;  %v1557_v59 = vmul.f32 %v6598_v61, %v1555_v49 }
 0x18c   : > { %v6820_v34 = vpop.permute.xlu0 %615  ;;  %v6822_v1 = vpop.permute.xlu1 %602  ;;  %v1543_v29 = vmul.f32 %v6547_v20, %v1542_v47 }
 0x18d   : > { %11308 = vst [vmem:[#allocation33_spill] sm:$0xff] %v6820_v34  ;;  %11309 = vst [vmem:[#allocation34_spill] sm:$0xff] %v6822_v1 }
 0x18e   : > { %1459 = vrot.lane.b32.xlu0 %v1458_v6, %s11298_s10  ;;  %1446 = vrot.lane.b32.xlu1 %v1445_v23, %s11298_s10  ;;  %v1531_v23 = vmul.f32 %v6598_v61, %v1529_v2  ;;  %v1484_v6 = vsel %vm1260_vm5, %v1482_v19, %v1483_v26  ;;  %v6873_v2 = vmul.f32 %v6547_v20, %v300_v8  ;;  %v1547_v34 = vrot.slane %v1543_v29, 3 }
 0x18f   : > { %v751_v8 = vmul.f32 %v6547_v20, %v750_v25  ;;  %v1497_v19 = vsel %vm1260_vm5, %v1495_v39, %v1496_v40  ;;  %v1556_v25 = vmul.f32 %v6547_v20, %v1555_v49  ;;  %v1544_v39 = vmul.f32 %v6598_v61, %v1542_v47 }
 0x190   : > { %v6842_v51 = vpop.permute.xlu0 %641  ;;  %v6844_v50 = vpop.permute.xlu1 %628  ;;  %v11315_v40 = vstv %s6506_s6  ;;  %v11318_v49 = vstv %s6716_s0  ;;  %s6992_s0 = sld [smem:[#allocation3 + $0x10f]]  ;;  %s7151_s6 = sld [smem:[#allocation3 + $0x111]] }
 0x191   : > { %11310 = vst [vmem:[#allocation35_spill] sm:$0xff] %v6842_v51  ;;  %11311 = vst [vmem:[#allocation36_spill] sm:$0xff] %v6844_v50  ;;  %v1671_v47 = vmul.f32 %v6547_v20, %v11318_v49  ;;  %v11319_v0 = vmov %v11318_v49  ;;  %v756_v58 = vrot.slane %v751_v8, 2  ;;  %v1523_v49 = vsel %vm1260_vm5, %v1521_v9, %v1522_v32 }
 0x192   : > { %1485 = vrot.lane.b32.xlu0 %v1484_v6, %s11312_s3  ;;  %1472 = vrot.lane.b32.xlu1 %v1471_v33, %s11312_s3  ;;  %v1534_v33 = vrot.slane %v1530_v56, 3  ;;  %v1535_v6 = vrot.slane %v1531_v23, 3  ;;  %v6913_v56 = vmul.f32 %v6547_v20, %v11315_v40  ;;  %v11316_v23 = vstv %s6510_s7  ;;  %s7153_s7 = sld [smem:[#allocation3 + $0xde]] }
 0x193   : > { %v6918_v60 = vmul.f32 %v6547_v20, %v11316_v23  ;;  %v1672_v40 = vmul.f32 %v6598_v61, %v11319_v0  ;;  %v1560_v1 = vrot.slane %v1556_v25, 3  ;;  %v1561_v0 = vrot.slane %v1557_v59, 3 }
 0x194   : > { %v6894_v26 = vpop.permute.xlu0 %667  ;;  %v6896_v24 = vpop.permute.xlu1 %654  ;;  %v1536_v51 = vsel %vm1260_vm5, %v1534_v33, %v1535_v6  ;;  %v6948_v8 = vsel %vm755_vm4, %v767_v10, %v768_v22  ;;  %v1675_v9 = vrot.slane %v1671_v47, 4 }
 0x195   : > { %11313 = vst [vmem:[#allocation37_spill] sm:$0xff] %v6894_v26  ;;  %11314 = vst [vmem:[#allocation38_spill] sm:$0xff] %v6896_v24  ;;  %v11321_v24 = vstv %s6726_s18  ;;  %v1676_v33 = vrot.slane %v1672_v40, 4  ;;  %s7188_s18 = sld [smem:[#allocation3 + $0xac]] }
 0x196   : > { %1511 = vrot.lane.b32.xlu0 %v1510_v28, %s11312_s3  ;;  %1498 = vrot.lane.b32.xlu1 %v1497_v19, %s11312_s3  ;;  %v1658_v23 = vmul.f32 %v6547_v20, %v11321_v24  ;;  %v11322_v26 = vmov %v11321_v24  ;;  %v757_v28 = vrot.slane %v752_v27, 2  ;;  %v1548_v24 = vrot.slane %v1544_v39, 3  ;;  %11326 = vst [vmem:[#allocation41_spill] sm:$0xff] %v6948_v8 }
 0x197   : > { %v1659_v57 = vmul.f32 %v6598_v61, %v11322_v26  ;;  %v6945_v26 = vmul.f32 %v6547_v20, %v11325_v11  ;;  %v11327_v27 = vstv %s11320_s28  ;;  %v11332_v39 = vstv %s6728_s1  ;;  %s7190_s1 = sld [smem:[#allocation3 + $0x14]]  ;;  %s7261_s28 = sld [smem:[#allocation3 + $0x113]] }
 0x198   : > { %v6936_v19 = vpop.permute.xlu0 %693  ;;  %v6938_v50 = vpop.permute.xlu1 %680  ;;  %v1662_v11 = vrot.slane %v1658_v23, 4  ;;  %v6957_v22 = vsel %vm755_vm4, %v756_v58, %v757_v28  ;;  %v11329_v25 = vmov %v11327_v27  ;;  %v1697_v10 = vmul.f32 %v6547_v20, %v11332_v39 }
 0x199   : > { %11323 = vst [vmem:[#allocation39_spill] sm:$0xff] %v6936_v19  ;;  %11324 = vst [vmem:[#allocation40_spill] sm:$0xff] %v6938_v50  ;;  %v785_v50 = vmul.f32 %v6547_v20, %v11327_v27  ;;  %v1663_v6 = vrot.slane %v1659_v57, 4  ;;  %v786_v59 = vmul.f32 %v6598_v61, %v11329_v25  ;;  %v11333_v47 = vmov %v11332_v39 }
 0x19a   : > { %1537 = vrot.lane.b32.xlu0 %v1536_v51, %s11312_s3  ;;  %1524 = vrot.lane.b32.xlu1 %v1523_v49, %s11312_s3  ;;  %11328 = vst [vmem:[#allocation42_spill] sm:$0xff] %v6957_v22  ;;  %v1698_v40 = vmul.f32 %v6598_v61, %v11333_v47  ;;  %v1562_v23 = vsel %vm1260_vm5, %v1560_v1, %v1561_v0  ;;  %v11334_v58 = vstv %s6746_s17  ;;  %v11336_v25 = vstv %s6658_s19  ;;  %s11342_s19 = sld [smem:[#allocation28_spill]]  ;;  %s7205_s17 = sld [smem:[#allocation3 + $0x79]] }
 0x19b   : > { %v1549_v57 = vsel %vm1260_vm5, %v1547_v34, %v1548_v24  ;;  %v1684_v28 = vmul.f32 %v6547_v20, %v11334_v58  ;;  %v11335_v49 = vmov %v11334_v58  ;;  %v774_v32 = vmul.f32 %v6547_v20, %v11336_v25 }
 0x19c   : > { %v6962_v29 = vpop.permute.xlu0 %719  ;;  %v6964_v51 = vpop.permute.xlu1 %706  ;;  %v1685_v27 = vmul.f32 %v6598_v61, %v11335_v49  ;;  %v789_v1 = vrot.slane %v785_v50, 2  ;;  %v1677_v58 = vsel %vm1573_vm6, %v1675_v9, %v1676_v33  ;;  %v11345_v9 = vstv %s6762_s8  ;;  %s7207_s8 = sld [smem:[#allocation3 + $0x112]] }
 0x19d   : > { %11330 = vst [vmem:[#allocation43_spill] sm:$0xff] %v6962_v29  ;;  %11331 = vst [vmem:[#allocation44_spill] sm:$0xff] %v6964_v51  ;;  %v11337_v51 = vmov %v11336_v25  ;;  %v11338_v29 = vstv %s6666_s15  ;;  %v11343_v25 = vstv %s6748_s4  ;;  %v1710_v33 = vmul.f32 %v6547_v20, %v11345_v9  ;;  %s7038_s15 = sld [smem:[#allocation3 + $0xdc]]  ;;  %s7167_s4 = sld [smem:[#allocation3 + $0x46]] }
 0x19e   : > { %v775_v39 = vmul.f32 %v6598_v61, %v11337_v51  ;;  %v807_v47 = vmul.f32 %v6547_v20, %v11338_v29  ;;  %1563 = vrot.lane.b32.xlu0 %v1562_v23, %s11312_s3  ;;  %1550 = vrot.lane.b32.xlu1 %v1549_v57, %s11312_s3  ;;  %v11339_v0 = vmov %v11338_v29  ;;  %v1664_v51 = vsel %vm1573_vm6, %v1662_v11, %v1663_v6 }
 0x19f   : > { %v808_v24 = vmul.f32 %v6598_v61, %v11339_v0  ;;  %v1701_v23 = vrot.slane %v1697_v10, 4  ;;  %v1702_v57 = vrot.slane %v1698_v40, 4  ;;  %v1723_v34 = vmul.f32 %v6547_v20, %v11343_v25 }
 0x1a0   : > { %v6999_v49 = vpop.permute.xlu0 %745  ;;  %v7001_v29 = vpop.permute.xlu1 %732  ;;  %v11344_v50 = vmov %v11343_v25  ;;  %v1688_v0 = vrot.slane %v1684_v28, 4  ;;  %v1689_v8 = vrot.slane %v1685_v27, 4  ;;  %v11346_v11 = vmov %v11345_v9 }
 0x1a1   : > { %11340 = vst [vmem:[#allocation45_spill] sm:$0xff] %v6999_v49  ;;  %11341 = vst [vmem:[#allocation46_spill] sm:$0xff] %v7001_v29  ;;  %v1724_v22 = vmul.f32 %v6598_v61, %v11344_v50  ;;  %v1711_v6 = vmul.f32 %v6598_v61, %v11346_v11  ;;  %v790_v10 = vrot.slane %v786_v59, 2  ;;  %v778_v29 = vrot.slane %v774_v32, 2 }
 0x1a2   : > { %v779_v40 = vrot.slane %v775_v39, 2  ;;  %v811_v49 = vrot.slane %v807_v47, 2  ;;  %1678 = vrot.lane.b32.xlu0 %v1677_v58, %s11298_s10  ;;  %1665 = vrot.lane.b32.xlu1 %v1664_v51, %s11298_s10  ;;  %v812_v25 = vrot.slane %v808_v24, 2  ;;  %v11347_v50 = vstv %s11342_s19 }
 0x1a3   : > { %v796_v28 = vmul.f32 %v6547_v20, %v11347_v50  ;;  %v11348_v27 = vstv %s6764_s16  ;;  %v1727_v59 = vrot.slane %v1723_v34, 4  ;;  %v1728_v39 = vrot.slane %v1724_v22, 4  ;;  %s11357_s16 = sld [smem:[#allocation29_spill]] }
 0x1a4   : > { %v1749_v9 = vmul.f32 %v6547_v20, %v11348_v27  ;;  %v11349_v19 = vmov %v11348_v27  ;;  %v7026_v48 = vpop.permute.xlu0 %860  ;;  %v7028_v32 = vpop.permute.xlu1 %847  ;;  %v11352_v47 = vstv %s6778_s14  ;;  %v1703_v50 = vsel %vm1573_vm6, %v1701_v23, %v1702_v57  ;;  %s7211_s14 = sld [smem:[#allocation3 + $0xdf]] }
 0x1a5   : > { %v1750_v11 = vmul.f32 %v6598_v61, %v11349_v19  ;;  %11350 = vst [vmem:[#allocation47_spill] sm:$0xff] %v7026_v48  ;;  %11351 = vst [vmem:[#allocation48_spill] sm:$0xff] %v7028_v32  ;;  %v1736_v24 = vmul.f32 %v6547_v20, %v11352_v47  ;;  %v11353_v58 = vmov %v11352_v47  ;;  %v1690_v27 = vsel %vm1573_vm6, %v1688_v0, %v1689_v8 }
 0x1a6   : > { %v1737_v51 = vmul.f32 %v6598_v61, %v11353_v58  ;;  %v1714_v19 = vrot.slane %v1710_v33, 4  ;;  %v1715_v53 = vrot.slane %v1711_v6, 4  ;;  %v7041_v34 = vsel %vm755_vm4, %v789_v1, %v790_v10  ;;  %1704 = vrot.lane.b32.xlu0 %v1703_v50, %s11298_s10  ;;  %1691 = vrot.lane.b32.xlu1 %v1690_v27, %s11298_s10 }
 0x1a7   : > { %11354 = vst [vmem:[#allocation49_spill] sm:$0xff] %v7041_v34  ;;  %v7044_v22 = vsel %vm755_vm4, %v778_v29, %v779_v40  ;;  %v11356_v47 = vstv %s11342_s19  ;;  %v1826_v8 = vstv %s6992_s0  ;;  %v1753_v23 = vrot.slane %v1749_v9, 4  ;;  %s7276_s0 = sld [smem:[#allocation3 + $0xe0]]  ;;  %s7288_s19 = sld [smem:[#allocation3 + $0x179]] }
 0x1a8   : > { %11355 = vst [vmem:[#allocation50_spill] sm:$0xff] %v7044_v22  ;;  %v797_v32 = vmul.f32 %v6598_v61, %v11356_v47  ;;  %v1754_v57 = vrot.slane %v1750_v11, 4  ;;  %v11358_v0 = vstv %s6780_s9  ;;  %v7060_v6 = vpop.permute.xlu0 %886  ;;  %v7062_v10 = vpop.permute.xlu1 %873  ;;  %v1740_v40 = vrot.slane %v1736_v24, 4  ;;  %s7086_s9 = sld [smem:[#allocation3 + $0x142]] }
 0x1a9   : > { %v1775_v1 = vmul.f32 %v6547_v20, %v11358_v0  ;;  %v11359_v33 = vmov %v11358_v0  ;;  %11360 = vst [vmem:[#allocation51_spill] sm:$0xff] %v7060_v6  ;;  %11361 = vst [vmem:[#allocation52_spill] sm:$0xff] %v7062_v10  ;;  %v1741_v58 = vrot.slane %v1737_v51, 4  ;;  %v11362_v9 = vstv %s6806_s2  ;;  %s7223_s2 = sld [smem:[#allocation3 + $0xad]] }
 0x1aa   : > { %v1776_v29 = vmul.f32 %v6598_v61, %v11359_v33  ;;  %v1762_v11 = vmul.f32 %v6547_v20, %v11362_v9  ;;  %v11363_v50 = vmov %v11362_v9  ;;  %v7071_v47 = vsel %vm755_vm4, %v811_v49, %v812_v25 }
 0x1ab   : > { %v1763_v27 = vmul.f32 %v6598_v61, %v11363_v50  ;;  %11364 = vst [vmem:[#allocation53_spill] sm:$0xff] %v7071_v47  ;;  %v800_v0 = vrot.slane %v796_v28, 2  ;;  %v1729_v33 = vsel %vm1573_vm6, %v1727_v59, %v1728_v39  ;;  %v1716_v6 = vsel %vm1573_vm6, %v1714_v19, %v1715_v53 }
 0x1ac   : > { %v801_v48 = vrot.slane %v797_v32, 2  ;;  %v11365_v10 = vstv %s11357_s16  ;;  %v11367_v22 = vstv %s6714_s12  ;;  %1730 = vrot.lane.b32.xlu0 %v1729_v33, %s11298_s10  ;;  %1717 = vrot.lane.b32.xlu1 %v1716_v6, %s11298_s10  ;;  %v1779_v25 = vrot.slane %v1775_v1, 4  ;;  %v7094_v39 = vpop.permute.xlu0 %912  ;;  %v7096_v19 = vpop.permute.xlu1 %899  ;;  %s7125_s12 = sld [smem:[#allocation3 + $0x45]]  ;;  %s7316_s16 = sld [smem:[#allocation3 + $0x48]] }
 0x1ad   : > { %v829_v24 = vmul.f32 %v6547_v20, %v11365_v10  ;;  %v11366_v51 = vmov %v11365_v10  ;;  %v818_v50 = vmul.f32 %v6547_v20, %v11367_v22  ;;  %v11368_v53 = vmov %v11367_v22  ;;  %11370 = vst [vmem:[#allocation54_spill] sm:$0xff] %v7094_v39  ;;  %11371 = vst [vmem:[#allocation55_spill] sm:$0xff] %v7096_v19 }
 0x1ae   : > { %v830_v9 = vmul.f32 %v6598_v61, %v11366_v51  ;;  %v819_v49 = vmul.f32 %v6598_v61, %v11368_v53  ;;  %v1780_v28 = vrot.slane %v1776_v29, 4  ;;  %v11369_v32 = vstv %s6884_s26  ;;  %s7231_s26 = sld [smem:[#allocation3 + $0x178]] }
 0x1af   : > { %v1801_v59 = vmul.f32 %v6547_v20, %v11369_v32  ;;  %v1755_v22 = vsel %vm1573_vm6, %v1753_v23, %v1754_v57  ;;  %v1742_v10 = vsel %vm1573_vm6, %v1740_v40, %v1741_v58  ;;  %v1766_v6 = vrot.slane %v1762_v11, 4 }
 0x1b0   : > { %v1767_v33 = vrot.slane %v1763_v27, 4  ;;  %v11372_v51 = vmov %v11369_v32  ;;  %v11373_v53 = vstv %s6922_s27  ;;  %v1813_v34 = vstv %s7038_s15  ;;  %1756 = vrot.lane.b32.xlu0 %v1755_v22, %s11298_s10  ;;  %1743 = vrot.lane.b32.xlu1 %v1742_v10, %s11298_s10  ;;  %s7249_s27 = sld [smem:[#allocation3 + $0x7a]]  ;;  %s7304_s15 = sld [smem:[#allocation3 + $0x146]] }
 0x1b1   : > { %v1802_v47 = vmul.f32 %v6598_v61, %v11372_v51  ;;  %v1788_v1 = vmul.f32 %v6547_v20, %v11373_v53  ;;  %v11374_v29 = vmov %v11373_v53  ;;  %v7111_v39 = vsel %vm755_vm4, %v800_v0, %v801_v48  ;;  %v7117_v51 = vpop.permute.xlu0 %938  ;;  %v7119_v53 = vpop.permute.xlu1 %925 }
 0x1b2   : > { %v1789_v32 = vmul.f32 %v6598_v61, %v11374_v29  ;;  %v833_v19 = vrot.slane %v829_v24, 2  ;;  %v834_v23 = vrot.slane %v830_v9, 2  ;;  %v822_v57 = vrot.slane %v818_v50, 2 }
 0x1b3   : > { %v823_v40 = vrot.slane %v819_v49, 2  ;;  %v1781_v58 = vsel %vm1573_vm6, %v1779_v25, %v1780_v28  ;;  %v1805_v11 = vrot.slane %v1801_v59, 4  ;;  %v1852_v27 = vstv %s7058_s5  ;;  %s7340_s5 = sld [smem:[#allocation3 + $0x15]] }
 0x1b4   : > { %v1827_v29 = vmul.f32 %v6547_v20, %v1826_v8  ;;  %v1828_v48 = vmul.f32 %v6598_v61, %v1826_v8  ;;  %v1814_v0 = vmul.f32 %v6547_v20, %v1813_v34  ;;  %v1815_v24 = vmul.f32 %v6598_v61, %v1813_v34  ;;  %1782 = vrot.lane.b32.xlu0 %v1781_v58, %s11375_s20 }
 0x1b5   : > { %v1768_v9 = vsel %vm1573_vm6, %v1766_v6, %v1767_v33  ;;  %v1806_v50 = vrot.slane %v1802_v47, 4  ;;  %v1792_v49 = vrot.slane %v1788_v1, 4  ;;  %v1793_v25 = vrot.slane %v1789_v32, 4  ;;  %v7157_v6 = vpop.permute.xlu1 %951 }
 0x1b6   : > { %v323_v28 = vadd.f32 %v6447_v15, %v6831_v37  ;;  %1769 = vrot.lane.b32.xlu1 %v1768_v9, %s11375_s20  ;;  %v1853_v34 = vmul.f32 %v6547_v20, %v1852_v27  ;;  %v1854_v8 = vmul.f32 %v6598_v61, %v1852_v27  ;;  %v1839_v59 = vstv %s7086_s9  ;;  %v7155_v37 = vpop.permute.xlu0 %964  ;;  %s7364_s9 = sld [smem:[#allocation3 + $0xae]] }
 0x1b7   : > { %v315_v47 = vadd.f32 %v6449_v16, %v6836_v41  ;;  %v339_v22 = vadd.f32 %v6471_v30, %v6861_v7  ;;  %v7146_v10 = vsel %vm755_vm4, %v833_v19, %v834_v23  ;;  %v7149_v15 = vsel %vm755_vm4, %v822_v57, %v823_v40 }
 0x1b8   : > { %v1831_v33 = vrot.slane %v1827_v29, 4  ;;  %v1832_v1 = vrot.slane %v1828_v48, 4  ;;  %v1818_v16 = vrot.slane %v1814_v0, 4  ;;  %v1819_v41 = vrot.slane %v1815_v24, 4 }
 0x1b9   : > { %v1807_v30 = vsel %vm1573_vm6, %v1805_v11, %v1806_v50  ;;  %v1794_v7 = vsel %vm1573_vm6, %v1792_v49, %v1793_v25  ;;  %v1840_v19 = vmul.f32 %v6547_v20, %v1839_v59  ;;  %v1841_v32 = vmul.f32 %v6598_v61, %v1839_v59 }
 0x1ba   : > { %v331_v23 = vadd.f32 %v6473_v31, %v6866_v3  ;;  %v355_v57 = vadd.f32 %v6496_v45, %v6873_v2  ;;  %1808 = vrot.lane.b32.xlu0 %v1807_v30, %s11375_s20  ;;  %1795 = vrot.lane.b32.xlu1 %v1794_v7, %s11375_s20  ;;  %v1857_v40 = vrot.slane %v1853_v34, 4  ;;  %v1858_v20 = vrot.slane %v1854_v8, 4  ;;  %v7193_v2 = vld [vmem:[%s11376_s21 + $0x18] sm:$0xff] }
 0x1bb   : > { %v347_v61 = vadd.f32 %v6498_v46, %v6913_v56  ;;  %v371_v31 = vadd.f32 %v6518_v62, %v6918_v60  ;;  %v363_v45 = vadd.f32 %v6520_v63, %v6945_v26  ;;  %v7186_v3 = vadd.f32 %v6541_v13, %v323_v28  ;;  %v7198_v46 = vpop.permute.xlu0 %990  ;;  %v7200_v62 = vpop.permute.xlu1 %977 }
 0x1bc   : > { %v7196_v58 = vadd.f32 %v6543_v14, %v315_v47  ;;  %v1833_v63 = vsel %vm1573_vm6, %v1831_v33, %v1832_v1  ;;  %v1820_v56 = vsel %vm1573_vm6, %v1818_v16, %v1819_v41  ;;  %v1909_v13 = vstv %s7125_s12  ;;  %v7264_v41 = vld [vmem:[%s11376_s21 + $0x20] sm:$0xff]  ;;  %s7368_s12 = sld [smem:[#allocation3 + $0x7b]] }
 0x1bd   : > { %v1844_v60 = vrot.slane %v1840_v19, 4  ;;  %v1845_v26 = vrot.slane %v1841_v32, 4  ;;  %v1901_v14 = vstv %s7127_s30  ;;  %v1925_v11 = vstv %s7130_s11  ;;  %s7386_s30 = sld [smem:[#allocation3 + $0x114]]  ;;  %s7400_s11 = sld [smem:[#allocation3 + $0xe1]] }
 0x1be   : > { %v7214_v27 = vadd.f32 %v6571_v35, %v339_v22  ;;  %v7217_v29 = vadd.f32 %v6573_v36, %v331_v23  ;;  %1834 = vrot.lane.b32.xlu0 %v1833_v63, %s11375_s20  ;;  %1821 = vrot.lane.b32.xlu1 %v1820_v56, %s11375_s20  ;;  %v1859_v48 = vsel %vm1573_vm6, %v1857_v40, %v1858_v20  ;;  %v1917_v0 = vstv %s7139_s24  ;;  %s7414_s24 = sld [smem:[#allocation3 + $0x17a]] }
 0x1bf   : > { %v7226_v24 = vadd.f32 %v6593_v54, %v355_v57  ;;  %v1910_v35 = vmul.f32 %v7193_v2, %v1909_v13  ;;  %v1941_v9 = vstv %s7151_s6  ;;  %v1933_v36 = vstv %s7153_s7  ;;  %v7236_v49 = vpop.permute.xlu0 %1016  ;;  %v7238_v25 = vpop.permute.xlu1 %1003  ;;  %s7416_s6 = sld [smem:[#allocation3 + $0x147]]  ;;  %s7444_s7 = sld [smem:[#allocation3 + $0x49]] }
 0x1c0   : > { %v7234_v50 = vadd.f32 %v6595_v55, %v347_v61  ;;  %v1902_v28 = vmul.f32 %v7193_v2, %v1901_v14  ;;  %v1926_v54 = vmul.f32 %v7193_v2, %v1925_v11  ;;  %v1957_v34 = vstv %s7159_s22  ;;  %s7470_s22 = sld [smem:[#allocation3 + $0x16]] }
 0x1c1   : > { %v1846_v8 = vsel %vm1573_vm6, %v1844_v60, %v1845_v26  ;;  %v1918_v55 = vmul.f32 %v7193_v2, %v1917_v0  ;;  %v1949_v59 = vstv %s7165_s23  ;;  %v1973_v47 = vstv %s7167_s4  ;;  %s7484_s23 = sld [smem:[#allocation3 + $0x41]]  ;;  %s7490_s4 = sld [smem:[#allocation3 + $0xe]] }
 0x1c2   : > { %1860 = vrot.lane.b32.xlu0 %v1859_v48, %s11375_s20  ;;  %1847 = vrot.lane.b32.xlu1 %v1846_v8, %s11375_s20  ;;  %v7254_v22 = vmul.f32 %v7193_v2, %v1941_v9  ;;  %v7257_v33 = vmul.f32 %v7193_v2, %v1933_v36  ;;  %v1965_v1 = vstv %s7175_s25  ;;  %v2042_v16 = vstv %s7177_s29  ;;  %s7496_s25 = sld [smem:[#allocation3 + $0xaf]]  ;;  %s7518_s29 = sld [smem:[#allocation3 + $0x7c]] }
 0x1c3   : > { %v7267_v30 = vadd.f32 %v6619_v12, %v371_v31  ;;  %v7270_v7 = vadd.f32 %v6621_v17, %v363_v45  ;;  %v7273_v19 = vmul.f32 %v7193_v2, %v1957_v34  ;;  %v2029_v32 = vstv %s7190_s1  ;;  %v7278_v23 = vpop.permute.xlu0 %1042  ;;  %v7280_v57 = vpop.permute.xlu1 %1029  ;;  %s7578_s1 = sld [smem:[#allocation3 + $0x74]] }
 0x1c4   : > { %v7283_v40 = vmul.f32 %v7193_v2, %v1949_v59  ;;  %v1989_v20 = vstv %s7188_s18  ;;  %v1981_v12 = vstv %s7205_s17  ;;  %v2005_v61 = vstv %s7207_s8  ;;  %s7546_s18 = sld [smem:[#allocation3 + $0xa7]]  ;;  %s11398_s17 = smov 127  }
 0x1c5   : > { %v7291_v17 = vmul.f32 %v7193_v2, %v1973_v47  ;;  %v7294_v31 = vmul.f32 %v7193_v2, %v1965_v1  ;;  %v1997_v45 = vstv %s7211_s14  ;;  %v2043_v63 = vmul.f32 %v7193_v2, %v2042_v16  ;;  %s7595_s8 = sld [smem:[#allocation3 + $0x115]]  ;;  %s7605_s14 = sld [smem:[#allocation3 + $0xe2]] }
 0x1c6   : > { %1912 = vrot.lane.b32.xlu0 %v1910_v35, %s11298_s10  ;;  %1904 = vrot.lane.b32.xlu1 %v1902_v28, %s11298_s10  ;;  %v2044_v56 = vmul.f32 %v7264_v41, %v2042_v16  ;;  %v2030_v13 = vmul.f32 %v7193_v2, %v2029_v32  ;;  %v2031_v60 = vmul.f32 %v7264_v41, %v2029_v32  ;;  %v2068_v26 = vstv %s7223_s2  ;;  %s7612_s2 = sld [smem:[#allocation3 + $0x10d]] }
 0x1c7   : > { %v7307_v14 = vmul.f32 %v7193_v2, %v1989_v20  ;;  %v7310_v11 = vmul.f32 %v7193_v2, %v1981_v12  ;;  %v7313_v48 = vmul.f32 %v7193_v2, %v2005_v61  ;;  %v2021_v0 = vstv %s7231_s26  ;;  %v7326_v36 = vpop.permute.xlu0 %1068  ;;  %v7328_v28 = vpop.permute.xlu1 %1055  ;;  %s7623_s26 = sld [smem:[#allocation3 + $0xda]] }
 0x1c8   : > { %v7320_v35 = vadd.f32 %v6646_v42, %v7186_v3  ;;  %v7324_v9 = vadd.f32 %v6648_v43, %v7196_v58  ;;  %v7331_v34 = vmul.f32 %v7193_v2, %v1997_v45  ;;  %v2013_v8 = vstv %s7243_s13  ;;  %s7625_s13 = sld [smem:[#allocation3 + $0x17b]] }
 0x1c9   : > { %v2047_v59 = vrot.slane %v2043_v63, 1  ;;  %v2069_v47 = vmul.f32 %v7193_v2, %v2068_v26  ;;  %v2070_v1 = vmul.f32 %v7264_v41, %v2068_v26  ;;  %v2055_v42 = vstv %s7249_s27  ;;  %s7681_s27 = sld [smem:[#allocation3 + $0x148]] }
 0x1ca   : > { %1928 = vrot.lane.b32.xlu0 %v1926_v54, %s11298_s10  ;;  %1920 = vrot.lane.b32.xlu1 %v1918_v55, %s11298_s10  ;;  %v2048_v43 = vrot.slane %v2044_v56, 1  ;;  %v2034_v3 = vrot.slane %v2030_v13, 1  ;;  %v2035_v58 = vrot.slane %v2031_v60, 1  ;;  %v2094_v16 = vstv %s7261_s28  ;;  %s7694_s28 = sld [smem:[#allocation3 + $0x173]] }
 0x1cb   : > { %v7344_v32 = vadd.f32 %v6668_v4, %v7214_v27  ;;  %v7347_v20 = vmul.f32 %v7193_v2, %v2021_v0  ;;  %v7350_v12 = vmul.f32 %v7193_v2, %v2013_v8  ;;  %v2081_v54 = vstv %s7276_s0  ;;  %v7357_v61 = vpop.permute.xlu0 %1094  ;;  %v7359_v45 = vpop.permute.xlu1 %1081  ;;  %s7700_s0 = sld [smem:[#allocation3 + $0x140]] }
 0x1cc   : > { %v7355_v55 = vadd.f32 %v6670_v5, %v7217_v29  ;;  %11377 = vst [vmem:[#allocation56_spill] sm:$0xff] %v7357_v61  ;;  %11378 = vst [vmem:[#allocation57_spill] sm:$0xff] %v7359_v45  ;;  %v2056_v63 = vmul.f32 %v7193_v2, %v2055_v42  ;;  %v2057_v4 = vmul.f32 %v7264_v41, %v2055_v42  ;;  %v2120_v27 = vstv %s7288_s19  ;;  %s7709_s19 = sld [smem:[#allocation3 + $0x4b]] }
 0x1cd   : > { %v2073_v56 = vrot.slane %v2069_v47, 1  ;;  %v2074_v13 = vrot.slane %v2070_v1, 1  ;;  %v2095_v60 = vmul.f32 %v7193_v2, %v2094_v16  ;;  %v2096_v5 = vmul.f32 %v7264_v41, %v2094_v16 }
 0x1ce   : > { %1944 = vrot.lane.b32.xlu0 %v7254_v22, %s11298_s10  ;;  %1936 = vrot.lane.b32.xlu1 %v7257_v33, %s11298_s10  ;;  %v7375_v29 = vsel %vm442_vm3, %v2047_v59, %v2048_v43  ;;  %v7378_v26 = vsel %vm442_vm3, %v2034_v3, %v2035_v58  ;;  %v2082_v0 = vmul.f32 %v7193_v2, %v2081_v54  ;;  %v2107_v8 = vstv %s7304_s15  ;;  %s7717_s15 = sld [smem:[#allocation3 + $0x18]] }
 0x1cf   : > { %v2083_v47 = vmul.f32 %v7264_v41, %v2081_v54  ;;  %v2121_v1 = vmul.f32 %v7193_v2, %v2120_v27  ;;  %v2122_v42 = vmul.f32 %v7264_v41, %v2120_v27  ;;  %v2146_v16 = vstv %s7316_s16  ;;  %v7396_v59 = vpop.permute.xlu0 %1120  ;;  %v7398_v43 = vpop.permute.xlu1 %1107  ;;  %s7728_s16 = sld [smem:[#allocation3 + $0xb1]] }
 0x1d0   : > { %v7390_v22 = vadd.f32 %v6691_v38, %v7226_v24  ;;  %v7394_v33 = vadd.f32 %v6693_v44, %v7234_v50  ;;  %11379 = vst [vmem:[#allocation58_spill] sm:$0xff] %v7396_v59  ;;  %11380 = vst [vmem:[#allocation59_spill] sm:$0xff] %v7398_v43  ;;  %v2060_v3 = vrot.slane %v2056_v63, 1  ;;  %v2061_v58 = vrot.slane %v2057_v4, 1 }
 0x1d1   : > { %v7403_v54 = vsel %vm442_vm3, %v2073_v56, %v2074_v13  ;;  %v2099_v27 = vrot.slane %v2095_v60, 1  ;;  %v2100_v45 = vrot.slane %v2096_v5, 1  ;;  %v2108_v38 = vmul.f32 %v7193_v2, %v2107_v8 }
 0x1d2   : > { %1960 = vrot.lane.b32.xlu0 %v7273_v19, %s11298_s10  ;;  %1952 = vrot.lane.b32.xlu1 %v7283_v40, %s11298_s10  ;;  %v2109_v44 = vmul.f32 %v7264_v41, %v2107_v8  ;;  %v2147_v24 = vmul.f32 %v7193_v2, %v2146_v16  ;;  %v2148_v50 = vmul.f32 %v7264_v41, %v2146_v16  ;;  %v2133_v63 = vstv %s7340_s5  ;;  %s7730_s5 = sld [smem:[#allocation3 + $0x7e]] }
 0x1d3   : > { %v2086_v4 = vrot.slane %v2082_v0, 1  ;;  %v2087_v56 = vrot.slane %v2083_v47, 1  ;;  %v2125_v13 = vrot.slane %v2121_v1, 1  ;;  %v2126_v60 = vrot.slane %v2122_v42, 1  ;;  %v7426_v5 = vpop.permute.xlu0 %1146  ;;  %v7428_v8 = vpop.permute.xlu1 %1133 }
 0x1d4   : > { %v7420_v19 = vadd.f32 %v6730_v21, %v7267_v30  ;;  %v7424_v40 = vadd.f32 %v6732_v18, %v7270_v7  ;;  %11381 = vst [vmem:[#allocation60_spill] sm:$0xff] %v7426_v5  ;;  %11382 = vst [vmem:[#allocation61_spill] sm:$0xff] %v7428_v8  ;;  %v7431_v16 = vsel %vm442_vm3, %v2060_v3, %v2061_v58  ;;  %v2172_v0 = vstv %s7364_s9  ;;  %s7767_s9 = sld [smem:[#allocation3 + $0x117]] }
 0x1d5   : > { %v7435_v47 = vsel %vm442_vm3, %v2099_v27, %v2100_v45  ;;  %v2134_v1 = vmul.f32 %v7193_v2, %v2133_v63  ;;  %v2135_v21 = vmul.f32 %v7264_v41, %v2133_v63  ;;  %v2159_v30 = vstv %s7368_s12  ;;  %s7788_s12 = sld [smem:[#allocation3 + $0xe4]] }
 0x1d6   : > { %1976 = vrot.lane.b32.xlu0 %v7291_v17, %s11375_s20  ;;  %1968 = vrot.lane.b32.xlu1 %v7294_v31, %s11375_s20  ;;  %v2112_v18 = vrot.slane %v2108_v38, 1  ;;  %v2113_v7 = vrot.slane %v2109_v44, 1  ;;  %v2151_v42 = vrot.slane %v2147_v24, 1  ;;  %v2152_v3 = vrot.slane %v2148_v50, 1 }
 0x1d7   : > { %v7447_v45 = vsel %vm442_vm3, %v2086_v4, %v2087_v56  ;;  %v7450_v58 = vsel %vm442_vm3, %v2125_v13, %v2126_v60  ;;  %v2173_v27 = vmul.f32 %v7193_v2, %v2172_v0  ;;  %v2198_v63 = vstv %s7386_s30  ;;  %v7454_v17 = vpop.permute.xlu0 %1172  ;;  %v7456_v8 = vpop.permute.xlu1 %1159  ;;  %v11385_v4 = vld [vmem:[#allocation30_spill] sm:$0xff]  ;;  %s7813_s30 = sld [smem:[#allocation3 + $0x17d]] }
 0x1d8   : > { %11383 = vst [vmem:[#allocation62_spill] sm:$0xff] %v7454_v17  ;;  %11384 = vst [vmem:[#allocation63_spill] sm:$0xff] %v7456_v8  ;;  %v2174_v31 = vmul.f32 %v7264_v41, %v2172_v0  ;;  %v2160_v38 = vmul.f32 %v7193_v2, %v2159_v30  ;;  %v2161_v44 = vmul.f32 %v7264_v41, %v2159_v30  ;;  %v2185_v24 = vstv %s7400_s11  ;;  %s7818_s11 = sld [smem:[#allocation3 + $0x14a]] }
 0x1d9   : > { %v7464_v50 = vadd.f32 %v6754_v52, %v7320_v35  ;;  %v7468_v56 = vadd.f32 %v11385_v4, %v7324_v9  ;;  %v2138_v13 = vrot.slane %v2134_v1, 1  ;;  %v2139_v60 = vrot.slane %v2135_v21, 1 }
 0x1da   : > { %1992 = vrot.lane.b32.xlu0 %v7307_v14, %s11375_s20  ;;  %1984 = vrot.lane.b32.xlu1 %v7310_v11, %s11375_s20  ;;  %v7477_v0 = vsel %vm442_vm3, %v2112_v18, %v2113_v7  ;;  %v7480_v52 = vsel %vm442_vm3, %v2151_v42, %v2152_v3  ;;  %v2199_v35 = vmul.f32 %v7193_v2, %v2198_v63  ;;  %v2224_v9 = vstv %s7414_s24  ;;  %s7826_s24 = sld [smem:[#allocation3 + $0x4c]] }
 0x1db   : > { %v2200_v1 = vmul.f32 %v7264_v41, %v2198_v63  ;;  %v2186_v21 = vmul.f32 %v7193_v2, %v2185_v24  ;;  %v2187_v14 = vmul.f32 %v7264_v41, %v2185_v24  ;;  %v2211_v30 = vstv %s7416_s6  ;;  %v7492_v11 = vpop.permute.xlu0 %1198  ;;  %v7494_v18 = vpop.permute.xlu1 %1185  ;;  %v11388_v63 = vld [vmem:[#allocation31_spill] sm:$0xff]  ;;  %v11389_v24 = vld [vmem:[#allocation32_spill] sm:$0xff]  ;;  %s7828_s6 = sld [smem:[#allocation3 + $0x19]] }
 0x1dc   : > { %11386 = vst [vmem:[#allocation30_spill] sm:$0xff] %v7492_v11  ;;  %11387 = vst [vmem:[#allocation64_spill] sm:$0xff] %v7494_v18  ;;  %v2177_v7 = vrot.slane %v2173_v27, 1  ;;  %v2178_v42 = vrot.slane %v2174_v31, 1  ;;  %v2164_v3 = vrot.slane %v2160_v38, 1  ;;  %v2165_v4 = vrot.slane %v2161_v44, 1 }
 0x1dd   : > { %v7500_v8 = vadd.f32 %v11388_v63, %v7344_v32  ;;  %v7504_v17 = vadd.f32 %v11389_v24, %v7355_v55  ;;  %v7507_v5 = vsel %vm442_vm3, %v2138_v13, %v2139_v60  ;;  %v2225_v11 = vmul.f32 %v7193_v2, %v2224_v9  ;;  %v11390_v63 = vld [vmem:[#allocation33_spill] sm:$0xff] }
 0x1de   : > { %2008 = vrot.lane.b32.xlu0 %v7313_v48, %s11375_s20  ;;  %2000 = vrot.lane.b32.xlu1 %v7331_v34, %s11375_s20  ;;  %v2226_v27 = vmul.f32 %v7264_v41, %v2224_v9  ;;  %v2212_v32 = vmul.f32 %v7193_v2, %v2211_v30  ;;  %v2213_v31 = vmul.f32 %v7264_v41, %v2211_v30  ;;  %v2250_v55 = vstv %s7444_s7  ;;  %v11391_v34 = vld [vmem:[#allocation34_spill] sm:$0xff]  ;;  %s7831_s7 = sld [smem:[#allocation3 + $0xb2]] }
 0x1df   : > { %v2203_v38 = vrot.slane %v2199_v35, 1  ;;  %v2204_v44 = vrot.slane %v2200_v1, 1  ;;  %v2190_v13 = vrot.slane %v2186_v21, 1  ;;  %v2191_v60 = vrot.slane %v2187_v14, 1  ;;  %v7528_v24 = vpop.permute.xlu0 %1224  ;;  %v7530_v30 = vpop.permute.xlu1 %1211 }
 0x1e0   : > { %v7522_v48 = vadd.f32 %v11390_v63, %v7390_v22  ;;  %v7526_v9 = vadd.f32 %v11391_v34, %v7394_v33  ;;  %11392 = vst [vmem:[#allocation31_spill] sm:$0xff] %v7528_v24  ;;  %11393 = vst [vmem:[#allocation32_spill] sm:$0xff] %v7530_v30  ;;  %v7533_v35 = vsel %vm442_vm3, %v2177_v7, %v2178_v42  ;;  %v2229_v21 = vrot.slane %v2225_v11, 1  ;;  %v11394_v11 = vld [vmem:[#allocation35_spill] sm:$0xff]  ;;  %v7571_v24 = vld [vmem:[%s11376_s21] sm:$0xff] }
 0x1e1   : > { %v7536_v1 = vsel %vm442_vm3, %v2164_v3, %v2165_v4  ;;  %v2251_v14 = vmul.f32 %v7193_v2, %v2250_v55  ;;  %v2252_v22 = vmul.f32 %v7264_v41, %v2250_v55  ;;  %v2237_v63 = vstv %s7470_s22  ;;  %s7868_s22 = sld [smem:[#allocation3 + $0x7f]] }
 0x1e2   : > { %2024 = vrot.lane.b32.xlu0 %v7347_v20, %s11375_s20  ;;  %2016 = vrot.lane.b32.xlu1 %v7350_v12, %s11375_s20  ;;  %v2230_v33 = vrot.slane %v2226_v27, 1  ;;  %v2216_v7 = vrot.slane %v2212_v32, 1  ;;  %v2217_v42 = vrot.slane %v2213_v31, 1  ;;  %v1580_v34 = vstv %s7484_s23  ;;  %v11395_v12 = vld [vmem:[#allocation36_spill] sm:$0xff]  ;;  %s7901_s23 = sld [smem:[#allocation3 + $0x118]] }
 0x1e3   : > { %v7550_v3 = vadd.f32 %v11394_v11, %v7420_v19  ;;  %v7553_v4 = vsel %vm442_vm3, %v2203_v38, %v2204_v44  ;;  %v7556_v20 = vsel %vm442_vm3, %v2190_v13, %v2191_v60  ;;  %v1568_v55 = vstv %s7490_s4  ;;  %v7563_v32 = vpop.permute.xlu0 %1250  ;;  %v7565_v31 = vpop.permute.xlu1 %1237  ;;  %v7575_v60 = vld [vmem:[%s11376_s21 + $0x8] sm:$0xff]  ;;  %s7912_s4 = sld [smem:[#allocation3 + $0xe5]] }
 0x1e4   : > { %v7561_v27 = vadd.f32 %v11395_v12, %v7424_v40  ;;  %11396 = vst [vmem:[#allocation33_spill] sm:$0xff] %v7563_v32  ;;  %11397 = vst [vmem:[#allocation34_spill] sm:$0xff] %v7565_v31  ;;  %v2238_v30 = vmul.f32 %v7193_v2, %v2237_v63  ;;  %v2239_v19 = vmul.f32 %v7264_v41, %v2237_v63  ;;  %v2276_v11 = vstv %s7496_s25  ;;  %s7918_s25 = sld [smem:[#allocation3 + $0x17e]] }
 0x1e5   : > { %v2255_v38 = vrot.slane %v2251_v14, 1  ;;  %v2256_v44 = vrot.slane %v2252_v22, 1  ;;  %v1581_v13 = vmul.f32 %v7571_v24, %v1580_v34  ;;  %v1582_v40 = vmul.f32 %v7575_v60, %v1580_v34 }
 0x1e6   : > { %2050 = vrot.lane.b32.xlu0 %v7375_v29, %s11398_s17  ;;  %2037 = vrot.lane.b32.xlu1 %v7378_v26, %s11398_s17  ;;  %v7585_v63 = vsel %vm442_vm3, %v2229_v21, %v2230_v33  ;;  %v7588_v14 = vsel %vm442_vm3, %v2216_v7, %v2217_v42  ;;  %v1569_v22 = vmul.f32 %v7571_v24, %v1568_v55  ;;  %v2263_v32 = vstv %s7518_s29  ;;  %v11399_v29 = vld [vmem:[#allocation37_spill] sm:$0xff]  ;;  %v11400_v21 = vld [vmem:[#allocation38_spill] sm:$0xff]  ;;  %s7930_s29 = sld [smem:[#allocation3 + $0x14b]] }
 0x1e7   : > { %v1570_v12 = vmul.f32 %v7575_v60, %v1568_v55  ;;  %v2277_v34 = vmul.f32 %v7193_v2, %v2276_v11  ;;  %v2278_v31 = vmul.f32 %v7264_v41, %v2276_v11  ;;  %v670_v26 = vadd.f32 %v11399_v29, %v7464_v50  ;;  %v7601_v7 = vpop.permute.xlu0 %1277  ;;  %v7603_v42 = vpop.permute.xlu1 %1264  ;;  %v11402_v11 = vld [vmem:[#allocation39_spill] sm:$0xff] }
 0x1e8   : > { %v657_v33 = vadd.f32 %v11400_v21, %v7468_v56  ;;  %11401 = vst [vmem:[#allocation35_spill] sm:$0xff] %v7603_v42  ;;  %v2242_v18 = vrot.slane %v2238_v30, 1  ;;  %v2243_v55 = vrot.slane %v2239_v19, 1  ;;  %v696_v43 = vadd.f32 %v11402_v11, %v7500_v8  ;;  %v11403_v56 = vld [vmem:[#allocation40_spill] sm:$0xff] }
 0x1e9   : > { %v7610_v59 = vsel %vm442_vm3, %v2255_v38, %v2256_v44  ;;  %v1585_v61 = vrot.slane %v1581_v13, 4  ;;  %v1586_v50 = vrot.slane %v1582_v40, 4  ;;  %v683_v29 = vadd.f32 %v11403_v56, %v7504_v17  ;;  %v11404_v17 = vld [vmem:[#allocation41_spill] sm:$0xff] }
 0x1ea   : > { %2076 = vrot.lane.b32.xlu0 %v7403_v54, %s11398_s17  ;;  %2063 = vrot.lane.b32.xlu1 %v7431_v16, %s11398_s17  ;;  %v2264_v30 = vmul.f32 %v7193_v2, %v2263_v32  ;;  %v2265_v8 = vmul.f32 %v7264_v41, %v2263_v32  ;;  %v1602_v19 = vstv %s7546_s18  ;;  %v1574_v38 = vrot.slane %v1569_v22, 4  ;;  %v11405_v54 = vld [vmem:[#allocation42_spill] sm:$0xff]  ;;  %v11406_v16 = vld [vmem:[#allocation43_spill] sm:$0xff]  ;;  %s7937_s18 = sld [smem:[#allocation3 + $0x4d]] }
 0x1eb   : > { %v1575_v44 = vrot.slane %v1570_v12, 4  ;;  %v2281_v13 = vrot.slane %v2277_v34, 1  ;;  %v2282_v40 = vrot.slane %v2278_v31, 1  ;;  %v7628_v21 = vadd.f32 %v11404_v17, %v670_v26  ;;  %v7635_v32 = vpop.permute.xlu0 %1303  ;;  %v7637_v42 = vpop.permute.xlu1 %1290  ;;  %v11407_v31 = vld [vmem:[#allocation44_spill] sm:$0xff]  ;;  %v11408_v17 = vld [vmem:[#allocation49_spill] sm:$0xff] }
 0x1ec   : > { %v7631_v11 = vadd.f32 %v11405_v54, %v657_v33  ;;  %v722_v56 = vadd.f32 %v11406_v16, %v7522_v48  ;;  %v7640_v22 = vsel %vm442_vm3, %v2242_v18, %v2243_v55  ;;  %v709_v12 = vadd.f32 %v11407_v31, %v7526_v9  ;;  %v11410_v55 = vld [vmem:[#allocation50_spill] sm:$0xff] }
 0x1ed   : > { %v1603_v34 = vmul.f32 %v7571_v24, %v1602_v19  ;;  %v1604_v26 = vmul.f32 %v7575_v60, %v1602_v19  ;;  %v1591_v33 = vstv %s7578_s1  ;;  %v7648_v54 = vadd.f32 %v11408_v17, %v696_v43  ;;  %s7949_s1 = sld [smem:[#allocation3 + $0x1a]] }
 0x1ee   : > { %2102 = vrot.lane.b32.xlu0 %v7435_v47, %s11398_s17  ;;  %2089 = vrot.lane.b32.xlu1 %v7447_v45, %s11398_s17  ;;  %v7655_v18 = vsel %vm1573_vm6, %v1585_v61, %v1586_v50  ;;  %v2268_v48 = vrot.slane %v2264_v30, 1  ;;  %v2269_v9 = vrot.slane %v2265_v8, 1  ;;  %v7658_v16 = vadd.f32 %v11410_v55, %v683_v29  ;;  %v11412_v47 = vld [vmem:[#allocation53_spill] sm:$0xff] }
 0x1ef   : > { %11409 = vst [vmem:[#allocation36_spill] sm:$0xff] %v7655_v18  ;;  %v7661_v19 = vsel %vm1573_vm6, %v1574_v38, %v1575_v44  ;;  %v7664_v43 = vsel %vm442_vm3, %v2281_v13, %v2282_v40  ;;  %v2302_v31 = vstv %s7595_s8  ;;  %v7668_v17 = vadd.f32 %v11412_v47, %v722_v56  ;;  %v7670_v45 = vpop.permute.xlu0 %1329  ;;  %v7672_v61 = vpop.permute.xlu1 %1316  ;;  %v11414_v40 = vld [vmem:[#allocation45_spill] sm:$0xff]  ;;  %s7985_s8 = sld [smem:[#allocation3 + $0xb3]] }
 0x1f0   : > { %11411 = vst [vmem:[#allocation37_spill] sm:$0xff] %v7661_v19  ;;  %11413 = vst [vmem:[#allocation38_spill] sm:$0xff] %v7672_v61  ;;  %v1592_v50 = vmul.f32 %v7571_v24, %v1591_v33  ;;  %v1593_v29 = vmul.f32 %v7575_v60, %v1591_v33  ;;  %v2289_v30 = vstv %s7605_s14  ;;  %v7678_v8 = vadd.f32 %v7111_v39, %v709_v12  ;;  %s8004_s14 = sld [smem:[#allocation3 + $0x44]] }
 0x1f1   : > { %v1607_v38 = vrot.slane %v1603_v34, 4  ;;  %v1608_v44 = vrot.slane %v1604_v26, 4  ;;  %v1624_v13 = vstv %s7612_s2  ;;  %v748_v56 = vadd.f32 %v11414_v40, %v7550_v3  ;;  %s8006_s2 = sld [smem:[#allocation3 + $0x80]] }
 0x1f2   : > { %2128 = vrot.lane.b32.xlu0 %v7450_v58, %s11398_s17  ;;  %2115 = vrot.lane.b32.xlu1 %v7477_v0, %s11398_s17  ;;  %v7690_v33 = vsel %vm442_vm3, %v2268_v48, %v2269_v9  ;;  %v2303_v39 = vmul.f32 %v7193_v2, %v2302_v31  ;;  %v1613_v12 = vstv %s7623_s26  ;;  %v2304_v34 = vmul.f32 %v7264_v41, %v2302_v31  ;;  %v11415_v58 = vld [vmem:[#allocation46_spill] sm:$0xff]  ;;  %s8027_s26 = sld [smem:[#allocation3 + $0x119]] }
 0x1f3   : > { %v2290_v26 = vmul.f32 %v7193_v2, %v2289_v30  ;;  %v2291_v3 = vmul.f32 %v7264_v41, %v2289_v30  ;;  %v2328_v55 = vstv %s7625_s13  ;;  %v735_v0 = vadd.f32 %v11415_v58, %v7561_v27  ;;  %v7704_v47 = vpop.permute.xlu0 %1355  ;;  %v7706_v48 = vpop.permute.xlu1 %1342  ;;  %s8039_s13 = sld [smem:[#allocation3 + $0x11]] }
 0x1f4   : > { %v1596_v9 = vrot.slane %v1592_v50, 4  ;;  %v1597_v40 = vrot.slane %v1593_v29, 4  ;;  %v1625_v19 = vmul.f32 %v7571_v24, %v1624_v13  ;;  %v7712_v31 = vsel %vm1573_vm6, %v1607_v38, %v1608_v44 }
 0x1f5   : > { %11416 = vst [vmem:[#allocation39_spill] sm:$0xff] %v7712_v31  ;;  %v1626_v30 = vmul.f32 %v7575_v60, %v1624_v13  ;;  %v1614_v18 = vmul.f32 %v7571_v24, %v1613_v12  ;;  %v1615_v61 = vmul.f32 %v7575_v60, %v1613_v12  ;;  %v7720_v27 = vadd.f32 %v7146_v10, %v748_v56 }
 0x1f6   : > { %2154 = vrot.lane.b32.xlu0 %v7480_v52, %s11298_s10  ;;  %2141 = vrot.lane.b32.xlu1 %v7507_v5, %s11298_s10  ;;  %v2329_v50 = vmul.f32 %v7193_v2, %v2328_v55  ;;  %v2330_v29 = vmul.f32 %v7264_v41, %v2328_v55  ;;  %v2307_v38 = vrot.slane %v2303_v39, 1  ;;  %v2308_v44 = vrot.slane %v2304_v34, 1  ;;  %v11417_v52 = vld [vmem:[#allocation47_spill] sm:$0xff] }
 0x1f7   : > { %v2294_v13 = vrot.slane %v2290_v26, 1  ;;  %v2295_v12 = vrot.slane %v2291_v3, 1  ;;  %v7733_v10 = vadd.f32 %v7149_v15, %v735_v0  ;;  %v7737_v5 = vadd.f32 %v11417_v52, %v7628_v21  ;;  %v7739_v56 = vpop.permute.xlu0 %1381  ;;  %v7741_v55 = vpop.permute.xlu1 %1368  ;;  %v11419_v15 = vld [vmem:[#allocation48_spill] sm:$0xff] }
 0x1f8   : > { %v7744_v39 = vsel %vm1573_vm6, %v1596_v9, %v1597_v40  ;;  %v1629_v34 = vrot.slane %v1625_v19, 4  ;;  %v1630_v26 = vrot.slane %v1626_v30, 4  ;;  %v1618_v3 = vrot.slane %v1614_v18, 4  ;;  %v11420_v19 = vld [vmem:[#allocation51_spill] sm:$0xff] }
 0x1f9   : > { %11418 = vst [vmem:[#allocation40_spill] sm:$0xff] %v7744_v39  ;;  %v1619_v58 = vrot.slane %v1615_v61, 4  ;;  %v2315_v31 = vstv %s7681_s27  ;;  %v7749_v0 = vadd.f32 %v11419_v15, %v7631_v11  ;;  %v2333_v21 = vrot.slane %v2329_v50, 1  ;;  %s8046_s27 = sld [smem:[#allocation3 + $0xaa]] }
 0x1fa   : > { %2180 = vrot.lane.b32.xlu0 %v7533_v35, %s11298_s10  ;;  %2167 = vrot.lane.b32.xlu1 %v7536_v1, %s11298_s10  ;;  %v2334_v52 = vrot.slane %v2330_v29, 1  ;;  %v1646_v9 = vstv %s7694_s28  ;;  %v7758_v18 = vadd.f32 %v11420_v19, %v7648_v54  ;;  %v7761_v61 = vsel %vm442_vm3, %v2307_v38, %v2308_v44  ;;  %v11421_v35 = vld [vmem:[#allocation52_spill] sm:$0xff]  ;;  %s8048_s28 = sld [smem:[#allocation3 + $0xe6]] }
 0x1fb   : > { %v7764_v11 = vsel %vm442_vm3, %v2294_v13, %v2295_v12  ;;  %v1635_v40 = vstv %s7700_s0  ;;  %v7771_v1 = vadd.f32 %v11421_v35, %v7658_v16  ;;  %v7773_v30 = vpop.permute.xlu0 %1407  ;;  %v7775_v50 = vpop.permute.xlu1 %1394  ;;  %v2316_v54 = vmul.f32 %v7193_v2, %v2315_v31  ;;  %s8055_s0 = sld [smem:[#allocation3 + $0x77]] }
 0x1fc   : > { %11422 = vst [vmem:[#allocation41_spill] sm:$0xff] %v7775_v50  ;;  %v2317_v29 = vmul.f32 %v7264_v41, %v2315_v31  ;;  %v2442_v38 = vstv %s7709_s19  ;;  %v7781_v44 = vsel %vm1573_vm6, %v1629_v34, %v1630_v26  ;;  %v7784_v13 = vsel %vm1573_vm6, %v1618_v3, %v1619_v58  ;;  %s8070_s19 = sld [smem:[#allocation3 + $0x110]] }
 0x1fd   : > { %11423 = vst [vmem:[#allocation42_spill] sm:$0xff] %v7781_v44  ;;  %11424 = vst [vmem:[#allocation43_spill] sm:$0xff] %v7784_v13  ;;  %v1647_v16 = vmul.f32 %v7571_v24, %v1646_v9  ;;  %v2429_v12 = vstv %s7717_s15  ;;  %v7795_v31 = vsel %vm442_vm3, %v2333_v21, %v2334_v52  ;;  %v1648_v34 = vmul.f32 %v7575_v60, %v1646_v9  ;;  %s8077_s15 = sld [smem:[#allocation3 + $0xdd]] }
 0x1fe   : > { %2206 = vrot.lane.b32.xlu0 %v7553_v4, %s11298_s10  ;;  %2193 = vrot.lane.b32.xlu1 %v7556_v20, %s11298_s10  ;;  %v1636_v26 = vmul.f32 %v7571_v24, %v1635_v40  ;;  %v2468_v3 = vstv %s7728_s16  ;;  %v1637_v58 = vmul.f32 %v7575_v60, %v1635_v40  ;;  %v2443_v15 = vmul.f32 %v7193_v2, %v2442_v38  ;;  %v11425_v4 = vld [vmem:[#allocation54_spill] sm:$0xff]  ;;  %s8097_s16 = sld [smem:[#allocation3 + $0x17f]] }
 0x1ff   : > { %v2444_v19 = vmul.f32 %v7264_v41, %v2442_v38  ;;  %v2455_v35 = vstv %s7730_s5  ;;  %v7806_v13 = vadd.f32 %v11425_v4, %v7668_v17  ;;  %v7808_v20 = vpop.permute.xlu0 %1433  ;;  %v7810_v21 = vpop.permute.xlu1 %1420  ;;  %v2320_v52 = vrot.slane %v2316_v54, 1  ;;  %s8099_s5 = sld [smem:[#allocation3 + $0x14c]] }
 0x200   : > { %11426 = vst [vmem:[#allocation44_spill] sm:$0xff] %v7808_v20  ;;  %11427 = vst [vmem:[#allocation49_spill] sm:$0xff] %v7810_v21  ;;  %v2321_v9 = vrot.slane %v2317_v29, 1  ;;  %v2430_v24 = vmul.f32 %v7193_v2, %v2429_v12  ;;  %v1651_v60 = vrot.slane %v1647_v16, 4  ;;  %v2431_v40 = vmul.f32 %v7264_v41, %v2429_v12 }
 0x201   : > { %v2469_v38 = vmul.f32 %v7193_v2, %v2468_v3  ;;  %v2470_v44 = vmul.f32 %v7264_v41, %v2468_v3  ;;  %v1652_v17 = vrot.slane %v1648_v34, 4  ;;  %v1640_v54 = vrot.slane %v1636_v26, 4 }
 0x202   : > { %2232 = vrot.lane.b32.xlu0 %v7585_v63, %s11298_s10  ;;  %2219 = vrot.lane.b32.xlu1 %v7588_v14, %s11298_s10  ;;  %v2456_v29 = vmul.f32 %v7193_v2, %v2455_v35  ;;  %v2457_v16 = vmul.f32 %v7264_v41, %v2455_v35  ;;  %v1641_v12 = vrot.slane %v1637_v58, 4  ;;  %v2447_v3 = vrot.slane %v2443_v15, 2  ;;  %v11428_v63 = vld [vmem:[#allocation55_spill] sm:$0xff] }
 0x203   : > { %v2448_v4 = vrot.slane %v2444_v19, 2  ;;  %v2494_v39 = vstv %s7767_s9  ;;  %v7835_v14 = vadd.f32 %v11428_v63, %v7678_v8  ;;  %v7839_v34 = vadd.f32 %v7117_v51, %v7720_v27  ;;  %v7841_v26 = vpop.permute.xlu0 %1459  ;;  %v7843_v35 = vpop.permute.xlu1 %1446  ;;  %s8122_s9 = sld [smem:[#allocation3 + $0x4e]] }
 0x204   : > { %v7846_v21 = vsel %vm442_vm3, %v2320_v52, %v2321_v9  ;;  %v2434_v58 = vrot.slane %v2430_v24, 2  ;;  %v2435_v15 = vrot.slane %v2431_v40, 2  ;;  %v2473_v19 = vrot.slane %v2469_v38, 2 }
 0x205   : > { %v2474_v20 = vrot.slane %v2470_v44, 2  ;;  %v2481_v50 = vstv %s7788_s12  ;;  %v7851_v8 = vadd.f32 %v7119_v53, %v7733_v10  ;;  %v2460_v51 = vrot.slane %v2456_v29, 2  ;;  %s8128_s12 = sld [smem:[#allocation3 + $0x1b]] }
 0x206   : > { %2258 = vrot.lane.b32.xlu0 %v7610_v59, %s11312_s3  ;;  %2245 = vrot.lane.b32.xlu1 %v7640_v22, %s11312_s3  ;;  %v2461_v27 = vrot.slane %v2457_v16, 2  ;;  %v2495_v52 = vmul.f32 %v7193_v2, %v2494_v39  ;;  %v7859_v9 = vsel %vm1573_vm6, %v1651_v60, %v1652_v17  ;;  %v7862_v44 = vsel %vm1573_vm6, %v1640_v54, %v1641_v12 }
 0x207   : > { %v7865_v53 = vsel %vm755_vm4, %v2447_v3, %v2448_v4  ;;  %v2496_v10 = vmul.f32 %v7264_v41, %v2494_v39  ;;  %v7872_v59 = vadd.f32 %v7155_v37, %v7737_v5  ;;  %v7874_v22 = vpop.permute.xlu0 %1485  ;;  %v7876_v24 = vpop.permute.xlu1 %1472  ;;  %v2482_v60 = vmul.f32 %v7193_v2, %v2481_v50 }
 0x208   : > { %v2483_v40 = vmul.f32 %v7264_v41, %v2481_v50  ;;  %v2520_v38 = vstv %s7813_s30  ;;  %v7883_v39 = vadd.f32 %v7157_v6, %v7749_v0  ;;  %v7886_v17 = vsel %vm755_vm4, %v2434_v58, %v2435_v15  ;;  %s8145_s30 = sld [smem:[#allocation3 + $0x176]] }
 0x209   : > { %v7889_v37 = vsel %vm755_vm4, %v2473_v19, %v2474_v20  ;;  %v2507_v5 = vstv %s7818_s11  ;;  %v7897_v50 = vsel %vm755_vm4, %v2460_v51, %v2461_v27  ;;  %v2499_v54 = vrot.slane %v2495_v52, 2  ;;  %s8147_s11 = sld [smem:[#allocation3 + $0xb4]] }
 0x20a   : > { %2284 = vrot.lane.b32.xlu0 %v7664_v43, %s11312_s3  ;;  %2271 = vrot.lane.b32.xlu1 %v7690_v33, %s11312_s3  ;;  %v2546_v29 = vstv %s7826_s24  ;;  %v2533_v6 = vstv %s7828_s6  ;;  %v2500_v0 = vrot.slane %v2496_v10, 2  ;;  %v2521_v16 = vmul.f32 %v7193_v2, %v2520_v38  ;;  %s8160_s24 = sld [smem:[#allocation3 + $0x143]]  ;;  %s8172_s6 = sld [smem:[#allocation3 + $0x81]] }
 0x20b   : > { %v2522_v20 = vmul.f32 %v7264_v41, %v2520_v38  ;;  %v2572_v12 = vstv %s7831_s7  ;;  %v7906_v3 = vpop.permute.xlu0 %1511  ;;  %v7908_v43 = vpop.permute.xlu1 %1498  ;;  %v2486_v4 = vrot.slane %v2482_v60, 2  ;;  %v2487_v33 = vrot.slane %v2483_v40, 2  ;;  %s8180_s7 = sld [smem:[#allocation3 + $0x11a]] }
 0x20c   : > { %v2508_v63 = vmul.f32 %v7193_v2, %v2507_v5  ;;  %v2509_v58 = vmul.f32 %v7264_v41, %v2507_v5  ;;  %v2547_v15 = vmul.f32 %v7193_v2, %v2546_v29  ;;  %v2548_v19 = vmul.f32 %v7264_v41, %v2546_v29 }
 0x20d   : > { %v2534_v51 = vmul.f32 %v7193_v2, %v2533_v6  ;;  %v2535_v27 = vmul.f32 %v7264_v41, %v2533_v6  ;;  %v7922_v52 = vadd.f32 %v7198_v46, %v7758_v18  ;;  %v2573_v10 = vmul.f32 %v7193_v2, %v2572_v12 }
 0x20e   : > { %2310 = vrot.lane.b32.xlu0 %v7761_v61, %s11312_s3  ;;  %2297 = vrot.lane.b32.xlu1 %v7764_v11, %s11312_s3  ;;  %v2574_v60 = vmul.f32 %v7264_v41, %v2572_v12  ;;  %v7934_v40 = vadd.f32 %v7200_v62, %v7771_v1  ;;  %v2525_v38 = vrot.slane %v2521_v16, 2  ;;  %v2526_v5 = vrot.slane %v2522_v20, 2 }
 0x20f   : > { %v2559_v46 = vstv %s7868_s22  ;;  %v7939_v18 = vpop.permute.xlu0 %1537  ;;  %v7941_v61 = vpop.permute.xlu1 %1524  ;;  %v7944_v11 = vsel %vm755_vm4, %v2499_v54, %v2500_v0  ;;  %v7947_v29 = vsel %vm755_vm4, %v2486_v4, %v2487_v33  ;;  %v2512_v6 = vrot.slane %v2508_v63, 2  ;;  %s8224_s22 = sld [smem:[#allocation3 + $0xe7]] }
 0x210   : > { %v2513_v12 = vrot.slane %v2509_v58, 2  ;;  %v2551_v62 = vrot.slane %v2547_v15, 2  ;;  %v2552_v1 = vrot.slane %v2548_v19, 2  ;;  %v2538_v16 = vrot.slane %v2534_v51, 2 }
 0x211   : > { %v2539_v20 = vrot.slane %v2535_v27, 2  ;;  %v2577_v54 = vrot.slane %v2573_v10, 2  ;;  %v2578_v0 = vrot.slane %v2574_v60, 2  ;;  %v2560_v4 = vmul.f32 %v7193_v2, %v2559_v46 }
 0x212   : > { %2336 = vrot.lane.b32.xlu0 %v7795_v31, %s11312_s3  ;;  %2323 = vrot.lane.b32.xlu1 %v7846_v21, %s11312_s3  ;;  %v2598_v33 = vstv %s7901_s23  ;;  %v7959_v63 = vadd.f32 %v7236_v49, %v7806_v13  ;;  %v7963_v58 = vadd.f32 %v7238_v25, %v7835_v14  ;;  %v7966_v15 = vsel %vm755_vm4, %v2525_v38, %v2526_v5  ;;  %v8013_v38 = vld [vmem:[%s11376_s21 + $0x18] sm:$0xff]  ;;  %s8240_s23 = sld [smem:[#allocation3 + $0x180]] }
 0x213   : > { %v2561_v31 = vmul.f32 %v7264_v41, %v2559_v46  ;;  %v7971_v21 = vadd.f32 %v7278_v23, %v7839_v34  ;;  %v7975_v19 = vadd.f32 %v7280_v57, %v7851_v8  ;;  %v7977_v49 = vpop.permute.xlu0 %1563  ;;  %v7979_v13 = vpop.permute.xlu1 %1550  ;;  %v7982_v25 = vsel %vm755_vm4, %v2512_v6, %v2513_v12 }
 0x214   : > { %v2585_v14 = vstv %s7912_s4  ;;  %v7988_v51 = vsel %vm755_vm4, %v2551_v62, %v2552_v1  ;;  %v2599_v23 = vmul.f32 %v7193_v2, %v2598_v33  ;;  %v2600_v57 = vmul.f32 %v7264_v41, %v2598_v33  ;;  %s8243_s4 = sld [smem:[#allocation3 + $0x14d]] }
 0x215   : > { %v2624_v34 = vstv %s7918_s25  ;;  %v7998_v8 = vsel %vm755_vm4, %v2538_v16, %v2539_v20  ;;  %v8001_v27 = vsel %vm755_vm4, %v2577_v54, %v2578_v0  ;;  %v2564_v10 = vrot.slane %v2560_v4, 2  ;;  %s8255_s25 = sld [smem:[#allocation3 + $0x4f]] }
 0x216   : > { %2450 = vrot.lane.b32.xlu0 %v7865_v53, %s11398_s17  ;;  %2437 = vrot.lane.b32.xlu1 %v7886_v17, %s11398_s17  ;;  %v2611_v60 = vstv %s7930_s29  ;;  %v8010_v2 = vadd.f32 %v7326_v36, %v7872_v59  ;;  %v2565_v53 = vrot.slane %v2561_v31, 2  ;;  %v2586_v17 = vmul.f32 %v8013_v38, %v2585_v14  ;;  %s8260_s29 = sld [smem:[#allocation3 + $0x1c]] }
 0x217   : > { %v2650_v5 = vstv %s7937_s18  ;;  %v8017_v46 = vpop.permute.xlu0 %1678  ;;  %v8019_v6 = vpop.permute.xlu1 %1665  ;;  %v2587_v12 = vmul.f32 %v7264_v41, %v2585_v14  ;;  %v2625_v62 = vmul.f32 %v8013_v38, %v2624_v34  ;;  %v2626_v1 = vmul.f32 %v7264_v41, %v2624_v34  ;;  %s8278_s18 = sld [smem:[#allocation3 + $0xb5]] }
 0x218   : > { %v2637_v16 = vstv %s7949_s1  ;;  %v2603_v20 = vrot.slane %v2599_v23, 2  ;;  %v2604_v36 = vrot.slane %v2600_v57, 2  ;;  %v2612_v59 = vmul.f32 %v8013_v38, %v2611_v60  ;;  %s8288_s1 = sld [smem:[#allocation3 + $0x82]] }
 0x219   : > { %v2613_v54 = vmul.f32 %v7264_v41, %v2611_v60  ;;  %v8031_v0 = vadd.f32 %v7328_v28, %v7883_v39  ;;  %v2651_v4 = vmul.f32 %v8013_v38, %v2650_v5  ;;  %v2652_v33 = vmul.f32 %v7264_v41, %v2650_v5  ;;  %v11430_v60 = vld [vmem:[#allocation56_spill] sm:$0xff] }
 0x21a   : > { %2476 = vrot.lane.b32.xlu0 %v7889_v37, %s11398_s17  ;;  %2463 = vrot.lane.b32.xlu1 %v7897_v50, %s11398_s17  ;;  %v8042_v31 = vsel %vm755_vm4, %v2564_v10, %v2565_v53  ;;  %v2590_v14 = vrot.slane %v2586_v17, 2  ;;  %v2638_v28 = vmul.f32 %v8013_v38, %v2637_v16  ;;  %v2639_v39 = vmul.f32 %v7264_v41, %v2637_v16 }
 0x21b   : > { %v8050_v37 = vpop.permute.xlu0 %1704  ;;  %v8052_v50 = vpop.permute.xlu1 %1691  ;;  %v2591_v23 = vrot.slane %v2587_v12, 2  ;;  %v2629_v57 = vrot.slane %v2625_v62, 2  ;;  %v2630_v34 = vrot.slane %v2626_v1, 2  ;;  %v2676_v10 = vstv %s7985_s8  ;;  %s8314_s8 = sld [smem:[#allocation3 + $0x11b]] }
 0x21c   : > { %11429 = vst [vmem:[#allocation50_spill] sm:$0xff] %v8052_v50  ;;  %v8059_v41 = vadd.f32 %v11430_v60, %v7922_v52  ;;  %v8062_v53 = vsel %vm755_vm4, %v2603_v20, %v2604_v36  ;;  %v2616_v17 = vrot.slane %v2612_v59, 2  ;;  %v2617_v5 = vrot.slane %v2613_v54, 2  ;;  %v8074_v36 = vld [vmem:[%s11376_s21 + $0x20] sm:$0xff]  ;;  %v11432_v54 = vld [vmem:[#allocation58_spill] sm:$0xff] }
 0x21d   : > { %v2655_v12 = vrot.slane %v2651_v4, 2  ;;  %v2656_v62 = vrot.slane %v2652_v33, 2  ;;  %v1873_v1 = vstv %s8004_s14  ;;  %v2663_v16 = vstv %s8006_s2  ;;  %s8345_s14 = sld [smem:[#allocation3 + $0xe8]]  ;;  %s8352_s2 = sld [smem:[#allocation3 + $0x181]] }
 0x21e   : > { %2502 = vrot.lane.b32.xlu0 %v7944_v11, %s11398_s17  ;;  %2489 = vrot.lane.b32.xlu1 %v7947_v29, %s11398_s17  ;;  %v2642_v50 = vrot.slane %v2638_v28, 2  ;;  %v2643_v52 = vrot.slane %v2639_v39, 2  ;;  %v2677_v20 = vmul.f32 %v8013_v38, %v2676_v10  ;;  %v2678_v59 = vmul.f32 %v8074_v36, %v2676_v10  ;;  %v11431_v11 = vld [vmem:[#allocation57_spill] sm:$0xff] }
 0x21f   : > { %v8081_v29 = vadd.f32 %v11431_v11, %v7934_v40  ;;  %v8085_v4 = vadd.f32 %v11432_v54, %v7959_v63  ;;  %v8087_v33 = vpop.permute.xlu0 %1730  ;;  %v8089_v28 = vpop.permute.xlu1 %1717  ;;  %v8092_v39 = vsel %vm755_vm4, %v2590_v14, %v2591_v23  ;;  %v8095_v10 = vsel %vm755_vm4, %v2629_v57, %v2630_v34  ;;  %v11435_v40 = vld [vmem:[#allocation59_spill] sm:$0xff] }
 0x220   : > { %11433 = vst [vmem:[#allocation53_spill] sm:$0xff] %v8087_v33  ;;  %11434 = vst [vmem:[#allocation45_spill] sm:$0xff] %v8089_v28  ;;  %v8103_v63 = vadd.f32 %v11435_v40, %v7963_v58  ;;  %v2664_v60 = vmul.f32 %v8013_v38, %v2663_v16  ;;  %v2665_v11 = vmul.f32 %v8074_v36, %v2663_v16  ;;  %v2702_v54 = vstv %s8027_s26  ;;  %s8362_s26 = sld [smem:[#allocation3 + $0x14e]] }
 0x221   : > { %v8113_v14 = vsel %vm755_vm4, %v2616_v17, %v2617_v5  ;;  %v8116_v23 = vsel %vm755_vm4, %v2655_v12, %v2656_v62  ;;  %v8119_v58 = vmul.f32 %v8013_v38, %v1873_v1  ;;  %v1869_v57 = vstv %s8039_s13  ;;  %s8368_s13 = sld [smem:[#allocation3 + $0x50]] }
 0x222   : > { %2528 = vrot.lane.b32.xlu0 %v7966_v15, %s11398_s17  ;;  %2515 = vrot.lane.b32.xlu1 %v7982_v25, %s11398_s17  ;;  %v8125_v34 = vsel %vm755_vm4, %v2642_v50, %v2643_v52  ;;  %v2681_v16 = vrot.slane %v2677_v20, 2  ;;  %v2682_v15 = vrot.slane %v2678_v59, 2  ;;  %v2689_v40 = vstv %s8048_s28  ;;  %s8410_s28 = sld [smem:[#allocation3 + $0xb6]] }
 0x223   : > { %11436 = vst [vmem:[#allocation46_spill] sm:$0xff] %v8119_v58  ;;  %v8130_v25 = vpop.permute.xlu0 %1756  ;;  %v8132_v17 = vpop.permute.xlu1 %1743  ;;  %v1881_v5 = vstv %s8046_s27  ;;  %v1877_v12 = vstv %s8055_s0  ;;  %v2703_v62 = vmul.f32 %v8013_v38, %v2702_v54  ;;  %v2704_v1 = vmul.f32 %v8074_v36, %v2702_v54  ;;  %v11439_v58 = vld [vmem:[#allocation60_spill] sm:$0xff]  ;;  %s8387_s27 = sld [smem:[#allocation3 + $0x1d]]  ;;  %s8412_s0 = sld [smem:[#allocation3 + $0x83]] }
 0x224   : > { %11437 = vst [vmem:[#allocation47_spill] sm:$0xff] %v8130_v25  ;;  %11438 = vst [vmem:[#allocation48_spill] sm:$0xff] %v8132_v17  ;;  %v8140_v50 = vadd.f32 %v11439_v58, %v7971_v21  ;;  %v8143_v52 = vmul.f32 %v8013_v38, %v1869_v57  ;;  %v2668_v20 = vrot.slane %v2664_v60, 2  ;;  %v2669_v59 = vrot.slane %v2665_v11, 2  ;;  %v11441_v17 = vld [vmem:[#allocation61_spill] sm:$0xff] }
 0x225   : > { %v8151_v25 = vadd.f32 %v11441_v17, %v7975_v19  ;;  %v2690_v21 = vmul.f32 %v8013_v38, %v2689_v40  ;;  %v2691_v60 = vmul.f32 %v8074_v36, %v2689_v40  ;;  %v1889_v11 = vstv %s8070_s19  ;;  %s8429_s19 = sld [smem:[#allocation3 + $0x11c]] }
 0x226   : > { %11440 = vst [vmem:[#allocation51_spill] sm:$0xff] %v8143_v52  ;;  %2554 = vrot.lane.b32.xlu0 %v7988_v51, %s11298_s10  ;;  %2541 = vrot.lane.b32.xlu1 %v7998_v8, %s11298_s10  ;;  %v8163_v54 = vsel %vm755_vm4, %v2681_v16, %v2682_v15  ;;  %v8166_v19 = vmul.f32 %v8013_v38, %v1881_v5  ;;  %v1885_v51 = vstv %s8077_s15  ;;  %v2707_v40 = vrot.slane %v2703_v62, 2  ;;  %v11446_v15 = vld [vmem:[#allocation62_spill] sm:$0xff]  ;;  %s8455_s15 = sld [smem:[#allocation3 + $0xe9]] }
 0x227   : > { %v8169_v58 = vmul.f32 %v8013_v38, %v1877_v12  ;;  %v8174_v8 = vpop.permute.xlu0 %1782  ;;  %v2708_v17 = vrot.slane %v2704_v1, 2  ;;  %v2728_v52 = vstv %s8097_s16  ;;  %v2715_v16 = vstv %s8099_s5  ;;  %v11447_v12 = vld [vmem:[#allocation63_spill] sm:$0xff]  ;;  %s8473_s16 = sld [smem:[#allocation3 + $0x182]]  ;;  %s8484_s5 = sld [smem:[#allocation3 + $0x14f]] }
 0x228   : > { %11442 = vst [vmem:[#allocation52_spill] sm:$0xff] %v8166_v19  ;;  %11444 = vst [vmem:[#allocation55_spill] sm:$0xff] %v8174_v8  ;;  %v8176_v57 = vpop.permute.xlu1 %1769  ;;  %v8184_v5 = vadd.f32 %v11446_v15, %v8010_v2  ;;  %v8191_v19 = vsel %vm755_vm4, %v2668_v20, %v2669_v59  ;;  %v2694_v62 = vrot.slane %v2690_v21, 2  ;;  %v2695_v2 = vrot.slane %v2691_v60, 2 }
 0x229   : > { %11443 = vst [vmem:[#allocation54_spill] sm:$0xff] %v8169_v58  ;;  %11445 = vst [vmem:[#allocation56_spill] sm:$0xff] %v8176_v57  ;;  %v8188_v58 = vadd.f32 %v11447_v12, %v8031_v0  ;;  %v8194_v57 = vmul.f32 %v8013_v38, %v1889_v11  ;;  %v8201_v1 = vmul.f32 %v8013_v38, %v1885_v51  ;;  %v2754_v0 = vstv %s8122_s9  ;;  %s8493_s9 = sld [smem:[#allocation3 + $0x51]] }
 0x22a   : > { %2580 = vrot.lane.b32.xlu0 %v8001_v27, %s11298_s10  ;;  %2567 = vrot.lane.b32.xlu1 %v8042_v31, %s11298_s10  ;;  %v2729_v20 = vmul.f32 %v8013_v38, %v2728_v52  ;;  %v2730_v59 = vmul.f32 %v8074_v36, %v2728_v52  ;;  %v2716_v11 = vmul.f32 %v8013_v38, %v2715_v16  ;;  %v2741_v15 = vstv %s8128_s12  ;;  %v11450_v27 = vld [vmem:[#allocation30_spill] sm:$0xff]  ;;  %v11451_v31 = vld [vmem:[#allocation64_spill] sm:$0xff]  ;;  %s8514_s12 = sld [smem:[#allocation3 + $0x1e]] }
 0x22b   : > { %11448 = vst [vmem:[#allocation57_spill] sm:$0xff] %v8194_v57  ;;  %11449 = vst [vmem:[#allocation58_spill] sm:$0xff] %v8201_v1  ;;  %v8210_v12 = vadd.f32 %v11450_v27, %v8059_v41  ;;  %v8214_v21 = vadd.f32 %v11451_v31, %v8081_v29  ;;  %v8221_v1 = vsel %vm755_vm4, %v2707_v40, %v2708_v17  ;;  %v1897_v57 = vstv %s8145_s30  ;;  %s8531_s30 = sld [smem:[#allocation3 + $0xb7]] }
 0x22c   : > { %v8216_v60 = vpop.permute.xlu0 %1808  ;;  %v8218_v51 = vpop.permute.xlu1 %1795  ;;  %v2717_v52 = vmul.f32 %v8074_v36, %v2715_v16  ;;  %v2755_v41 = vmul.f32 %v8013_v38, %v2754_v0  ;;  %v2756_v27 = vmul.f32 %v8074_v36, %v2754_v0  ;;  %v2780_v8 = vstv %s8147_s11  ;;  %s8558_s11 = sld [smem:[#allocation3 + $0x84]] }
 0x22d   : > { %11452 = vst [vmem:[#allocation59_spill] sm:$0xff] %v8216_v60  ;;  %11453 = vst [vmem:[#allocation60_spill] sm:$0xff] %v8218_v51  ;;  %v8235_v29 = vsel %vm755_vm4, %v2694_v62, %v2695_v2  ;;  %v1893_v40 = vstv %s8160_s24  ;;  %v2742_v17 = vmul.f32 %v8013_v38, %v2741_v15  ;;  %v2743_v16 = vmul.f32 %v8074_v36, %v2741_v15  ;;  %s8569_s24 = sld [smem:[#allocation3 + $0x11d]] }
 0x22e   : > { %2606 = vrot.lane.b32.xlu0 %v8062_v53, %s11298_s10  ;;  %2593 = vrot.lane.b32.xlu1 %v8092_v39, %s11298_s10  ;;  %v2733_v31 = vrot.slane %v2729_v20, 2  ;;  %v2734_v0 = vrot.slane %v2730_v59, 2  ;;  %v2720_v51 = vrot.slane %v2716_v11, 2  ;;  %v2767_v60 = vstv %s8172_s6  ;;  %s8582_s6 = sld [smem:[#allocation3 + $0xea]] }
 0x22f   : > { %v8250_v62 = vmul.f32 %v8013_v38, %v1897_v57  ;;  %v2781_v2 = vmul.f32 %v8013_v38, %v2780_v8  ;;  %v2782_v28 = vmul.f32 %v8074_v36, %v2780_v8  ;;  %v2806_v15 = vstv %s8180_s7  ;;  %s8589_s7 = sld [smem:[#allocation3 + $0x183]] }
 0x230   : > { %v8245_v53 = vpop.permute.xlu0 %1834  ;;  %v8247_v39 = vpop.permute.xlu1 %1821  ;;  %v2721_v20 = vrot.slane %v2717_v52, 2  ;;  %v8258_v59 = vmul.f32 %v8013_v38, %v1893_v40  ;;  %v2759_v11 = vrot.slane %v2755_v41, 2  ;;  %v2760_v33 = vrot.slane %v2756_v27, 2  ;;  %v11458_v40 = vld [vmem:[#allocation31_spill] sm:$0xff]  ;;  %v11459_v41 = vld [vmem:[#allocation32_spill] sm:$0xff] }
 0x231   : > { %11454 = vst [vmem:[#allocation61_spill] sm:$0xff] %v8245_v53  ;;  %11455 = vst [vmem:[#allocation62_spill] sm:$0xff] %v8247_v39  ;;  %v2746_v57 = vrot.slane %v2742_v17, 2  ;;  %v2747_v8 = vrot.slane %v2743_v16, 2  ;;  %v2769_v52 = vmul.f32 %v8074_v36, %v2767_v60  ;;  %v8274_v27 = vadd.f32 %v11459_v41, %v8103_v63  ;;  %v11461_v63 = vld [vmem:[#allocation33_spill] sm:$0xff] }
 0x232   : > { %11456 = vst [vmem:[#allocation63_spill] sm:$0xff] %v8250_v62  ;;  %11457 = vst [vmem:[#allocation30_spill] sm:$0xff] %v8258_v59  ;;  %2632 = vrot.lane.b32.xlu0 %v8095_v10, %s11298_s10  ;;  %2619 = vrot.lane.b32.xlu1 %v8113_v14, %s11298_s10  ;;  %v2768_v62 = vmul.f32 %v8013_v38, %v2767_v60  ;;  %v8270_v59 = vadd.f32 %v11458_v40, %v8085_v4  ;;  %v2785_v4 = vrot.slane %v2781_v2, 2 }
 0x233   : > { %v2807_v10 = vmul.f32 %v8013_v38, %v2806_v15  ;;  %v2808_v39 = vmul.f32 %v8074_v36, %v2806_v15  ;;  %v8285_v60 = vsel %vm755_vm4, %v2733_v31, %v2734_v0  ;;  %v2786_v16 = vrot.slane %v2782_v28, 2  ;;  %v11462_v15 = vld [vmem:[#allocation34_spill] sm:$0xff] }
 0x234   : > { %v8280_v14 = vpop.permute.xlu0 %1860  ;;  %v8282_v17 = vpop.permute.xlu1 %1847  ;;  %v2793_v40 = vstv %s8224_s22  ;;  %v8292_v41 = vadd.f32 %v11461_v63, %v8140_v50  ;;  %v8296_v53 = vadd.f32 %v11462_v15, %v8151_v25  ;;  %v8302_v31 = vsel %vm755_vm4, %v2759_v11, %v2760_v33  ;;  %s8616_s22 = sld [smem:[#allocation3 + $0x150]] }
 0x235   : > { %11460 = vst [vmem:[#allocation64_spill] sm:$0xff] %v8280_v14  ;;  %v8299_v14 = vsel %vm755_vm4, %v2720_v51, %v2721_v20  ;;  %v8309_v28 = vsel %vm755_vm4, %v2746_v57, %v2747_v8  ;;  %v2772_v50 = vrot.slane %v2768_v62, 2  ;;  %v2773_v0 = vrot.slane %v2769_v52, 2 }
 0x236   : > { %2658 = vrot.lane.b32.xlu0 %v8116_v23, %s11312_s3  ;;  %2645 = vrot.lane.b32.xlu1 %v8125_v34, %s11312_s3  ;;  %v2832_v25 = vstv %s8240_s23  ;;  %v2811_v2 = vrot.slane %v2807_v10, 2  ;;  %v2812_v51 = vrot.slane %v2808_v39, 2  ;;  %v2794_v20 = vmul.f32 %v8013_v38, %v2793_v40  ;;  %v11463_v34 = vld [vmem:[#allocation35_spill] sm:$0xff]  ;;  %s8638_s23 = sld [smem:[#allocation3 + $0x53]] }
 0x237   : > { %v2819_v33 = vstv %s8243_s4  ;;  %v8318_v23 = vadd.f32 %v7601_v7, %v8184_v5  ;;  %v8322_v11 = vadd.f32 %v11463_v34, %v8188_v58  ;;  %v8329_v39 = vsel %vm755_vm4, %v2785_v4, %v2786_v16  ;;  %s8648_s4 = sld [smem:[#allocation3 + $0x20]] }
 0x238   : > { %v8324_v57 = vpop.permute.xlu0 %1912  ;;  %v8326_v62 = vpop.permute.xlu1 %1904  ;;  %v2858_v8 = vstv %s8255_s25  ;;  %v2795_v52 = vmul.f32 %v8074_v36, %v2793_v40  ;;  %v2833_v10 = vmul.f32 %v8013_v38, %v2832_v25  ;;  %v2834_v7 = vmul.f32 %v8074_v36, %v2832_v25  ;;  %s8663_s25 = sld [smem:[#allocation3 + $0x4a]] }
 0x239   : > { %11464 = vst [vmem:[#allocation31_spill] sm:$0xff] %v8324_v57  ;;  %11465 = vst [vmem:[#allocation32_spill] sm:$0xff] %v8326_v62  ;;  %v2845_v5 = vstv %s8260_s29  ;;  %v8341_v58 = vsel %vm755_vm4, %v2772_v50, %v2773_v0  ;;  %v2820_v4 = vmul.f32 %v8013_v38, %v2819_v33  ;;  %v2821_v16 = vmul.f32 %v8074_v36, %v2819_v33  ;;  %s8682_s29 = sld [smem:[#allocation3 + $0x17]] }
 0x23a   : > { %2684 = vrot.lane.b32.xlu0 %v8163_v54, %s11312_s3  ;;  %2671 = vrot.lane.b32.xlu1 %v8191_v19, %s11312_s3  ;;  %v8348_v40 = vsel %vm755_vm4, %v2811_v2, %v2812_v51  ;;  %v2798_v63 = vrot.slane %v2794_v20, 2  ;;  %v2859_v15 = vmul.f32 %v8013_v38, %v2858_v8  ;;  %v2884_v54 = vstv %s8278_s18  ;;  %s8696_s18 = sld [smem:[#allocation3 + $0xb9]] }
 0x23b   : > { %v2860_v50 = vmul.f32 %v8074_v36, %v2858_v8  ;;  %v2846_v0 = vmul.f32 %v8013_v38, %v2845_v5  ;;  %v2847_v33 = vmul.f32 %v8074_v36, %v2845_v5  ;;  %v2871_v34 = vstv %s8288_s1  ;;  %s8698_s1 = sld [smem:[#allocation3 + $0x86]] }
 0x23c   : > { %v8354_v25 = vpop.permute.xlu0 %1928  ;;  %v8356_v19 = vpop.permute.xlu1 %1920  ;;  %v8366_v2 = vadd.f32 %v7635_v32, %v8210_v12  ;;  %v2799_v51 = vrot.slane %v2795_v52, 2  ;;  %v2837_v20 = vrot.slane %v2833_v10, 2  ;;  %v2838_v62 = vrot.slane %v2834_v7, 2 }
 0x23d   : > { %11466 = vst [vmem:[#allocation33_spill] sm:$0xff] %v8354_v25  ;;  %11467 = vst [vmem:[#allocation34_spill] sm:$0xff] %v8356_v19  ;;  %v8372_v8 = vadd.f32 %v7637_v42, %v8214_v21  ;;  %v2824_v5 = vrot.slane %v2820_v4, 2  ;;  %v2825_v19 = vrot.slane %v2821_v16, 2  ;;  %v2885_v32 = vmul.f32 %v8013_v38, %v2884_v54  ;;  %v11469_v16 = vld [vmem:[#allocation38_spill] sm:$0xff] }
 0x23e   : > { %2710 = vrot.lane.b32.xlu0 %v8221_v1, %s11312_s3  ;;  %2697 = vrot.lane.b32.xlu1 %v8235_v29, %s11312_s3  ;;  %v2886_v12 = vmul.f32 %v8074_v36, %v2884_v54  ;;  %v2872_v52 = vmul.f32 %v8013_v38, %v2871_v34  ;;  %v2873_v10 = vmul.f32 %v8074_v36, %v2871_v34  ;;  %v2910_v7 = vstv %s8314_s8  ;;  %s8701_s8 = sld [smem:[#allocation3 + $0xb0]] }
 0x23f   : > { %v2863_v1 = vrot.slane %v2859_v15, 3  ;;  %v2864_v21 = vrot.slane %v2860_v50, 3  ;;  %v2850_v57 = vrot.slane %v2846_v0, 3  ;;  %v2851_v29 = vrot.slane %v2847_v33, 3 }
 0x240   : > { %v8383_v25 = vpop.permute.xlu0 %1944  ;;  %v8385_v42 = vpop.permute.xlu1 %1936  ;;  %v8391_v4 = vadd.f32 %v7670_v45, %v8270_v59  ;;  %v8395_v54 = vadd.f32 %v11469_v16, %v8274_v27  ;;  %v8398_v34 = vsel %vm755_vm4, %v2798_v63, %v2799_v51  ;;  %v2889_v15 = vrot.slane %v2885_v32, 3 }
 0x241   : > { %11468 = vst [vmem:[#allocation35_spill] sm:$0xff] %v8385_v42  ;;  %v8401_v42 = vsel %vm755_vm4, %v2837_v20, %v2838_v62  ;;  %v2911_v45 = vmul.f32 %v8013_v38, %v2910_v7  ;;  %v2912_v59 = vmul.f32 %v8074_v36, %v2910_v7  ;;  %v2897_v27 = vstv %s8345_s14  ;;  %s8752_s14 = sld [smem:[#allocation3 + $0x7d]] }
 0x242   : > { %2736 = vrot.lane.b32.xlu0 %v8285_v60, %s11312_s3  ;;  %2723 = vrot.lane.b32.xlu1 %v8299_v14, %s11312_s3  ;;  %v2890_v62 = vrot.slane %v2886_v12, 3  ;;  %v2876_v63 = vrot.slane %v2872_v52, 3  ;;  %v2877_v50 = vrot.slane %v2873_v10, 3  ;;  %v2936_v0 = vstv %s8352_s2  ;;  %s8754_s2 = sld [smem:[#allocation3 + $0x11f]] }
 0x243   : > { %v8420_v14 = vsel %vm755_vm4, %v2824_v5, %v2825_v19  ;;  %v8423_v51 = vsel %vm1260_vm5, %v2863_v1, %v2864_v21  ;;  %v8426_v20 = vsel %vm1260_vm5, %v2850_v57, %v2851_v29  ;;  %v2923_v32 = vstv %s8362_s26  ;;  %s8768_s26 = sld [smem:[#allocation3 + $0xec]] }
 0x244   : > { %v8415_v60 = vpop.permute.xlu0 %1960  ;;  %v8417_v33 = vpop.permute.xlu1 %1952  ;;  %v8433_v12 = vadd.f32 %v7704_v47, %v8292_v41  ;;  %v2898_v52 = vmul.f32 %v8013_v38, %v2897_v27  ;;  %v2899_v10 = vmul.f32 %v8074_v36, %v2897_v27  ;;  %v2962_v7 = vstv %s8368_s13  ;;  %s8784_s13 = sld [smem:[#allocation3 + $0x116]] }
 0x245   : > { %v8440_v19 = vadd.f32 %v7706_v48, %v8296_v53  ;;  %v2915_v57 = vrot.slane %v2911_v45, 3  ;;  %v2916_v5 = vrot.slane %v2912_v59, 3  ;;  %v2937_v47 = vmul.f32 %v8013_v38, %v2936_v0 }
 0x246   : > { %2762 = vrot.lane.b32.xlu0 %v8302_v31, %s11375_s20  ;;  %2749 = vrot.lane.b32.xlu1 %v8309_v28, %s11375_s20  ;;  %v8448_v41 = vsel %vm1260_vm5, %v2889_v15, %v2890_v62  ;;  %v8451_v1 = vsel %vm1260_vm5, %v2876_v63, %v2877_v50  ;;  %v2938_v48 = vmul.f32 %v8074_v36, %v2936_v0  ;;  %v2949_v15 = vstv %s8387_s27  ;;  %s8813_s27 = sld [smem:[#allocation3 + $0xe3]] }
 0x247   : > { %v2924_v53 = vmul.f32 %v8013_v38, %v2923_v32  ;;  %v2925_v21 = vmul.f32 %v8074_v36, %v2923_v32  ;;  %v2963_v29 = vmul.f32 %v8013_v38, %v2962_v7  ;;  %v2964_v16 = vmul.f32 %v8074_v36, %v2962_v7 }
 0x248   : > { %v8457_v31 = vpop.permute.xlu0 %1976  ;;  %v8459_v28 = vpop.permute.xlu1 %1968  ;;  %v8467_v45 = vadd.f32 %v7739_v56, %v8318_v23  ;;  %v8471_v59 = vadd.f32 %v7741_v55, %v8322_v11  ;;  %v2902_v27 = vrot.slane %v2898_v52, 3  ;;  %v2903_v62 = vrot.slane %v2899_v10, 3 }
 0x249   : > { %v8480_v63 = vsel %vm1260_vm5, %v2915_v57, %v2916_v5  ;;  %v2941_v56 = vrot.slane %v2937_v47, 3  ;;  %v2988_v23 = vstv %s8410_s28  ;;  %v2975_v50 = vstv %s8412_s0  ;;  %s8822_s28 = sld [smem:[#allocation3 + $0x185]]  ;;  %s8829_s0 = sld [smem:[#allocation3 + $0x152]] }
 0x24a   : > { %2788 = vrot.lane.b32.xlu0 %v8329_v39, %s11375_s20  ;;  %2775 = vrot.lane.b32.xlu1 %v8341_v58, %s11375_s20  ;;  %v2942_v55 = vrot.slane %v2938_v48, 3  ;;  %v2928_v11 = vrot.slane %v2924_v53, 3  ;;  %v2950_v0 = vmul.f32 %v8013_v38, %v2949_v15  ;;  %v2951_v32 = vmul.f32 %v8074_v36, %v2949_v15 }
 0x24b   : > { %v2929_v10 = vrot.slane %v2925_v21, 3  ;;  %v2967_v58 = vrot.slane %v2963_v29, 3  ;;  %v2968_v7 = vrot.slane %v2964_v16, 3  ;;  %v3014_v57 = vstv %s8429_s19  ;;  %v11472_v21 = vld [vmem:[#allocation41_spill] sm:$0xff]  ;;  %s8837_s19 = sld [smem:[#allocation3 + $0x17c]] }
 0x24c   : > { %v8488_v52 = vpop.permute.xlu0 %1992  ;;  %v8490_v39 = vpop.permute.xlu1 %1984  ;;  %v8496_v5 = vsel %vm1260_vm5, %v2902_v27, %v2903_v62  ;;  %v2989_v47 = vmul.f32 %v8013_v38, %v2988_v23  ;;  %v2990_v48 = vmul.f32 %v8074_v36, %v2988_v23  ;;  %v2976_v53 = vmul.f32 %v8013_v38, %v2975_v50 }
 0x24d   : > { %11470 = vst [vmem:[#allocation38_spill] sm:$0xff] %v8488_v52  ;;  %11471 = vst [vmem:[#allocation65_spill] sm:$0xff] %v8490_v39  ;;  %v1410_v15 = vadd.f32 %v7773_v30, %v8366_v2  ;;  %v8505_v29 = vadd.f32 %v11472_v21, %v8372_v8  ;;  %v2977_v16 = vmul.f32 %v8074_v36, %v2975_v50  ;;  %v2954_v27 = vrot.slane %v2950_v0, 3 }
 0x24e   : > { %2814 = vrot.lane.b32.xlu0 %v8348_v40, %s11375_s20  ;;  %2801 = vrot.lane.b32.xlu1 %v8398_v34, %s11375_s20  ;;  %v2955_v62 = vrot.slane %v2951_v32, 3  ;;  %v3015_v23 = vmul.f32 %v8013_v38, %v3014_v57  ;;  %v3001_v39 = vstv %s8455_s15  ;;  %v8521_v40 = vsel %vm1260_vm5, %v2941_v56, %v2942_v55  ;;  %s8875_s15 = sld [smem:[#allocation3 + $0x149]] }
 0x24f   : > { %v8524_v8 = vsel %vm1260_vm5, %v2928_v11, %v2929_v10  ;;  %v8527_v34 = vsel %vm1260_vm5, %v2967_v58, %v2968_v7  ;;  %v3016_v50 = vmul.f32 %v8074_v36, %v3014_v57  ;;  %v2993_v0 = vrot.slane %v2989_v47, 3  ;;  %v11475_v58 = vld [vmem:[#allocation44_spill] sm:$0xff]  ;;  %v11476_v57 = vld [vmem:[#allocation49_spill] sm:$0xff] }
 0x250   : > { %v8516_v30 = vpop.permute.xlu0 %2008  ;;  %v8518_v2 = vpop.permute.xlu1 %2000  ;;  %v2994_v32 = vrot.slane %v2990_v48, 3  ;;  %v2980_v21 = vrot.slane %v2976_v53, 3  ;;  %v3040_v52 = vstv %s8473_s16  ;;  %v2981_v56 = vrot.slane %v2977_v16, 3  ;;  %s8888_s16 = sld [smem:[#allocation3 + $0x54]] }
 0x251   : > { %11473 = vst [vmem:[#allocation41_spill] sm:$0xff] %v8516_v30  ;;  %11474 = vst [vmem:[#allocation66_spill] sm:$0xff] %v8518_v2  ;;  %v3002_v55 = vmul.f32 %v8013_v38, %v3001_v39  ;;  %v3003_v11 = vmul.f32 %v8074_v36, %v3001_v39  ;;  %v3027_v10 = vstv %s8484_s5  ;;  %v8542_v7 = vadd.f32 %v11475_v58, %v8391_v4  ;;  %s8923_s5 = sld [smem:[#allocation3 + $0x21]] }
 0x252   : > { %2840 = vrot.lane.b32.xlu0 %v8401_v42, %s11375_s20  ;;  %2827 = vrot.lane.b32.xlu1 %v8420_v14, %s11375_s20  ;;  %v8546_v47 = vadd.f32 %v11476_v57, %v8395_v54  ;;  %v8549_v48 = vsel %vm1260_vm5, %v2954_v27, %v2955_v62  ;;  %v3019_v42 = vrot.slane %v3015_v23, 3  ;;  %v3020_v16 = vrot.slane %v3016_v50, 3 }
 0x253   : > { %v3041_v39 = vmul.f32 %v8013_v38, %v3040_v52  ;;  %v3042_v2 = vmul.f32 %v8074_v36, %v3040_v52  ;;  %v3066_v30 = vstv %s8493_s9  ;;  %v8562_v4 = vadd.f32 %v7841_v26, %v8433_v12  ;;  %s8930_s9 = sld [smem:[#allocation3 + $0xba]] }
 0x254   : > { %v8551_v53 = vpop.permute.xlu0 %2024  ;;  %v8553_v14 = vpop.permute.xlu1 %2016  ;;  %v8565_v54 = vsel %vm1260_vm5, %v2993_v0, %v2994_v32  ;;  %v3028_v27 = vmul.f32 %v8013_v38, %v3027_v10  ;;  %v3029_v62 = vmul.f32 %v8074_v36, %v3027_v10  ;;  %v8573_v52 = vadd.f32 %v7843_v35, %v8440_v19 }
 0x255   : > { %v8580_v26 = vsel %vm1260_vm5, %v2980_v21, %v2981_v56  ;;  %v3006_v12 = vrot.slane %v3002_v55, 3  ;;  %v3007_v23 = vrot.slane %v3003_v11, 3  ;;  %v1488_v50 = vadd.f32 %v7874_v22, %v8467_v45 }
 0x256   : > { %2866 = vrot.lane.b32.xlu0 %v8423_v51, %s11398_s17  ;;  %2853 = vrot.lane.b32.xlu1 %v8426_v20, %s11398_s17  ;;  %v3067_v35 = vmul.f32 %v8013_v38, %v3066_v30  ;;  %v3068_v19 = vmul.f32 %v8074_v36, %v3066_v30  ;;  %v3053_v0 = vstv %s8514_s12  ;;  %v1475_v51 = vadd.f32 %v7876_v24, %v8471_v59  ;;  %s8944_s12 = sld [smem:[#allocation3 + $0x87]] }
 0x257   : > { %v8598_v21 = vsel %vm1260_vm5, %v3019_v42, %v3020_v16  ;;  %v3045_v56 = vrot.slane %v3041_v39, 3  ;;  %v3046_v55 = vrot.slane %v3042_v2, 3  ;;  %v1514_v22 = vadd.f32 %v7906_v3, %v1410_v15  ;;  %v11477_v2 = vld [vmem:[#allocation36_spill] sm:$0xff] }
 0x258   : > { %v8593_v20 = vpop.permute.xlu0 %2050  ;;  %v8595_v32 = vpop.permute.xlu1 %2037  ;;  %v3032_v45 = vrot.slane %v3028_v27, 3  ;;  %v3033_v11 = vrot.slane %v3029_v62, 3  ;;  %v3092_v30 = vstv %s8531_s30  ;;  %v1501_v10 = vadd.f32 %v7908_v43, %v8505_v29  ;;  %v11478_v43 = vld [vmem:[#allocation37_spill] sm:$0xff]  ;;  %v11479_v27 = vld [vmem:[#allocation39_spill] sm:$0xff]  ;;  %s8949_s30 = sld [smem:[#allocation3 + $0x120]] }
 0x259   : > { %v3054_v24 = vmul.f32 %v8013_v38, %v3053_v0  ;;  %v3055_v59 = vmul.f32 %v8074_v36, %v3053_v0  ;;  %v8611_v3 = vadd.f32 %v11477_v2, %v1488_v50  ;;  %v8614_v15 = vsel %vm1260_vm5, %v3006_v12, %v3007_v23 }
 0x25a   : > { %2892 = vrot.lane.b32.xlu0 %v8448_v41, %s11398_s17  ;;  %2879 = vrot.lane.b32.xlu1 %v8451_v1, %s11398_s17  ;;  %v3071_v58 = vrot.slane %v3067_v35, 3  ;;  %v3072_v57 = vrot.slane %v3068_v19, 3  ;;  %v8619_v41 = vadd.f32 %v11478_v43, %v1475_v51  ;;  %v3093_v42 = vmul.f32 %v8013_v38, %v3092_v30  ;;  %v11480_v35 = vld [vmem:[#allocation40_spill] sm:$0xff] }
 0x25b   : > { %v3094_v16 = vmul.f32 %v8074_v36, %v3092_v30  ;;  %v3079_v39 = vstv %s8558_s11  ;;  %v8629_v62 = vadd.f32 %v11479_v27, %v1514_v22  ;;  %v8632_v12 = vsel %vm1260_vm5, %v3045_v56, %v3046_v55  ;;  %s8958_s11 = sld [smem:[#allocation3 + $0xed]] }
 0x25c   : > { %v8621_v1 = vpop.permute.xlu0 %2076  ;;  %v8623_v29 = vpop.permute.xlu1 %2063  ;;  %v8635_v23 = vsel %vm1260_vm5, %v3032_v45, %v3033_v11  ;;  %v3118_v50 = vstv %s8569_s24  ;;  %v8641_v19 = vadd.f32 %v11480_v35, %v1501_v10  ;;  %v3058_v0 = vrot.slane %v3054_v24, 3  ;;  %s8970_s24 = sld [smem:[#allocation3 + $0x186]] }
 0x25d   : > { %v3059_v51 = vrot.slane %v3055_v59, 3  ;;  %v3105_v22 = vstv %s8582_s6  ;;  %v8651_v56 = vsel %vm1260_vm5, %v3071_v58, %v3072_v57  ;;  %v3080_v55 = vmul.f32 %v8013_v38, %v3079_v39  ;;  %s8972_s6 = sld [smem:[#allocation3 + $0x153]] }
 0x25e   : > { %2918 = vrot.lane.b32.xlu0 %v8480_v63, %s11398_s17  ;;  %2905 = vrot.lane.b32.xlu1 %v8496_v5, %s11398_s17  ;;  %v3081_v45 = vmul.f32 %v8074_v36, %v3079_v39  ;;  %v3144_v11 = vstv %s8589_s7  ;;  %v1540_v30 = vadd.f32 %v7939_v18, %v8542_v7  ;;  %v3097_v5 = vrot.slane %v3093_v42, 3  ;;  %s9024_s7 = sld [smem:[#allocation3 + $0x56]] }
 0x25f   : > { %v3098_v24 = vrot.slane %v3094_v16, 3  ;;  %v3119_v59 = vmul.f32 %v8013_v38, %v3118_v50  ;;  %v1527_v2 = vadd.f32 %v7941_v61, %v8546_v47  ;;  %v3120_v58 = vmul.f32 %v8074_v36, %v3118_v50 }
 0x260   : > { %v8658_v63 = vpop.permute.xlu0 %2102  ;;  %v8660_v10 = vpop.permute.xlu1 %2089  ;;  %v3106_v57 = vmul.f32 %v8013_v38, %v3105_v22  ;;  %v3107_v18 = vmul.f32 %v8074_v36, %v3105_v22  ;;  %v8675_v7 = vsel %vm1260_vm5, %v3058_v0, %v3059_v51  ;;  %v3145_v43 = vmul.f32 %v8013_v38, %v3144_v11 }
 0x261   : > { %v3146_v42 = vmul.f32 %v8074_v36, %v3144_v11  ;;  %v1566_v61 = vadd.f32 %v7977_v49, %v8562_v4  ;;  %v3084_v47 = vrot.slane %v3080_v55, 3  ;;  %v3085_v16 = vrot.slane %v3081_v45, 3 }
 0x262   : > { %2944 = vrot.lane.b32.xlu0 %v8521_v40, %s11398_s17  ;;  %2931 = vrot.lane.b32.xlu1 %v8524_v8, %s11398_s17  ;;  %v3131_v39 = vstv %s8616_s22  ;;  %v11481_v40 = vld [vmem:[#allocation42_spill] sm:$0xff]  ;;  %v1553_v8 = vadd.f32 %v7979_v13, %v8573_v52  ;;  %v8694_v0 = vsel %vm1260_vm5, %v3097_v5, %v3098_v24  ;;  %v3123_v49 = vrot.slane %v3119_v59, 3  ;;  %s9026_s22 = sld [smem:[#allocation3 + $0x23]] }
 0x263   : > { %v8685_v27 = vadd.f32 %v11481_v40, %v1540_v30  ;;  %v3124_v4 = vrot.slane %v3120_v58, 3  ;;  %v3110_v51 = vrot.slane %v3106_v57, 3  ;;  %v3111_v22 = vrot.slane %v3107_v18, 3  ;;  %v11482_v30 = vld [vmem:[#allocation43_spill] sm:$0xff] }
 0x264   : > { %v8689_v50 = vpop.permute.xlu0 %2128  ;;  %v8691_v35 = vpop.permute.xlu1 %2115  ;;  %v3258_v55 = vstv %s8638_s23  ;;  %v3149_v13 = vrot.slane %v3145_v43, 3  ;;  %v3150_v52 = vrot.slane %v3146_v42, 3  ;;  %v3132_v45 = vmul.f32 %v8013_v38, %v3131_v39  ;;  %s9046_s23 = sld [smem:[#allocation3 + $0xbc]] }
 0x265   : > { %v3245_v11 = vstv %s8648_s4  ;;  %v8710_v5 = vadd.f32 %v11482_v30, %v1527_v2  ;;  %v8713_v24 = vadd.f32 %v7859_v9, %v1566_v61  ;;  %v8716_v59 = vsel %vm1260_vm5, %v3084_v47, %v3085_v16  ;;  %s9048_s4 = sld [smem:[#allocation3 + $0x89]] }
 0x266   : > { %2970 = vrot.lane.b32.xlu0 %v8527_v34, %s11298_s10  ;;  %2957 = vrot.lane.b32.xlu1 %v8549_v48, %s11298_s10  ;;  %v3133_v58 = vmul.f32 %v8074_v36, %v3131_v39  ;;  %v8720_v34 = vadd.f32 %v7862_v44, %v1553_v8  ;;  %v3259_v18 = vmul.f32 %v8013_v38, %v3258_v55  ;;  %v2352_v43 = vstv %s8663_s25  ;;  %s9056_s25 = sld [smem:[#allocation3 + $0x122]] }
 0x267   : > { %v3260_v2 = vmul.f32 %v8074_v36, %v3258_v55  ;;  %v8731_v9 = vadd.f32 %v8017_v46, %v8611_v3  ;;  %v8734_v42 = vsel %vm1260_vm5, %v3123_v49, %v3124_v4  ;;  %v3246_v44 = vmul.f32 %v8013_v38, %v3245_v11 }
 0x268   : > { %v8722_v48 = vpop.permute.xlu0 %2154  ;;  %v8724_v57 = vpop.permute.xlu1 %2141  ;;  %v3247_v61 = vmul.f32 %v8074_v36, %v3245_v11  ;;  %v8740_v47 = vadd.f32 %v8019_v6, %v8619_v41  ;;  %v8747_v46 = vsel %vm1260_vm5, %v3110_v51, %v3111_v22  ;;  %v8750_v3 = vsel %vm1260_vm5, %v3149_v13, %v3150_v52 }
 0x269   : > { %v3136_v16 = vrot.slane %v3132_v45, 3  ;;  %v3137_v6 = vrot.slane %v3133_v58, 3  ;;  %v2354_v41 = vmul.f32 %v8074_v36, %v2352_v43  ;;  %v2341_v39 = vstv %s8682_s29  ;;  %v11483_v45 = vld [vmem:[#allocation50_spill] sm:$0xff]  ;;  %s9058_s29 = sld [smem:[#allocation3 + $0xef]] }
 0x26a   : > { %2996 = vrot.lane.b32.xlu0 %v8565_v54, %s11298_s10  ;;  %2983 = vrot.lane.b32.xlu1 %v8580_v26, %s11298_s10  ;;  %v2353_v54 = vmul.f32 %v8013_v38, %v2352_v43  ;;  %v8761_v26 = vadd.f32 %v8050_v37, %v8629_v62  ;;  %v3263_v49 = vrot.slane %v3259_v18, 4  ;;  %v3264_v4 = vrot.slane %v3260_v2, 4 }
 0x26b   : > { %v3284_v51 = vstv %s8696_s18  ;;  %v3250_v22 = vrot.slane %v3246_v44, 4  ;;  %v3251_v55 = vrot.slane %v3247_v61, 4  ;;  %v3271_v13 = vstv %s8698_s1  ;;  %s9064_s18 = sld [smem:[#allocation3 + $0x188]]  ;;  %s9070_s1 = sld [smem:[#allocation3 + $0x155]] }
 0x26c   : > { %v8763_v40 = vpop.permute.xlu0 %2180  ;;  %v8765_v8 = vpop.permute.xlu1 %2167  ;;  %v2374_v52 = vstv %s8701_s8  ;;  %v8774_v11 = vadd.f32 %v11483_v45, %v8641_v19  ;;  %v2342_v37 = vmul.f32 %v8013_v38, %v2341_v39  ;;  %v2343_v62 = vmul.f32 %v8074_v36, %v2341_v39  ;;  %s9072_s8 = sld [smem:[#allocation3 + $0x57]] }
 0x26d   : > { %v2357_v30 = vrot.slane %v2353_v54, 2  ;;  %v2358_v58 = vrot.slane %v2354_v41, 2  ;;  %v3285_v18 = vmul.f32 %v8013_v38, %v3284_v51  ;;  %v3286_v2 = vmul.f32 %v8074_v36, %v3284_v51  ;;  %v11485_v54 = vld [vmem:[#allocation53_spill] sm:$0xff] }
 0x26e   : > { %3022 = vrot.lane.b32.xlu0 %v8598_v21, %s11298_s10  ;;  %3009 = vrot.lane.b32.xlu1 %v8614_v15, %s11298_s10  ;;  %v8791_v15 = vsel %vm1260_vm5, %v3136_v16, %v3137_v6  ;;  %v3272_v43 = vmul.f32 %v8013_v38, %v3271_v13  ;;  %v3273_v44 = vmul.f32 %v8074_v36, %v3271_v13  ;;  %v2347_v16 = vrot.slane %v2343_v62, 2 }
 0x26f   : > { %v2375_v61 = vmul.f32 %v8013_v38, %v2374_v52  ;;  %v8798_v41 = vadd.f32 %v11485_v54, %v8685_v27  ;;  %v8801_v39 = vsel %vm1573_vm6, %v3263_v49, %v3264_v4  ;;  %v8804_v51 = vsel %vm1573_vm6, %v3250_v22, %v3251_v55  ;;  %v11486_v49 = vld [vmem:[#allocation45_spill] sm:$0xff] }
 0x270   : > { %v8786_v19 = vpop.permute.xlu0 %2206  ;;  %v8788_v21 = vpop.permute.xlu1 %2193  ;;  %v2376_v45 = vmul.f32 %v8074_v36, %v2374_v52  ;;  %v2346_v38 = vrot.slane %v2342_v37, 2  ;;  %v2363_v6 = vstv %s8752_s14  ;;  %v3310_v27 = vstv %s8754_s2  ;;  %s9078_s14 = sld [smem:[#allocation3 + $0x24]]  ;;  %s9091_s2 = sld [smem:[#allocation3 + $0xbd]] }
 0x271   : > { %11484 = vst [vmem:[#allocation44_spill] sm:$0xff] %v8788_v21  ;;  %v8817_v4 = vadd.f32 %v11486_v49, %v8710_v5  ;;  %v8820_v22 = vsel %vm755_vm4, %v2357_v30, %v2358_v58  ;;  %v3289_v55 = vrot.slane %v3285_v18, 4  ;;  %v3276_v52 = vrot.slane %v3272_v43, 4  ;;  %v8832_v49 = vld [vmem:[%s11376_s21 + $0x18] sm:$0xff] }
 0x272   : > { %3048 = vrot.lane.b32.xlu0 %v8632_v12, %s11298_s10  ;;  %3035 = vrot.lane.b32.xlu1 %v8635_v23, %s11298_s10  ;;  %11487 = vst [vmem:[#allocation49_spill] sm:$0xff] %v8820_v22  ;;  %v3290_v12 = vrot.slane %v3286_v2, 4  ;;  %v3277_v37 = vrot.slane %v3273_v44, 4  ;;  %v2379_v62 = vrot.slane %v2375_v61, 2  ;;  %v3297_v54 = vstv %s8768_s26  ;;  %11490 = vst [vmem:[#allocation39_spill] sm:$0xff] %v8832_v49  ;;  %v11491_v2 = vld [vmem:[#allocation55_spill] sm:$0xff] }
 0x273   : > { %v2380_v5 = vrot.slane %v2376_v45, 2  ;;  %v2364_v30 = vmul.f32 %v8832_v49, %v2363_v6  ;;  %v2365_v58 = vmul.f32 %v8074_v36, %v2363_v6  ;;  %v3311_v18 = vmul.f32 %v8832_v49, %v3310_v27  ;;  %v11493_v45 = vld [vmem:[#allocation47_spill] sm:$0xff]  ;;  %s9101_s26 = sld [smem:[#allocation3 + $0x8a]] }
 0x274   : > { %v8824_v23 = vpop.permute.xlu0 %2232  ;;  %v8826_v13 = vpop.permute.xlu1 %2219  ;;  %v1785_v43 = vadd.f32 %v11491_v2, %v8731_v9  ;;  %v8846_v44 = vsel %vm755_vm4, %v2346_v38, %v2347_v16  ;;  %v3312_v61 = vmul.f32 %v8074_v36, %v3310_v27  ;;  %v8851_v6 = vadd.f32 %v11493_v45, %v8713_v24  ;;  %v11494_v2 = vld [vmem:[#allocation48_spill] sm:$0xff] }
 0x275   : > { %11488 = vst [vmem:[#allocation36_spill] sm:$0xff] %v8824_v23  ;;  %11489 = vst [vmem:[#allocation37_spill] sm:$0xff] %v8826_v13  ;;  %v3298_v22 = vmul.f32 %v8832_v49, %v3297_v54  ;;  %v3299_v13 = vmul.f32 %v8074_v36, %v3297_v54  ;;  %v2396_v9 = vstv %s8784_s13  ;;  %v8867_v24 = vsel %vm1573_vm6, %v3289_v55, %v3290_v12  ;;  %s9103_s13 = sld [smem:[#allocation3 + $0x123]] }
 0x276   : > { %3074 = vrot.lane.b32.xlu0 %v8651_v56, %s11312_s3  ;;  %3061 = vrot.lane.b32.xlu1 %v8675_v7, %s11312_s3  ;;  %11492 = vst [vmem:[#allocation40_spill] sm:$0xff] %v8846_v44  ;;  %v8858_v56 = vadd.f32 %v11494_v2, %v8720_v34  ;;  %v11495_v7 = vld [vmem:[#allocation56_spill] sm:$0xff]  ;;  %v8870_v45 = vsel %vm1573_vm6, %v3276_v52, %v3277_v37  ;;  %v2368_v34 = vrot.slane %v2364_v30, 2  ;;  %v2369_v2 = vrot.slane %v2365_v58, 2  ;;  %v11500_v58 = vld [vmem:[#allocation59_spill] sm:$0xff] }
 0x277   : > { %v1772_v38 = vadd.f32 %v11495_v7, %v8740_v47  ;;  %v8873_v54 = vsel %vm755_vm4, %v2379_v62, %v2380_v5  ;;  %v3315_v44 = vrot.slane %v3311_v18, 4  ;;  %v11499_v47 = vld [vmem:[#allocation46_spill] sm:$0xff]  ;;  %v3316_v55 = vrot.slane %v3312_v61, 4  ;;  %v11501_v18 = vld [vmem:[#allocation60_spill] sm:$0xff] }
 0x278   : > { %v8862_v16 = vpop.permute.xlu0 %2258  ;;  %v8864_v27 = vpop.permute.xlu1 %2245  ;;  %11498 = vst [vmem:[#allocation50_spill] sm:$0xff] %v8873_v54  ;;  %v8878_v7 = vadd.f32 %v11499_v47, %v1785_v43  ;;  %v8885_v12 = vmul.f32 %v8832_v49, %v2396_v9  ;;  %v2385_v52 = vstv %s8813_s27  ;;  %v3302_v37 = vrot.slane %v3298_v22, 4  ;;  %v11502_v43 = vld [vmem:[#allocation51_spill] sm:$0xff]  ;;  %s9105_s27 = sld [smem:[#allocation3 + $0x58]] }
 0x279   : > { %11496 = vst [vmem:[#allocation42_spill] sm:$0xff] %v8862_v16  ;;  %11497 = vst [vmem:[#allocation43_spill] sm:$0xff] %v8864_v27  ;;  %v3303_v62 = vrot.slane %v3299_v13, 4  ;;  %v2398_v5 = vmul.f32 %v8074_v36, %v2396_v9  ;;  %v3336_v30 = vstv %s8822_s28  ;;  %v8897_v61 = vadd.f32 %v11502_v43, %v1772_v38  ;;  %v8909_v13 = vld [vmem:[%s11376_s21 + $0x20] sm:$0xff]  ;;  %s9121_s28 = sld [smem:[#allocation3 + $0xf0]] }
 0x27a   : > { %3100 = vrot.lane.b32.xlu0 %v8694_v0, %s11312_s3  ;;  %3087 = vrot.lane.b32.xlu1 %v8716_v59, %s11312_s3  ;;  %v1811_v0 = vadd.f32 %v11500_v58, %v8761_v26  ;;  %v1798_v59 = vadd.f32 %v11501_v18, %v8774_v11  ;;  %v3323_v27 = vstv %s8829_s0  ;;  %v8905_v22 = vsel %vm755_vm4, %v2368_v34, %v2369_v2  ;;  %s9123_s0 = sld [smem:[#allocation3 + $0x25]] }
 0x27b   : > { %11505 = vst [vmem:[#allocation55_spill] sm:$0xff] %v8905_v22  ;;  %v2386_v36 = vmul.f32 %v8832_v49, %v2385_v52  ;;  %11506 = vst [vmem:[#allocation47_spill] sm:$0xff] %v8909_v13  ;;  %v2387_v26 = vmul.f32 %v8909_v13, %v2385_v52  ;;  %v2418_v9 = vstv %s8837_s19  ;;  %v8918_v11 = vsel %vm1573_vm6, %v3315_v44, %v3316_v55  ;;  %v11507_v44 = vld [vmem:[#allocation52_spill] sm:$0xff]  ;;  %s9135_s19 = sld [smem:[#allocation3 + $0xbe]] }
 0x27c   : > { %v8899_v47 = vpop.permute.xlu0 %2284  ;;  %v8901_v54 = vpop.permute.xlu1 %2271  ;;  %v2401_v38 = vrot.slane %v8885_v12, 2  ;;  %v3337_v34 = vmul.f32 %v8832_v49, %v3336_v30  ;;  %v3338_v2 = vmul.f32 %v8909_v13, %v3336_v30  ;;  %v8926_v52 = vsel %vm1573_vm6, %v3302_v37, %v3303_v62  ;;  %v11508_v12 = vld [vmem:[#allocation54_spill] sm:$0xff] }
 0x27d   : > { %11503 = vst [vmem:[#allocation53_spill] sm:$0xff] %v8899_v47  ;;  %11504 = vst [vmem:[#allocation45_spill] sm:$0xff] %v8901_v54  ;;  %v2402_v58 = vrot.slane %v2398_v5, 2  ;;  %v8933_v55 = vadd.f32 %v11507_v44, %v1811_v0  ;;  %v8936_v18 = vadd.f32 %v11508_v12, %v1798_v59  ;;  %v2419_v37 = vmul.f32 %v8832_v49, %v2418_v9  ;;  %v11512_v59 = vld [vmem:[#allocation62_spill] sm:$0xff] }
 0x27e   : > { %3126 = vrot.lane.b32.xlu0 %v8734_v42, %s11312_s3  ;;  %3113 = vrot.lane.b32.xlu1 %v8747_v46, %s11312_s3  ;;  %v3324_v42 = vmul.f32 %v8832_v49, %v3323_v27  ;;  %v3325_v46 = vmul.f32 %v8909_v13, %v3323_v27  ;;  %v2420_v62 = vmul.f32 %v8909_v13, %v2418_v9  ;;  %v11511_v27 = vld [vmem:[#allocation61_spill] sm:$0xff]  ;;  %v2390_v22 = vrot.slane %v2386_v36, 2 }
 0x27f   : > { %v1837_v5 = vadd.f32 %v11511_v27, %v8798_v41  ;;  %v2391_v0 = vrot.slane %v2387_v26, 2  ;;  %v2407_v44 = vstv %s8875_s15  ;;  %v1824_v12 = vadd.f32 %v11512_v59, %v8817_v4  ;;  %v11513_v41 = vld [vmem:[#allocation64_spill] sm:$0xff]  ;;  %s9137_s15 = sld [smem:[#allocation3 + $0x8b]] }
 0x280   : > { %v8938_v30 = vpop.permute.xlu0 %2310  ;;  %v8940_v43 = vpop.permute.xlu1 %2297  ;;  %v3341_v9 = vrot.slane %v3337_v34, 4  ;;  %v1863_v36 = vadd.f32 %v11513_v41, %v8851_v6  ;;  %v1850_v26 = vadd.f32 %v8282_v17, %v8858_v56  ;;  %v3328_v27 = vrot.slane %v3324_v42, 4 }
 0x281   : > { %11509 = vst [vmem:[#allocation48_spill] sm:$0xff] %v8938_v30  ;;  %11510 = vst [vmem:[#allocation56_spill] sm:$0xff] %v8940_v43  ;;  %v3342_v43 = vrot.slane %v3338_v2, 4  ;;  %v3362_v30 = vstv %s8888_s16  ;;  %v3329_v54 = vrot.slane %v3325_v46, 4  ;;  %v2408_v34 = vmul.f32 %v8832_v49, %v2407_v44  ;;  %v11518_v46 = vld [vmem:[#allocation57_spill] sm:$0xff]  ;;  %s9149_s16 = sld [smem:[#allocation3 + $0x189]] }
 0x282   : > { %3152 = vrot.lane.b32.xlu0 %v8750_v3, %s11312_s3  ;;  %3139 = vrot.lane.b32.xlu1 %v8791_v15, %s11312_s3  ;;  %v2423_v3 = vrot.slane %v2419_v37, 2  ;;  %v2424_v15 = vrot.slane %v2420_v62, 2  ;;  %v2409_v2 = vmul.f32 %v8909_v13, %v2407_v44  ;;  %v8975_v17 = vsel %vm755_vm4, %v2401_v38, %v2402_v58  ;;  %v11519_v62 = vld [vmem:[#allocation58_spill] sm:$0xff]  ;;  %v11520_v58 = vld [vmem:[#allocation63_spill] sm:$0xff] }
 0x283   : > { %11516 = vst [vmem:[#allocation60_spill] sm:$0xff] %v8975_v17  ;;  %v8978_v6 = vsel %vm755_vm4, %v2390_v22, %v2391_v0  ;;  %v3363_v56 = vmul.f32 %v8832_v49, %v3362_v30  ;;  %v3364_v42 = vmul.f32 %v8909_v13, %v3362_v30  ;;  %v8983_v37 = vadd.f32 %v11518_v46, %v1837_v5  ;;  %v11521_v0 = vld [vmem:[#allocation30_spill] sm:$0xff] }
 0x284   : > { %v8964_v4 = vpop.permute.xlu0 %2336  ;;  %v8966_v59 = vpop.permute.xlu1 %2323  ;;  %11517 = vst [vmem:[#allocation51_spill] sm:$0xff] %v8978_v6  ;;  %v8986_v44 = vadd.f32 %v11519_v62, %v1824_v12  ;;  %v8993_v22 = vsel %vm1573_vm6, %v3341_v9, %v3342_v43  ;;  %v3349_v38 = vstv %s8923_s5  ;;  %v8997_v30 = vadd.f32 %v11520_v58, %v1863_v36  ;;  %s9151_s5 = sld [smem:[#allocation3 + $0x156]] }
 0x285   : > { %11514 = vst [vmem:[#allocation46_spill] sm:$0xff] %v8964_v4  ;;  %11515 = vst [vmem:[#allocation59_spill] sm:$0xff] %v8966_v59  ;;  %v9000_v5 = vadd.f32 %v11521_v0, %v1850_v26  ;;  %v9003_v12 = vsel %vm1573_vm6, %v3328_v27, %v3329_v54  ;;  %v3388_v41 = vstv %s8930_s9  ;;  %v2412_v43 = vrot.slane %v2408_v34, 2  ;;  %v11525_v34 = vld [vmem:[#allocation31_spill] sm:$0xff]  ;;  %s9190_s9 = sld [smem:[#allocation3 + $0x124]] }
 0x286   : > { %3266 = vrot.lane.b32.xlu0 %v8801_v39, %s11298_s10  ;;  %3253 = vrot.lane.b32.xlu1 %v8804_v51, %s11298_s10  ;;  %v9011_v51 = vsel %vm755_vm4, %v2423_v3, %v2424_v15  ;;  %v2413_v9 = vrot.slane %v2409_v2, 2  ;;  %v3375_v62 = vstv %s8944_s12  ;;  %v3367_v36 = vrot.slane %v3363_v56, 4  ;;  %s9205_s12 = sld [smem:[#allocation3 + $0xf1]] }
 0x287   : > { %11524 = vst [vmem:[#allocation61_spill] sm:$0xff] %v9011_v51  ;;  %v3368_v58 = vrot.slane %v3364_v42, 4  ;;  %v3350_v26 = vmul.f32 %v8832_v49, %v3349_v38  ;;  %v3414_v0 = vstv %s8949_s30  ;;  %v3351_v54 = vmul.f32 %v8909_v13, %v3349_v38  ;;  %s9217_s30 = sld [smem:[#allocation3 + $0x18a]] }
 0x288   : > { %v9006_v39 = vpop.permute.xlu0 %2450  ;;  %v9008_v46 = vpop.permute.xlu1 %2437  ;;  %v3389_v27 = vmul.f32 %v8832_v49, %v3388_v41  ;;  %v3390_v3 = vmul.f32 %v8909_v13, %v3388_v41  ;;  %v3401_v15 = vstv %s8958_s11  ;;  %v9030_v2 = vadd.f32 %v11525_v34, %v8878_v7  ;;  %s9226_s11 = sld [smem:[#allocation3 + $0x157]] }
 0x289   : > { %11522 = vst [vmem:[#allocation52_spill] sm:$0xff] %v9006_v39  ;;  %11523 = vst [vmem:[#allocation54_spill] sm:$0xff] %v9008_v46  ;;  %v3377_v42 = vmul.f32 %v8909_v13, %v3375_v62  ;;  %v3415_v46 = vmul.f32 %v8832_v49, %v3414_v0  ;;  %v3416_v39 = vmul.f32 %v8909_v13, %v3414_v0  ;;  %v3440_v51 = vstv %s8970_s24  ;;  %s9253_s24 = sld [smem:[#allocation3 + $0x59]] }
 0x28a   : > { %3292 = vrot.lane.b32.xlu0 %v8867_v24, %s11298_s10  ;;  %3279 = vrot.lane.b32.xlu1 %v8870_v45, %s11298_s10  ;;  %v11526_v24 = vld [vmem:[#allocation32_spill] sm:$0xff]  ;;  %v3376_v45 = vmul.f32 %v8832_v49, %v3375_v62  ;;  %v3427_v6 = vstv %s8972_s6  ;;  %v9051_v7 = vsel %vm755_vm4, %v2412_v43, %v2413_v9  ;;  %v3402_v62 = vmul.f32 %v8832_v49, %v3401_v15  ;;  %s9272_s6 = sld [smem:[#allocation3 + $0x26]] }
 0x28b   : > { %v9034_v56 = vadd.f32 %v11526_v24, %v8897_v61  ;;  %11529 = vst [vmem:[#allocation57_spill] sm:$0xff] %v9051_v7  ;;  %v3369_v61 = vsel %vm1573_vm6, %v3367_v36, %v3368_v58  ;;  %v3403_v34 = vmul.f32 %v8909_v13, %v3401_v15  ;;  %v3354_v0 = vrot.slane %v3350_v26, 4  ;;  %v11533_v7 = vld [vmem:[#allocation34_spill] sm:$0xff] }
 0x28c   : > { %v9038_v38 = vpop.permute.xlu0 %2476  ;;  %v9040_v41 = vpop.permute.xlu1 %2463  ;;  %v3355_v24 = vrot.slane %v3351_v54, 4  ;;  %v3393_v43 = vrot.slane %v3389_v27, 4  ;;  %v3394_v9 = vrot.slane %v3390_v3, 4  ;;  %v3441_v36 = vmul.f32 %v8832_v49, %v3440_v51 }
 0x28d   : > { %11527 = vst [vmem:[#allocation62_spill] sm:$0xff] %v9038_v38  ;;  %11528 = vst [vmem:[#allocation64_spill] sm:$0xff] %v9040_v41  ;;  %v3442_v58 = vmul.f32 %v8909_v13, %v3440_v51  ;;  %v3428_v15 = vmul.f32 %v8832_v49, %v3427_v6  ;;  %v3429_v41 = vmul.f32 %v8909_v13, %v3427_v6  ;;  %v3380_v26 = vrot.slane %v3376_v45, 4  ;;  %v9081_v51 = vld [vmem:[%s11376_s21 + $0x30] sm:$0xff]  ;;  %v11532_v6 = vld [vmem:[#allocation33_spill] sm:$0xff] }
 0x28e   : > { %3318 = vrot.lane.b32.xlu0 %v8918_v11, %s11298_s10  ;;  %3305 = vrot.lane.b32.xlu1 %v8926_v52, %s11298_s10  ;;  %v3381_v54 = vrot.slane %v3377_v42, 4  ;;  %v3419_v27 = vrot.slane %v3415_v46, 4  ;;  %v3420_v3 = vrot.slane %v3416_v39, 4  ;;  %v9085_v38 = vadd.f32 %v11532_v6, %v8933_v55 }
 0x28f   : > { %v9089_v59 = vadd.f32 %v11533_v7, %v8936_v18  ;;  %v3356_v39 = vsel %vm1573_vm6, %v3354_v0, %v3355_v24  ;;  %v3395_v46 = vsel %vm1573_vm6, %v3393_v43, %v3394_v9  ;;  %v3497_v55 = vstv %s9024_s7  ;;  %s9279_s7 = sld [smem:[#allocation3 + $0xbf]] }
 0x290   : > { %v9074_v11 = vpop.permute.xlu0 %2502  ;;  %v9076_v52 = vpop.permute.xlu1 %2489  ;;  %v3489_v45 = vstv %s9026_s22  ;;  %v3445_v18 = vrot.slane %v3441_v36, 4  ;;  %v3446_v42 = vrot.slane %v3442_v58, 4  ;;  %v3432_v7 = vrot.slane %v3428_v15, 4  ;;  %s9289_s22 = sld [smem:[#allocation3 + $0x8c]] }
 0x291   : > { %11530 = vst [vmem:[#allocation58_spill] sm:$0xff] %v9074_v11  ;;  %11531 = vst [vmem:[#allocation63_spill] sm:$0xff] %v9076_v52  ;;  %v3406_v11 = vrot.slane %v3402_v62, 4  ;;  %v3407_v52 = vrot.slane %v3403_v34, 4  ;;  %v3433_v62 = vrot.slane %v3429_v41, 4  ;;  %v3382_v43 = vsel %vm1573_vm6, %v3380_v26, %v3381_v54 }
 0x292   : > { %3344 = vrot.lane.b32.xlu0 %v8993_v22, %s11298_s10  ;;  %3331 = vrot.lane.b32.xlu1 %v9003_v12, %s11298_s10  ;;  %v9109_v22 = vadd.f32 %v8383_v25, %v8983_v37  ;;  %v11534_v12 = vld [vmem:[#allocation35_spill] sm:$0xff]  ;;  %v3421_v41 = vsel %vm1573_vm6, %v3419_v27, %v3420_v3  ;;  %v9127_v25 = vadd.f32 %v8415_v60, %v8997_v30  ;;  %v3513_v9 = vstv %s9046_s23  ;;  %s9303_s23 = sld [smem:[#allocation3 + $0x125]] }
 0x293   : > { %v9113_v34 = vadd.f32 %v11534_v12, %v8986_v44  ;;  %v9131_v37 = vadd.f32 %v8417_v33, %v9000_v5  ;;  %v3408_v44 = vsel %vm1573_vm6, %v3406_v11, %v3407_v52  ;;  %v9142_v60 = vmul.f32 %v9081_v51, %v3497_v55 }
 0x294   : > { %v9115_v0 = vpop.permute.xlu0 %2528  ;;  %v9117_v24 = vpop.permute.xlu1 %2515  ;;  %v9145_v33 = vmul.f32 %v9081_v51, %v3489_v45  ;;  %v3505_v30 = vstv %s9048_s4  ;;  %v3529_v5 = vstv %s9056_s25  ;;  %v3447_v36 = vsel %vm1573_vm6, %v3445_v18, %v3446_v42  ;;  %v9193_v42 = vld [vmem:[%s11376_s21 + $0x38] sm:$0xff]  ;;  %s9322_s4 = sld [smem:[#allocation3 + $0xf2]]  ;;  %s9330_s25 = sld [smem:[#allocation3 + $0x18b]] }
 0x295   : > { %11535 = vst [vmem:[#allocation30_spill] sm:$0xff] %v9115_v0  ;;  %11536 = vst [vmem:[#allocation31_spill] sm:$0xff] %v9117_v24  ;;  %v3521_v58 = vstv %s9058_s29  ;;  %v3545_v15 = vstv %s9064_s18  ;;  %v9162_v26 = vmul.f32 %v9081_v51, %v3513_v9  ;;  %v3537_v54 = vstv %s9070_s1  ;;  %s9352_s29 = sld [smem:[#allocation3 + $0x158]]  ;;  %s9371_s18 = sld [smem:[#allocation3 + $0x5a]] }
 0x296   : > { %3370 = vrot.lane.b32.xlu0 %v3369_v61, %s11375_s20  ;;  %3357 = vrot.lane.b32.xlu1 %v3356_v39, %s11375_s20  ;;  %v3434_v61 = vsel %vm1573_vm6, %v3432_v7, %v3433_v62  ;;  %v3561_v27 = vstv %s9072_s8  ;;  %v3553_v3 = vstv %s9078_s14  ;;  %v9169_v6 = vadd.f32 %v8457_v31, %v9030_v2  ;;  %s9380_s1 = sld [smem:[#allocation3 + $0x27]]  ;;  %s9398_s8 = sld [smem:[#allocation3 + $0xc0]] }
 0x297   : > { %v9172_v39 = vmul.f32 %v9081_v51, %v3505_v30  ;;  %v9175_v55 = vmul.f32 %v9081_v51, %v3529_v5  ;;  %v3577_v45 = vstv %s9091_s2  ;;  %v9180_v18 = vadd.f32 %v8459_v28, %v9034_v56  ;;  %s9404_s14 = sld [smem:[#allocation3 + $0x8d]]  ;;  %s9426_s2 = sld [smem:[#allocation3 + $0x126]] }
 0x298   : > { %v9157_v11 = vpop.permute.xlu0 %2554  ;;  %v9159_v52 = vpop.permute.xlu1 %2541  ;;  %v9185_v31 = vmul.f32 %v9081_v51, %v3521_v58  ;;  %v9188_v2 = vmul.f32 %v9081_v51, %v3545_v15  ;;  %v9196_v28 = vmul.f32 %v9081_v51, %v3537_v54  ;;  %v9199_v56 = vmul.f32 %v9081_v51, %v3561_v27  ;;  %v11541_v58 = vld [vmem:[#allocation38_spill] sm:$0xff] }
 0x299   : > { %11537 = vst [vmem:[#allocation32_spill] sm:$0xff] %v9157_v11  ;;  %11538 = vst [vmem:[#allocation33_spill] sm:$0xff] %v9159_v52  ;;  %v3630_v7 = vstv %s9105_s27  ;;  %v3569_v9 = vstv %s9101_s26  ;;  %v3593_v30 = vstv %s9103_s13  ;;  %v3617_v5 = vstv %s9123_s0  ;;  %v11542_v11 = vld [vmem:[#allocation65_spill] sm:$0xff]  ;;  %s9428_s26 = sld [smem:[#allocation3 + $0xf3]]  ;;  %s9456_s13 = sld [smem:[#allocation3 + $0x18c]] }
 0x29a   : > { %3396 = vrot.lane.b32.xlu0 %v3395_v46, %s11375_s20  ;;  %3383 = vrot.lane.b32.xlu1 %v3382_v43, %s11375_s20  ;;  %v9202_v46 = vmul.f32 %v9081_v51, %v3553_v3  ;;  %v9212_v43 = vmul.f32 %v9081_v51, %v3577_v45  ;;  %v9221_v15 = vadd.f32 %v11541_v58, %v9085_v38  ;;  %v3585_v54 = vstv %s9121_s28  ;;  %s9482_s27 = sld [smem:[#allocation3 + $0x159]]  ;;  %s9500_s28 = sld [smem:[#allocation3 + $0x5c]] }
 0x29b   : > { %v3656_v27 = vstv %s9135_s19  ;;  %v3643_v3 = vstv %s9137_s15  ;;  %v3609_v45 = vstv %s9149_s16  ;;  %v3632_v52 = vmul.f32 %v9193_v42, %v3630_v7  ;;  %s9502_s0 = sld [smem:[#allocation3 + $0x29]]  ;;  %s9508_s19 = sld [smem:[#allocation3 + $0x52]] }
 0x29c   : > { %v9207_v62 = vpop.permute.xlu0 %2580  ;;  %v9209_v12 = vpop.permute.xlu1 %2567  ;;  %v9236_v24 = vadd.f32 %v11542_v11, %v9089_v59  ;;  %v9239_v38 = vmul.f32 %v9081_v51, %v3569_v9  ;;  %v3618_v58 = vmul.f32 %v9081_v51, %v3617_v5  ;;  %v3619_v0 = vmul.f32 %v9193_v42, %v3617_v5  ;;  %s9522_s15 = sld [smem:[#allocation3 + $0x1f]]  ;;  %s9557_s16 = sld [smem:[#allocation3 + $0xc2]] }
 0x29d   : > { %11539 = vst [vmem:[#allocation34_spill] sm:$0xff] %v9207_v62  ;;  %11540 = vst [vmem:[#allocation35_spill] sm:$0xff] %v9209_v12  ;;  %v3601_v12 = vstv %s9151_s5  ;;  %v3631_v62 = vmul.f32 %v9081_v51, %v3630_v7  ;;  %v9248_v4 = vmul.f32 %v9081_v51, %v3593_v30  ;;  %v3657_v7 = vmul.f32 %v9081_v51, %v3656_v27  ;;  %s9583_s5 = sld [smem:[#allocation3 + $0x8f]] }
 0x29e   : > { %3422 = vrot.lane.b32.xlu0 %v3421_v41, %s11375_s20  ;;  %3409 = vrot.lane.b32.xlu1 %v3408_v44, %s11375_s20  ;;  %v3658_v59 = vmul.f32 %v9193_v42, %v3656_v27  ;;  %v3644_v11 = vmul.f32 %v9081_v51, %v3643_v3  ;;  %v9256_v9 = vmul.f32 %v9081_v51, %v3585_v54  ;;  %v3636_v54 = vrot.slane %v3632_v52, 1 }
 0x29f   : > { %v9259_v5 = vmul.f32 %v9081_v51, %v3609_v45  ;;  %v3645_v30 = vmul.f32 %v9193_v42, %v3643_v3  ;;  %v3635_v27 = vrot.slane %v3631_v62, 1  ;;  %v3682_v47 = vstv %s9190_s9  ;;  %s9602_s9 = sld [smem:[#allocation3 + $0xb8]] }
 0x2a0   : > { %v9243_v41 = vpop.permute.xlu0 %2606  ;;  %v9245_v44 = vpop.permute.xlu1 %2593  ;;  %v3622_v3 = vrot.slane %v3618_v58, 1  ;;  %v3623_v13 = vrot.slane %v3619_v0, 1  ;;  %v3669_v49 = vstv %s9205_s12  ;;  %v3662_v62 = vrot.slane %v3658_v59, 1  ;;  %s9611_s12 = sld [smem:[#allocation3 + $0x85]] }
 0x2a1   : > { %11543 = vst [vmem:[#allocation38_spill] sm:$0xff] %v9243_v41  ;;  %11544 = vst [vmem:[#allocation65_spill] sm:$0xff] %v9245_v44  ;;  %v9262_v44 = vmul.f32 %v9081_v51, %v3601_v12  ;;  %v11545_v41 = vld [vmem:[#allocation41_spill] sm:$0xff]  ;;  %v11546_v12 = vld [vmem:[#allocation66_spill] sm:$0xff]  ;;  %v3648_v52 = vrot.slane %v3644_v11, 1  ;;  %v3649_v16 = vrot.slane %v3645_v30, 1  ;;  %v3683_v23 = vmul.f32 %v9081_v51, %v3682_v47 }
 0x2a2   : > { %v9267_v17 = vadd.f32 %v11545_v41, %v9109_v22  ;;  %3448 = vrot.lane.b32.xlu0 %v3447_v36, %s11375_s20  ;;  %3435 = vrot.lane.b32.xlu1 %v3434_v61, %s11375_s20  ;;  %v9276_v45 = vadd.f32 %v11546_v12, %v9113_v34  ;;  %v3661_v61 = vrot.slane %v3657_v7, 1  ;;  %v3708_v41 = vstv %s9217_s30  ;;  %s9625_s30 = sld [smem:[#allocation3 + $0x128]] }
 0x2a3   : > { %v3684_v21 = vmul.f32 %v9193_v42, %v3682_v47  ;;  %v3695_v34 = vstv %s9226_s11  ;;  %v9293_v0 = vadd.f32 %v8551_v53, %v9127_v25  ;;  %v9300_v58 = vsel %vm442_vm3, %v3635_v27, %v3636_v54  ;;  %s9627_s11 = sld [smem:[#allocation3 + $0xf5]] }
 0x2a4   : > { %v9281_v22 = vpop.permute.xlu0 %2632  ;;  %v9283_v36 = vpop.permute.xlu1 %2619  ;;  %v3670_v7 = vmul.f32 %v9081_v51, %v3669_v49  ;;  %v9307_v47 = vadd.f32 %v8553_v14, %v9131_v37  ;;  %v9310_v53 = vsel %vm442_vm3, %v3622_v3, %v3623_v13  ;;  %v3671_v25 = vmul.f32 %v9193_v42, %v3669_v49 }
 0x2a5   : > { %v3710_v11 = vmul.f32 %v9193_v42, %v3708_v41  ;;  %v3696_v30 = vmul.f32 %v9081_v51, %v3695_v34  ;;  %v3697_v27 = vmul.f32 %v9193_v42, %v3695_v34  ;;  %v3734_v14 = vstv %s9253_s24  ;;  %s9634_s24 = sld [smem:[#allocation3 + $0x11e]] }
 0x2a6   : > { %3500 = vrot.lane.b32.xlu0 %v9142_v60, %s11298_s10  ;;  %3492 = vrot.lane.b32.xlu1 %v9145_v33, %s11298_s10  ;;  %v3709_v60 = vmul.f32 %v9081_v51, %v3708_v41  ;;  %v9325_v13 = vsel %vm442_vm3, %v3661_v61, %v3662_v62  ;;  %v9328_v49 = vsel %vm442_vm3, %v3648_v52, %v3649_v16  ;;  %v3687_v37 = vrot.slane %v3683_v23, 1 }
 0x2a7   : > { %v3688_v54 = vrot.slane %v3684_v21, 1  ;;  %v9334_v12 = vadd.f32 %v8593_v20, %v9169_v6  ;;  %v9338_v3 = vadd.f32 %v8595_v32, %v9180_v18  ;;  %v3674_v16 = vrot.slane %v3670_v7, 1 }
 0x2a8   : > { %v9314_v59 = vpop.permute.xlu0 %2658  ;;  %v9316_v33 = vpop.permute.xlu1 %2645  ;;  %v3721_v23 = vstv %s9272_s6  ;;  %v3675_v21 = vrot.slane %v3671_v25, 1  ;;  %v3735_v61 = vmul.f32 %v9081_v51, %v3734_v14  ;;  %v3736_v62 = vmul.f32 %v9193_v42, %v3734_v14  ;;  %s9686_s6 = sld [smem:[#allocation3 + $0xeb]] }
 0x2a9   : > { %v3760_v20 = vstv %s9279_s7  ;;  %v3713_v18 = vrot.slane %v3709_v60, 1  ;;  %v3714_v52 = vrot.slane %v3710_v11, 1  ;;  %v3701_v41 = vrot.slane %v3697_v27, 1  ;;  %s9700_s7 = sld [smem:[#allocation3 + $0x18e]] }
 0x2aa   : > { %3516 = vrot.lane.b32.xlu0 %v9162_v26, %s11298_s10  ;;  %3508 = vrot.lane.b32.xlu1 %v9172_v39, %s11298_s10  ;;  %v3700_v26 = vrot.slane %v3696_v30, 1  ;;  %v9356_v39 = vadd.f32 %v8621_v1, %v9221_v15  ;;  %v9359_v34 = vsel %vm442_vm3, %v3687_v37, %v3688_v54  ;;  %v3722_v7 = vmul.f32 %v9081_v51, %v3721_v23 }
 0x2ab   : > { %v3747_v25 = vstv %s9289_s22  ;;  %v3723_v60 = vmul.f32 %v9193_v42, %v3721_v23  ;;  %v3761_v11 = vmul.f32 %v9081_v51, %v3760_v20  ;;  %v3762_v1 = vmul.f32 %v9193_v42, %v3760_v20  ;;  %s9715_s22 = sld [smem:[#allocation3 + $0x15b]] }
 0x2ac   : > { %v9348_v6 = vpop.permute.xlu0 %2684  ;;  %v9350_v32 = vpop.permute.xlu1 %2671  ;;  %v3786_v15 = vstv %s9303_s23  ;;  %v9375_v30 = vadd.f32 %v8623_v29, %v9236_v24  ;;  %v3739_v27 = vrot.slane %v3735_v61, 1  ;;  %v9387_v54 = vsel %vm442_vm3, %v3713_v18, %v3714_v52  ;;  %s9717_s23 = sld [smem:[#allocation3 + $0x184]] }
 0x2ad   : > { %v9390_v23 = vsel %vm442_vm3, %v3700_v26, %v3701_v41  ;;  %v3748_v29 = vmul.f32 %v9081_v51, %v3747_v25  ;;  %v3773_v24 = vstv %s9322_s4  ;;  %v3788_v61 = vmul.f32 %v9193_v42, %v3786_v15  ;;  %s9725_s4 = sld [smem:[#allocation3 + $0x151]] }
 0x2ae   : > { %3532 = vrot.lane.b32.xlu0 %v9175_v55, %s11298_s10  ;;  %3524 = vrot.lane.b32.xlu1 %v9185_v31, %s11298_s10  ;;  %v9378_v55 = vsel %vm442_vm3, %v3674_v16, %v3675_v21  ;;  %v3740_v31 = vrot.slane %v3736_v62, 1  ;;  %v3749_v16 = vmul.f32 %v9193_v42, %v3747_v25  ;;  %v3787_v21 = vmul.f32 %v9081_v51, %v3786_v15 }
 0x2af   : > { %v3812_v62 = vstv %s9330_s25  ;;  %v3726_v20 = vrot.slane %v3722_v7, 1  ;;  %v3727_v18 = vrot.slane %v3723_v60, 1  ;;  %v3765_v52 = vrot.slane %v3761_v11, 1  ;;  %s9737_s25 = sld [smem:[#allocation3 + $0x5d]] }
 0x2b0   : > { %v9382_v14 = vpop.permute.xlu0 %2710  ;;  %v9384_v37 = vpop.permute.xlu1 %2697  ;;  %v3766_v26 = vrot.slane %v3762_v1, 1  ;;  %v9408_v41 = vadd.f32 %v8658_v63, %v9267_v17  ;;  %v9412_v25 = vadd.f32 %v8660_v10, %v9276_v45  ;;  %v3774_v15 = vmul.f32 %v9081_v51, %v3773_v24 }
 0x2b1   : > { %v3775_v60 = vmul.f32 %v9193_v42, %v3773_v24  ;;  %v3813_v11 = vmul.f32 %v9081_v51, %v3812_v62  ;;  %v3814_v63 = vmul.f32 %v9193_v42, %v3812_v62  ;;  %v3799_v17 = vstv %s9352_s29  ;;  %s9739_s29 = sld [smem:[#allocation3 + $0x2a]] }
 0x2b2   : > { %3548 = vrot.lane.b32.xlu0 %v9188_v2, %s11298_s10  ;;  %3540 = vrot.lane.b32.xlu1 %v9196_v28, %s11298_s10  ;;  %v9415_v2 = vsel %vm442_vm3, %v3739_v27, %v3740_v31  ;;  %v3752_v10 = vrot.slane %v3748_v29, 1  ;;  %v3753_v45 = vrot.slane %v3749_v16, 1  ;;  %v3791_v1 = vrot.slane %v3787_v21, 1 }
 0x2b3   : > { %v3792_v27 = vrot.slane %v3788_v61, 1  ;;  %v9432_v31 = vadd.f32 %v8689_v50, %v9293_v0  ;;  %v9439_v24 = vsel %vm442_vm3, %v3726_v20, %v3727_v18  ;;  %v9442_v29 = vsel %vm442_vm3, %v3765_v52, %v3766_v26 }
 0x2b4   : > { %v9418_v28 = vpop.permute.xlu0 %2736  ;;  %v9420_v7 = vpop.permute.xlu1 %2723  ;;  %v3838_v16 = vstv %s9371_s18  ;;  %v9447_v21 = vadd.f32 %v8691_v35, %v9307_v47  ;;  %v3800_v50 = vmul.f32 %v9081_v51, %v3799_v17  ;;  %v3801_v0 = vmul.f32 %v9193_v42, %v3799_v17  ;;  %s9775_s18 = sld [smem:[#allocation3 + $0xc3]] }
 0x2b5   : > { %v3778_v62 = vrot.slane %v3774_v15, 1  ;;  %v3779_v20 = vrot.slane %v3775_v60, 1  ;;  %v3817_v18 = vrot.slane %v3813_v11, 1  ;;  %v3818_v52 = vrot.slane %v3814_v63, 1 }
 0x2b6   : > { %3564 = vrot.lane.b32.xlu0 %v9199_v56, %s11375_s20  ;;  %3556 = vrot.lane.b32.xlu1 %v9202_v46, %s11375_s20  ;;  %v3825_v56 = vstv %s9380_s1  ;;  %v9459_v26 = vsel %vm442_vm3, %v3752_v10, %v3753_v45  ;;  %v9462_v35 = vsel %vm442_vm3, %v3791_v1, %v3792_v27  ;;  %v3839_v47 = vmul.f32 %v9081_v51, %v3838_v16  ;;  %s9791_s1 = sld [smem:[#allocation3 + $0x90]] }
 0x2b7   : > { %v3864_v17 = vstv %s9398_s8  ;;  %v3840_v15 = vmul.f32 %v9193_v42, %v3838_v16  ;;  %v3826_v60 = vmul.f32 %v9081_v51, %v3825_v56  ;;  %v3827_v11 = vmul.f32 %v9193_v42, %v3825_v56  ;;  %s9816_s8 = sld [smem:[#allocation3 + $0x129]] }
 0x2b8   : > { %v9452_v61 = vpop.permute.xlu0 %2762  ;;  %v9454_v46 = vpop.permute.xlu1 %2749  ;;  %v3851_v63 = vstv %s9404_s14  ;;  %v9476_v10 = vadd.f32 %v8722_v48, %v9334_v12  ;;  %v9480_v45 = vadd.f32 %v8724_v57, %v9338_v3  ;;  %v3805_v1 = vrot.slane %v3801_v0, 1  ;;  %s9818_s14 = sld [smem:[#allocation3 + $0xf6]] }
 0x2b9   : > { %11547 = vst [vmem:[#allocation41_spill] sm:$0xff] %v9454_v46  ;;  %v9489_v16 = vsel %vm442_vm3, %v3778_v62, %v3779_v20  ;;  %v9492_v56 = vsel %vm442_vm3, %v3817_v18, %v3818_v52  ;;  %v3865_v48 = vmul.f32 %v9081_v51, %v3864_v17  ;;  %v3890_v12 = vstv %s9426_s2  ;;  %s9821_s2 = sld [smem:[#allocation3 + $0x18f]] }
 0x2ba   : > { %3580 = vrot.lane.b32.xlu0 %v9212_v43, %s11375_s20  ;;  %3572 = vrot.lane.b32.xlu1 %v9239_v38, %s11375_s20  ;;  %v3804_v43 = vrot.slane %v3800_v50, 1  ;;  %v3866_v57 = vmul.f32 %v9193_v42, %v3864_v17  ;;  %v3852_v3 = vmul.f32 %v9081_v51, %v3851_v63  ;;  %v3853_v50 = vmul.f32 %v9193_v42, %v3851_v63 }
 0x2bb   : > { %v3877_v0 = vstv %s9428_s26  ;;  %v3843_v62 = vrot.slane %v3839_v47, 1  ;;  %v3844_v20 = vrot.slane %v3840_v15, 1  ;;  %v3830_v18 = vrot.slane %v3826_v60, 1  ;;  %s9839_s26 = sld [smem:[#allocation3 + $0x15c]] }
 0x2bc   : > { %v9484_v38 = vpop.permute.xlu0 %2788  ;;  %v9486_v27 = vpop.permute.xlu1 %2775  ;;  %v3831_v52 = vrot.slane %v3827_v11, 1  ;;  %v9512_v17 = vadd.f32 %v8763_v40, %v9356_v39  ;;  %v9516_v63 = vadd.f32 %v8765_v8, %v9375_v30  ;;  %v3892_v60 = vmul.f32 %v9193_v42, %v3890_v12 }
 0x2bd   : > { %11548 = vst [vmem:[#allocation66_spill] sm:$0xff] %v9484_v38  ;;  %11549 = vst [vmem:[#allocation67_spill] sm:$0xff] %v9486_v27  ;;  %v3878_v40 = vmul.f32 %v9081_v51, %v3877_v0  ;;  %v3879_v39 = vmul.f32 %v9193_v42, %v3877_v0  ;;  %v3916_v8 = vstv %s9456_s13  ;;  %v3869_v30 = vrot.slane %v3865_v48, 1  ;;  %v11552_v48 = vld [vmem:[#allocation44_spill] sm:$0xff]  ;;  %s9845_s13 = sld [smem:[#allocation3 + $0x5e]] }
 0x2be   : > { %3596 = vrot.lane.b32.xlu0 %v9248_v4, %s11375_s20  ;;  %3588 = vrot.lane.b32.xlu1 %v9256_v9, %s11375_s20  ;;  %v9519_v4 = vsel %vm442_vm3, %v3804_v43, %v3805_v1  ;;  %v3891_v9 = vmul.f32 %v9081_v51, %v3890_v12  ;;  %v3870_v11 = vrot.slane %v3866_v57, 1  ;;  %v3856_v43 = vrot.slane %v3852_v3, 1 }
 0x2bf   : > { %v3857_v1 = vrot.slane %v3853_v50, 1  ;;  %v9534_v27 = vadd.f32 %v8786_v19, %v9408_v41  ;;  %v9541_v12 = vsel %vm442_vm3, %v3843_v62, %v3844_v20  ;;  %v9544_v0 = vsel %vm442_vm3, %v3830_v18, %v3831_v52 }
 0x2c0   : > { %v9524_v47 = vpop.permute.xlu0 %2814  ;;  %v9526_v15 = vpop.permute.xlu1 %2801  ;;  %v9548_v57 = vadd.f32 %v11552_v48, %v9412_v25  ;;  %v3917_v19 = vmul.f32 %v9081_v51, %v3916_v8  ;;  %v3918_v41 = vmul.f32 %v9193_v42, %v3916_v8  ;;  %v3903_v3 = vstv %s9482_s27  ;;  %v11555_v25 = vld [vmem:[#allocation36_spill] sm:$0xff]  ;;  %s9859_s27 = sld [smem:[#allocation3 + $0x2b]] }
 0x2c1   : > { %11550 = vst [vmem:[#allocation68_spill] sm:$0xff] %v9524_v47  ;;  %11551 = vst [vmem:[#allocation69_spill] sm:$0xff] %v9526_v15  ;;  %v3895_v50 = vrot.slane %v3891_v9, 1  ;;  %v3896_v62 = vrot.slane %v3892_v60, 1  ;;  %v3882_v20 = vrot.slane %v3878_v40, 1  ;;  %v3883_v18 = vrot.slane %v3879_v39, 1 }
 0x2c2   : > { %3612 = vrot.lane.b32.xlu0 %v9259_v5, %s11375_s20  ;;  %3604 = vrot.lane.b32.xlu1 %v9262_v44, %s11375_s20  ;;  %v9561_v52 = vadd.f32 %v11555_v25, %v9432_v31  ;;  %v9564_v8 = vsel %vm442_vm3, %v3869_v30, %v3870_v11  ;;  %v9567_v48 = vsel %vm442_vm3, %v3856_v43, %v3857_v1  ;;  %v4017_v60 = vstv %s9502_s0  ;;  %s9922_s0 = sld [smem:[#allocation3 + $0x55]] }
 0x2c3   : > { %v3904_v31 = vmul.f32 %v9081_v51, %v3903_v3  ;;  %v3168_v40 = vstv %s9508_s19  ;;  %v3921_v39 = vrot.slane %v3917_v19, 1  ;;  %v3922_v30 = vrot.slane %v3918_v41, 1  ;;  %v11559_v41 = vld [vmem:[#allocation42_spill] sm:$0xff]  ;;  %s9924_s19 = sld [smem:[#allocation3 + $0x91]] }
 0x2c4   : > { %v9553_v5 = vpop.permute.xlu0 %2840  ;;  %v9555_v44 = vpop.permute.xlu1 %2827  ;;  %v3905_v11 = vmul.f32 %v9193_v42, %v3903_v3  ;;  %v3157_v43 = vstv %s9522_s15  ;;  %v2261_v3 = vadd.f32 %v11559_v41, %v9476_v10  ;;  %v4018_v25 = vmul.f32 %v9081_v51, %v4017_v60  ;;  %s9942_s15 = sld [smem:[#allocation3 + $0x22]] }
 0x2c5   : > { %11553 = vst [vmem:[#allocation44_spill] sm:$0xff] %v9553_v5  ;;  %11554 = vst [vmem:[#allocation70_spill] sm:$0xff] %v9555_v44  ;;  %v4030_v5 = vstv %s9500_s28  ;;  %v11556_v44 = vld [vmem:[#allocation37_spill] sm:$0xff]  ;;  %v4019_v15 = vmul.f32 %v9193_v42, %v4017_v60  ;;  %v9616_v60 = vsel %vm442_vm3, %v3921_v39, %v3922_v30  ;;  %v3908_v41 = vrot.slane %v3904_v31, 1  ;;  %s9895_s28 = sld [smem:[#allocation3 + $0xc4]] }
 0x2c6   : > { %v9572_v9 = vadd.f32 %v11556_v44, %v9447_v21  ;;  %3638 = vrot.lane.b32.xlu0 %v9300_v58, %s11398_s17  ;;  %3625 = vrot.lane.b32.xlu1 %v9310_v53, %s11398_s17  ;;  %v9590_v58 = vsel %vm442_vm3, %v3895_v50, %v3896_v62  ;;  %v9593_v53 = vsel %vm442_vm3, %v3882_v20, %v3883_v18  ;;  %v11561_v50 = vld [vmem:[#allocation47_spill] sm:$0xff]  ;;  %v11567_v31 = vld [vmem:[#allocation49_spill] sm:$0xff] }
 0x2c7   : > { %v4031_v44 = vmul.f32 %v9081_v51, %v4030_v5  ;;  %v4032_v19 = vmul.f32 %v9193_v42, %v4030_v5  ;;  %v3170_v5 = vmul.f32 %v11561_v50, %v3168_v40  ;;  %v3159_v10 = vmul.f32 %v11561_v50, %v3157_v43  ;;  %v11562_v20 = vld [vmem:[#allocation43_spill] sm:$0xff] }
 0x2c8   : > { %v9585_v1 = vpop.permute.xlu0 %2866  ;;  %v9587_v21 = vpop.permute.xlu1 %2853  ;;  %v2248_v18 = vadd.f32 %v11562_v20, %v9480_v45  ;;  %v11566_v45 = vld [vmem:[#allocation45_spill] sm:$0xff]  ;;  %v9632_v30 = vadd.f32 %v11567_v31, %v2261_v3  ;;  %v11569_v31 = vld [vmem:[#allocation40_spill] sm:$0xff] }
 0x2c9   : > { %11557 = vst [vmem:[#allocation36_spill] sm:$0xff] %v9585_v1  ;;  %11558 = vst [vmem:[#allocation37_spill] sm:$0xff] %v9587_v21  ;;  %v11560_v1 = vld [vmem:[#allocation39_spill] sm:$0xff]  ;;  %v3909_v21 = vrot.slane %v3905_v11, 1  ;;  %v4036_v46 = vrot.slane %v4032_v19, 2  ;;  %v2274_v39 = vadd.f32 %v11566_v45, %v9516_v63  ;;  %v4022_v11 = vrot.slane %v4018_v25, 2 }
 0x2ca   : > { %v3169_v47 = vmul.f32 %v11560_v1, %v3168_v40  ;;  %3664 = vrot.lane.b32.xlu0 %v9325_v13, %s11398_s17  ;;  %3651 = vrot.lane.b32.xlu1 %v9328_v49, %s11398_s17  ;;  %v3158_v62 = vmul.f32 %v11560_v1, %v3157_v43  ;;  %v11563_v13 = vld [vmem:[#allocation53_spill] sm:$0xff]  ;;  %v4035_v1 = vrot.slane %v4031_v44, 2  ;;  %v4056_v43 = vstv %s9557_s16  ;;  %v11568_v63 = vld [vmem:[#allocation48_spill] sm:$0xff]  ;;  %s9946_s16 = sld [smem:[#allocation3 + $0x12a]] }
 0x2cb   : > { %v2287_v38 = vadd.f32 %v11563_v13, %v9512_v17  ;;  %v4023_v17 = vrot.slane %v4019_v15, 2  ;;  %v3174_v19 = vrot.slane %v3170_v5, 4  ;;  %v3163_v13 = vrot.slane %v3159_v10, 4 }
 0x2cc   : > { %v9620_v49 = vpop.permute.xlu0 %2892  ;;  %v9622_v40 = vpop.permute.xlu1 %2879  ;;  %v3173_v44 = vrot.slane %v3169_v47, 4  ;;  %v3162_v20 = vrot.slane %v3158_v62, 4  ;;  %v2313_v45 = vadd.f32 %v11568_v63, %v9534_v27  ;;  %v4057_v3 = vmul.f32 %v9081_v51, %v4056_v43  ;;  %v11572_v62 = vld [vmem:[#allocation56_spill] sm:$0xff] }
 0x2cd   : > { %11564 = vst [vmem:[#allocation42_spill] sm:$0xff] %v9620_v49  ;;  %11565 = vst [vmem:[#allocation39_spill] sm:$0xff] %v9622_v40  ;;  %v4058_v15 = vmul.f32 %v9193_v42, %v4056_v43  ;;  %v4043_v25 = vstv %s9583_s5  ;;  %v9646_v40 = vadd.f32 %v11569_v31, %v2248_v18  ;;  %v9656_v5 = vsel %vm442_vm3, %v3908_v41, %v3909_v21  ;;  %v11573_v43 = vld [vmem:[#allocation55_spill] sm:$0xff]  ;;  %s9955_s5 = sld [smem:[#allocation3 + $0xbb]] }
 0x2ce   : > { %3690 = vrot.lane.b32.xlu0 %v9359_v34, %s11398_s17  ;;  %3677 = vrot.lane.b32.xlu1 %v9378_v55, %s11398_s17  ;;  %v11570_v34 = vld [vmem:[#allocation50_spill] sm:$0xff]  ;;  %v9659_v27 = vsel %vm755_vm4, %v4035_v1, %v4036_v46  ;;  %v2300_v10 = vadd.f32 %v11572_v62, %v9548_v57  ;;  %v9664_v63 = vadd.f32 %v11573_v43, %v2274_v39  ;;  %v3179_v41 = vstv %s9611_s12  ;;  %v11575_v1 = vld [vmem:[#allocation60_spill] sm:$0xff]  ;;  %s9973_s12 = sld [smem:[#allocation3 + $0xf7]] }
 0x2cf   : > { %v9649_v49 = vadd.f32 %v11570_v34, %v2287_v38  ;;  %v9667_v18 = vsel %vm755_vm4, %v4022_v11, %v4023_v17  ;;  %v3190_v38 = vstv %s9602_s9  ;;  %v9675_v46 = vsel %vm1573_vm6, %v3173_v44, %v3174_v19  ;;  %s9971_s9 = sld [smem:[#allocation3 + $0x88]] }
 0x2d0   : > { %v9651_v55 = vpop.permute.xlu0 %2918  ;;  %v9653_v47 = vpop.permute.xlu1 %2905  ;;  %11574 = vst [vmem:[#allocation43_spill] sm:$0xff] %v9675_v46  ;;  %v4044_v57 = vmul.f32 %v9081_v51, %v4043_v25  ;;  %v4045_v21 = vmul.f32 %v9193_v42, %v4043_v25  ;;  %v9681_v39 = vadd.f32 %v11575_v1, %v2313_v45  ;;  %v9684_v11 = vsel %vm1573_vm6, %v3162_v20, %v3163_v13  ;;  %v9695_v25 = vld [vmem:[%s11376_s21 + $0x18] sm:$0xff]  ;;  %v11581_v1 = vld [vmem:[#allocation51_spill] sm:$0xff] }
 0x2d1   : > { %11571 = vst [vmem:[#allocation47_spill] sm:$0xff] %v9653_v47  ;;  %11576 = vst [vmem:[#allocation53_spill] sm:$0xff] %v9684_v11  ;;  %v4062_v17 = vrot.slane %v4058_v15, 2  ;;  %v3191_v45 = vmul.f32 %v9695_v25, %v3190_v38  ;;  %v4082_v34 = vstv %s9625_s30  ;;  %v4069_v62 = vstv %s9627_s11  ;;  %s9990_s30 = sld [smem:[#allocation3 + $0x121]]  ;;  %s9992_s11 = sld [smem:[#allocation3 + $0x190]] }
 0x2d2   : > { %3716 = vrot.lane.b32.xlu0 %v9387_v54, %s11398_s17  ;;  %3703 = vrot.lane.b32.xlu1 %v9390_v23, %s11398_s17  ;;  %v4061_v54 = vrot.slane %v4057_v3, 2  ;;  %v11577_v23 = vld [vmem:[#allocation46_spill] sm:$0xff]  ;;  %v3192_v20 = vmul.f32 %v11561_v50, %v3190_v38  ;;  %v3180_v13 = vmul.f32 %v9695_v25, %v3179_v41  ;;  %v3181_v3 = vmul.f32 %v11561_v50, %v3179_v41 }
 0x2d3   : > { %v2339_v44 = vadd.f32 %v11577_v23, %v9561_v52  ;;  %v3212_v15 = vstv %s9634_s24  ;;  %v11580_v52 = vld [vmem:[#allocation59_spill] sm:$0xff]  ;;  %v9709_v23 = vadd.f32 %v11581_v1, %v2300_v10  ;;  %v4048_v11 = vrot.slane %v4044_v57, 2  ;;  %s10000_s24 = sld [smem:[#allocation3 + $0x15d]] }
 0x2d4   : > { %v9690_v19 = vpop.permute.xlu0 %2944  ;;  %v9692_v31 = vpop.permute.xlu1 %2931  ;;  %v2326_v43 = vadd.f32 %v11580_v52, %v9572_v9  ;;  %v4049_v38 = vrot.slane %v4045_v21, 2  ;;  %v9720_v50 = vsel %vm755_vm4, %v4061_v54, %v4062_v17  ;;  %v4083_v9 = vmul.f32 %v9081_v51, %v4082_v34  ;;  %v5769_v17 = vld [vmem:[%s11376_s21 + $0x20] sm:$0xff] }
 0x2d5   : > { %11578 = vst [vmem:[#allocation45_spill] sm:$0xff] %v9690_v19  ;;  %11579 = vst [vmem:[#allocation49_spill] sm:$0xff] %v9692_v31  ;;  %v4084_v10 = vmul.f32 %v9193_v42, %v4082_v34  ;;  %v4070_v41 = vmul.f32 %v9081_v51, %v4069_v62  ;;  %v4071_v21 = vmul.f32 %v9193_v42, %v4069_v62  ;;  %v3195_v34 = vrot.slane %v3191_v45, 4 }
 0x2d6   : > { %3742 = vrot.lane.b32.xlu0 %v9415_v2, %s11298_s10  ;;  %3729 = vrot.lane.b32.xlu1 %v9439_v24, %s11298_s10  ;;  %v11582_v2 = vld [vmem:[#allocation61_spill] sm:$0xff]  ;;  %v3213_v54 = vmul.f32 %v9695_v25, %v3212_v15  ;;  %v3214_v1 = vmul.f32 %v5769_v17, %v3212_v15  ;;  %v3196_v46 = vrot.slane %v3192_v20, 4  ;;  %v3184_v31 = vrot.slane %v3180_v13, 4 }
 0x2d7   : > { %v9728_v52 = vadd.f32 %v11582_v2, %v2339_v44  ;;  %v3185_v19 = vrot.slane %v3181_v3, 4  ;;  %v11585_v44 = vld [vmem:[#allocation52_spill] sm:$0xff]  ;;  %v9753_v45 = vsel %vm755_vm4, %v4048_v11, %v4049_v38  ;;  %v4087_v20 = vrot.slane %v4083_v9, 2  ;;  %v11588_v11 = vld [vmem:[#allocation62_spill] sm:$0xff] }
 0x2d8   : > { %v9730_v24 = vpop.permute.xlu0 %2970  ;;  %v9732_v57 = vpop.permute.xlu1 %2957  ;;  %v9743_v2 = vadd.f32 %v11585_v44, %v9632_v30  ;;  %v4088_v13 = vrot.slane %v4084_v10, 2  ;;  %v4074_v3 = vrot.slane %v4070_v41, 2  ;;  %v3201_v15 = vstv %s9686_s6  ;;  %v11591_v41 = vld [vmem:[#allocation64_spill] sm:$0xff]  ;;  %s10018_s6 = sld [smem:[#allocation3 + $0xee]] }
 0x2d9   : > { %11583 = vst [vmem:[#allocation48_spill] sm:$0xff] %v9730_v24  ;;  %11584 = vst [vmem:[#allocation40_spill] sm:$0xff] %v9732_v57  ;;  %v11586_v57 = vld [vmem:[#allocation57_spill] sm:$0xff]  ;;  %v3218_v44 = vrot.slane %v3214_v1, 4  ;;  %v9767_v38 = vadd.f32 %v11588_v11, %v9649_v49  ;;  %v9770_v9 = vsel %vm1573_vm6, %v3195_v34, %v3196_v46  ;;  %v9773_v10 = vsel %vm1573_vm6, %v3184_v31, %v3185_v19 }
 0x2da   : > { %v9746_v62 = vadd.f32 %v11586_v57, %v2326_v43  ;;  %3768 = vrot.lane.b32.xlu0 %v9442_v29, %s11298_s10  ;;  %3755 = vrot.lane.b32.xlu1 %v9459_v26, %s11298_s10  ;;  %v4075_v43 = vrot.slane %v4071_v21, 2  ;;  %v3217_v57 = vrot.slane %v3213_v54, 4  ;;  %v4108_v29 = vstv %s9700_s7  ;;  %v11587_v26 = vld [vmem:[#allocation54_spill] sm:$0xff]  ;;  %11589 = vst [vmem:[#allocation50_spill] sm:$0xff] %v9770_v9  ;;  %11590 = vst [vmem:[#allocation56_spill] sm:$0xff] %v9773_v10  ;;  %s10020_s7 = sld [smem:[#allocation3 + $0x5f]] }
 0x2db   : > { %v9763_v47 = vadd.f32 %v11587_v26, %v9646_v40  ;;  %v9779_v21 = vadd.f32 %v11591_v41, %v9664_v63  ;;  %v3202_v49 = vmul.f32 %v9695_v25, %v3201_v15  ;;  %v4095_v40 = vstv %s9715_s22  ;;  %s10039_s22 = sld [smem:[#allocation3 + $0x2c]] }
 0x2dc   : > { %v9756_v24 = vpop.permute.xlu0 %2996  ;;  %v9758_v30 = vpop.permute.xlu1 %2983  ;;  %v3234_v46 = vstv %s9717_s23  ;;  %v3203_v19 = vmul.f32 %v5769_v17, %v3201_v15  ;;  %v4109_v31 = vmul.f32 %v9081_v51, %v4108_v29  ;;  %v4110_v54 = vmul.f32 %v9193_v42, %v4108_v29  ;;  %s10063_s23 = sld [smem:[#allocation3 + $0x187]] }
 0x2dd   : > { %v3223_v1 = vstv %s9725_s4  ;;  %v9804_v26 = vsel %vm1573_vm6, %v3217_v57, %v3218_v44  ;;  %v4134_v15 = vstv %s9737_s25  ;;  %v4096_v11 = vmul.f32 %v9081_v51, %v4095_v40  ;;  %s10072_s4 = sld [smem:[#allocation3 + $0x154]]  ;;  %s10074_s25 = sld [smem:[#allocation3 + $0xc5]] }
 0x2de   : > { %3794 = vrot.lane.b32.xlu0 %v9462_v35, %s11298_s10  ;;  %3781 = vrot.lane.b32.xlu1 %v9489_v16, %s11298_s10  ;;  %v9798_v35 = vsel %vm755_vm4, %v4087_v20, %v4088_v13  ;;  %v9801_v16 = vsel %vm755_vm4, %v4074_v3, %v4075_v43  ;;  %11594 = vst [vmem:[#allocation46_spill] sm:$0xff] %v9804_v26  ;;  %v4121_v10 = vstv %s9739_s29  ;;  %v3206_v20 = vrot.slane %v3202_v49, 4  ;;  %s10101_s29 = sld [smem:[#allocation3 + $0x92]] }
 0x2df   : > { %v4097_v29 = vmul.f32 %v9193_v42, %v4095_v40  ;;  %v3235_v41 = vmul.f32 %v9695_v25, %v3234_v46  ;;  %v3236_v13 = vmul.f32 %v5769_v17, %v3234_v46  ;;  %v3224_v3 = vmul.f32 %v9695_v25, %v3223_v1 }
 0x2e0   : > { %v9793_v63 = vpop.permute.xlu0 %3022  ;;  %v9795_v34 = vpop.permute.xlu1 %3009  ;;  %v3225_v43 = vmul.f32 %v5769_v17, %v3223_v1  ;;  %v3207_v57 = vrot.slane %v3203_v19, 4  ;;  %v4113_v44 = vrot.slane %v4109_v31, 2  ;;  %v4114_v40 = vrot.slane %v4110_v54, 2  ;;  %v11596_v31 = vld [vmem:[#allocation63_spill] sm:$0xff] }
 0x2e1   : > { %11592 = vst [vmem:[#allocation55_spill] sm:$0xff] %v9793_v63  ;;  %11593 = vst [vmem:[#allocation60_spill] sm:$0xff] %v9795_v34  ;;  %v4135_v26 = vmul.f32 %v9081_v51, %v4134_v15  ;;  %v4136_v17 = vmul.f32 %v9193_v42, %v4134_v15  ;;  %v4122_v46 = vmul.f32 %v9081_v51, %v4121_v10  ;;  %v4100_v1 = vrot.slane %v4096_v11, 2 }
 0x2e2   : > { %3820 = vrot.lane.b32.xlu0 %v9492_v56, %s11298_s10  ;;  %3807 = vrot.lane.b32.xlu1 %v9519_v4, %s11298_s10  ;;  %v11595_v56 = vld [vmem:[#allocation58_spill] sm:$0xff]  ;;  %v4123_v19 = vmul.f32 %v9193_v42, %v4121_v10  ;;  %v9836_v54 = vadd.f32 %v11596_v31, %v9709_v23  ;;  %v4101_v9 = vrot.slane %v4097_v29, 2  ;;  %v4160_v34 = vstv %s9775_s18  ;;  %s10122_s18 = sld [smem:[#allocation3 + $0x12b]] }
 0x2e3   : > { %v9825_v4 = vadd.f32 %v11595_v56, %v9681_v39  ;;  %v3239_v39 = vrot.slane %v3235_v41, 4  ;;  %v3240_v15 = vrot.slane %v3236_v13, 4  ;;  %v3228_v56 = vrot.slane %v3224_v3, 4 }
 0x2e4   : > { %v9827_v49 = vpop.permute.xlu0 %3048  ;;  %v9829_v25 = vpop.permute.xlu1 %3035  ;;  %v3229_v10 = vrot.slane %v3225_v43, 4  ;;  %v9848_v23 = vsel %vm1573_vm6, %v3206_v20, %v3207_v57  ;;  %v9851_v11 = vsel %vm755_vm4, %v4113_v44, %v4114_v40  ;;  %v4139_v29 = vrot.slane %v4135_v26, 2  ;;  %v11598_v20 = vld [vmem:[#allocation30_spill] sm:$0xff]  ;;  %v11599_v26 = vld [vmem:[#allocation31_spill] sm:$0xff] }
 0x2e5   : > { %11597 = vst [vmem:[#allocation59_spill] sm:$0xff] %v9848_v23  ;;  %v4147_v31 = vstv %s9791_s1  ;;  %v4126_v41 = vrot.slane %v4122_v46, 2  ;;  %v4127_v13 = vrot.slane %v4123_v19, 2  ;;  %v4161_v3 = vmul.f32 %v9081_v51, %v4160_v34  ;;  %s10129_s1 = sld [smem:[#allocation3 + $0xf8]] }
 0x2e6   : > { %3846 = vrot.lane.b32.xlu0 %v9541_v12, %s11312_s3  ;;  %3833 = vrot.lane.b32.xlu1 %v9544_v0, %s11312_s3  ;;  %v4140_v0 = vrot.slane %v4136_v17, 2  ;;  %v9863_v43 = vadd.f32 %v11598_v20, %v9728_v52  ;;  %v9867_v57 = vadd.f32 %v11599_v26, %v9746_v62  ;;  %v9870_v44 = vsel %vm755_vm4, %v4100_v1, %v4101_v9  ;;  %v11600_v17 = vld [vmem:[#allocation32_spill] sm:$0xff] }
 0x2e7   : > { %v4162_v40 = vmul.f32 %v9193_v42, %v4160_v34  ;;  %v9875_v46 = vadd.f32 %v11600_v17, %v9743_v2  ;;  %v9882_v52 = vsel %vm1573_vm6, %v3239_v39, %v3240_v15  ;;  %v9885_v62 = vsel %vm1573_vm6, %v3228_v56, %v3229_v10  ;;  %v11603_v34 = vld [vmem:[#allocation33_spill] sm:$0xff] }
 0x2e8   : > { %v9854_v63 = vpop.permute.xlu0 %3074  ;;  %v9856_v12 = vpop.permute.xlu1 %3061  ;;  %11601 = vst [vmem:[#allocation51_spill] sm:$0xff] %v9882_v52  ;;  %11602 = vst [vmem:[#allocation61_spill] sm:$0xff] %v9885_v62  ;;  %v4186_v9 = vstv %s9816_s8  ;;  %v9890_v19 = vadd.f32 %v11603_v34, %v9763_v47  ;;  %v4148_v2 = vmul.f32 %v9081_v51, %v4147_v31  ;;  %v4173_v1 = vstv %s9818_s14  ;;  %v9909_v51 = vld [vmem:[%s11376_s21 + $0x30] sm:$0xff]  ;;  %s10143_s8 = sld [smem:[#allocation3 + $0x191]]  ;;  %s10149_s14 = sld [smem:[#allocation3 + $0x15e]] }
 0x2e9   : > { %v9902_v15 = vsel %vm755_vm4, %v4139_v29, %v4140_v0  ;;  %v9905_v56 = vsel %vm755_vm4, %v4126_v41, %v4127_v13  ;;  %v4165_v10 = vrot.slane %v4161_v3, 2  ;;  %v4149_v47 = vmul.f32 %v9193_v42, %v4147_v31  ;;  %v11606_v13 = vld [vmem:[#allocation34_spill] sm:$0xff] }
 0x2ea   : > { %3872 = vrot.lane.b32.xlu0 %v9564_v8, %s11312_s3  ;;  %3859 = vrot.lane.b32.xlu1 %v9567_v48, %s11312_s3  ;;  %v4212_v8 = vstv %s9821_s2  ;;  %v4166_v20 = vrot.slane %v4162_v40, 2  ;;  %v4187_v26 = vmul.f32 %v9909_v51, %v4186_v9  ;;  %v4188_v17 = vmul.f32 %v9193_v42, %v4186_v9  ;;  %s10155_s2 = sld [smem:[#allocation3 + $0x60]] }
 0x2eb   : > { %v4199_v34 = vstv %s9839_s26  ;;  %v4174_v29 = vmul.f32 %v9909_v51, %v4173_v1  ;;  %v4175_v0 = vmul.f32 %v9193_v42, %v4173_v1  ;;  %v4213_v31 = vmul.f32 %v9909_v51, %v4212_v8  ;;  %s10196_s26 = sld [smem:[#allocation3 + $0x2d]] }
 0x2ec   : > { %v9897_v48 = vpop.permute.xlu0 %3100  ;;  %v9899_v39 = vpop.permute.xlu1 %3087  ;;  %v4238_v41 = vstv %s9845_s13  ;;  %v9928_v3 = vadd.f32 %v11606_v13, %v9767_v38  ;;  %v4214_v9 = vmul.f32 %v9193_v42, %v4212_v8  ;;  %v4201_v62 = vmul.f32 %v9193_v42, %v4199_v34  ;;  %s10205_s13 = sld [smem:[#allocation3 + $0xc6]] }
 0x2ed   : > { %11604 = vst [vmem:[#allocation52_spill] sm:$0xff] %v9897_v48  ;;  %11605 = vst [vmem:[#allocation57_spill] sm:$0xff] %v9899_v39  ;;  %v4153_v39 = vrot.slane %v4149_v47, 2  ;;  %v4200_v48 = vmul.f32 %v9909_v51, %v4199_v34  ;;  %v4225_v52 = vstv %s9859_s27  ;;  %v4191_v38 = vrot.slane %v4187_v26, 2  ;;  %s10215_s27 = sld [smem:[#allocation3 + $0x93]] }
 0x2ee   : > { %3898 = vrot.lane.b32.xlu0 %v9590_v58, %s11312_s3  ;;  %3885 = vrot.lane.b32.xlu1 %v9593_v53, %s11312_s3  ;;  %v11607_v58 = vld [vmem:[#allocation35_spill] sm:$0xff]  ;;  %v4152_v53 = vrot.slane %v4148_v2, 2  ;;  %v4192_v13 = vrot.slane %v4188_v17, 2  ;;  %v4240_v2 = vmul.f32 %v9193_v42, %v4238_v41  ;;  %v9953_v8 = vsel %vm755_vm4, %v4165_v10, %v4166_v20 }
 0x2ef   : > { %v9932_v40 = vadd.f32 %v11607_v58, %v9779_v21  ;;  %v4239_v21 = vmul.f32 %v9909_v51, %v4238_v41  ;;  %v4178_v47 = vrot.slane %v4174_v29, 2  ;;  %v4179_v34 = vrot.slane %v4175_v0, 2 }
 0x2f0   : > { %v9935_v23 = vpop.permute.xlu0 %3126  ;;  %v9937_v1 = vpop.permute.xlu1 %3113  ;;  %v4217_v58 = vrot.slane %v4213_v31, 2  ;;  %v4218_v26 = vrot.slane %v4214_v9, 2  ;;  %v4226_v17 = vmul.f32 %v9909_v51, %v4225_v52  ;;  %v4227_v41 = vmul.f32 %v9193_v42, %v4225_v52  ;;  %v11611_v52 = vld [vmem:[#allocation65_spill] sm:$0xff] }
 0x2f1   : > { %11608 = vst [vmem:[#allocation54_spill] sm:$0xff] %v9935_v23  ;;  %11609 = vst [vmem:[#allocation62_spill] sm:$0xff] %v9937_v1  ;;  %v4264_v1 = vstv %s9895_s28  ;;  %v9969_v20 = vsel %vm755_vm4, %v4152_v53, %v4153_v39  ;;  %v4204_v29 = vrot.slane %v4200_v48, 2  ;;  %v4205_v0 = vrot.slane %v4201_v62, 2  ;;  %s10239_s28 = sld [smem:[#allocation3 + $0x12c]] }
 0x2f2   : > { %3924 = vrot.lane.b32.xlu0 %v9616_v60, %s11312_s3  ;;  %3911 = vrot.lane.b32.xlu1 %v9656_v5, %s11312_s3  ;;  %v11610_v60 = vld [vmem:[#allocation38_spill] sm:$0xff]  ;;  %v9977_v31 = vadd.f32 %v11611_v52, %v9836_v54  ;;  %v4243_v9 = vrot.slane %v4239_v21, 2  ;;  %v3461_v62 = vstv %s9922_s0  ;;  %v4265_v48 = vmul.f32 %v9909_v51, %v4264_v1  ;;  %s10253_s0 = sld [smem:[#allocation3 + $0xf9]] }
 0x2f3   : > { %v9962_v23 = vadd.f32 %v11610_v60, %v9825_v4  ;;  %v9980_v4 = vsel %vm755_vm4, %v4191_v38, %v4192_v13  ;;  %v4244_v60 = vrot.slane %v4240_v2, 2  ;;  %v4266_v39 = vmul.f32 %v9193_v42, %v4264_v1 }
 0x2f4   : > { %v9964_v5 = vpop.permute.xlu0 %3152  ;;  %v9966_v10 = vpop.permute.xlu1 %3139  ;;  %v4251_v53 = vstv %s9924_s19  ;;  %v9995_v54 = vsel %vm755_vm4, %v4178_v47, %v4179_v34  ;;  %v4231_v38 = vrot.slane %v4227_v41, 2  ;;  %v10004_v42 = vadd.f32 %v9281_v22, %v9863_v43  ;;  %s10264_s19 = sld [smem:[#allocation3 + $0x192]] }
 0x2f5   : > { %v10008_v1 = vadd.f32 %v9283_v36, %v9867_v57  ;;  %v10015_v2 = vsel %vm755_vm4, %v4204_v29, %v4205_v0  ;;  %v3457_v47 = vstv %s9942_s15  ;;  %v10023_v22 = vmul.f32 %v9909_v51, %v3461_v62  ;;  %v10027_v36 = vld [vmem:[%s11376_s21 + $0x38] sm:$0xff]  ;;  %s10266_s15 = sld [smem:[#allocation3 + $0x15f]] }
 0x2f6   : > { %4038 = vrot.lane.b32.xlu0 %v9659_v27, %s11398_s17  ;;  %4025 = vrot.lane.b32.xlu1 %v9667_v18, %s11398_s17  ;;  %v9998_v27 = vsel %vm755_vm4, %v4217_v58, %v4218_v26  ;;  %v4230_v18 = vrot.slane %v4226_v17, 2  ;;  %v4252_v43 = vmul.f32 %v9909_v51, %v4251_v53  ;;  %v4253_v57 = vmul.f32 %v10027_v36, %v4251_v53 }
 0x2f7   : > { %11612 = vst [vmem:[#allocation64_spill] sm:$0xff] %v10023_v22  ;;  %v4290_v34 = vstv %s9946_s16  ;;  %v10036_v58 = vsel %vm755_vm4, %v4243_v9, %v4244_v60  ;;  %v4269_v26 = vrot.slane %v4265_v48, 2  ;;  %v4270_v17 = vrot.slane %v4266_v39, 2  ;;  %s10298_s16 = sld [smem:[#allocation3 + $0x61]] }
 0x2f8   : > { %v10010_v13 = vpop.permute.xlu0 %3266  ;;  %v10012_v21 = vpop.permute.xlu1 %3253  ;;  %v3469_v41 = vstv %s9955_s5  ;;  %v10043_v29 = vadd.f32 %v9314_v59, %v9875_v46  ;;  %v10047_v0 = vadd.f32 %v9316_v33, %v9890_v19  ;;  %v3465_v60 = vstv %s9971_s9  ;;  %s10318_s5 = sld [smem:[#allocation3 + $0x2e]]  ;;  %s10320_s9 = sld [smem:[#allocation3 + $0xc7]] }
 0x2f9   : > { %v4291_v59 = vmul.f32 %v9909_v51, %v4290_v34  ;;  %v4292_v46 = vmul.f32 %v10027_v36, %v4290_v34  ;;  %v4277_v62 = vstv %s9973_s12  ;;  %v10067_v33 = vadd.f32 %v9348_v6, %v9928_v3  ;;  %s10326_s12 = sld [smem:[#allocation3 + $0x94]] }
 0x2fa   : > { %4064 = vrot.lane.b32.xlu0 %v9720_v50, %s11398_s17  ;;  %4051 = vrot.lane.b32.xlu1 %v9753_v45, %s11398_s17  ;;  %v10050_v50 = vsel %vm755_vm4, %v4230_v18, %v4231_v38  ;;  %v10053_v45 = vmul.f32 %v9909_v51, %v3457_v47  ;;  %v4256_v19 = vrot.slane %v4252_v43, 2  ;;  %v4257_v48 = vrot.slane %v4253_v57, 2 }
 0x2fb   : > { %v10070_v39 = vmul.f32 %v9909_v51, %v3469_v41  ;;  %v10078_v53 = vadd.f32 %v9350_v32, %v9932_v40  ;;  %v10085_v6 = vsel %vm755_vm4, %v4269_v26, %v4270_v17  ;;  %v3477_v3 = vstv %s9990_s30  ;;  %s10335_s30 = sld [smem:[#allocation3 + $0x12d]] }
 0x2fc   : > { %11613 = vst [vmem:[#allocation58_spill] sm:$0xff] %v10053_v45  ;;  %v10055_v52 = vpop.permute.xlu0 %3292  ;;  %v10057_v9 = vpop.permute.xlu1 %3279  ;;  %v4316_v18 = vstv %s9992_s11  ;;  %v10090_v38 = vmul.f32 %v9909_v51, %v3465_v60  ;;  %v4278_v47 = vmul.f32 %v9909_v51, %v4277_v62  ;;  %v4279_v43 = vmul.f32 %v10027_v36, %v4277_v62  ;;  %s10384_s11 = sld [smem:[#allocation3 + $0xfa]] }
 0x2fd   : > { %11614 = vst [vmem:[#allocation63_spill] sm:$0xff] %v10057_v9  ;;  %11615 = vst [vmem:[#allocation30_spill] sm:$0xff] %v10070_v39  ;;  %v4303_v32 = vstv %s10000_s24  ;;  %v4295_v57 = vrot.slane %v4291_v59, 2  ;;  %v3473_v34 = vstv %s10018_s6  ;;  %v4342_v26 = vstv %s10020_s7  ;;  %s10387_s24 = sld [smem:[#allocation3 + $0x193]]  ;;  %s10400_s6 = sld [smem:[#allocation3 + $0x160]] }
 0x2fe   : > { %4090 = vrot.lane.b32.xlu0 %v9798_v35, %s11398_s17  ;;  %4077 = vrot.lane.b32.xlu1 %v9801_v16, %s11398_s17  ;;  %11616 = vst [vmem:[#allocation31_spill] sm:$0xff] %v10090_v38  ;;  %v4296_v16 = vrot.slane %v4292_v46, 2  ;;  %v10105_v17 = vadd.f32 %v9382_v14, %v9962_v23  ;;  %v10108_v41 = vsel %vm755_vm4, %v4256_v19, %v4257_v48  ;;  %v4329_v46 = vstv %s10039_s22  ;;  %s10414_s7 = sld [smem:[#allocation3 + $0x62]]  ;;  %s10426_s22 = sld [smem:[#allocation3 + $0x2f]] }
 0x2ff   : > { %v10111_v60 = vmul.f32 %v9909_v51, %v3477_v3  ;;  %v4317_v62 = vmul.f32 %v9909_v51, %v4316_v18  ;;  %v4318_v59 = vmul.f32 %v10027_v36, %v4316_v18  ;;  %v4304_v14 = vmul.f32 %v9909_v51, %v4303_v32 }
 0x300   : > { %v10095_v40 = vpop.permute.xlu0 %3318  ;;  %v10097_v35 = vpop.permute.xlu1 %3305  ;;  %v4305_v23 = vmul.f32 %v10027_v36, %v4303_v32  ;;  %v10126_v19 = vadd.f32 %v9384_v37, %v9977_v31  ;;  %v4283_v48 = vrot.slane %v4279_v43, 2  ;;  %v4343_v3 = vmul.f32 %v9909_v51, %v4342_v26 }
 0x301   : > { %11617 = vst [vmem:[#allocation32_spill] sm:$0xff] %v10095_v40  ;;  %11618 = vst [vmem:[#allocation33_spill] sm:$0xff] %v10097_v35  ;;  %v10136_v32 = vsel %vm755_vm4, %v4295_v57, %v4296_v16  ;;  %v3485_v38 = vstv %s10063_s23  ;;  %v4344_v37 = vmul.f32 %v10027_v36, %v4342_v26  ;;  %v3481_v31 = vstv %s10072_s4  ;;  %v11626_v40 = vld [vmem:[#allocation66_spill] sm:$0xff]  ;;  %s10438_s23 = sld [smem:[#allocation3 + $0xc8]]  ;;  %s10450_s4 = sld [smem:[#allocation3 + $0x95]] }
 0x302   : > { %11619 = vst [vmem:[#allocation34_spill] sm:$0xff] %v10111_v60  ;;  %4116 = vrot.lane.b32.xlu0 %v9851_v11, %s11398_s17  ;;  %4103 = vrot.lane.b32.xlu1 %v9870_v44, %s11398_s17  ;;  %v4282_v11 = vrot.slane %v4278_v47, 2  ;;  %v10139_v60 = vmul.f32 %v9909_v51, %v3473_v34  ;;  %v4330_v47 = vmul.f32 %v9909_v51, %v4329_v46  ;;  %v4368_v39 = vstv %s10074_s25  ;;  %s10514_s25 = sld [smem:[#allocation3 + $0x12e]] }
 0x303   : > { %v4331_v43 = vmul.f32 %v10027_v36, %v4329_v46  ;;  %v4321_v57 = vrot.slane %v4317_v62, 2  ;;  %v4322_v16 = vrot.slane %v4318_v59, 2  ;;  %v4308_v34 = vrot.slane %v4304_v14, 2 }
 0x304   : > { %v10131_v44 = vpop.permute.xlu0 %3344  ;;  %v10133_v18 = vpop.permute.xlu1 %3331  ;;  %11620 = vst [vmem:[#allocation35_spill] sm:$0xff] %v10139_v60  ;;  %v4309_v26 = vrot.slane %v4305_v23, 2  ;;  %v10159_v60 = vadd.f32 %v9418_v28, %v10004_v42  ;;  %v10163_v46 = vadd.f32 %v9420_v7, %v10008_v1  ;;  %v4347_v35 = vrot.slane %v4343_v3, 2 }
 0x305   : > { %v4348_v59 = vrot.slane %v4344_v37, 2  ;;  %v4369_v14 = vmul.f32 %v9909_v51, %v4368_v39  ;;  %v4370_v23 = vmul.f32 %v10027_v36, %v4368_v39  ;;  %v4355_v28 = vstv %s10101_s29  ;;  %v11623_v37 = vld [vmem:[#allocation41_spill] sm:$0xff]  ;;  %s10516_s29 = sld [smem:[#allocation3 + $0xfb]] }
 0x306   : > { %4142 = vrot.lane.b32.xlu0 %v9902_v15, %s11298_s10  ;;  %4129 = vrot.lane.b32.xlu1 %v9905_v56, %s11298_s10  ;;  %v10166_v15 = vsel %vm755_vm4, %v4282_v11, %v4283_v48  ;;  %v10176_v42 = vmul.f32 %v9909_v51, %v3485_v38  ;;  %v10179_v7 = vmul.f32 %v9909_v51, %v3481_v31  ;;  %v4334_v1 = vrot.slane %v4330_v47, 2 }
 0x307   : > { %v4335_v11 = vrot.slane %v4331_v43, 2  ;;  %v10183_v48 = vadd.f32 %v9452_v61, %v10043_v29  ;;  %v10190_v39 = vsel %vm755_vm4, %v4321_v57, %v4322_v16  ;;  %v10193_v38 = vsel %vm755_vm4, %v4308_v34, %v4309_v26 }
 0x308   : > { %v10168_v56 = vpop.permute.xlu0 %3370  ;;  %v10170_v62 = vpop.permute.xlu1 %3357  ;;  %11621 = vst [vmem:[#allocation38_spill] sm:$0xff] %v10176_v42  ;;  %11622 = vst [vmem:[#allocation65_spill] sm:$0xff] %v10179_v7  ;;  %v4394_v3 = vstv %s10122_s18  ;;  %v10200_v61 = vadd.f32 %v11623_v37, %v10047_v0  ;;  %v4357_v29 = vmul.f32 %v10027_v36, %v4355_v28  ;;  %v4381_v31 = vstv %s10129_s1  ;;  %s10572_s18 = sld [smem:[#allocation3 + $0x194]]  ;;  %s10603_s1 = sld [smem:[#allocation3 + $0x161]] }
 0x309   : > { %v10212_v43 = vsel %vm755_vm4, %v4347_v35, %v4348_v59  ;;  %v4373_v57 = vrot.slane %v4369_v14, 2  ;;  %v4374_v16 = vrot.slane %v4370_v23, 2  ;;  %v4420_v34 = vstv %s10143_s8  ;;  %v11627_v23 = vld [vmem:[#allocation67_spill] sm:$0xff]  ;;  %s10633_s8 = sld [smem:[#allocation3 + $0x64]] }
 0x30a   : > { %4168 = vrot.lane.b32.xlu0 %v9953_v8, %s11298_s10  ;;  %4155 = vrot.lane.b32.xlu1 %v9969_v20, %s11298_s10  ;;  %v4356_v8 = vmul.f32 %v9909_v51, %v4355_v28  ;;  %v10218_v0 = vsel %vm755_vm4, %v4334_v1, %v4335_v11  ;;  %v4395_v26 = vmul.f32 %v9909_v51, %v4394_v3  ;;  %v4407_v37 = vstv %s10149_s14  ;;  %s10659_s14 = sld [smem:[#allocation3 + $0x5b]] }
 0x30b   : > { %v4396_v28 = vmul.f32 %v10027_v36, %v4394_v3  ;;  %v10225_v45 = vadd.f32 %v11626_v40, %v10067_v33  ;;  %v4382_v35 = vmul.f32 %v9909_v51, %v4381_v31  ;;  %v4383_v59 = vmul.f32 %v10027_v36, %v4381_v31 }
 0x30c   : > { %v10207_v20 = vpop.permute.xlu0 %3396  ;;  %v10209_v47 = vpop.permute.xlu1 %3383  ;;  %v4446_v14 = vstv %s10155_s2  ;;  %v10236_v1 = vadd.f32 %v11627_v23, %v10078_v53  ;;  %v4360_v11 = vrot.slane %v4356_v8, 2  ;;  %v4361_v3 = vrot.slane %v4357_v29, 2  ;;  %s10665_s2 = sld [smem:[#allocation3 + $0x28]] }
 0x30d   : > { %11624 = vst [vmem:[#allocation41_spill] sm:$0xff] %v10207_v20  ;;  %11625 = vst [vmem:[#allocation71_spill] sm:$0xff] %v10209_v47  ;;  %v4421_v33 = vmul.f32 %v9909_v51, %v4420_v34  ;;  %v4422_v31 = vmul.f32 %v10027_v36, %v4420_v34  ;;  %v4408_v22 = vmul.f32 %v9909_v51, %v4407_v37  ;;  %v4399_v8 = vrot.slane %v4395_v26, 2  ;;  %v11631_v26 = vld [vmem:[#allocation69_spill] sm:$0xff] }
 0x30e   : > { %4194 = vrot.lane.b32.xlu0 %v9980_v4, %s11298_s10  ;;  %4181 = vrot.lane.b32.xlu1 %v9995_v54, %s11298_s10  ;;  %v10246_v54 = vsel %vm755_vm4, %v4373_v57, %v4374_v16  ;;  %v4409_v53 = vmul.f32 %v10027_v36, %v4407_v37  ;;  %v4400_v29 = vrot.slane %v4396_v28, 2  ;;  %v4447_v23 = vmul.f32 %v9909_v51, %v4446_v14 }
 0x30f   : > { %v4448_v47 = vmul.f32 %v10027_v36, %v4446_v14  ;;  %v4386_v57 = vrot.slane %v4382_v35, 2  ;;  %v4387_v16 = vrot.slane %v4383_v59, 2  ;;  %v4433_v34 = vstv %s10196_s26  ;;  %s10671_s26 = sld [smem:[#allocation3 + $0xca]] }
 0x310   : > { %v10241_v40 = vpop.permute.xlu0 %3422  ;;  %v10243_v4 = vpop.permute.xlu1 %3409  ;;  %v10270_v28 = vadd.f32 %v11631_v26, %v10126_v19  ;;  %v4425_v37 = vrot.slane %v4421_v33, 2  ;;  %v4412_v35 = vrot.slane %v4408_v22, 2  ;;  %v4413_v59 = vrot.slane %v4409_v53, 2 }
 0x311   : > { %11628 = vst [vmem:[#allocation66_spill] sm:$0xff] %v10241_v40  ;;  %11629 = vst [vmem:[#allocation67_spill] sm:$0xff] %v10243_v4  ;;  %v11630_v4 = vld [vmem:[#allocation68_spill] sm:$0xff]  ;;  %v4459_v20 = vstv %s10215_s27  ;;  %v4451_v7 = vrot.slane %v4447_v23, 3  ;;  %v4452_v42 = vrot.slane %v4448_v47, 3  ;;  %v4434_v9 = vmul.f32 %v9909_v51, %v4433_v34  ;;  %s10708_s27 = sld [smem:[#allocation3 + $0xc1]] }
 0x312   : > { %v10257_v40 = vadd.f32 %v11630_v4, %v10105_v17  ;;  %4220 = vrot.lane.b32.xlu0 %v9998_v27, %s11298_s10  ;;  %4207 = vrot.lane.b32.xlu1 %v10015_v2, %s11298_s10  ;;  %v10273_v17 = vsel %vm755_vm4, %v4360_v11, %v4361_v3  ;;  %v4472_v27 = vstv %s10205_s13  ;;  %v4426_v2 = vrot.slane %v4422_v31, 2  ;;  %s10679_s13 = sld [smem:[#allocation3 + $0x97]] }
 0x313   : > { %v4435_v19 = vmul.f32 %v10027_v36, %v4433_v34  ;;  %v10288_v11 = vsel %vm755_vm4, %v4399_v8, %v4400_v29  ;;  %v10291_v3 = vsel %vm755_vm4, %v4386_v57, %v4387_v16  ;;  %v4473_v22 = vmul.f32 %v9909_v51, %v4472_v27  ;;  %v11633_v8 = vld [vmem:[#allocation70_spill] sm:$0xff] }
 0x314   : > { %v10276_v14 = vpop.permute.xlu0 %3448  ;;  %v10278_v4 = vpop.permute.xlu1 %3435  ;;  %v4474_v47 = vmul.f32 %v10027_v36, %v4472_v27  ;;  %v4460_v33 = vmul.f32 %v9909_v51, %v4459_v20  ;;  %v4461_v31 = vmul.f32 %v10027_v36, %v4459_v20  ;;  %v4498_v53 = vstv %s10239_s28  ;;  %s10723_s28 = sld [smem:[#allocation3 + $0x8e]] }
 0x315   : > { %v10306_v29 = vadd.f32 %v11633_v8, %v10163_v46  ;;  %v10313_v16 = vsel %vm755_vm4, %v4425_v37, %v4426_v2  ;;  %v10316_v20 = vsel %vm755_vm4, %v4412_v35, %v4413_v59  ;;  %v4438_v46 = vrot.slane %v4434_v9, 3 }
 0x316   : > { %4246 = vrot.lane.b32.xlu0 %v10036_v58, %s11312_s3  ;;  %4233 = vrot.lane.b32.xlu1 %v10050_v50, %s11312_s3  ;;  %v11632_v58 = vld [vmem:[#allocation44_spill] sm:$0xff]  ;;  %v4439_v34 = vrot.slane %v4435_v19, 3  ;;  %v4485_v26 = vstv %s10253_s0  ;;  %v4477_v37 = vrot.slane %v4473_v22, 3  ;;  %v4499_v27 = vmul.f32 %v9909_v51, %v4498_v53  ;;  %s10725_s0 = sld [smem:[#allocation3 + $0x130]] }
 0x317   : > { %v10302_v50 = vadd.f32 %v11632_v58, %v10159_v60  ;;  %v10323_v60 = vsel %vm1260_vm5, %v4451_v7, %v4452_v42  ;;  %v4524_v2 = vstv %s10264_s19  ;;  %v4511_v35 = vstv %s10266_s15  ;;  %v11636_v19 = vld [vmem:[#allocation36_spill] sm:$0xff]  ;;  %s10736_s19 = sld [smem:[#allocation3 + $0xfd]]  ;;  %s10751_s15 = sld [smem:[#allocation3 + $0x127]] }
 0x318   : > { %v10308_v23 = vpop.permute.xlu0 %3500  ;;  %v10310_v57 = vpop.permute.xlu1 %3492  ;;  %v4478_v42 = vrot.slane %v4474_v47, 3  ;;  %v4464_v7 = vrot.slane %v4460_v33, 3  ;;  %v4465_v9 = vrot.slane %v4461_v31, 3  ;;  %v4500_v59 = vmul.f32 %v10027_v36, %v4498_v53  ;;  %v11640_v53 = vld [vmem:[#allocation42_spill] sm:$0xff] }
 0x319   : > { %11634 = vst [vmem:[#allocation68_spill] sm:$0xff] %v10308_v23  ;;  %11635 = vst [vmem:[#allocation69_spill] sm:$0xff] %v10310_v57  ;;  %v10340_v58 = vadd.f32 %v11636_v19, %v10183_v48  ;;  %v4486_v57 = vmul.f32 %v9909_v51, %v4485_v26  ;;  %v4487_v47 = vmul.f32 %v10027_v36, %v4485_v26 }
 0x31a   : > { %4272 = vrot.lane.b32.xlu0 %v10085_v6, %s11312_s3  ;;  %4259 = vrot.lane.b32.xlu1 %v10108_v41, %s11312_s3  ;;  %v11637_v6 = vld [vmem:[#allocation37_spill] sm:$0xff]  ;;  %v10353_v33 = vsel %vm1260_vm5, %v4438_v46, %v4439_v34  ;;  %v4525_v31 = vmul.f32 %v9909_v51, %v4524_v2  ;;  %v4526_v48 = vmul.f32 %v10027_v36, %v4524_v2  ;;  %v4503_v46 = vrot.slane %v4499_v27, 3 }
 0x31b   : > { %v10344_v8 = vadd.f32 %v11637_v6, %v10200_v61  ;;  %v4512_v61 = vmul.f32 %v9909_v51, %v4511_v35  ;;  %v10360_v19 = vadd.f32 %v11640_v53, %v10225_v45  ;;  %v11641_v6 = vld [vmem:[#allocation39_spill] sm:$0xff]  ;;  %v4513_v34 = vmul.f32 %v10027_v36, %v4511_v35 }
 0x31c   : > { %v10346_v41 = vpop.permute.xlu0 %3516  ;;  %v10348_v22 = vpop.permute.xlu1 %3508  ;;  %v10372_v26 = vsel %vm1260_vm5, %v4477_v37, %v4478_v42  ;;  %v10375_v45 = vsel %vm1260_vm5, %v4464_v7, %v4465_v9  ;;  %v4504_v2 = vrot.slane %v4500_v59, 3  ;;  %v4550_v53 = vstv %s10298_s16  ;;  %s10760_s16 = sld [smem:[#allocation3 + $0xf4]] }
 0x31d   : > { %11638 = vst [vmem:[#allocation44_spill] sm:$0xff] %v10346_v41  ;;  %11639 = vst [vmem:[#allocation70_spill] sm:$0xff] %v10348_v22  ;;  %v10364_v22 = vadd.f32 %v11641_v6, %v10236_v1  ;;  %v4491_v41 = vrot.slane %v4487_v47, 3  ;;  %v4576_v27 = vstv %s10320_s9  ;;  %v4529_v35 = vrot.slane %v4525_v31, 3  ;;  %s10789_s9 = sld [smem:[#allocation3 + $0x163]] }
 0x31e   : > { %4298 = vrot.lane.b32.xlu0 %v10136_v32, %s11312_s3  ;;  %4285 = vrot.lane.b32.xlu1 %v10166_v15, %s11312_s3  ;;  %v4490_v32 = vrot.slane %v4486_v57, 3  ;;  %v4537_v15 = vstv %s10318_s5  ;;  %v4530_v23 = vrot.slane %v4526_v48, 3  ;;  %v4516_v37 = vrot.slane %v4512_v61, 3  ;;  %s10769_s5 = sld [smem:[#allocation3 + $0x196]] }
 0x31f   : > { %v4563_v42 = vstv %s10326_s12  ;;  %v4517_v7 = vrot.slane %v4513_v34, 3  ;;  %v4551_v57 = vmul.f32 %v9909_v51, %v4550_v53  ;;  %v4552_v9 = vmul.f32 %v10027_v36, %v4550_v53  ;;  %s10820_s12 = sld [smem:[#allocation3 + $0x15a]] }
 0x320   : > { %v10378_v1 = vpop.permute.xlu0 %3532  ;;  %v10380_v6 = vpop.permute.xlu1 %3524  ;;  %v4602_v59 = vstv %s10335_s30  ;;  %v4538_v47 = vmul.f32 %v9909_v51, %v4537_v15  ;;  %v4539_v31 = vmul.f32 %v10027_v36, %v4537_v15  ;;  %v4577_v48 = vmul.f32 %v9909_v51, %v4576_v27  ;;  %s10832_s30 = sld [smem:[#allocation3 + $0x65]] }
 0x321   : > { %11642 = vst [vmem:[#allocation36_spill] sm:$0xff] %v10378_v1  ;;  %11643 = vst [vmem:[#allocation37_spill] sm:$0xff] %v10380_v6  ;;  %v4578_v61 = vmul.f32 %v10027_v36, %v4576_v27  ;;  %v10410_v34 = vsel %vm1260_vm5, %v4490_v32, %v4491_v41  ;;  %v4564_v53 = vmul.f32 %v9909_v51, %v4563_v42  ;;  %v11647_v1 = vld [vmem:[#allocation47_spill] sm:$0xff]  ;;  %v4556_v41 = vrot.slane %v4552_v9, 3 }
 0x322   : > { %4324 = vrot.lane.b32.xlu0 %v10190_v39, %s11312_s3  ;;  %4311 = vrot.lane.b32.xlu1 %v10193_v38, %s11312_s3  ;;  %v10407_v38 = vsel %vm1260_vm5, %v4503_v46, %v4504_v2  ;;  %11646 = vst [vmem:[#allocation72_spill] sm:$0xff] %v10410_v34  ;;  %v4565_v15 = vmul.f32 %v10027_v36, %v4563_v42  ;;  %v4543_v32 = vrot.slane %v4539_v31, 3  ;;  %v4581_v42 = vrot.slane %v4577_v48, 3  ;;  %v11650_v48 = vld [vmem:[#allocation48_spill] sm:$0xff] }
 0x323   : > { %v10418_v27 = vadd.f32 %v9651_v55, %v10257_v40  ;;  %v4603_v46 = vmul.f32 %v9909_v51, %v4602_v59  ;;  %v4604_v2 = vmul.f32 %v10027_v36, %v4602_v59  ;;  %v10433_v55 = vsel %vm1260_vm5, %v4529_v35, %v4530_v23 }
 0x324   : > { %v10402_v39 = vpop.permute.xlu0 %3548  ;;  %v10404_v6 = vpop.permute.xlu1 %3540  ;;  %v10436_v40 = vsel %vm1260_vm5, %v4516_v37, %v4517_v7  ;;  %v4582_v59 = vrot.slane %v4578_v61, 3  ;;  %v4568_v23 = vrot.slane %v4564_v53, 3  ;;  %v4569_v35 = vrot.slane %v4565_v15, 3  ;;  %v11649_v7 = vld [vmem:[#allocation49_spill] sm:$0xff]  ;;  %v11651_v61 = vld [vmem:[#allocation40_spill] sm:$0xff] }
 0x325   : > { %11644 = vst [vmem:[#allocation42_spill] sm:$0xff] %v10402_v39  ;;  %11645 = vst [vmem:[#allocation39_spill] sm:$0xff] %v10404_v6  ;;  %v10422_v39 = vadd.f32 %v11647_v1, %v10270_v28  ;;  %v4555_v28 = vrot.slane %v4551_v57, 3  ;;  %v4542_v1 = vrot.slane %v4538_v47, 3  ;;  %v4589_v37 = vstv %s10384_s11  ;;  %s10844_s11 = sld [smem:[#allocation3 + $0x32]] }
 0x326   : > { %4350 = vrot.lane.b32.xlu0 %v10212_v43, %s11375_s20  ;;  %4337 = vrot.lane.b32.xlu1 %v10218_v0, %s11375_s20  ;;  %v11648_v43 = vld [vmem:[#allocation45_spill] sm:$0xff]  ;;  %v2934_v57 = vadd.f32 %v11649_v7, %v10306_v29  ;;  %v4607_v9 = vrot.slane %v4603_v46, 3  ;;  %v4608_v47 = vrot.slane %v4604_v2, 3  ;;  %v4628_v31 = vstv %s10387_s24  ;;  %s10855_s24 = sld [smem:[#allocation3 + $0xcb]] }
 0x327   : > { %v2947_v6 = vadd.f32 %v11648_v43, %v10302_v50  ;;  %v2973_v50 = vadd.f32 %v11650_v48, %v10340_v58  ;;  %v2960_v43 = vadd.f32 %v11651_v61, %v10344_v8  ;;  %v10461_v29 = vsel %vm1260_vm5, %v4555_v28, %v4556_v41 }
 0x328   : > { %v10442_v34 = vpop.permute.xlu0 %3564  ;;  %v10444_v0 = vpop.permute.xlu1 %3556  ;;  %v10464_v53 = vsel %vm1260_vm5, %v4542_v1, %v4543_v32  ;;  %v10467_v15 = vsel %vm1260_vm5, %v4581_v42, %v4582_v59  ;;  %v4590_v58 = vmul.f32 %v9909_v51, %v4589_v37  ;;  %v4615_v46 = vstv %s10400_s6  ;;  %s10857_s6 = sld [smem:[#allocation3 + $0x98]] }
 0x329   : > { %v4629_v28 = vmul.f32 %v9909_v51, %v4628_v31  ;;  %v4654_v41 = vstv %s10414_s7  ;;  %v2999_v1 = vadd.f32 %v9756_v24, %v10360_v19  ;;  %v10484_v32 = vsel %vm1260_vm5, %v4607_v9, %v4608_v47  ;;  %s10891_s7 = sld [smem:[#allocation3 + $0xfe]] }
 0x32a   : > { %4376 = vrot.lane.b32.xlu0 %v10246_v54, %s11375_s20  ;;  %4363 = vrot.lane.b32.xlu1 %v10273_v17, %s11375_s20  ;;  %v10476_v54 = vsel %vm1260_vm5, %v4568_v23, %v4569_v35  ;;  %v4591_v17 = vmul.f32 %v10027_v36, %v4589_v37  ;;  %11652 = vst [vmem:[#allocation47_spill] sm:$0xff] %v10484_v32  ;;  %v4641_v59 = vstv %s10426_s22  ;;  %v4594_v19 = vrot.slane %v4590_v58, 3  ;;  %s10911_s22 = sld [smem:[#allocation3 + $0x197]] }
 0x32b   : > { %v4630_v42 = vmul.f32 %v10027_v36, %v4628_v31  ;;  %v2986_v7 = vadd.f32 %v9758_v30, %v10364_v22  ;;  %v4616_v23 = vmul.f32 %v9909_v51, %v4615_v46  ;;  %v4617_v24 = vmul.f32 %v10027_v36, %v4615_v46 }
 0x32c   : > { %v10471_v8 = vpop.permute.xlu0 %3580  ;;  %v10473_v2 = vpop.permute.xlu1 %3572  ;;  %v4655_v35 = vmul.f32 %v9909_v51, %v4654_v41  ;;  %v4656_v37 = vmul.f32 %v10027_v36, %v4654_v41  ;;  %v4680_v9 = vstv %s10438_s23  ;;  %v4595_v22 = vrot.slane %v4591_v17, 3  ;;  %s10918_s23 = sld [smem:[#allocation3 + $0x164]] }
 0x32d   : > { %v4642_v31 = vmul.f32 %v9909_v51, %v4641_v59  ;;  %v3051_v48 = vadd.f32 %v9827_v49, %v2947_v6  ;;  %v3038_v61 = vadd.f32 %v9829_v25, %v2934_v57  ;;  %v4634_v58 = vrot.slane %v4630_v42, 3 }
 0x32e   : > { %4402 = vrot.lane.b32.xlu0 %v10288_v11, %s11375_s20  ;;  %4389 = vrot.lane.b32.xlu1 %v10291_v3, %s11375_s20  ;;  %v4633_v11 = vrot.slane %v4629_v28, 3  ;;  %v4643_v3 = vmul.f32 %v10027_v36, %v4641_v59  ;;  %v4667_v46 = vstv %s10450_s4  ;;  %v4620_v41 = vrot.slane %v4616_v23, 3  ;;  %s5618_s4 = sld [smem:[#allocation3 + $0xc9]] }
 0x32f   : > { %v4621_v32 = vrot.slane %v4617_v24, 3  ;;  %v4681_v17 = vmul.f32 %v9909_v51, %v4680_v9  ;;  %v4682_v28 = vmul.f32 %v10027_v36, %v4680_v9  ;;  %v3155_v49 = vadd.f32 %v9964_v5, %v3051_v48  ;;  %v11654_v9 = vld [vmem:[#allocation55_spill] sm:$0xff] }
 0x330   : > { %v10499_v47 = vpop.permute.xlu0 %3596  ;;  %v10501_v30 = vpop.permute.xlu1 %3588  ;;  %v3142_v25 = vadd.f32 %v9966_v10, %v3038_v61  ;;  %v4659_v6 = vrot.slane %v4655_v35, 3  ;;  %v4660_v57 = vrot.slane %v4656_v37, 3  ;;  %v4646_v59 = vrot.slane %v4642_v31, 3  ;;  %v11655_v37 = vld [vmem:[#allocation60_spill] sm:$0xff]  ;;  %v11656_v31 = vld [vmem:[#allocation51_spill] sm:$0xff] }
 0x331   : > { %11653 = vst [vmem:[#allocation45_spill] sm:$0xff] %v10501_v30  ;;  %v4647_v23 = vrot.slane %v4643_v3, 3  ;;  %v4668_v24 = vmul.f32 %v9909_v51, %v4667_v46  ;;  %v3025_v30 = vadd.f32 %v11654_v9, %v10418_v27  ;;  %v3077_v5 = vadd.f32 %v9854_v63, %v2973_v50  ;;  %v11657_v50 = vld [vmem:[#allocation61_spill] sm:$0xff] }
 0x332   : > { %4428 = vrot.lane.b32.xlu0 %v10313_v16, %s11375_s20  ;;  %4415 = vrot.lane.b32.xlu1 %v10316_v20, %s11375_s20  ;;  %v10525_v20 = vsel %vm1260_vm5, %v4594_v19, %v4595_v22  ;;  %v3064_v10 = vadd.f32 %v9856_v12, %v2960_v43  ;;  %v10533_v35 = vsel %vm1260_vm5, %v4633_v11, %v4634_v58  ;;  %v4685_v19 = vrot.slane %v4681_v17, 3  ;;  %v11658_v11 = vld [vmem:[#allocation52_spill] sm:$0xff]  ;;  %v11659_v3 = vld [vmem:[#allocation57_spill] sm:$0xff] }
 0x333   : > { %v3012_v48 = vadd.f32 %v11655_v37, %v10422_v39  ;;  %v4686_v22 = vrot.slane %v4682_v28, 3  ;;  %v4669_v27 = vmul.f32 %v10027_v36, %v4667_v46  ;;  %v3243_v63 = vadd.f32 %v11656_v31, %v3155_v49  ;;  %v11660_v28 = vld [vmem:[#allocation43_spill] sm:$0xff] }
 0x334   : > { %v10520_v16 = vpop.permute.xlu0 %3612  ;;  %v10522_v42 = vpop.permute.xlu1 %3604  ;;  %v3232_v12 = vadd.f32 %v11657_v50, %v3142_v25  ;;  %v10545_v43 = vsel %vm1260_vm5, %v4620_v41, %v4621_v32  ;;  %v10548_v39 = vsel %vm1260_vm5, %v4659_v6, %v4660_v57  ;;  %v10557_v46 = vsel %vm1260_vm5, %v4646_v59, %v4647_v23  ;;  %v11661_v41 = vld [vmem:[#allocation53_spill] sm:$0xff]  ;;  %v11667_v50 = vld [vmem:[#allocation72_spill] sm:$0xff] }
 0x335   : > { %v4672_v17 = vrot.slane %v4668_v24, 3  ;;  %v3177_v32 = vadd.f32 %v11660_v28, %v3077_v5  ;;  %v3166_v49 = vadd.f32 %v11661_v41, %v3064_v10  ;;  %v3347_v25 = vadd.f32 %v10131_v44, %v3243_v63  ;;  %v11663_v5 = vld [vmem:[#allocation62_spill] sm:$0xff]  ;;  %v11671_v28 = vld [vmem:[#allocation59_spill] sm:$0xff]  ;;  %v11672_v41 = vld [vmem:[#allocation41_spill] sm:$0xff] }
 0x336   : > { %4454 = vrot.lane.b32.xlu0 %v10323_v60, %s11398_s17  ;;  %4441 = vrot.lane.b32.xlu1 %v10353_v33, %s11398_s17  ;;  %v3103_v60 = vadd.f32 %v11658_v11, %v2999_v1  ;;  %v3090_v33 = vadd.f32 %v11659_v3, %v2986_v7  ;;  %v3334_v6 = vadd.f32 %v10133_v18, %v3232_v12  ;;  %v4673_v7 = vrot.slane %v4669_v27, 3  ;;  %v11664_v10 = vld [vmem:[#allocation50_spill] sm:$0xff]  ;;  %v11669_v11 = vld [vmem:[#allocation65_spill] sm:$0xff] }
 0x337   : > { %v10568_v1 = vsel %vm1260_vm5, %v4685_v19, %v4686_v22  ;;  %v4706_v57 = vstv %s10514_s25  ;;  %v4693_v59 = vstv %s10516_s29  ;;  %v3269_v23 = vadd.f32 %v10010_v13, %v3177_v32  ;;  %v11665_v19 = vld [vmem:[#allocation56_spill] sm:$0xff]  ;;  %s5617_s25 = sld [smem:[#allocation3 + $0x96]]  ;;  %s5620_s29 = sld [smem:[#allocation3 + $0x12f]] }
 0x338   : > { %v10552_v61 = vpop.permute.xlu0 %3638  ;;  %v10554_v58 = vpop.permute.xlu1 %3625  ;;  %v3256_v44 = vadd.f32 %v10012_v21, %v3166_v49  ;;  %v3451_v18 = vadd.f32 %v10276_v14, %v3347_v25  ;;  %v3438_v24 = vadd.f32 %v10278_v4, %v3334_v6  ;;  %v3199_v37 = vadd.f32 %v11664_v10, %v3103_v60  ;;  %v11673_v49 = vld [vmem:[#allocation71_spill] sm:$0xff]  ;;  %v11678_v10 = vld [vmem:[#allocation32_spill] sm:$0xff] }
 0x339   : > { %v3188_v22 = vadd.f32 %v11665_v19, %v3090_v33  ;;  %v3373_v13 = vadd.f32 %v10168_v56, %v3269_v23  ;;  %v10589_v14 = vmul.f32 %v9909_v51, %v4706_v57  ;;  %v10592_v4 = vmul.f32 %v10027_v36, %v4706_v57  ;;  %v11670_v33 = vld [vmem:[#allocation46_spill] sm:$0xff]  ;;  %v11674_v57 = vld [vmem:[#allocation64_spill] sm:$0xff] }
 0x33a   : > { %4480 = vrot.lane.b32.xlu0 %v10372_v26, %s11398_s17  ;;  %4467 = vrot.lane.b32.xlu1 %v10375_v45, %s11398_s17  ;;  %v11662_v26 = vld [vmem:[#allocation54_spill] sm:$0xff]  ;;  %v3116_v45 = vadd.f32 %v11663_v5, %v3012_v48  ;;  %v3360_v21 = vadd.f32 %v10170_v62, %v3256_v44  ;;  %v11666_v48 = vld [vmem:[#allocation63_spill] sm:$0xff]  ;;  %v10601_v56 = vsel %vm1260_vm5, %v4672_v17, %v4673_v7 }
 0x33b   : > { %v3129_v9 = vadd.f32 %v11662_v26, %v3025_v30  ;;  %v3295_v30 = vadd.f32 %v10055_v52, %v3199_v37  ;;  %v3282_v63 = vadd.f32 %v11666_v48, %v3188_v22  ;;  %v11668_v62 = vld [vmem:[#allocation38_spill] sm:$0xff]  ;;  %v3483_v60 = vadd.f32 %v11669_v11, %v3438_v24  ;;  %v11677_v26 = vld [vmem:[#allocation39_spill] sm:$0xff]  ;;  %v11679_v37 = vld [vmem:[#allocation33_spill] sm:$0xff] }
 0x33c   : > { %v10582_v27 = vpop.permute.xlu0 %3664  ;;  %v10584_v31 = vpop.permute.xlu1 %3651  ;;  %v3487_v12 = vadd.f32 %v11668_v62, %v3451_v18  ;;  %v10608_v3 = vmul.f32 %v9909_v51, %v4693_v59  ;;  %v10611_v52 = vmul.f32 %v10027_v36, %v4693_v59  ;;  %v3210_v32 = vadd.f32 %v11671_v28, %v3116_v45  ;;  %v11675_v44 = vld [vmem:[#allocation58_spill] sm:$0xff]  ;;  %v11683_v11 = vld [vmem:[#allocation67_spill] sm:$0xff] }
 0x33d   : > { %v3399_v17 = vadd.f32 %v11672_v41, %v3295_v30  ;;  %v3386_v25 = vadd.f32 %v11673_v49, %v3282_v63  ;;  %v3463_v23 = vadd.f32 %v11674_v57, %v3373_v13  ;;  %v3459_v18 = vadd.f32 %v11675_v44, %v3360_v21  ;;  %v11676_v24 = vld [vmem:[#allocation42_spill] sm:$0xff]  ;;  %v11680_v13 = vld [vmem:[#allocation68_spill] sm:$0xff]  ;;  %v11681_v30 = vld [vmem:[#allocation69_spill] sm:$0xff] }
 0x33e   : > { %4506 = vrot.lane.b32.xlu0 %v10407_v38, %s11398_s17  ;;  %4493 = vrot.lane.b32.xlu1 %v11667_v50, %s11398_s17  ;;  %v3221_v38 = vadd.f32 %v11670_v33, %v3129_v9  ;;  %v3551_v59 = vadd.f32 %v11676_v24, %v3487_v12  ;;  %v3543_v5 = vadd.f32 %v11677_v26, %v3483_v60  ;;  %v4711_v19 = vrot.slane %v10589_v14, 3  ;;  %v11682_v62 = vld [vmem:[#allocation66_spill] sm:$0xff]  ;;  %v11685_v33 = vld [vmem:[#allocation31_spill] sm:$0xff] }
 0x33f   : > { %v3308_v45 = vadd.f32 %v11679_v37, %v3210_v32  ;;  %v4732_v22 = vstv %s10572_s18  ;;  %v3503_v21 = vadd.f32 %v11680_v13, %v3463_v23  ;;  %v3495_v48 = vadd.f32 %v11681_v30, %v3459_v18  ;;  %v11684_v60 = vld [vmem:[#allocation30_spill] sm:$0xff]  ;;  %s11013_s18 = sld [smem:[#allocation3 + $0xfc]] }
 0x340   : > { %v10617_v6 = vpop.permute.xlu0 %3690  ;;  %v10619_v7 = vpop.permute.xlu1 %3677  ;;  %v3321_v9 = vadd.f32 %v11678_v10, %v3221_v38  ;;  %v3615_v63 = vadd.f32 %v10520_v16, %v3551_v59  ;;  %v3607_v50 = vadd.f32 %v10522_v42, %v3543_v5  ;;  %v3467_v14 = vadd.f32 %v11685_v33, %v3386_v25  ;;  %v11687_v23 = vld [vmem:[#allocation70_spill] sm:$0xff] }
 0x341   : > { %v3567_v32 = vadd.f32 %v10442_v34, %v3503_v21  ;;  %v3559_v41 = vadd.f32 %v10444_v0, %v3495_v48  ;;  %v4733_v49 = vmul.f32 %v9909_v51, %v4732_v22  ;;  %v4734_v25 = vmul.f32 %v10027_v36, %v4732_v22  ;;  %v11686_v34 = vld [vmem:[#allocation44_spill] sm:$0xff]  ;;  %v11691_v21 = vld [vmem:[#allocation37_spill] sm:$0xff] }
 0x342   : > { %4532 = vrot.lane.b32.xlu0 %v10433_v55, %s11398_s17  ;;  %4519 = vrot.lane.b32.xlu1 %v10436_v40, %s11398_s17  ;;  %v3425_v12 = vadd.f32 %v11682_v62, %v3321_v9  ;;  %v3412_v55 = vadd.f32 %v11683_v11, %v3308_v45  ;;  %v3471_v40 = vadd.f32 %v11684_v60, %v3399_v17  ;;  %s10643_s17 = sld [smem:[#allocation3 + $0x31]]  ;;  %v4712_v17 = vrot.slane %v10592_v4, 3  ;;  %v11689_v4 = vld [vmem:[#allocation35_spill] sm:$0xff]  ;;  %v11690_v22 = vld [vmem:[#allocation36_spill] sm:$0xff]  ;;  %v11692_v60 = vld [vmem:[#allocation45_spill] sm:$0xff] }
 0x343   : > { %v4719_v57 = vstv %s10603_s1  ;;  %v3511_v44 = vadd.f32 %v11687_v23, %v3467_v14  ;;  %v3641_v18 = vadd.f32 %v10552_v61, %v3567_v32  ;;  %v4698_v5 = vrot.slane %v10608_v3, 3  ;;  %v10686_v45 = vld [vmem:[%s11376_s21 + $0x30] sm:$0xff]  ;;  %s11021_s1 = sld [smem:[#allocation3 + $0x195]] }
 0x344   : > { %v3717_v38 = vpop.permute.xlu0 %3716  ;;  %v3704_v28 = vpop.permute.xlu1 %3703  ;;  %v3519_v0 = vadd.f32 %v11686_v34, %v3471_v40  ;;  %v3475_v51 = vadd.f32 %v11689_v4, %v3412_v55  ;;  %v4699_v10 = vrot.slane %v10611_v52, 3  ;;  %v4737_v3 = vrot.slane %v4733_v49, 3 }
 0x345   : > { %v10647_v16 = vadd.f32 %v3717_v38, %v3615_v63  ;;  %v10649_v42 = vadd.f32 %v3704_v28, %v3607_v50  ;;  %v4738_v52 = vrot.slane %v4734_v25, 3  ;;  %v3940_v38 = vstv %s10659_s14  ;;  %s11057_s14 = sld [smem:[#allocation6]] }
 0x346   : > { %4558 = vrot.lane.b32.xlu0 %v10461_v29, %s11298_s10  ;;  %4545 = vrot.lane.b32.xlu1 %v10464_v53, %s11298_s10  ;;  %v3628_v29 = vadd.f32 %v10554_v58, %v3559_v41  ;;  %v11688_v53 = vld [vmem:[#allocation34_spill] sm:$0xff]  ;;  %v3583_v61 = vadd.f32 %v10471_v8, %v3519_v0  ;;  %v3575_v58 = vadd.f32 %v10473_v2, %v3511_v44  ;;  %v4846_v2 = vstv %s10633_s8  ;;  %s11023_s8 = sld [smem:[#allocation3 + $0x162]] }
 0x347   : > { %v3479_v24 = vadd.f32 %v11688_v53, %v3425_v12  ;;  %v4720_v8 = vmul.f32 %v10686_v45, %v4719_v57  ;;  %v3527_v30 = vadd.f32 %v11691_v21, %v3475_v51  ;;  %v10698_v62 = vsel %vm1260_vm5, %v4698_v5, %v4699_v10 }
 0x348   : > { %v3743_v59 = vpop.permute.xlu0 %3742  ;;  %v3730_v26 = vpop.permute.xlu1 %3729  ;;  %v3667_v48 = vadd.f32 %v10582_v27, %v3583_v61  ;;  %v3654_v63 = vadd.f32 %v10584_v31, %v3575_v58  ;;  %v4721_v12 = vmul.f32 %v10027_v36, %v4719_v57  ;;  %v4833_v11 = vstv %s10643_s17  ;;  %s11055_s17 = sld [smem:[#allocation6 + $0x1]] }
 0x349   : > { %v10675_v9 = vadd.f32 %v3743_v59, %v3641_v18  ;;  %v10677_v37 = vadd.f32 %v3730_v26, %v3628_v29  ;;  %v3535_v13 = vadd.f32 %v11690_v22, %v3479_v24  ;;  %v3591_v40 = vadd.f32 %v11692_v60, %v3527_v30 }
 0x34a   : > { %4584 = vrot.lane.b32.xlu0 %v10467_v15, %s11298_s10  ;;  %4571 = vrot.lane.b32.xlu1 %v10476_v54, %s11298_s10  ;;  %v10695_v54 = vsel %vm1260_vm5, %v4711_v19, %v4712_v17  ;;  %v11693_v19 = vld [vmem:[#allocation47_spill] sm:$0xff]  ;;  %v10715_v33 = vsel %vm1260_vm5, %v4737_v3, %v4738_v52  ;;  %v4724_v14 = vrot.slane %v4720_v8, 3  ;;  %v4848_v41 = vmul.f32 %v10027_v36, %v4846_v2 }
 0x34b   : > { %v3599_v55 = vadd.f32 %v10499_v47, %v3535_v13  ;;  %v4847_v47 = vmul.f32 %v10686_v45, %v4846_v2  ;;  %v3680_v32 = vadd.f32 %v10619_v7, %v3591_v40  ;;  %v3929_v17 = vstv %s10665_s2  ;;  %s11694_s2 = sld [smem:[#allocation13_spill]] }
 0x34c   : > { %v3769_v15 = vpop.permute.xlu0 %3768  ;;  %v3756_v50 = vpop.permute.xlu1 %3755  ;;  %v4725_v25 = vrot.slane %v4721_v12, 3  ;;  %v4834_v57 = vmul.f32 %v10686_v45, %v4833_v11  ;;  %v4835_v34 = vmul.f32 %v10027_v36, %v4833_v11  ;;  %v4872_v0 = vstv %s10671_s26  ;;  %s11077_s26 = sld [smem:[#allocation6 + $0x3]] }
 0x34d   : > { %v10704_v27 = vadd.f32 %v3769_v15, %v3667_v48  ;;  %v10706_v31 = vadd.f32 %v3756_v50, %v3654_v63  ;;  %v3693_v28 = vadd.f32 %v10617_v6, %v3599_v55  ;;  %v3941_v7 = vmul.f32 %v10686_v45, %v3940_v38  ;;  %v10785_v55 = vld [vmem:[%s11376_s21 + $0x38] sm:$0xff]  ;;  %s10808_s21 = sld [smem:[#allocation3 + $0x18d]] }
 0x34e   : > { %4610 = vrot.lane.b32.xlu0 %v11693_v19, %s11298_s10  ;;  %4597 = vrot.lane.b32.xlu1 %v10525_v20, %s11298_s10  ;;  %v4859_v44 = vstv %s10679_s13  ;;  %v3942_v18 = vmul.f32 %v10027_v36, %v3940_v38  ;;  %v3930_v29 = vmul.f32 %v10686_v45, %v3929_v17  ;;  %v3931_v53 = vmul.f32 %v10027_v36, %v3929_v17  ;;  %s11079_s13 = sld [smem:[#allocation6 + $0x2]] }
 0x34f   : > { %v4851_v24 = vrot.slane %v4847_v47, 4  ;;  %v4852_v4 = vrot.slane %v4848_v41, 4  ;;  %v4873_v51 = vmul.f32 %v10686_v45, %v4872_v0  ;;  %v4874_v59 = vmul.f32 %v10027_v36, %v4872_v0 }
 0x350   : > { %v3795_v20 = vpop.permute.xlu0 %3794  ;;  %v3782_v49 = vpop.permute.xlu1 %3781  ;;  %v4838_v10 = vrot.slane %v4834_v57, 4  ;;  %v4860_v61 = vmul.f32 %v10686_v45, %v4859_v44  ;;  %v3945_v52 = vrot.slane %v3941_v7, 2  ;;  %v3962_v8 = vstv %s10708_s27 }
 0x351   : > { %v10730_v23 = vadd.f32 %v3795_v20, %v3693_v28  ;;  %v10732_v6 = vadd.f32 %v3782_v49, %v3680_v32  ;;  %v3946_v2 = vrot.slane %v3942_v18, 2  ;;  %v3934_v22 = vrot.slane %v3930_v29, 2  ;;  %s202_s27 = sand.u32 1, %s11694_s2  }
 0x352   : > { %4636 = vrot.lane.b32.xlu0 %v10533_v35, %s11298_s10  ;;  %4623 = vrot.lane.b32.xlu1 %v10545_v43, %s11298_s10  ;;  %v10748_v35 = vsel %vm1260_vm5, %v4724_v14, %v4725_v25  ;;  %v4839_v43 = vrot.slane %v4835_v34, 4  ;;  %v3935_v13 = vrot.slane %v3931_v53, 2  ;;  %v4877_v21 = vrot.slane %v4873_v51, 4 }
 0x353   : > { %v3951_v30 = vstv %s10723_s28  ;;  %v4898_v48 = vstv %s10725_s0  ;;  %v4864_v50 = vrot.slane %v4860_v61, 4  ;;  %v3963_v12 = vmul.f32 %v10686_v45, %v3962_v8  ;;  %s11105_s28 = sshll.u32 %s202_s27, 6  ;;  %s11114_s0 = sld [smem:[#allocation6 + $0x5]] }
 0x354   : > { %v3821_v26 = vpop.permute.xlu0 %3820  ;;  %v3808_v5 = vpop.permute.xlu1 %3807  ;;  %v3964_v60 = vmul.f32 %v10785_v55, %v3962_v8  ;;  %v4885_v40 = vstv %s10736_s19  ;;  %v4899_v14 = vmul.f32 %v10686_v45, %v4898_v48  ;;  %v10799_v47 = vsel %vm755_vm4, %v3945_v52, %v3946_v2  ;;  %s11116_s19 = sld [smem:[#allocation6 + $0x4]] }
 0x355   : > { %v10754_v58 = vadd.f32 %v3821_v26, %v10647_v16  ;;  %v10757_v3 = vadd.f32 %v3808_v5, %v10649_v42  ;;  %v4861_v16 = vmul.f32 %v10027_v36, %v4859_v44  ;;  %v4878_v42 = vrot.slane %v4874_v59, 4 }
 0x356   : > { %4662 = vrot.lane.b32.xlu0 %v10548_v39, %s11312_s3  ;;  %4649 = vrot.lane.b32.xlu1 %v10557_v46, %s11312_s3  ;;  %v10772_v39 = vsel %vm1573_vm6, %v4851_v24, %v4852_v4  ;;  %v10775_v46 = vsel %vm1573_vm6, %v4838_v10, %v4839_v43  ;;  %v10802_v38 = vsel %vm755_vm4, %v3934_v22, %v3935_v13  ;;  %v3967_v41 = vrot.slane %v3963_v12, 2 }
 0x357   : > { %v4865_v19 = vrot.slane %v4861_v16, 4  ;;  %v4900_v28 = vmul.f32 %v10785_v55, %v4898_v48  ;;  %v4886_v17 = vmul.f32 %v10686_v45, %v4885_v40  ;;  %v4887_v20 = vmul.f32 %v10785_v55, %v4885_v40 }
 0x358   : > { %v3847_v63 = vpop.permute.xlu0 %3846  ;;  %v3834_v15 = vpop.permute.xlu1 %3833  ;;  %v3984_v49 = vstv %s10751_s15  ;;  %v3968_v34 = vrot.slane %v3964_v60, 2  ;;  %v3973_v0 = vstv %s10760_s16  ;;  %v4924_v24 = vstv %s10769_s5  ;;  %s11126_s15 = sld [smem:[#allocation6 + $0x7]]  ;;  %s11128_s16 = sld [smem:[#allocation6 + $0x6]] }
 0x359   : > { %v10779_v36 = vadd.f32 %v3847_v63, %v10675_v9  ;;  %v10782_v11 = vadd.f32 %v3834_v15, %v10677_v37  ;;  %v3952_v9 = vmul.f32 %v10686_v45, %v3951_v30  ;;  %v3953_v37 = vmul.f32 %v10785_v55, %v3951_v30  ;;  %s11695_s5 = sld [smem:[#allocation16_spill]] }
 0x35a   : > { %4688 = vrot.lane.b32.xlu0 %v10568_v1, %s11312_s3  ;;  %4675 = vrot.lane.b32.xlu1 %v10601_v56, %s11312_s3  ;;  %v10805_v1 = vsel %vm1573_vm6, %v4877_v21, %v4878_v42  ;;  %v10827_v7 = vsel %vm1573_vm6, %v4864_v50, %v4865_v19  ;;  %v4904_v29 = vrot.slane %v4900_v28, 4  ;;  %v3986_v53 = vmul.f32 %v10785_v55, %v3984_v49 }
 0x35b   : > { %v3956_v44 = vrot.slane %v3952_v9, 2  ;;  %v3957_v18 = vrot.slane %v3953_v37, 2  ;;  %v4890_v51 = vrot.slane %v4886_v17, 4  ;;  %v4891_v59 = vrot.slane %v4887_v20, 4 }
 0x35c   : > { %v3873_v56 = vpop.permute.xlu0 %3872  ;;  %v3860_v32 = vpop.permute.xlu1 %3859  ;;  %v3975_v26 = vmul.f32 %v10785_v55, %v3973_v0  ;;  %v3969_v43 = vsel %vm755_vm4, %v3967_v41, %v3968_v34  ;;  %v4911_v61 = vstv %s10789_s9  ;;  %v4925_v8 = vmul.f32 %v10686_v45, %v4924_v24  ;;  %s11135_s9 = scalar_lea.vmem [#allocation8], %s11105_s28 }
 0x35d   : > { %v10814_v25 = vadd.f32 %v3873_v56, %v10704_v27  ;;  %v10817_v57 = vadd.f32 %v3860_v32, %v10706_v31  ;;  %v4903_v27 = vrot.slane %v4899_v14, 4  ;;  %v3985_v31 = vmul.f32 %v10686_v45, %v3984_v49 }
 0x35e   : > { %4714 = vrot.lane.b32.xlu0 %v10695_v54, %s11312_s3  ;;  %4701 = vrot.lane.b32.xlu1 %v10698_v62, %s11312_s3  ;;  %v3974_v62 = vmul.f32 %v10686_v45, %v3973_v0  ;;  %v3958_v52 = vsel %vm755_vm4, %v3956_v44, %v3957_v18  ;;  %v3990_v22 = vrot.slane %v3986_v53, 2  ;;  %v4006_v13 = vstv %s10808_s21  ;;  %s11696_s21 = sld [smem:[#allocation15_spill]] }
 0x35f   : > { %v3989_v2 = vrot.slane %v3985_v31, 2  ;;  %v3979_v42 = vrot.slane %v3975_v26, 2  ;;  %v4912_v30 = vmul.f32 %v10686_v45, %v4911_v61  ;;  %v4913_v15 = vmul.f32 %v10785_v55, %v4911_v61 }
 0x360   : > { %v3899_v4 = vpop.permute.xlu0 %3898  ;;  %v3886_v54 = vpop.permute.xlu1 %3885  ;;  %v3978_v21 = vrot.slane %v3974_v62, 2  ;;  %v3995_v50 = vstv %s10820_s12  ;;  %v4929_v12 = vrot.slane %v4925_v8, 4  ;;  %v4007_v40 = vmul.f32 %v10686_v45, %v4006_v13  ;;  %s5654_s12 = sshll.u32 %s11695_s5, 4 }
 0x361   : > { %v10837_v5 = vadd.f32 %v3899_v4, %v10730_v23  ;;  %v10840_v10 = vadd.f32 %v3886_v54, %v10732_v6  ;;  %v4926_v23 = vmul.f32 %v10785_v55, %v4924_v24  ;;  %v4905_v6 = vsel %vm1573_vm6, %v4903_v27, %v4904_v29 }
 0x362   : > { %4740 = vrot.lane.b32.xlu0 %v10715_v33, %s11312_s3  ;;  %4727 = vrot.lane.b32.xlu1 %v10748_v35, %s11312_s3  ;;  %v4892_v35 = vsel %vm1573_vm6, %v4890_v51, %v4891_v59  ;;  %v3938_v19 = vadd.f32 %v10802_v38, %v10782_v11  ;;  %v3991_v9 = vsel %vm755_vm4, %v3989_v2, %v3990_v22  ;;  %v4950_v37 = vstv %s10832_s30  ;;  %s10881_s3 = sld [smem:[#allocation3 + $0x131]] }
 0x363   : > { %v4930_v60 = vrot.slane %v4926_v23, 4  ;;  %v3980_v14 = vsel %vm755_vm4, %v3978_v21, %v3979_v42  ;;  %v4916_v28 = vrot.slane %v4912_v30, 4  ;;  %v3996_v56 = vmul.f32 %v10686_v45, %v3995_v50 }
 0x364   : > { %v3925_v33 = vpop.permute.xlu0 %3924  ;;  %v3912_v16 = vpop.permute.xlu1 %3911  ;;  %v3997_v32 = vmul.f32 %v10785_v55, %v3995_v50  ;;  %v4917_v11 = vrot.slane %v4913_v15, 4  ;;  %v4937_v38 = vstv %s10844_s11  ;;  %v4011_v17 = vrot.slane %v4007_v40, 2  ;;  %s5100_s30 = sadd.s32 %s11696_s21, %s5654_s12  ;;  %s5103_s11 = sshll.u32 %s11135_s9, 4  ;;  %s11154_s11 = int_to_ptr.vmem [resolvable:$true] %s5103_s11 }
 0x365   : > { %v10862_v48 = vadd.f32 %v3925_v33, %v10754_v58  ;;  %v10865_v63 = vadd.f32 %v3912_v16, %v10757_v3  ;;  %v4008_v58 = vmul.f32 %v10785_v55, %v4006_v13  ;;  %v3949_v3 = vadd.f32 %v10799_v47, %v10779_v36 }
 0x366   : > { %4854 = vrot.lane.b32.xlu0 %v10772_v39, %s11298_s10  ;;  %4841 = vrot.lane.b32.xlu1 %v10775_v46, %s11298_s10  ;;  %v4931_v41 = vsel %vm1573_vm6, %v4929_v12, %v4930_v60  ;;  %v4951_v49 = vmul.f32 %v10686_v45, %v4950_v37  ;;  %v3971_v34 = vadd.f32 %v3969_v43, %v10814_v25  ;;  %v4976_v44 = vstv %s10855_s24  ;;  %s11697_s24 = sld [smem:[#allocation21_spill]] }
 0x367   : > { %v4012_v20 = vrot.slane %v4008_v58, 2  ;;  %v3960_v0 = vadd.f32 %v3958_v52, %v10817_v57  ;;  %v4963_v18 = vstv %s10857_s6  ;;  %v4000_v31 = vrot.slane %v3996_v56, 2  ;;  %s5655_s6 = sshll.u32 %s5100_s30, 7 }
 0x368   : > { %v4039_v39 = vpop.permute.xlu0 %4038  ;;  %v4026_v46 = vpop.permute.xlu1 %4025  ;;  %v4001_v53 = vrot.slane %v3997_v32, 2  ;;  %v4918_v54 = vsel %vm1573_vm6, %v4916_v28, %v4917_v11  ;;  %v4939_v25 = vmul.f32 %v10785_v55, %v4937_v38  ;;  %v4955_v57 = vrot.slane %v4951_v49, 4 }
 0x369   : > { %v10886_v36 = vadd.f32 %v4039_v39, %v3949_v3  ;;  %v10888_v47 = vadd.f32 %v4026_v46, %v3938_v19  ;;  %v4977_v51 = vmul.f32 %v10686_v45, %v4976_v44  ;;  %v4978_v59 = vmul.f32 %v10785_v55, %v4976_v44 }
 0x36a   : > { %4880 = vrot.lane.b32.xlu0 %v10805_v1, %s11298_s10  ;;  %4867 = vrot.lane.b32.xlu1 %v10827_v7, %s11298_s10  ;;  %v4952_v1 = vmul.f32 %v10785_v55, %v4950_v37  ;;  %v4938_v7 = vmul.f32 %v10686_v45, %v4937_v38  ;;  %v4964_v62 = vmul.f32 %v10686_v45, %v4963_v18  ;;  %v5002_v52 = vstv %s10881_s3 }
 0x36b   : > { %v3993_v26 = vadd.f32 %v3991_v9, %v10837_v5  ;;  %v3982_v43 = vadd.f32 %v3980_v14, %v10840_v10  ;;  %v4965_v61 = vmul.f32 %v10785_v55, %v4963_v18  ;;  %v4002_v2 = vsel %vm755_vm4, %v4000_v31, %v4001_v53 }
 0x36c   : > { %v4065_v27 = vpop.permute.xlu0 %4064  ;;  %v4052_v29 = vpop.permute.xlu1 %4051  ;;  %v4956_v22 = vrot.slane %v4952_v1, 4  ;;  %v4942_v13 = vrot.slane %v4938_v7, 4  ;;  %v4989_v21 = vstv %s10891_s7  ;;  %v4981_v5 = vrot.slane %v4977_v51, 4  ;;  %p11699_p10 = scmp.ne.s32.totalorder %s11697_s24, 0 }
 0x36d   : > { %v10905_v24 = vadd.f32 %v4065_v27, %v3971_v34  ;;  %v10907_v4 = vadd.f32 %v4052_v29, %v3960_v0  ;;  %v4982_v10 = vrot.slane %v4978_v59, 4  ;;  %v4968_v42 = vrot.slane %v4964_v62, 4 }
 0x36e   : > { %4906 = vrot.lane.b32.xlu0 %v4905_v6, %s11298_s10  ;;  %4893 = vrot.lane.b32.xlu1 %v4892_v35, %s11298_s10  ;;  %v4013_v6 = vsel %vm755_vm4, %v4011_v17, %v4012_v20  ;;  %v4943_v35 = vrot.slane %v4939_v25, 4  ;;  %v5003_v30 = vmul.f32 %v10686_v45, %v5002_v52  ;;  %v4004_v50 = vadd.f32 %v4002_v2, %v10865_v63 }
 0x36f   : > { %v4015_v15 = vadd.f32 %v4013_v6, %v10862_v48  ;;  %v4969_v12 = vrot.slane %v4965_v61, 4  ;;  %v5004_v60 = vmul.f32 %v10785_v55, %v5002_v52  ;;  %v4957_v3 = vsel %vm1573_vm6, %v4955_v57, %v4956_v22 }
 0x370   : > { %v4091_v8 = vpop.permute.xlu0 %4090  ;;  %v4078_v23 = vpop.permute.xlu1 %4077  ;;  %v4990_v19 = vmul.f32 %v10686_v45, %v4989_v21  ;;  %v4991_v9 = vmul.f32 %v10785_v55, %v4989_v21  ;;  %v4944_v46 = vsel %vm1573_vm6, %v4942_v13, %v4943_v35  ;;  %v5028_v14 = vstv %s10911_s22  ;;  %s11698_s22 = sld [smem:[#allocation76_spill]] }
 0x371   : > { %v4093_v33 = vadd.f32 %v4091_v8, %v3993_v26  ;;  %v4080_v16 = vadd.f32 %v4078_v23, %v3982_v43  ;;  %v5015_v48 = vstv %s10918_s23  ;;  %v4983_v63 = vsel %vm1573_vm6, %v4981_v5, %v4982_v10 }
 0x372   : > { %4932 = vrot.lane.b32.xlu0 %v4931_v41, %s11298_s10  ;;  %4919 = vrot.lane.b32.xlu1 %v4918_v54, %s11298_s10  ;;  %v4970_v28 = vsel %vm1573_vm6, %v4968_v42, %v4969_v12  ;;  %v5007_v56 = vrot.slane %v5003_v30, 4  ;;  %v5008_v32 = vrot.slane %v5004_v60, 4  ;;  %v4994_v41 = vrot.slane %v4990_v19, 4  ;;  %s5616_s10 = sld [smem:[#allocation3 + $0x63]] }
 0x373   : > { %v4995_v17 = vrot.slane %v4991_v9, 4  ;;  %v5029_v20 = vmul.f32 %v10686_v45, %v5028_v14  ;;  %v5030_v49 = vmul.f32 %v10785_v55, %v5028_v14  ;;  %v5016_v44 = vmul.f32 %v10686_v45, %v5015_v48 }
 0x374   : > { %v4117_v40 = vpop.permute.xlu0 %4116  ;;  %v4104_v58 = vpop.permute.xlu1 %4103  ;;  %v5017_v18 = vmul.f32 %v10785_v55, %v5015_v48  ;;  %v5009_v31 = vsel %vm1573_vm6, %v5007_v56, %v5008_v32 }
 0x375   : > { %v4119_v37 = vadd.f32 %v4117_v40, %v4015_v15  ;;  %v4106_v39 = vadd.f32 %v4104_v58, %v4004_v50  ;;  %v4996_v53 = vsel %vm1573_vm6, %v4994_v41, %v4995_v17  ;;  %v5033_v1 = vrot.slane %v5029_v20, 4 }
 0x376   : > { %4958 = vrot.lane.b32.xlu0 %v4957_v3, %s11375_s20  ;;  %4945 = vrot.lane.b32.xlu1 %v4944_v46, %s11375_s20  ;;  %v5034_v7 = vrot.slane %v5030_v49, 4  ;;  %v5020_v54 = vrot.slane %v5016_v44, 4  ;;  %v5021_v25 = vrot.slane %v5017_v18, 4  ;;  %s11163_s23 = scalar_lea.hbm %s11698_s22, %s5655_s6 }
 0x378   : > { %v4143_v11 = vpop.permute.xlu0 %4142  ;;  %v4130_v38 = vpop.permute.xlu1 %4129  ;;  %v5035_v26 = vsel %vm1573_vm6, %v5033_v1, %v5034_v7  ;;  %v5022_v43 = vsel %vm1573_vm6, %v5020_v54, %v5021_v25 }
 0x379   : > { %v4145_v34 = vadd.f32 %v4143_v11, %v10886_v36  ;;  %v4132_v0 = vadd.f32 %v4130_v38, %v10888_v47 }
 0x37a   : > { %4984 = vrot.lane.b32.xlu0 %v4983_v63, %s11375_s20  ;;  %4971 = vrot.lane.b32.xlu1 %v4970_v28, %s11375_s20 }
 0x37c   : > { %v4169_v27 = vpop.permute.xlu0 %4168  ;;  %v4156_v29 = vpop.permute.xlu1 %4155 }
 0x37d   : > { %v4171_v36 = vadd.f32 %v4169_v27, %v10905_v24  ;;  %v4158_v47 = vadd.f32 %v4156_v29, %v10907_v4 }
 0x37e   : > { %5010 = vrot.lane.b32.xlu0 %v5009_v31, %s11375_s20  ;;  %4997 = vrot.lane.b32.xlu1 %v4996_v53, %s11375_s20 }
 0x380   : > { %v4195_v57 = vpop.permute.xlu0 %4194  ;;  %v4182_v51 = vpop.permute.xlu1 %4181 }
 0x381   : > { %v4197_v59 = vadd.f32 %v4195_v57, %v4093_v33  ;;  %v4184_v62 = vadd.f32 %v4182_v51, %v4080_v16 }
 0x382   : > { %5036 = vrot.lane.b32.xlu0 %v5035_v26, %s11375_s20  ;;  %5023 = vrot.lane.b32.xlu1 %v5022_v43, %s11375_s20  ;;  %s5615_s20 = sld [smem:[#allocation3 + $0x30]] }
 0x384   : > { %v4221_v24 = vpop.permute.xlu0 %4220  ;;  %v4208_v4 = vpop.permute.xlu1 %4207 }
 0x385   : > { %v4223_v61 = vadd.f32 %v4221_v24, %v4119_v37  ;;  %v4210_v52 = vadd.f32 %v4208_v4, %v4106_v39 }
 0x388   : > { %v4247_v8 = vpop.permute.xlu0 %4246  ;;  %v4234_v23 = vpop.permute.xlu1 %4233  ;;  %v4745_v43 = vstv %s5615_s20  ;;  %s5804_s20 = scalar_lea.vmem %s11154_s11, 1024 }
 0x389   : > { %v4249_v6 = vadd.f32 %v4247_v8, %v4145_v34  ;;  %v4236_v2 = vadd.f32 %v4234_v23, %v4132_v0  ;;  %v4747_v8 = vmul.f32 %v10785_v55, %v4745_v43  ;;  %p5805_p8 = scmp.ne.s32.totalorder %s11154_s11, %s5804_s20 }
 0x38b   : > { %p5806_p12 = pnand %p5805_p8, %p11699_p10 }
 0x38c   : > { %v4273_v22 = vpop.permute.xlu0 %4272  ;;  %v4260_v13 = vpop.permute.xlu1 %4259 }
 0x38d   : > { %v4275_v33 = vadd.f32 %v4273_v22, %v4171_v36  ;;  %v4262_v16 = vadd.f32 %v4260_v13, %v4158_v47  ;;  %v4800_v22 = vstv %s5620_s29  ;;  %p5807_p0 = pneg %p5806_p12 }
 0x390   : > { %v4299_v35 = vpop.permute.xlu0 %4298  ;;  %v4286_v21 = vpop.permute.xlu1 %4285 }
 0x391   : > { %v4301_v5 = vadd.f32 %v4299_v35, %v4197_v59  ;;  %v4288_v10 = vadd.f32 %v4286_v21, %v4184_v62  ;;  %v4756_v59 = vstv %s5616_s10  ;;  %v4789_v21 = vstv %s11013_s18  ;;  %s11171_s10 = scalar_lea.sflag [#allocation4], %s202_s27 }
 0x392   : > { %v4757_v62 = vmul.f32 %v10686_v45, %v4756_v59  ;;  %v4758_v26 = vmul.f32 %v10785_v55, %v4756_v59 }
 0x394   : > { %v4325_v42 = vpop.permute.xlu0 %4324  ;;  %v4312_v30 = vpop.permute.xlu1 %4311  ;;  %v4761_v23 = vrot.slane %v4757_v62, 4 }
 0x395   : > { %v4327_v15 = vadd.f32 %v4325_v42, %v4223_v61  ;;  %v4314_v50 = vadd.f32 %v4312_v30, %v4210_v52  ;;  %v4778_v61 = vstv %s5618_s4  ;;  %v4746_v52 = vmul.f32 %v10686_v45, %v4745_v43  ;;  %s5916_s4 = smov [#allocation8]  }
 0x396   : > { %v4780_v35 = vmul.f32 %v10785_v55, %v4778_v61  ;;  %v4801_v42 = vmul.f32 %v10686_v45, %v4800_v22  ;;  %v4802_v30 = vmul.f32 %v10785_v55, %v4800_v22 }
 0x398   : > { %v4351_v12 = vpop.permute.xlu0 %4350  ;;  %v4338_v60 = vpop.permute.xlu1 %4337  ;;  %v4784_v62 = vrot.slane %v4780_v35, 4 }
 0x399   : > { %v10961_v40 = vadd.f32 %v4351_v12, %v4249_v6  ;;  %v10963_v58 = vadd.f32 %v4338_v60, %v4236_v2  ;;  %v4762_v6 = vrot.slane %v4758_v26, 4  ;;  %v4767_v2 = vstv %s5617_s25  ;;  %s5808_s25 = sshll.u32 %s5916_s4, 4  ;;  %s5809_s25 = int_to_ptr.vmem [resolvable:$false] %s5808_s25 }
 0x39a   : > { %v4751_v12 = vrot.slane %v4747_v8, 4  ;;  %v4811_v26 = vstv %s11023_s8  ;;  %v4806_v8 = vrot.slane %v4802_v30, 4  ;;  %s5810_s29 = scalar_lea.vmem %s5809_s25, 2048  ;;  %p5811_p2 = scmp.lt.s32.totalorder %s11154_s11, %s5809_s25 }
 0x39b   : > { %p5812_p7 = scmp.lt.s32.totalorder %s5810_s29, %s5804_s20 }
 0x39c   : > { %v4377_v3 = vpop.permute.xlu0 %4376  ;;  %v4364_v19 = vpop.permute.xlu1 %4363 }
 0x39d   : > { %v10965_v9 = vadd.f32 %v4377_v3, %v4275_v33  ;;  %v10967_v37 = vadd.f32 %v4364_v19, %v4262_v16  ;;  %v4779_v16 = vmul.f32 %v10686_v45, %v4778_v61  ;;  %p5813_p9 = por %p5812_p7, %p5811_p2 }
 0x39f   : > { %v4783_v60 = vrot.slane %v4779_v16, 4  ;;  %p5814_p11 = pnand %p5813_p9, %p5807_p0 }
 0x3a0   : > { %v4403_v39 = vpop.permute.xlu0 %4402  ;;  %v4390_v46 = vpop.permute.xlu1 %4389 }
 0x3a1   : > { %v10969_v14 = vadd.f32 %v4403_v39, %v4301_v5  ;;  %v10971_v48 = vadd.f32 %v4390_v46, %v4288_v10  ;;  %v4768_v5 = vmul.f32 %v10686_v45, %v4767_v2  ;;  %v4769_v10 = vmul.f32 %v10785_v55, %v4767_v2 }
 0x3a2   : > { %v4790_v39 = vmul.f32 %v10686_v45, %v4789_v21  ;;  %v4791_v46 = vmul.f32 %v10785_v55, %v4789_v21 }
 0x3a3   : > { %v4772_v43 = vrot.slane %v4768_v5, 4  ;;  %v4773_v61 = vrot.slane %v4769_v10, 4  ;;  %v4785_v10 = vsel %vm1573_vm6, %v4783_v60, %v4784_v62 }
 0x3a4   : > { %v4429_v63 = vpop.permute.xlu0 %4428  ;;  %v4416_v28 = vpop.permute.xlu1 %4415 }
 0x3a5   : > { %v10973_v56 = vadd.f32 %v4429_v63, %v4327_v15  ;;  %v10975_v32 = vadd.f32 %v4416_v28, %v4314_v50  ;;  %v4763_v15 = vsel %vm1573_vm6, %v4761_v23, %v4762_v6  ;;  %v4750_v50 = vrot.slane %v4746_v52, 4 }
 0x3a6   : > { %v4822_v63 = vstv %s11021_s1  ;;  %v4805_v52 = vrot.slane %v4801_v42, 4  ;;  %v4774_v42 = vsel %vm1573_vm6, %v4772_v43, %v4773_v61 }
 0x3a7   : > { %v11050_v2 = vmul.f32 %v10686_v45, %v4822_v63  ;;  %v11053_v22 = vmul.f32 %v10785_v55, %v4822_v63 }
 0x3a8   : > { %v4455_v11 = vpop.permute.xlu0 %4454  ;;  %v4442_v38 = vpop.permute.xlu1 %4441  ;;  %v4807_v30 = vsel %vm1573_vm6, %v4805_v52, %v4806_v8 }
 0x3a9   : > { %v4457_v28 = vadd.f32 %v4455_v11, %v10961_v40  ;;  %v4444_v59 = vadd.f32 %v4442_v38, %v10963_v58  ;;  %v4752_v40 = vsel %vm1573_vm6, %v4750_v50, %v4751_v12  ;;  %v4794_v11 = vrot.slane %v4790_v39, 4 }
 0x3aa   : > { %v4795_v38 = vrot.slane %v4791_v46, 4 }
 0x3ac   : > { %v10977_v41 = vpop.permute.xlu0 %4480  ;;  %v10979_v17 = vpop.permute.xlu1 %4467 }
 0x3ad   : > { %v4470_v35 = vadd.f32 %v10979_v17, %v10967_v37  ;;  %v4828_v17 = vrot.slane %v11053_v22, 4 }
 0x3b0   : > { %v10981_v20 = vpop.permute.xlu0 %4506  ;;  %v10983_v49 = vpop.permute.xlu1 %4493 }
 0x3b4   : > { %v10985_v34 = vpop.permute.xlu0 %4532  ;;  %v10987_v0 = vpop.permute.xlu1 %4519 }
 0x3b8   : > { %v4559_v44 = vpop.permute.xlu0 %4558  ;;  %v4546_v18 = vpop.permute.xlu1 %4545 }
 0x3b9   : > { %v4561_v23 = vadd.f32 %v4559_v44, %v4457_v28  ;;  %v4548_v6 = vadd.f32 %v4546_v18, %v4444_v59  ;;  %v11065_v44 = vmul.f32 %v10686_v45, %v4811_v26  ;;  %v4483_v18 = vadd.f32 %v10977_v41, %v10965_v9 }
 0x3ba   : > { %v4813_v45 = vmul.f32 %v10785_v55, %v4811_v26  ;;  %v4827_v41 = vrot.slane %v11050_v2, 4  ;;  %v4796_v55 = vsel %vm1573_vm6, %v4794_v11, %v4795_v38  ;;  %v5047_v28 = vstv %s11055_s17 }
 0x3bc   : > { %v10989_v27 = vpop.permute.xlu0 %4584  ;;  %v10991_v29 = vpop.permute.xlu1 %4571  ;;  %v4817_v39 = vrot.slane %v4813_v45, 4 }
 0x3bd   : > { %v4587_v9 = vadd.f32 %v10989_v27, %v4483_v18  ;;  %v4574_v37 = vadd.f32 %v10991_v29, %v4470_v35  ;;  %v4816_v27 = vrot.slane %v11065_v44, 4 }
 0x3bf   : > { %v4818_v11 = vsel %vm1573_vm6, %v4816_v27, %v4817_v39  ;;  %v5077_v27 = vstv %s11128_s16 }
 0x3c0   : > { %v10993_v31 = vpop.permute.xlu0 %4610  ;;  %v10995_v53 = vpop.permute.xlu1 %4597 }
 0x3c4   : > { %v10997_v1 = vpop.permute.xlu0 %4636  ;;  %v10999_v7 = vpop.permute.xlu1 %4623 }
 0x3c8   : > { %v11001_v36 = vpop.permute.xlu0 %4662  ;;  %v11003_v47 = vpop.permute.xlu1 %4649 }
 0x3c9   : > { %v4665_v21 = vadd.f32 %v11001_v36, %v4561_v23  ;;  %v4652_v5 = vadd.f32 %v11003_v47, %v4548_v6  ;;  %v4509_v36 = vadd.f32 %v10981_v20, %v10969_v14  ;;  %v4496_v47 = vadd.f32 %v10983_v49, %v10971_v48 }
 0x3cb   : > { %v4765_v14 = vadd.f32 %v4763_v15, %v4665_v21  ;;  %v4754_v20 = vadd.f32 %v4752_v40, %v4652_v5  ;;  %v4613_v48 = vadd.f32 %v10993_v31, %v4509_v36  ;;  %v4600_v49 = vadd.f32 %v10995_v53, %v4496_v47 }
 0x3cc   : > { %v11005_v54 = vpop.permute.xlu0 %4688  ;;  %v11007_v25 = vpop.permute.xlu1 %4675  ;;  %v4522_v31 = vadd.f32 %v10987_v0, %v10975_v32  ;;  %v5053_v32 = vstv %s11079_s13  ;;  %v5071_v5 = vstv %s11114_s0  ;;  %v5083_v47 = vstv %s11126_s15 }
 0x3cd   : > { %v4691_v12 = vadd.f32 %v11005_v54, %v4587_v9  ;;  %v4678_v60 = vadd.f32 %v11007_v25, %v4574_v37  ;;  %v5041_v54 = vstv %s11057_s14  ;;  %v4535_v25 = vadd.f32 %v10985_v34, %v10973_v56 }
 0x3ce   : > { %v4626_v56 = vadd.f32 %v10999_v7, %v4522_v31  ;;  %v5059_v34 = vstv %s11077_s26 }
 0x3cf   : > { %v4776_v62 = vadd.f32 %v4774_v42, %v4678_v60  ;;  %v4639_v61 = vadd.f32 %v10997_v1, %v4535_v25 }
 0x3d0   : > { %v11009_v57 = vpop.permute.xlu0 %4714  ;;  %v11011_v51 = vpop.permute.xlu1 %4701 }
 0x3d1   : > { %v4717_v53 = vadd.f32 %v11009_v57, %v4613_v48  ;;  %v4704_v15 = vadd.f32 %v11011_v51, %v4600_v49 }
 0x3d3   : > { %v4809_v6 = vadd.f32 %v4807_v30, %v4717_v53  ;;  %v4798_v2 = vadd.f32 %v4796_v55, %v4704_v15 }
 0x3d4   : > { %v11017_v24 = vpop.permute.xlu0 %4740  ;;  %v11019_v4 = vpop.permute.xlu1 %4727 }
 0x3d5   : > { %v4743_v8 = vadd.f32 %v11017_v24, %v4639_v61  ;;  %v4730_v23 = vadd.f32 %v11019_v4, %v4626_v56  ;;  %v4829_v24 = vsel %vm1573_vm6, %v4827_v41, %v4828_v17 }
 0x3d7   : > { %v4831_v35 = vadd.f32 %v4829_v24, %v4743_v8  ;;  %v4820_v21 = vadd.f32 %v4818_v11, %v4730_v23 }
 0x3d8   : > { %v11027_v13 = vpop.permute.xlu0 %4854  ;;  %v11029_v33 = vpop.permute.xlu1 %4841 }
 0x3d9   : > { %v4857_v46 = vadd.f32 %v11027_v13, %v4765_v14  ;;  %v4844_v63 = vadd.f32 %v11029_v33, %v4754_v20  ;;  %v4787_v33 = vadd.f32 %v4785_v10, %v4691_v12 }
 0x3dc   : > { %v11039_v3 = vpop.permute.xlu0 %4880  ;;  %v11041_v19 = vpop.permute.xlu1 %4867 }
 0x3dd   : > { %v4883_v0 = vadd.f32 %v11039_v3, %v4787_v33  ;;  %v4870_v57 = vadd.f32 %v11041_v19, %v4776_v62 }
 0x3e0   : > { %v11060_v58 = vpop.permute.xlu0 %4906  ;;  %v11062_v16 = vpop.permute.xlu1 %4893 }
 0x3e1   : > { %v4909_v4 = vadd.f32 %v11060_v58, %v4809_v6  ;;  %v4896_v38 = vadd.f32 %v11062_v16, %v4798_v2  ;;  %v5065_v16 = vstv %s11116_s19 }
 0x3e4   : > { %v11090_v50 = vpop.permute.xlu0 %4932  ;;  %v11093_v29 = vpop.permute.xlu1 %4919 }
 0x3e5   : > { %v4935_v37 = vadd.f32 %v11090_v50, %v4831_v35  ;;  %v4922_v41 = vadd.f32 %v11093_v29, %v4820_v21 }
 0x3e8   : > { %v4959_v13 = vpop.permute.xlu0 %4958  ;;  %v4946_v59 = vpop.permute.xlu1 %4945 }
 0x3e9   : > { %v4961_v26 = vadd.f32 %v4959_v13, %v4857_v46  ;;  %v4948_v43 = vadd.f32 %v4946_v59, %v4844_v63 }
 0x3eb   : > { %v5048_v51 = vadd.f32 %v5047_v28, %v4961_v26  ;;  %v5042_v52 = vadd.f32 %v5041_v54, %v4948_v43 }
 0x3ec   : > { %v4985_v22 = vpop.permute.xlu0 %4984  ;;  %v4972_v40 = vpop.permute.xlu1 %4971 }
 0x3ed   : > { %v5049_v1 = vmax.f32 %v5048_v51, 0.0  ;;  %v5043_v7 = vmax.f32 %v5042_v52, 0.0  ;;  %v4987_v3 = vadd.f32 %v4985_v22, %v4883_v0  ;;  %v4974_v19 = vadd.f32 %v4972_v40, %v4870_v57 }
 0x3ef   : > { %5640 = vst.msk [vmem:[%s11135_s9 + $0x8] sm:$0xff] %vm5044_vm7, %v5049_v1  ;;  %5045 = vst.msk [vmem:[%s11135_s9] sm:$0xff] %vm5044_vm7, %v5043_v7  ;;  %v5060_v44 = vadd.f32 %v5059_v34, %v4987_v3  ;;  %v5054_v18 = vadd.f32 %v5053_v32, %v4974_v19 }
 0x3f0   : > { %v5011_v58 = vpop.permute.xlu0 %5010  ;;  %v4998_v10 = vpop.permute.xlu1 %4997 }
 0x3f1   : > { %v5061_v42 = vmax.f32 %v5060_v44, 0.0  ;;  %v5055_v30 = vmax.f32 %v5054_v18, 0.0  ;;  %v5013_v45 = vadd.f32 %v5011_v58, %v4909_v4  ;;  %v5000_v9 = vadd.f32 %v4998_v10, %v4896_v38 }
 0x3f3   : > { %5644 = vst.msk [vmem:[%s11135_s9 + $0x18] sm:$0xff] %vm5044_vm7, %v5061_v42  ;;  %5642 = vst.msk [vmem:[%s11135_s9 + $0x10] sm:$0xff] %vm5044_vm7, %v5055_v30  ;;  %v5072_v17 = vadd.f32 %v5071_v5, %v5013_v45  ;;  %v5066_v36 = vadd.f32 %v5065_v16, %v5000_v9 }
 0x3f4   : > { %v5037_v55 = vpop.permute.xlu0 %5036  ;;  %v5024_v12 = vpop.permute.xlu1 %5023 }
 0x3f5   : > { %v5073_v50 = vmax.f32 %v5072_v17, 0.0  ;;  %v5067_v60 = vmax.f32 %v5066_v36, 0.0  ;;  %v5039_v29 = vadd.f32 %v5037_v55, %v4935_v37  ;;  %v5026_v14 = vadd.f32 %v5024_v12, %v4922_v41 }
 0x3f7   : > { %5648 = vst.msk [vmem:[%s11135_s9 + $0x28] sm:$0xff] %vm5044_vm7, %v5073_v50  ;;  %5646 = vst.msk [vmem:[%s11135_s9 + $0x20] sm:$0xff] %vm5044_vm7, %v5067_v60  ;;  %v5084_v20 = vadd.f32 %v5083_v47, %v5039_v29  ;;  %v5078_v48 = vadd.f32 %v5077_v27, %v5026_v14 }
 0x3f9   : > { %v5085_v49 = vmax.f32 %v5084_v20, 0.0  ;;  %v5079_v39 = vmax.f32 %v5078_v48, 0.0 }
 0x3fb   : > { %5652 = vst.msk [vmem:[%s11135_s9 + $0x38] sm:$0xff] %vm5044_vm7, %v5085_v49  ;;  %5650 = vst.msk [vmem:[%s11135_s9 + $0x30] sm:$0xff] %vm5044_vm7, %v5079_v39 }
 0x3fc   : > { %5817 = shalt.err (!%p5814_p11)
}
 0x3fd   : > { %s5818_s18 = scalar_lea.hbm %s11163_s23, 1024  ;;  %s5822_s17 = scalar_lea.hbm %s11698_s22, 4096 }
 0x3fe   : > { %p5819_p13 = scmp.ne.s32.totalorder %s11163_s23, %s5818_s18  ;;  %p5823_p5 = scmp.lt.u32.totalorder %s11163_s23, %s11698_s22 }
 0x3ff   : > { %p5824_p6 = scmp.lt.u32.totalorder %s5822_s17, %s5818_s18  ;;  %p5826_p8 = scmp.lt.u32.totalorder %s5818_s18, %s11163_s23 }
 0x400   : > { %p5820_p1 = pnand %p5819_p13, %p11699_p10 }
 0x401   : > { %p5825_p3 = por %p5824_p6, %p5823_p5 }
 0x402   : > { %p5821_p4 = pneg %p5820_p1 }
 0x403   : > { %p5827_p12 = por %p5826_p8, %p5825_p3 }
 0x405   : > { %p5828_p0 = pnand %p5827_p12, %p5821_p4 }
 0x407   : > { %5831 = shalt.err (!%p5828_p0)
}
 0x408   : > { %s5917_s26 = smov 128   ;;  %s5918_s13 = smov 256  }
 0x409   : > { %s5919_s27 = smov 8  }
 0x40a   : > { %5667 = dma.vmem_to_hbm [thread:$0]  (%p11699_p10), %s11154_s11, 1024, %s11163_s23, %s11171_s10, %s5917_s26, %s5918_s13, %s5919_s27  }
 0x40b PF: > { %s11700_s28 = sld [smem:[#allocation19_spill]]  ;;  %s11701_s0 = sld [smem:[#allocation12_spill]] }
 0x40c   : > { %s11702_s19 = sld [smem:[#allocation23_spill]] }
 0x411   : > { %p5684_p2 = scmp.ge.s32.totalorder %s11700_s28, 2  ;;  %s5118_s15 = sand.u32 1, %s11701_s0  }
 0x412   : > { %p11703_p7 = scmp.ne.s32.totalorder %s11702_s19, 0  ;;  %s5119_s16 = scalar_lea.sflag [#allocation4], %s5118_s15 }
 0x414   : > { %p5677_p9 = pnand %p5684_p2, %p11703_p7 }
 0x416   : > { %5873 = dma.done.wait (!%p5677_p9), %s5119_s16, 1024  }
 0x417   : > { %5875 = vsyncadd (!%p5677_p9), %s5119_s16, 4294966272  ;;  %s18_s19 = sadd.s32 1, %s11700_s28   ;;  %s11704_s12 = sld [smem:[#allocation13_spill]] }
 0x418   : > { %p15_p11 = scmp.ge.s32.totalorder %s18_s19, 6   ;;  %s11705_s13 = sld [smem:[#allocation14_spill]] }
 0x419   : > { %s11706_s14 = sld [smem:[#allocation24_spill]]  ;;  %s11707_s15 = sld [smem:[#allocation17_spill]] }
 0x41a   : > { %s11708_s16 = sld [smem:[#allocation18_spill]]  ;;  %s11709_s17 = sld [smem:[#allocation20_spill]] }
 0x41b   : > { %s11710_s18 = sld [smem:[#allocation22_spill]]  ;;  %17 = sbr.rel (!%p15_p11) target bundleno = 12 (0xc), region = 90 }
 0x422   :  { %5124 = vsyncpa [#allocation4], 1 }
 0x423   :  { %5126 = vsyncpa [#allocation4 + $0x1], 1 }
 0x424   :  { %5127 = vsyncpa [#allocation5], 1 }
 0x425   :  { %5129 = vsyncpa [#allocation5 + $0x1], 1 }
 0x426   :  { %5130 = vsyncpa [#allocation7], 1 }

</bundles_post_ra>
